<compile_context>
chip_gen: v7x
topology: tpu7x:2x2x1
jax: 0.10.0
libtpu: 0.0.40
codegen_flags: <defaults>
</compile_context>

<pallas_src>
import functools

import jax
import jax.numpy as jnp
from jax.experimental import pallas as pl
from jax.experimental.pallas import tpu as pltpu

_LANE = 128
_SUBLANE = 8


def _round_up(x, m):
    return (x + m - 1) // m * m


def _zero_pad_regions(ref, h, w, p):
    """Zero the regions of a (Rs, Wp, C) padded scratch that act as conv
    padding.  Interior (data) lives at rows [p+1, p+1+h), cols [0, w).
      * rows 1..p and h+p+1..h+2p : top / bottom zero padding
      * cols [w, Wp)              : right padding AND (via row-major
                                    wraparound) the left padding of the next
                                    row in the flattened view.
    Row 0 (cols < w) and the last row are never read for valid outputs.
    The interior is fully overwritten every step, so only these small regions
    are re-zeroed per grid step (kept per-step for safety under 'parallel'
    megacore sharding)."""
    rs, wp, c = ref.shape
    dt = ref.dtype
    if p > 0:
        ref[1:p + 1, :, :] = jnp.zeros((p, wp, c), dt)
        ref[h + p + 1:h + 2 * p + 1, :, :] = jnp.zeros((p, wp, c), dt)
    if wp > w:
        ref[:, w:, :] = jnp.zeros((rs, wp - w, c), dt)


def _conv_flat(src_ref, w_ref, h):
    """'Same' KxK conv of the padded (Rs, Wp, Cin) scratch with
    (K, K, Cin, Cout) weights using the flattened-window decomposition.

    The scratch is loaded once and reshaped to (Rs*Wp, Cin) (layout-free since
    Wp % 8 == 0); every tap is a contiguous row window, accumulated in f32 on
    the MXU.  Returns an (h*Wp, Cout) f32 accumulator whose valid entries are
    at flat position i*Wp + j for output pixel (i, j), j < w."""
    rs, wp, cin = src_ref.shape
    kn, _, _, cout = w_ref.shape
    p = kn // 2
    flat = src_ref[...].reshape(rs * wp, cin)
    acc = None
    for kh in range(kn):
        for kw in range(kn):
            start = (kh + 1) * wp + (kw - p)          # >= 0 since Wp > p
            patch = flat[start:start + h * wp, :]
            t = jnp.dot(patch, w_ref[kh, kw],
                        preferred_element_type=jnp.float32)
            acc = t if acc is None else acc + t
    return acc


def _bottleneck_kernel(x_ref, w1_ref, b1_ref, w2_ref, b2_ref, o_ref,
                       xs_ref, ys_ref, *, add):
    """One batch element: SiLU(conv2(SiLU(conv1(x)+b1))+b2) [+ x].
    (BN scale already folded into w1/w2 on the host.)"""
    _, h, w, c2p = o_ref.shape
    _, _, _, c1 = x_ref.shape
    kn = w1_ref.shape[0]
    p = kn // 2
    cdt = xs_ref.dtype
    c1p = xs_ref.shape[-1]
    cmid_p = ys_ref.shape[-1]
    wp = xs_ref.shape[1]

    # ---- stage x: channel-pad in registers, one lane-dense bf16 store ------
    _zero_pad_regions(xs_ref, h, w, p)
    xf = x_ref[0]                                        # (h, w, c1) f32
    if c1p > c1:
        xf = jnp.concatenate(
            [xf, jnp.zeros((h, w, c1p - c1), xf.dtype)], axis=-1)
    xs_ref[p + 1:p + 1 + h, 0:w, :] = xf.astype(cdt)

    # ---- cv1: 3x3 conv (MXU) + bias + SiLU ----------------------------------
    acc1 = _conv_flat(xs_ref, w1_ref, h)                 # (h*Wp, cmid_p) f32
    y1 = acc1.reshape(h, wp, cmid_p)[:, :w, :] + b1_ref[...].reshape(1, 1, cmid_p)
    y1 = y1 * jax.nn.sigmoid(y1)

    # intermediate never touches HBM: dense bf16 store into the cv2 scratch
    _zero_pad_regions(ys_ref, h, w, p)
    ys_ref[p + 1:p + 1 + h, 0:w, :] = y1.astype(cdt)

    # ---- cv2: 3x3 conv (MXU) + bias + SiLU (+ fused residual) --------------
    acc2 = _conv_flat(ys_ref, w2_ref, h)                 # (h*Wp, c2p) f32
    y2 = acc2.reshape(h, wp, c2p)[:, :w, :] + b2_ref[...].reshape(1, 1, c2p)
    y2 = y2 * jax.nn.sigmoid(y2)
    if add:
        y2 = y2 + xf                                     # f32 residual (c1p==c2p)
    o_ref[0] = y2.astype(o_ref.dtype)                    # lane-dense writeback


def bottleneck_nhwc(x, w1, s1, b1, w2, s2, b2, *, add,
                    compute_dtype=jnp.bfloat16):
    """x: (N,H,W,C1); w*: (K,K,Cin,Cout) f32; s*/b*: (Cout,) folded-BN f32."""
    n, h, w, c1 = x.shape
    kh, kw, _, cm = w1.shape
    _, _, _, c2 = w2.shape
    assert kh == kw and kh % 2 == 1, "square odd kernels only (module uses 3x3)"
    if add:
        assert c1 == c2
    p = kh // 2
    wp = _round_up(w + 2 * p, _SUBLANE)      # sublane-multiple => free reshapes
    rs = h + 2 * p + 2                       # rows needed by the flat windows

    # Pad channel dims to a lane multiple for the internal compute layout.
    c1p = _round_up(c1, _LANE)
    cmp_ = _round_up(cm, _LANE)
    c2p = _round_up(c2, _LANE)

    # Fold BN scale into the weights (per output channel), then pad + cast.
    w1f = w1 * s1.reshape(1, 1, 1, cm)
    w2f = w2 * s2.reshape(1, 1, 1, c2)
    w1p = jnp.pad(w1f, ((0, 0), (0, 0), (0, c1p - c1),
                        (0, cmp_ - cm))).astype(compute_dtype)
    w2p = jnp.pad(w2f, ((0, 0), (0, 0), (0, cmp_ - cm),
                        (0, c2p - c2))).astype(compute_dtype)
    b1p = jnp.pad(b1, (0, cmp_ - cm)).reshape(1, cmp_).astype(jnp.float32)
    b2p = jnp.pad(b2, (0, c2p - c2)).reshape(1, c2p).astype(jnp.float32)

    # Explicit VMEM estimate + 50% slack, floored at 32 MiB, capped at 48 MiB
    # (leaves headroom on v7x's 64 MiB part).
    bpe = jnp.dtype(compute_dtype).itemsize
    scr = rs * wp * (c1p + cmp_) * bpe                     # bf16 scratches
    wts = 2 * kh * kw * (c1p * cmp_ + cmp_ * c2p) * bpe    # dbl-buf weights
    bias = 2 * (cmp_ + c2p) * 4 * 2
    io = 2 * 4 * h * w * (c1 + c2p)                        # dbl-buf x in / y out
    accb = 4 * h * wp * (cmp_ + c2p)                       # f32 accumulators
    tmp = scr + accb                                       # flat loads / temps
    est = scr + wts + bias + io + accb + tmp
    vmem_limit = int(min(max(est * 3 // 2, 32 * 1024 * 1024),
                         48 * 1024 * 1024))

    kernel = functools.partial(_bottleneck_kernel, add=add)
    y = pl.pallas_call(
        kernel,
        out_shape=jax.ShapeDtypeStruct((n, h, w, c2p), x.dtype),
        grid=(n,),
        in_specs=[
            pl.BlockSpec((1, h, w, c1), lambda i: (i, 0, 0, 0)),
            pl.BlockSpec((kh, kw, c1p, cmp_), lambda i: (0, 0, 0, 0)),
            pl.BlockSpec((1, cmp_), lambda i: (0, 0)),
            pl.BlockSpec((kh, kw, cmp_, c2p), lambda i: (0, 0, 0, 0)),
            pl.BlockSpec((1, c2p), lambda i: (0, 0)),
        ],
        out_specs=pl.BlockSpec((1, h, w, c2p), lambda i: (i, 0, 0, 0)),
        scratch_shapes=[
            pltpu.VMEM((rs, wp, c1p), compute_dtype),   # padded input
            pltpu.VMEM((rs, wp, cmp_), compute_dtype),  # padded cv1 activation
        ],
        compiler_params=pltpu.CompilerParams(
            dimension_semantics=("parallel",),
            vmem_limit_bytes=vmem_limit),
    )(x, w1p, b1p, w2p, b2p)
    return y[..., :c2]                                   # drop lane padding


def _fold_bn(gamma, beta, mean, var, eps=1e-5):
    scale = gamma / jnp.sqrt(var + eps)
    return scale, beta - mean * scale


def init_bottleneck_params(key, c1, c2, e=0.5, k=(3, 3)):
    """Deterministic synthetic params, PyTorch shapes: conv weight (Cout,Cin,KH,KW)."""
    c_ = int(c2 * e)
    ks = jax.random.split(key, 10)
    p = {}
    p["w1"] = 0.1 * jax.random.normal(ks[0], (c_, c1, k[0], k[0]), jnp.float32)
    p["g1"] = 1.0 + 0.1 * jax.random.normal(ks[1], (c_,), jnp.float32)
    p["b1"] = 0.1 * jax.random.normal(ks[2], (c_,), jnp.float32)
    p["m1"] = 0.05 * jax.random.normal(ks[3], (c_,), jnp.float32)
    p["v1"] = 1.0 + 0.1 * jax.random.uniform(ks[4], (c_,), jnp.float32)
    p["w2"] = 0.1 * jax.random.normal(ks[5], (c2, c_, k[1], k[1]), jnp.float32)
    p["g2"] = 1.0 + 0.1 * jax.random.normal(ks[6], (c2,), jnp.float32)
    p["b2"] = 0.1 * jax.random.normal(ks[7], (c2,), jnp.float32)
    p["m2"] = 0.05 * jax.random.normal(ks[8], (c2,), jnp.float32)
    p["v2"] = 1.0 + 0.1 * jax.random.uniform(ks[9], (c2,), jnp.float32)
    return p


@functools.partial(jax.jit, static_argnames=("shortcut",))
def bottleneck_forward(x_nchw, params, shortcut=True):
    """Public API matches the PyTorch module: NCHW in, NCHW out."""
    c1 = x_nchw.shape[1]
    c2 = params["w2"].shape[0]
    add = bool(shortcut) and (c1 == c2)

    # NCHW -> NHWC (kernel layout); kept only for API parity with the module.
    x = jnp.transpose(x_nchw, (0, 2, 3, 1))
    w1 = jnp.transpose(params["w1"], (2, 3, 1, 0))   # (KH,KW,Cin,Cout)
    w2 = jnp.transpose(params["w2"], (2, 3, 1, 0))
    s1, b1 = _fold_bn(params["g1"], params["b1"], params["m1"], params["v1"])
    s2, b2 = _fold_bn(params["g2"], params["b2"], params["m2"], params["v2"])

    y = bottleneck_nhwc(x, w1, s1, b1, w2, s2, b2, add=add)
    return jnp.transpose(y, (0, 3, 1, 2))            # NHWC -> NCHW


# ---------------------------- pure-JAX reference ----------------------------
def _ref_conv_bn_silu(x, w, s, b):
    y = jax.lax.conv_general_dilated(
        x, w, window_strides=(1, 1), padding="SAME",
        dimension_numbers=("NHWC", "HWIO", "NHWC"))
    y = y * s.reshape(1, 1, 1, -1) + b.reshape(1, 1, 1, -1)
    return y * jax.nn.sigmoid(y)


def bottleneck_reference(x_nchw, params, shortcut=True):
    c1 = x_nchw.shape[1]
    c2 = params["w2"].shape[0]
    add = bool(shortcut) and (c1 == c2)
    x = jnp.transpose(x_nchw, (0, 2, 3, 1))
    w1 = jnp.transpose(params["w1"], (2, 3, 1, 0))
    w2 = jnp.transpose(params["w2"], (2, 3, 1, 0))
    s1, b1 = _fold_bn(params["g1"], params["b1"], params["m1"], params["v1"])
    s2, b2 = _fold_bn(params["g2"], params["b2"], params["m2"], params["v2"])
    y = _ref_conv_bn_silu(x, w1, s1, b1)
    y = _ref_conv_bn_silu(y, w2, s2, b2)
    if add:
        y = y + x
    return jnp.transpose(y, (0, 3, 1, 2))


if __name__ == "__main__":
    key = jax.random.PRNGKey(0)
    kx, kp = jax.random.split(key)

    N, C, H, W = 2, 4, 16, 16          # c1 == c2 == 4 -> shortcut active
    x = jax.random.normal(kx, (N, C, H, W), jnp.float32)
    params = init_bottleneck_params(kp, c1=C, c2=C, e=0.5, k=(3, 3))

    out = bottleneck_forward(x, params, shortcut=True)
    jax.block_until_ready(out)
    assert out.shape == (N, C, H, W), out.shape

    ref = bottleneck_reference(x, params, shortcut=True)
    max_err = float(jnp.max(jnp.abs(out - ref)))
    assert jnp.allclose(out, ref, atol=3e-2, rtol=3e-2), f"max abs err {max_err}"

    print("KERNEL_OK")
</pallas_src>

<mosaic_0001>
module attributes {stable_mosaic.version = 11 : i64} {
  func.func @_bottleneck_kernel(%arg0: i32, %arg1: memref<1x16x16x4xf32, #tpu.memory_space<vmem>>, %arg2: memref<3x3x128x128xbf16, #tpu.memory_space<vmem>>, %arg3: memref<1x128xf32, #tpu.memory_space<vmem>>, %arg4: memref<3x3x128x128xbf16, #tpu.memory_space<vmem>>, %arg5: memref<1x128xf32, #tpu.memory_space<vmem>>, %arg6: memref<1x16x16x128xf32, #tpu.memory_space<vmem>>, %arg7: memref<20x24x128xbf16, #tpu.memory_space<vmem>>, %arg8: memref<20x24x128xbf16, #tpu.memory_space<vmem>>) attributes {dimension_semantics = [#tpu.dimension_semantics<parallel>], iteration_bounds = array<i64: 2>, scalar_prefetch = 0 : i64, scratch_operands = 2 : i64, tpu.core_type = #tpu.core_type<tc>, window_params = [{transform_indices = @transform_0, window_bounds = array<i64: 1, 16, 16, 4>}, {pipeline_mode = #tpu.pipeline_mode<synchronous>, transform_indices = @transform_1, window_bounds = array<i64: 3, 3, 128, 128>}, {pipeline_mode = #tpu.pipeline_mode<synchronous>, transform_indices = @transform_2, window_bounds = array<i64: 1, 128>}, {pipeline_mode = #tpu.pipeline_mode<synchronous>, transform_indices = @transform_3, window_bounds = array<i64: 3, 3, 128, 128>}, {pipeline_mode = #tpu.pipeline_mode<synchronous>, transform_indices = @transform_4, window_bounds = array<i64: 1, 128>}, {transform_indices = @transform_5, window_bounds = array<i64: 1, 16, 16, 128>}]} {
    %cst = arith.constant 0.000000e+00 : bf16
    %0 = vector.broadcast %cst : bf16 to vector<1x24x128xbf16>
    %c1 = arith.constant 1 : index
    %c0 = arith.constant 0 : index
    %c0_0 = arith.constant 0 : index
    %1 = vector.load %arg7[%c1, %c0, %c0_0] : memref<20x24x128xbf16, #tpu.memory_space<vmem>>, vector<1x24x128xbf16>
    tpu.vector_store %arg7[%c1, %c0, %c0_0], %0 {strides = array<i32>} : memref<20x24x128xbf16, #tpu.memory_space<vmem>>, vector<1x24x128xbf16>,
    %cst_1 = arith.constant 0.000000e+00 : bf16
    %2 = vector.broadcast %cst_1 : bf16 to vector<1x24x128xbf16>
    %c18 = arith.constant 18 : index
    %c0_2 = arith.constant 0 : index
    %c0_3 = arith.constant 0 : index
    %3 = vector.load %arg7[%c18, %c0_2, %c0_3] : memref<20x24x128xbf16, #tpu.memory_space<vmem>>, vector<1x24x128xbf16>
    tpu.vector_store %arg7[%c18, %c0_2, %c0_3], %2 {strides = array<i32>} : memref<20x24x128xbf16, #tpu.memory_space<vmem>>, vector<1x24x128xbf16>,
    %cst_4 = arith.constant 0.000000e+00 : bf16
    %4 = vector.broadcast %cst_4 : bf16 to vector<20x8x128xbf16>
    %c0_5 = arith.constant 0 : index
    %c16 = arith.constant 16 : index
    %c0_6 = arith.constant 0 : index
    %5 = vector.load %arg7[%c0_5, %c16, %c0_6] : memref<20x24x128xbf16, #tpu.memory_space<vmem>>, vector<20x8x128xbf16>
    tpu.vector_store %arg7[%c0_5, %c16, %c0_6], %4 {strides = array<i32>} : memref<20x24x128xbf16, #tpu.memory_space<vmem>>, vector<20x8x128xbf16>,
    %c0_7 = arith.constant 0 : index
    %c0_8 = arith.constant 0 : index
    %c0_9 = arith.constant 0 : index
    %c0_10 = arith.constant 0 : index
    %6 = vector.load %arg1[%c0_7, %c0_8, %c0_9, %c0_10] : memref<1x16x16x4xf32, #tpu.memory_space<vmem>>, vector<1x16x16x4xf32>
    %7 = vector.shape_cast %6 : vector<1x16x16x4xf32> to vector<16x16x4xf32>
    %cst_11 = arith.constant 0.000000e+00 : f32
    %8 = vector.broadcast %cst_11 : f32 to vector<16x16x124xf32>
    %9 = tpu.concatenate %7, %8 in 2 : vector<16x16x4xf32>, vector<16x16x124xf32> -> vector<16x16x128xf32>
    %10 = arith.truncf %9 : vector<16x16x128xf32> to vector<16x16x128xbf16>
    %c2 = arith.constant 2 : index
    %c0_12 = arith.constant 0 : index
    %c0_13 = arith.constant 0 : index
    %11 = vector.load %arg7[%c2, %c0_12, %c0_13] : memref<20x24x128xbf16, #tpu.memory_space<vmem>>, vector<16x16x128xbf16>
    tpu.vector_store %arg7[%c2, %c0_12, %c0_13], %10 {strides = array<i32>} : memref<20x24x128xbf16, #tpu.memory_space<vmem>>, vector<16x16x128xbf16>,
    %c0_14 = arith.constant 0 : index
    %c0_15 = arith.constant 0 : index
    %c0_16 = arith.constant 0 : index
    %12 = vector.load %arg7[%c0_14, %c0_15, %c0_16] : memref<20x24x128xbf16, #tpu.memory_space<vmem>>, vector<20x24x128xbf16>
    %13 = vector.shape_cast %12 : vector<20x24x128xbf16> to vector<480x128xbf16>
    %14 = vector.extract_strided_slice %13 {offsets = [23, 0], sizes = [384, 128], strides = [1, 1]} : vector<480x128xbf16> to vector<384x128xbf16>
    %c0_17 = arith.constant 0 : index
    %c0_18 = arith.constant 0 : index
    %c0_19 = arith.constant 0 : index
    %c0_20 = arith.constant 0 : index
    %15 = vector.load %arg2[%c0_17, %c0_18, %c0_19, %c0_20] : memref<3x3x128x128xbf16, #tpu.memory_space<vmem>>, vector<1x1x128x128xbf16>
    %16 = vector.shape_cast %15 : vector<1x1x128x128xbf16> to vector<128x128xbf16>
    %cst_21 = arith.constant dense<0.000000e+00> : vector<384x128xf32>
    %17 = tpu.matmul %14, %16, %cst_21 {dimension_numbers = #tpu.dot_dimension_numbers<[1], [0], [0], [1], [0, 0, 1, 1], [], []>} : vector<384x128xbf16>, vector<128x128xbf16>, vector<384x128xf32> -> vector<384x128xf32>
    %18 = vector.extract_strided_slice %13 {offsets = [24, 0], sizes = [384, 128], strides = [1, 1]} : vector<480x128xbf16> to vector<384x128xbf16>
    %c0_22 = arith.constant 0 : index
    %c1_23 = arith.constant 1 : index
    %c0_24 = arith.constant 0 : index
    %c0_25 = arith.constant 0 : index
    %19 = vector.load %arg2[%c0_22, %c1_23, %c0_24, %c0_25] : memref<3x3x128x128xbf16, #tpu.memory_space<vmem>>, vector<1x1x128x128xbf16>
    %20 = vector.shape_cast %19 : vector<1x1x128x128xbf16> to vector<128x128xbf16>
    %cst_26 = arith.constant dense<0.000000e+00> : vector<384x128xf32>
    %21 = tpu.matmul %18, %20, %cst_26 {dimension_numbers = #tpu.dot_dimension_numbers<[1], [0], [0], [1], [0, 0, 1, 1], [], []>} : vector<384x128xbf16>, vector<128x128xbf16>, vector<384x128xf32> -> vector<384x128xf32>
    %22 = arith.addf %17, %21 : vector<384x128xf32>
    %23 = vector.extract_strided_slice %13 {offsets = [25, 0], sizes = [384, 128], strides = [1, 1]} : vector<480x128xbf16> to vector<384x128xbf16>
    %c0_27 = arith.constant 0 : index
    %c2_28 = arith.constant 2 : index
    %c0_29 = arith.constant 0 : index
    %c0_30 = arith.constant 0 : index
    %24 = vector.load %arg2[%c0_27, %c2_28, %c0_29, %c0_30] : memref<3x3x128x128xbf16, #tpu.memory_space<vmem>>, vector<1x1x128x128xbf16>
    %25 = vector.shape_cast %24 : vector<1x1x128x128xbf16> to vector<128x128xbf16>
    %cst_31 = arith.constant dense<0.000000e+00> : vector<384x128xf32>
    %26 = tpu.matmul %23, %25, %cst_31 {dimension_numbers = #tpu.dot_dimension_numbers<[1], [0], [0], [1], [0, 0, 1, 1], [], []>} : vector<384x128xbf16>, vector<128x128xbf16>, vector<384x128xf32> -> vector<384x128xf32>
    %27 = arith.addf %22, %26 : vector<384x128xf32>
    %28 = vector.extract_strided_slice %13 {offsets = [47, 0], sizes = [384, 128], strides = [1, 1]} : vector<480x128xbf16> to vector<384x128xbf16>
    %c1_32 = arith.constant 1 : index
    %c0_33 = arith.constant 0 : index
    %c0_34 = arith.constant 0 : index
    %c0_35 = arith.constant 0 : index
    %29 = vector.load %arg2[%c1_32, %c0_33, %c0_34, %c0_35] : memref<3x3x128x128xbf16, #tpu.memory_space<vmem>>, vector<1x1x128x128xbf16>
    %30 = vector.shape_cast %29 : vector<1x1x128x128xbf16> to vector<128x128xbf16>
    %cst_36 = arith.constant dense<0.000000e+00> : vector<384x128xf32>
    %31 = tpu.matmul %28, %30, %cst_36 {dimension_numbers = #tpu.dot_dimension_numbers<[1], [0], [0], [1], [0, 0, 1, 1], [], []>} : vector<384x128xbf16>, vector<128x128xbf16>, vector<384x128xf32> -> vector<384x128xf32>
    %32 = arith.addf %27, %31 : vector<384x128xf32>
    %33 = vector.extract_strided_slice %13 {offsets = [48, 0], sizes = [384, 128], strides = [1, 1]} : vector<480x128xbf16> to vector<384x128xbf16>
    %c1_37 = arith.constant 1 : index
    %c1_38 = arith.constant 1 : index
    %c0_39 = arith.constant 0 : index
    %c0_40 = arith.constant 0 : index
    %34 = vector.load %arg2[%c1_37, %c1_38, %c0_39, %c0_40] : memref<3x3x128x128xbf16, #tpu.memory_space<vmem>>, vector<1x1x128x128xbf16>
    %35 = vector.shape_cast %34 : vector<1x1x128x128xbf16> to vector<128x128xbf16>
    %cst_41 = arith.constant dense<0.000000e+00> : vector<384x128xf32>
    %36 = tpu.matmul %33, %35, %cst_41 {dimension_numbers = #tpu.dot_dimension_numbers<[1], [0], [0], [1], [0, 0, 1, 1], [], []>} : vector<384x128xbf16>, vector<128x128xbf16>, vector<384x128xf32> -> vector<384x128xf32>
    %37 = arith.addf %32, %36 : vector<384x128xf32>
    %38 = vector.extract_strided_slice %13 {offsets = [49, 0], sizes = [384, 128], strides = [1, 1]} : vector<480x128xbf16> to vector<384x128xbf16>
    %c1_42 = arith.constant 1 : index
    %c2_43 = arith.constant 2 : index
    %c0_44 = arith.constant 0 : index
    %c0_45 = arith.constant 0 : index
    %39 = vector.load %arg2[%c1_42, %c2_43, %c0_44, %c0_45] : memref<3x3x128x128xbf16, #tpu.memory_space<vmem>>, vector<1x1x128x128xbf16>
    %40 = vector.shape_cast %39 : vector<1x1x128x128xbf16> to vector<128x128xbf16>
    %cst_46 = arith.constant dense<0.000000e+00> : vector<384x128xf32>
    %41 = tpu.matmul %38, %40, %cst_46 {dimension_numbers = #tpu.dot_dimension_numbers<[1], [0], [0], [1], [0, 0, 1, 1], [], []>} : vector<384x128xbf16>, vector<128x128xbf16>, vector<384x128xf32> -> vector<384x128xf32>
    %42 = arith.addf %37, %41 : vector<384x128xf32>
    %43 = vector.extract_strided_slice %13 {offsets = [71, 0], sizes = [384, 128], strides = [1, 1]} : vector<480x128xbf16> to vector<384x128xbf16>
    %c2_47 = arith.constant 2 : index
    %c0_48 = arith.constant 0 : index
    %c0_49 = arith.constant 0 : index
    %c0_50 = arith.constant 0 : index
    %44 = vector.load %arg2[%c2_47, %c0_48, %c0_49, %c0_50] : memref<3x3x128x128xbf16, #tpu.memory_space<vmem>>, vector<1x1x128x128xbf16>
    %45 = vector.shape_cast %44 : vector<1x1x128x128xbf16> to vector<128x128xbf16>
    %cst_51 = arith.constant dense<0.000000e+00> : vector<384x128xf32>
    %46 = tpu.matmul %43, %45, %cst_51 {dimension_numbers = #tpu.dot_dimension_numbers<[1], [0], [0], [1], [0, 0, 1, 1], [], []>} : vector<384x128xbf16>, vector<128x128xbf16>, vector<384x128xf32> -> vector<384x128xf32>
    %47 = arith.addf %42, %46 : vector<384x128xf32>
    %48 = vector.extract_strided_slice %13 {offsets = [72, 0], sizes = [384, 128], strides = [1, 1]} : vector<480x128xbf16> to vector<384x128xbf16>
    %c2_52 = arith.constant 2 : index
    %c1_53 = arith.constant 1 : index
    %c0_54 = arith.constant 0 : index
    %c0_55 = arith.constant 0 : index
    %49 = vector.load %arg2[%c2_52, %c1_53, %c0_54, %c0_55] : memref<3x3x128x128xbf16, #tpu.memory_space<vmem>>, vector<1x1x128x128xbf16>
    %50 = vector.shape_cast %49 : vector<1x1x128x128xbf16> to vector<128x128xbf16>
    %cst_56 = arith.constant dense<0.000000e+00> : vector<384x128xf32>
    %51 = tpu.matmul %48, %50, %cst_56 {dimension_numbers = #tpu.dot_dimension_numbers<[1], [0], [0], [1], [0, 0, 1, 1], [], []>} : vector<384x128xbf16>, vector<128x128xbf16>, vector<384x128xf32> -> vector<384x128xf32>
    %52 = arith.addf %47, %51 : vector<384x128xf32>
    %53 = vector.extract_strided_slice %13 {offsets = [73, 0], sizes = [384, 128], strides = [1, 1]} : vector<480x128xbf16> to vector<384x128xbf16>
    %c2_57 = arith.constant 2 : index
    %c2_58 = arith.constant 2 : index
    %c0_59 = arith.constant 0 : index
    %c0_60 = arith.constant 0 : index
    %54 = vector.load %arg2[%c2_57, %c2_58, %c0_59, %c0_60] : memref<3x3x128x128xbf16, #tpu.memory_space<vmem>>, vector<1x1x128x128xbf16>
    %55 = vector.shape_cast %54 : vector<1x1x128x128xbf16> to vector<128x128xbf16>
    %cst_61 = arith.constant dense<0.000000e+00> : vector<384x128xf32>
    %56 = tpu.matmul %53, %55, %cst_61 {dimension_numbers = #tpu.dot_dimension_numbers<[1], [0], [0], [1], [0, 0, 1, 1], [], []>} : vector<384x128xbf16>, vector<128x128xbf16>, vector<384x128xf32> -> vector<384x128xf32>
    %57 = arith.addf %52, %56 : vector<384x128xf32>
    %58 = vector.shape_cast %57 : vector<384x128xf32> to vector<16x24x128xf32>
    %59 = vector.extract_strided_slice %58 {offsets = [0, 0, 0], sizes = [16, 16, 128], strides = [1, 1, 1]} : vector<16x24x128xf32> to vector<16x16x128xf32>
    %c0_62 = arith.constant 0 : index
    %c0_63 = arith.constant 0 : index
    %60 = vector.load %arg3[%c0_62, %c0_63] : memref<1x128xf32, #tpu.memory_space<vmem>>, vector<1x128xf32>
    %61 = vector.shape_cast %60 : vector<1x128xf32> to vector<1x1x128xf32>
    %62 = vector.broadcast %61 : vector<1x1x128xf32> to vector<16x16x128xf32>
    %63 = arith.addf %59, %62 : vector<16x16x128xf32>
    %64 = arith.negf %63 : vector<16x16x128xf32>
    %65 = math.exp %64 : vector<16x16x128xf32>
    %cst_64 = arith.constant 1.000000e+00 : f32
    %66 = vector.broadcast %cst_64 : f32 to vector<16x16x128xf32>
    %67 = arith.addf %66, %65 : vector<16x16x128xf32>
    %68 = arith.divf %66, %67 : vector<16x16x128xf32>
    %69 = arith.mulf %63, %68 : vector<16x16x128xf32>
    %cst_65 = arith.constant 0.000000e+00 : bf16
    %70 = vector.broadcast %cst_65 : bf16 to vector<1x24x128xbf16>
    %c1_66 = arith.constant 1 : index
    %c0_67 = arith.constant 0 : index
    %c0_68 = arith.constant 0 : index
    %71 = vector.load %arg8[%c1_66, %c0_67, %c0_68] : memref<20x24x128xbf16, #tpu.memory_space<vmem>>, vector<1x24x128xbf16>
    tpu.vector_store %arg8[%c1_66, %c0_67, %c0_68], %70 {strides = array<i32>} : memref<20x24x128xbf16, #tpu.memory_space<vmem>>, vector<1x24x128xbf16>,
    %cst_69 = arith.constant 0.000000e+00 : bf16
    %72 = vector.broadcast %cst_69 : bf16 to vector<1x24x128xbf16>
    %c18_70 = arith.constant 18 : index
    %c0_71 = arith.constant 0 : index
    %c0_72 = arith.constant 0 : index
    %73 = vector.load %arg8[%c18_70, %c0_71, %c0_72] : memref<20x24x128xbf16, #tpu.memory_space<vmem>>, vector<1x24x128xbf16>
    tpu.vector_store %arg8[%c18_70, %c0_71, %c0_72], %72 {strides = array<i32>} : memref<20x24x128xbf16, #tpu.memory_space<vmem>>, vector<1x24x128xbf16>,
    %cst_73 = arith.constant 0.000000e+00 : bf16
    %74 = vector.broadcast %cst_73 : bf16 to vector<20x8x128xbf16>
    %c0_74 = arith.constant 0 : index
    %c16_75 = arith.constant 16 : index
    %c0_76 = arith.constant 0 : index
    %75 = vector.load %arg8[%c0_74, %c16_75, %c0_76] : memref<20x24x128xbf16, #tpu.memory_space<vmem>>, vector<20x8x128xbf16>
    tpu.vector_store %arg8[%c0_74, %c16_75, %c0_76], %74 {strides = array<i32>} : memref<20x24x128xbf16, #tpu.memory_space<vmem>>, vector<20x8x128xbf16>,
    %76 = arith.truncf %69 : vector<16x16x128xf32> to vector<16x16x128xbf16>
    %c2_77 = arith.constant 2 : index
    %c0_78 = arith.constant 0 : index
    %c0_79 = arith.constant 0 : index
    %77 = vector.load %arg8[%c2_77, %c0_78, %c0_79] : memref<20x24x128xbf16, #tpu.memory_space<vmem>>, vector<16x16x128xbf16>
    tpu.vector_store %arg8[%c2_77, %c0_78, %c0_79], %76 {strides = array<i32>} : memref<20x24x128xbf16, #tpu.memory_space<vmem>>, vector<16x16x128xbf16>,
    %c0_80 = arith.constant 0 : index
    %c0_81 = arith.constant 0 : index
    %c0_82 = arith.constant 0 : index
    %78 = vector.load %arg8[%c0_80, %c0_81, %c0_82] : memref<20x24x128xbf16, #tpu.memory_space<vmem>>, vector<20x24x128xbf16>
    %79 = vector.shape_cast %78 : vector<20x24x128xbf16> to vector<480x128xbf16>
    %80 = vector.extract_strided_slice %79 {offsets = [23, 0], sizes = [384, 128], strides = [1, 1]} : vector<480x128xbf16> to vector<384x128xbf16>
    %c0_83 = arith.constant 0 : index
    %c0_84 = arith.constant 0 : index
    %c0_85 = arith.constant 0 : index
    %c0_86 = arith.constant 0 : index
    %81 = vector.load %arg4[%c0_83, %c0_84, %c0_85, %c0_86] : memref<3x3x128x128xbf16, #tpu.memory_space<vmem>>, vector<1x1x128x128xbf16>
    %82 = vector.shape_cast %81 : vector<1x1x128x128xbf16> to vector<128x128xbf16>
    %cst_87 = arith.constant dense<0.000000e+00> : vector<384x128xf32>
    %83 = tpu.matmul %80, %82, %cst_87 {dimension_numbers = #tpu.dot_dimension_numbers<[1], [0], [0], [1], [0, 0, 1, 1], [], []>} : vector<384x128xbf16>, vector<128x128xbf16>, vector<384x128xf32> -> vector<384x128xf32>
    %84 = vector.extract_strided_slice %79 {offsets = [24, 0], sizes = [384, 128], strides = [1, 1]} : vector<480x128xbf16> to vector<384x128xbf16>
    %c0_88 = arith.constant 0 : index
    %c1_89 = arith.constant 1 : index
    %c0_90 = arith.constant 0 : index
    %c0_91 = arith.constant 0 : index
    %85 = vector.load %arg4[%c0_88, %c1_89, %c0_90, %c0_91] : memref<3x3x128x128xbf16, #tpu.memory_space<vmem>>, vector<1x1x128x128xbf16>
    %86 = vector.shape_cast %85 : vector<1x1x128x128xbf16> to vector<128x128xbf16>
    %cst_92 = arith.constant dense<0.000000e+00> : vector<384x128xf32>
    %87 = tpu.matmul %84, %86, %cst_92 {dimension_numbers = #tpu.dot_dimension_numbers<[1], [0], [0], [1], [0, 0, 1, 1], [], []>} : vector<384x128xbf16>, vector<128x128xbf16>, vector<384x128xf32> -> vector<384x128xf32>
    %88 = arith.addf %83, %87 : vector<384x128xf32>
    %89 = vector.extract_strided_slice %79 {offsets = [25, 0], sizes = [384, 128], strides = [1, 1]} : vector<480x128xbf16> to vector<384x128xbf16>
    %c0_93 = arith.constant 0 : index
    %c2_94 = arith.constant 2 : index
    %c0_95 = arith.constant 0 : index
    %c0_96 = arith.constant 0 : index
    %90 = vector.load %arg4[%c0_93, %c2_94, %c0_95, %c0_96] : memref<3x3x128x128xbf16, #tpu.memory_space<vmem>>, vector<1x1x128x128xbf16>
    %91 = vector.shape_cast %90 : vector<1x1x128x128xbf16> to vector<128x128xbf16>
    %cst_97 = arith.constant dense<0.000000e+00> : vector<384x128xf32>
    %92 = tpu.matmul %89, %91, %cst_97 {dimension_numbers = #tpu.dot_dimension_numbers<[1], [0], [0], [1], [0, 0, 1, 1], [], []>} : vector<384x128xbf16>, vector<128x128xbf16>, vector<384x128xf32> -> vector<384x128xf32>
    %93 = arith.addf %88, %92 : vector<384x128xf32>
    %94 = vector.extract_strided_slice %79 {offsets = [47, 0], sizes = [384, 128], strides = [1, 1]} : vector<480x128xbf16> to vector<384x128xbf16>
    %c1_98 = arith.constant 1 : index
    %c0_99 = arith.constant 0 : index
    %c0_100 = arith.constant 0 : index
    %c0_101 = arith.constant 0 : index
    %95 = vector.load %arg4[%c1_98, %c0_99, %c0_100, %c0_101] : memref<3x3x128x128xbf16, #tpu.memory_space<vmem>>, vector<1x1x128x128xbf16>
    %96 = vector.shape_cast %95 : vector<1x1x128x128xbf16> to vector<128x128xbf16>
    %cst_102 = arith.constant dense<0.000000e+00> : vector<384x128xf32>
    %97 = tpu.matmul %94, %96, %cst_102 {dimension_numbers = #tpu.dot_dimension_numbers<[1], [0], [0], [1], [0, 0, 1, 1], [], []>} : vector<384x128xbf16>, vector<128x128xbf16>, vector<384x128xf32> -> vector<384x128xf32>
    %98 = arith.addf %93, %97 : vector<384x128xf32>
    %99 = vector.extract_strided_slice %79 {offsets = [48, 0], sizes = [384, 128], strides = [1, 1]} : vector<480x128xbf16> to vector<384x128xbf16>
    %c1_103 = arith.constant 1 : index
    %c1_104 = arith.constant 1 : index
    %c0_105 = arith.constant 0 : index
    %c0_106 = arith.constant 0 : index
    %100 = vector.load %arg4[%c1_103, %c1_104, %c0_105, %c0_106] : memref<3x3x128x128xbf16, #tpu.memory_space<vmem>>, vector<1x1x128x128xbf16>
    %101 = vector.shape_cast %100 : vector<1x1x128x128xbf16> to vector<128x128xbf16>
    %cst_107 = arith.constant dense<0.000000e+00> : vector<384x128xf32>
    %102 = tpu.matmul %99, %101, %cst_107 {dimension_numbers = #tpu.dot_dimension_numbers<[1], [0], [0], [1], [0, 0, 1, 1], [], []>} : vector<384x128xbf16>, vector<128x128xbf16>, vector<384x128xf32> -> vector<384x128xf32>
    %103 = arith.addf %98, %102 : vector<384x128xf32>
    %104 = vector.extract_strided_slice %79 {offsets = [49, 0], sizes = [384, 128], strides = [1, 1]} : vector<480x128xbf16> to vector<384x128xbf16>
    %c1_108 = arith.constant 1 : index
    %c2_109 = arith.constant 2 : index
    %c0_110 = arith.constant 0 : index
    %c0_111 = arith.constant 0 : index
    %105 = vector.load %arg4[%c1_108, %c2_109, %c0_110, %c0_111] : memref<3x3x128x128xbf16, #tpu.memory_space<vmem>>, vector<1x1x128x128xbf16>
    %106 = vector.shape_cast %105 : vector<1x1x128x128xbf16> to vector<128x128xbf16>
    %cst_112 = arith.constant dense<0.000000e+00> : vector<384x128xf32>
    %107 = tpu.matmul %104, %106, %cst_112 {dimension_numbers = #tpu.dot_dimension_numbers<[1], [0], [0], [1], [0, 0, 1, 1], [], []>} : vector<384x128xbf16>, vector<128x128xbf16>, vector<384x128xf32> -> vector<384x128xf32>
    %108 = arith.addf %103, %107 : vector<384x128xf32>
    %109 = vector.extract_strided_slice %79 {offsets = [71, 0], sizes = [384, 128], strides = [1, 1]} : vector<480x128xbf16> to vector<384x128xbf16>
    %c2_113 = arith.constant 2 : index
    %c0_114 = arith.constant 0 : index
    %c0_115 = arith.constant 0 : index
    %c0_116 = arith.constant 0 : index
    %110 = vector.load %arg4[%c2_113, %c0_114, %c0_115, %c0_116] : memref<3x3x128x128xbf16, #tpu.memory_space<vmem>>, vector<1x1x128x128xbf16>
    %111 = vector.shape_cast %110 : vector<1x1x128x128xbf16> to vector<128x128xbf16>
    %cst_117 = arith.constant dense<0.000000e+00> : vector<384x128xf32>
    %112 = tpu.matmul %109, %111, %cst_117 {dimension_numbers = #tpu.dot_dimension_numbers<[1], [0], [0], [1], [0, 0, 1, 1], [], []>} : vector<384x128xbf16>, vector<128x128xbf16>, vector<384x128xf32> -> vector<384x128xf32>
    %113 = arith.addf %108, %112 : vector<384x128xf32>
    %114 = vector.extract_strided_slice %79 {offsets = [72, 0], sizes = [384, 128], strides = [1, 1]} : vector<480x128xbf16> to vector<384x128xbf16>
    %c2_118 = arith.constant 2 : index
    %c1_119 = arith.constant 1 : index
    %c0_120 = arith.constant 0 : index
    %c0_121 = arith.constant 0 : index
    %115 = vector.load %arg4[%c2_118, %c1_119, %c0_120, %c0_121] : memref<3x3x128x128xbf16, #tpu.memory_space<vmem>>, vector<1x1x128x128xbf16>
    %116 = vector.shape_cast %115 : vector<1x1x128x128xbf16> to vector<128x128xbf16>
    %cst_122 = arith.constant dense<0.000000e+00> : vector<384x128xf32>
    %117 = tpu.matmul %114, %116, %cst_122 {dimension_numbers = #tpu.dot_dimension_numbers<[1], [0], [0], [1], [0, 0, 1, 1], [], []>} : vector<384x128xbf16>, vector<128x128xbf16>, vector<384x128xf32> -> vector<384x128xf32>
    %118 = arith.addf %113, %117 : vector<384x128xf32>
    %119 = vector.extract_strided_slice %79 {offsets = [73, 0], sizes = [384, 128], strides = [1, 1]} : vector<480x128xbf16> to vector<384x128xbf16>
    %c2_123 = arith.constant 2 : index
    %c2_124 = arith.constant 2 : index
    %c0_125 = arith.constant 0 : index
    %c0_126 = arith.constant 0 : index
    %120 = vector.load %arg4[%c2_123, %c2_124, %c0_125, %c0_126] : memref<3x3x128x128xbf16, #tpu.memory_space<vmem>>, vector<1x1x128x128xbf16>
    %121 = vector.shape_cast %120 : vector<1x1x128x128xbf16> to vector<128x128xbf16>
    %cst_127 = arith.constant dense<0.000000e+00> : vector<384x128xf32>
    %122 = tpu.matmul %119, %121, %cst_127 {dimension_numbers = #tpu.dot_dimension_numbers<[1], [0], [0], [1], [0, 0, 1, 1], [], []>} : vector<384x128xbf16>, vector<128x128xbf16>, vector<384x128xf32> -> vector<384x128xf32>
    %123 = arith.addf %118, %122 : vector<384x128xf32>
    %124 = vector.shape_cast %123 : vector<384x128xf32> to vector<16x24x128xf32>
    %125 = vector.extract_strided_slice %124 {offsets = [0, 0, 0], sizes = [16, 16, 128], strides = [1, 1, 1]} : vector<16x24x128xf32> to vector<16x16x128xf32>
    %c0_128 = arith.constant 0 : index
    %c0_129 = arith.constant 0 : index
    %126 = vector.load %arg5[%c0_128, %c0_129] : memref<1x128xf32, #tpu.memory_space<vmem>>, vector<1x128xf32>
    %127 = vector.shape_cast %126 : vector<1x128xf32> to vector<1x1x128xf32>
    %128 = vector.broadcast %127 : vector<1x1x128xf32> to vector<16x16x128xf32>
    %129 = arith.addf %125, %128 : vector<16x16x128xf32>
    %130 = arith.negf %129 : vector<16x16x128xf32>
    %131 = math.exp %130 : vector<16x16x128xf32>
    %cst_130 = arith.constant 1.000000e+00 : f32
    %132 = vector.broadcast %cst_130 : f32 to vector<16x16x128xf32>
    %133 = arith.addf %132, %131 : vector<16x16x128xf32>
    %134 = arith.divf %132, %133 : vector<16x16x128xf32>
    %135 = arith.mulf %129, %134 : vector<16x16x128xf32>
    %136 = arith.addf %135, %9 : vector<16x16x128xf32>
    %c0_131 = arith.constant 0 : index
    %c0_132 = arith.constant 0 : index
    %c0_133 = arith.constant 0 : index
    %c0_134 = arith.constant 0 : index
    %137 = vector.load %arg6[%c0_131, %c0_132, %c0_133, %c0_134] : memref<1x16x16x128xf32, #tpu.memory_space<vmem>>, vector<1x16x16x128xf32>
    %138 = vector.shape_cast %137 : vector<1x16x16x128xf32> to vector<16x16x128xf32>
    %139 = vector.shape_cast %136 : vector<16x16x128xf32> to vector<1x16x16x128xf32>
    tpu.vector_store %arg6[%c0_131, %c0_132, %c0_133, %c0_134], %139 {strides = array<i32>} : memref<1x16x16x128xf32, #tpu.memory_space<vmem>>, vector<1x16x16x128xf32>,
    return
  }
  func.func @transform_0(%arg0: i32) -> (i32, i32, i32, i32) {
    %c0_i32 = arith.constant 0 : i32
    %c0_i32_0 = arith.constant 0 : i32
    %c0_i32_1 = arith.constant 0 : i32
    %c0_i32_2 = arith.constant 0 : i32
    return %arg0, %c0_i32, %c0_i32_0, %c0_i32_1 : i32, i32, i32, i32
  }
  func.func @transform_1(%arg0: i32) -> (i32, i32, i32, i32) {
    %c0_i32 = arith.constant 0 : i32
    %c0_i32_0 = arith.constant 0 : i32
    %c0_i32_1 = arith.constant 0 : i32
    %c0_i32_2 = arith.constant 0 : i32
    %c0_i32_3 = arith.constant 0 : i32
    return %c0_i32, %c0_i32_0, %c0_i32_1, %c0_i32_2 : i32, i32, i32, i32
  }
  func.func @transform_2(%arg0: i32) -> (i32, i32) {
    %c0_i32 = arith.constant 0 : i32
    %c0_i32_0 = arith.constant 0 : i32
    %c0_i32_1 = arith.constant 0 : i32
    return %c0_i32, %c0_i32_0 : i32, i32
  }
  func.func @transform_3(%arg0: i32) -> (i32, i32, i32, i32) {
    %c0_i32 = arith.constant 0 : i32
    %c0_i32_0 = arith.constant 0 : i32
    %c0_i32_1 = arith.constant 0 : i32
    %c0_i32_2 = arith.constant 0 : i32
    %c0_i32_3 = arith.constant 0 : i32
    return %c0_i32, %c0_i32_0, %c0_i32_1, %c0_i32_2 : i32, i32, i32, i32
  }
  func.func @transform_4(%arg0: i32) -> (i32, i32) {
    %c0_i32 = arith.constant 0 : i32
    %c0_i32_0 = arith.constant 0 : i32
    %c0_i32_1 = arith.constant 0 : i32
    return %c0_i32, %c0_i32_0 : i32, i32
  }
  func.func @transform_5(%arg0: i32) -> (i32, i32, i32, i32) {
    %c0_i32 = arith.constant 0 : i32
    %c0_i32_0 = arith.constant 0 : i32
    %c0_i32_1 = arith.constant 0 : i32
    %c0_i32_2 = arith.constant 0 : i32
    return %arg0, %c0_i32, %c0_i32_0, %c0_i32_1 : i32, i32, i32, i32
  }
}

</mosaic_0001>

<bundles_post_ra>
// kernel: bottleneck_forward.1
= control target key start
LH: loop header
LB: loop body
LE: loop exit
PB: predicated region body
PF: predicated region fallthrough
CT: control target
= control target key end

     0   :  { %s11889_s18 = smov 0   ;;  %s15547_s0 = inlined_call_operand.vmem [shape: f32[2,16,16,4], index: 0, kind: input, shape index: {}]   ;;  %s15548_s1 = inlined_call_operand.vmem [shape: bf16[3,3,128,128], index: 1, kind: input, shape index: {}]   ;;  %s15549_s2 = inlined_call_operand.vmem [shape: f32[1,128], index: 2, kind: input, shape index: {}]   ;;  %s15550_s3 = inlined_call_operand.vmem [shape: bf16[3,3,128,128], index: 3, kind: input, shape index: {}]   ;;  %s15551_s4 = inlined_call_operand.vmem [shape: f32[1,128], index: 4, kind: input, shape index: {}]   ;;  %s15552_s5 = inlined_call_operand.vmem [shape: f32[2,16,16,128], index: 5, kind: output, shape index: {}]  }
   0x1 LB: > { %s8790_s19 = sadd.s32 4294967295, %s11856_s18   ;;  %p8794_p0 = scmp.ge.s32.totalorder %s11856_s18, 1  ;;  %s11856_s18 = sphi %s11889_s18, %s15_s18  }
   0x2   : > { %p187_p1 = scmp.lt.s32.totalorder %s11856_s18, 3 }
   0x4   : > { %p188_p2 = pnand %p8794_p0, %p187_p1 }
   0x6   : > { %191 = sbr.rel (%p188_p2) target bundleno = 1425 (0x591), region = 40 }
   0xd   : > { %v11348_v0 = vld [vmem:[%s15548_s1 + $0x40] sm:$0xff]   ;;  %v11858_v2 = vmov 0   ;;  %v11350_v3 = vld [vmem:[%s15548_s1 + $0x48] sm:$0xff]   ;;  %p215_p3 = scmp.lt.s32.totalorder %s8790_s19, 1  ;;  %v11352_v5 = vld [vmem:[%s15548_s1 + $0x50] sm:$0xff]   ;;  %vm286_vm0 = vcmask 31744  }
   0xe   : > { %v11349_v1 = vld [vmem:[%s15548_s1] sm:$0xff]   ;;  %227 = vst [vmem:[#allocation2 + $0xc] sm:$0xf] %v11858_v2  ;;  %228 = vst [vmem:[#allocation2 + $0x10] sm:$0xf] %v11858_v2  ;;  %10187 = vmatprep.subr.bf16.mxu0 %v11348_v0  ;;  %v11351_v4 = vld [vmem:[%s15548_s1 + $0x8] sm:$0xff]  }
   0xf   : > { %229 = vst [vmem:[#allocation2 + $0x14] sm:$0xf] %v11858_v2  ;;  %234 = vst [vmem:[#allocation2 + $0x8] sm:$0xf] %v11858_v2  ;;  %10251 = vmatprep.subr.bf16.mxu1 %v11349_v1  ;;  %10188 = vmatpush3.bf16.msra.mxu0 %v11348_v0  ;;  %v11353_v6 = vld [vmem:[%s15548_s1 + $0x10] sm:$0xff]   ;;  %s16217_s19 = smov (!%p215_p3, %s8790_s19), 1 }
  0x10   : > { %231 = vst [vmem:[#allocation2 + $0xd8] sm:$0xf] %v11858_v2  ;;  %232 = vst [vmem:[#allocation2 + $0xdc] sm:$0xf] %v11858_v2  ;;  %10252 = vmatpush3.bf16.msra.mxu1 %v11349_v1  ;;  %10189 = vmatprep.subr.bf16.mxu0 %v11350_v3  ;;  %v11354_v7 = vld [vmem:[%s15548_s1 + $0x58] sm:$0xff]   ;;  %s9451_s11 = sshll.u32 %s16217_s19, 8 }
  0x11   : > { %233 = vst [vmem:[#allocation2 + $0xe0] sm:$0xf] %v11858_v2  ;;  %236 = vst [vmem:[#allocation2 + $0x20] sm:$0xf] %v11858_v2  ;;  %10253 = vmatprep.subr.bf16.mxu1 %v11351_v4  ;;  %v11355_v8 = vld [vmem:[%s15548_s1 + $0x18] sm:$0xff]   ;;  %v11356_v9 = vld [vmem:[%s15548_s1 + $0x60] sm:$0xff]   ;;  %s11942_s22 = scalar_lea.vmem %s15547_s0, %s9451_s11 }
  0x12   : > { %237 = vst [vmem:[#allocation2 + $0x2c] sm:$0xf] %v11858_v2  ;;  %238 = vst [vmem:[#allocation2 + $0x38] sm:$0xf] %v11858_v2  ;;  %v11357_v10 = vld [vmem:[%s15548_s1 + $0x20] sm:$0xff]   ;;  %v11358_v11 = vld [vmem:[%s15548_s1 + $0x68] sm:$0xff]  }
  0x13   : > { %239 = vst [vmem:[#allocation2 + $0x44] sm:$0xf] %v11858_v2  ;;  %240 = vst [vmem:[#allocation2 + $0x50] sm:$0xf] %v11858_v2  ;;  %10190 = vmatpush3.bf16.msra.mxu0 %v11350_v3  ;;  %v11359_v12 = vld [vmem:[%s15548_s1 + $0x28] sm:$0xff]   ;;  %v254_v19 = vld [vmem:[%s11942_s22] sm:$0xff] }
  0x14   : > { %241 = vst [vmem:[#allocation2 + $0x5c] sm:$0xf] %v11858_v2  ;;  %242 = vst [vmem:[#allocation2 + $0x68] sm:$0xf] %v11858_v2  ;;  %10254 = vmatpush3.bf16.msra.mxu1 %v11351_v4  ;;  %10191 = vmatprep.subr.bf16.mxu0 %v11352_v5  ;;  %v255_v20 = vld [vmem:[%s11942_s22 + $0x8] sm:$0xff]  ;;  %v11955_v22 = vsel %vm286_vm0, %v254_v19, 0.0 }
  0x15   : > { %243 = vst [vmem:[#allocation2 + $0x74] sm:$0xf] %v11858_v2  ;;  %244 = vst [vmem:[#allocation2 + $0x80] sm:$0xf] %v11858_v2  ;;  %10255 = vmatprep.subr.bf16.mxu1 %v11353_v6  ;;  %v481_v14 = vld [vmem:[#allocation2 + $0xc] sm:$0xf] }
  0x16   : > { %245 = vst [vmem:[#allocation2 + $0x8c] sm:$0xf] %v11858_v2  ;;  %246 = vst [vmem:[#allocation2 + $0x98] sm:$0xf] %v11858_v2  ;;  %v480_v13 = vld [vmem:[#allocation2 + $0x8] sm:$0xf] }
  0x17   : > { %247 = vst [vmem:[#allocation2 + $0xa4] sm:$0xf] %v11858_v2  ;;  %248 = vst [vmem:[#allocation2 + $0xb0] sm:$0xf] %v11858_v2  ;;  %10192 = vmatpush3.bf16.msra.mxu0 %v11352_v5  ;;  %v482_v15 = vld [vmem:[#allocation2 + $0x10] sm:$0xf]  ;;  %v8879_v18 = vcombine.low %v480_v13, %v481_v14 }
  0x18   : > { %249 = vst [vmem:[#allocation2 + $0xbc] sm:$0xf] %v11858_v2  ;;  %250 = vst [vmem:[#allocation2 + $0xc8] sm:$0xf] %v11858_v2  ;;  %10256 = vmatpush3.bf16.msra.mxu1 %v11353_v6  ;;  %10193 = vmatprep.subr.bf16.mxu0 %v11354_v7  ;;  %v11949_v17 = vcombine.low %v481_v14, %v482_v15  ;;  %v11958_v23 = vsel %vm286_vm0, %v255_v20, 0.0  ;;  %v256_v27 = vld [vmem:[%s11942_s22 + $0x10] sm:$0xff] }
  0x19   : > { %251 = vst [vmem:[#allocation2 + $0xd4] sm:$0xf] %v11858_v2  ;;  %4483 = vst [vmem:[#allocation3 + $0xc] sm:$0xf] %v11858_v2  ;;  %10257 = vmatprep.subr.bf16.mxu1 %v11355_v8  ;;  %v999_v24 = vshrl.u32 %v8879_v18, 16  ;;  %v1002_v25 = vshll.u32 %v8879_v18, 16  ;;  %v9520_v26 = vpack.c.bf16 %v11958_v23, %v11955_v22 }
  0x1a   : > { %4484 = vst [vmem:[#allocation3 + $0x10] sm:$0xf] %v11858_v2  ;;  %4485 = vst [vmem:[#allocation3 + $0x14] sm:$0xf] %v11858_v2  ;;  %10203 = vmatprep.mubr.bf16.mxu0 %v11949_v17  ;;  %v257_v28 = vld [vmem:[%s11942_s22 + $0x18] sm:$0xff]  ;;  %v11360_v29 = vld [vmem:[%s15548_s1 + $0x70] sm:$0xff]  }
  0x1b   : > { %4487 = vst [vmem:[#allocation3 + $0xd8] sm:$0xf] %v11858_v2  ;;  %4488 = vst [vmem:[#allocation3 + $0xdc] sm:$0xf] %v11858_v2  ;;  %10194 = vmatpush3.bf16.msra.mxu0 %v11354_v7  ;;  %v11969_v32 = vsel %vm286_vm0, %v256_v27, 0.0  ;;  %v11972_v33 = vsel %vm286_vm0, %v257_v28, 0.0 }
  0x1c   : > { %4489 = vst [vmem:[#allocation3 + $0xe0] sm:$0xf] %v11858_v2  ;;  %4490 = vst [vmem:[#allocation3 + $0x8] sm:$0xf] %v11858_v2  ;;  %10258 = vmatpush3.bf16.msra.mxu1 %v11355_v8  ;;  %10195 = vmatprep.subr.bf16.mxu0 %v11356_v9  ;;  %v11361_v34 = vld [vmem:[%s15548_s1 + $0x30] sm:$0xff]   ;;  %v1001_v35 = vrot.slane %v999_v24, 3  ;;  %v9455_v37 = vpack.c.bf16 %v11969_v32, %v11969_v32  ;;  %v9456_v38 = vpack.c.bf16 %v11972_v33, %v11972_v33 }
  0x1d   : > { %4492 = vst [vmem:[#allocation3 + $0x20] sm:$0xf] %v11858_v2  ;;  %4493 = vst [vmem:[#allocation3 + $0x2c] sm:$0xf] %v11858_v2  ;;  %10259 = vmatprep.subr.bf16.mxu1 %v11357_v10  ;;  %v1004_v36 = vrot.slane %v1002_v25, 4  ;;  %v258_v41 = vld [vmem:[%s11942_s22 + $0x20] sm:$0xff] }
  0x1e   : > { %4494 = vst [vmem:[#allocation3 + $0x38] sm:$0xf] %v11858_v2  ;;  %4495 = vst [vmem:[#allocation3 + $0x44] sm:$0xf] %v11858_v2  ;;  %vm997_vm1 = vsmask.f32 4352 }
  0x1f   : > { %4496 = vst [vmem:[#allocation3 + $0x50] sm:$0xf] %v11858_v2  ;;  %4497 = vst [vmem:[#allocation3 + $0x5c] sm:$0xf] %v11858_v2  ;;  %10196 = vmatpush3.bf16.msra.mxu0 %v11356_v9  ;;  %v1005_v42 = vor.u32 %v1004_v36, %v1001_v35  ;;  %v259_v43 = vld [vmem:[%s11942_s22 + $0x28] sm:$0xff]  ;;  %v11984_v44 = vsel %vm286_vm0, %v258_v41, 0.0 }
  0x20   : > { %4498 = vst [vmem:[#allocation3 + $0x68] sm:$0xf] %v11858_v2  ;;  %4499 = vst [vmem:[#allocation3 + $0x74] sm:$0xf] %v11858_v2  ;;  %10260 = vmatpush3.bf16.msra.mxu1 %v11357_v10  ;;  %10197 = vmatprep.subr.bf16.mxu0 %v11358_v11  ;;  %v260_v45 = vld [vmem:[%s11942_s22 + $0x30] sm:$0xff]  ;;  %v11362_v46 = vld [vmem:[%s15548_s1 + $0x78] sm:$0xff]  }
  0x21   : > { %4500 = vst [vmem:[#allocation3 + $0x80] sm:$0xf] %v11858_v2  ;;  %4501 = vst [vmem:[#allocation3 + $0x8c] sm:$0xf] %v11858_v2  ;;  %10261 = vmatprep.subr.bf16.mxu1 %v11359_v12  ;;  %v11993_v48 = vsel %vm286_vm0, %v259_v43, 0.0  ;;  %v11996_v49 = vsel %vm286_vm0, %v260_v45, 0.0 }
  0x22   : > { %4502 = vst [vmem:[#allocation3 + $0x98] sm:$0xf] %v11858_v2  ;;  %4503 = vst [vmem:[#allocation3 + $0xa4] sm:$0xf] %v11858_v2  ;;  %v261_v50 = vld [vmem:[%s11942_s22 + $0x38] sm:$0xff]  ;;  %v262_v51 = vld [vmem:[%s11942_s22 + $0x40] sm:$0xff]  ;;  %v9525_v53 = vpack.c.bf16 %v11993_v48, %v11984_v44  ;;  %v9459_v54 = vpack.c.bf16 %v11996_v49, %v11996_v49 }
  0x23   : > { %4504 = vst [vmem:[#allocation3 + $0xb0] sm:$0xf] %v11858_v2  ;;  %4505 = vst [vmem:[#allocation3 + $0xbc] sm:$0xf] %v11858_v2  ;;  %10198 = vmatpush3.bf16.msra.mxu0 %v11358_v11  ;;  %v11363_v52 = vld [vmem:[%s15548_s1 + $0x38] sm:$0xff]   ;;  %v12008_v55 = vsel %vm286_vm0, %v261_v50, 0.0 }
  0x24   : > { %4506 = vst [vmem:[#allocation3 + $0xc8] sm:$0xf] %v11858_v2  ;;  %4507 = vst [vmem:[#allocation3 + $0xd4] sm:$0xf] %v11858_v2  ;;  %10262 = vmatpush3.bf16.msra.mxu1 %v11359_v12  ;;  %10199 = vmatprep.subr.bf16.mxu0 %v11360_v29  ;;  %v263_v56 = vld [vmem:[%s11942_s22 + $0x48] sm:$0xff]  ;;  %v12012_v57 = vsel %vm286_vm0, %v262_v51, 0.0  ;;  %v9460_v60 = vpack.c.bf16 %v12008_v55, %v12008_v55 }
  0x25   : > { %235 = vst [vmem:[#allocation2 + $0x14] sm:$0xf] %v11858_v2  ;;  %252 = vst [vmem:[#allocation2 + $0xe0] sm:$0xf] %v11858_v2  ;;  %10263 = vmatprep.subr.bf16.mxu1 %v11361_v34  ;;  %v486_v59 = vld [vmem:[#allocation2 + $0x20] sm:$0xf] }
  0x26   : > { %4491 = vst [vmem:[#allocation3 + $0x14] sm:$0xf] %v11858_v2  ;;  %4508 = vst [vmem:[#allocation3 + $0xe0] sm:$0xf] %v11858_v2  ;;  %v12019_v61 = vsel %vm286_vm0, %v263_v56, 0.0  ;;  %v264_v62 = vld [vmem:[%s11942_s22 + $0x50] sm:$0xff] }
  0x27   : > { %15798 = vst [vmem:[#allocation4_spill] sm:$0xff] %v11955_v22  ;;  %15799 = vst [vmem:[#allocation5_spill] sm:$0xff] %v11958_v23  ;;  %10200 = vmatpush3.bf16.msra.mxu0 %v11360_v29  ;;  %v12022_v63 = vld [vmem:[#allocation2 + $0x2c] sm:$0xf]  ;;  %v9530_v0 = vpack.c.bf16 %v12019_v61, %v12012_v57  ;;  %v12027_v1 = vsel %vm286_vm0, %v264_v62, 0.0  ;;  %v265_v2 = vld [vmem:[%s11942_s22 + $0x58] sm:$0xff] }
  0x28   : > { %15800 = vst [vmem:[#allocation6_spill] sm:$0xff] %v11969_v32  ;;  %15801 = vst [vmem:[#allocation7_spill] sm:$0xff] %v11972_v33  ;;  %10264 = vmatpush3.bf16.msra.mxu1 %v11361_v34  ;;  %10201 = vmatprep.subr.bf16.mxu0 %v11362_v46  ;;  %v11368_v5 = vld [vmem:[%s15548_s1 + $0x80] sm:$0xff]   ;;  %v9463_v6 = vpack.c.bf16 %v12027_v1, %v12027_v1  ;;  %v12036_v7 = vsel %vm286_vm0, %v265_v2, 0.0  ;;  %v267_v11 = vld [vmem:[%s11942_s22 + $0x68] sm:$0xff] }
  0x29   : > { %9521 = vst [vmem:[#allocation2 + $0x18] sm:$0xff] %v9520_v26   ;;  %450 = vst [vmem:[#allocation2 + $0x24] sm:$0xf] %v9455_v37  ;;  %10265 = vmatprep.subr.bf16.mxu1 %v11363_v52  ;;  %v9464_v9 = vpack.c.bf16 %v12036_v7, %v12036_v7  ;;  %v266_v10 = vld [vmem:[%s11942_s22 + $0x60] sm:$0xff]  ;;  %v12057_v24 = vsel %vm286_vm0, %v267_v11, 0.0  ;;  %v11371_v25 = vld [vmem:[%s15548_s1 + $0x88] sm:$0xff]  }
  0x2a   : > { %451 = vst [vmem:[#allocation2 + $0x28] sm:$0xf] %v9456_v38  ;;  %15802 = vst [vmem:[#allocation8_spill] sm:$0xff] %v11984_v44  ;;  %v12050_v18 = vsel %vm286_vm0, %v266_v10, 0.0  ;;  %v12065_v26 = vld [vmem:[#allocation2 + $0x38] sm:$0xf] }
  0x2b   : > { %15803 = vst [vmem:[#allocation9_spill] sm:$0xff] %v11993_v48  ;;  %15804 = vst [vmem:[#allocation10_spill] sm:$0xff] %v11996_v49  ;;  %10202 = vmatpush3.bf16.msra.mxu0 %v11362_v46  ;;  %v9535_v38 = vpack.c.bf16 %v12057_v24, %v12050_v18  ;;  %v11376_v51 = vld [vmem:[%s15548_s1 + $0x90] sm:$0xff]   ;;  %v12470_v23 = vld [vmem:[#allocation2 + $0x98] sm:$0xf] }
  0x2c   : > { %v11947_v16 = vld [vmem:[#allocation2 + $0x14] sm:$0xf]  ;;  %15805 = vst [vmem:[#allocation11_spill] sm:$0xff] %v12008_v55  ;;  %15806 = vst [vmem:[#allocation12_spill] sm:$0xff] %v12012_v57  ;;  %10266 = vmatpush3.bf16.msra.mxu1 %v11363_v52  ;;  %10315 = vmatprep.subr.bf16.mxu0 %v11368_v5  ;;  %v12415_v57 = vld [vmem:[#allocation2 + $0x8c] sm:$0xf] }
  0x2d   : > { %v8880_v21 = vcombine.low %v482_v15, %v11947_v16  ;;  %15807 = vst [vmem:[#allocation13_spill] sm:$0xff] %v12019_v61  ;;  %9597 = vst [vmem:[#allocation2 + $0x30] sm:$0xff] %v9525_v53   ;;  %vm1523_vm2 = vsmask.f32 7424 }
  0x2e   : > { %454 = vst [vmem:[#allocation2 + $0x3c] sm:$0xf] %v9459_v54  ;;  %15808 = vst [vmem:[#allocation14_spill] sm:$0xff] %v12027_v1 }
  0x2f   : > { %v1007_v30 = vshrl.u32 %v8880_v21, 16  ;;  %v1010_v31 = vshll.u32 %v8880_v21, 16  ;;  %455 = vst [vmem:[#allocation2 + $0x40] sm:$0xf] %v9460_v60  ;;  %15809 = vst [vmem:[#allocation15_spill] sm:$0xff] %v12036_v7 }
  0x30   : > { %v484_v3 = vld [vmem:[#allocation2 + $0x18] sm:$0xf]  ;;  %v485_v4 = vld [vmem:[#allocation2 + $0x1c] sm:$0xf]  ;;  %9598 = vst [vmem:[#allocation2 + $0x48] sm:$0xff] %v9530_v0   ;;  %15810 = vst [vmem:[#allocation16_spill] sm:$0xff] %v12050_v18 }
  0x31   : > { %v1009_v39 = vrot.slane %v1007_v30, 3  ;;  %v1012_v40 = vrot.slane %v1010_v31, 4  ;;  %v12038_v8 = vcombine.low %v484_v3, %v485_v4  ;;  %v12045_v12 = vcombine.low %v11947_v16, %v484_v3  ;;  %v487_v13 = vld [vmem:[#allocation2 + $0x24] sm:$0xf]  ;;  %v488_v15 = vld [vmem:[#allocation2 + $0x28] sm:$0xf] }
  0x32   : > { %v12047_v14 = vcombine.low %v485_v4, %v486_v59  ;;  %458 = vst [vmem:[#allocation2 + $0x54] sm:$0xf] %v9463_v6  ;;  %v12054_v21 = vcombine.low %v486_v59, %v487_v13  ;;  %459 = vst [vmem:[#allocation2 + $0x58] sm:$0xf] %v9464_v9  ;;  %v12060_v16 = vcombine.low %v488_v15, %v12022_v63  ;;  %v12073_v31 = vld [vmem:[#allocation2 + $0x44] sm:$0xf] }
  0x33   : > { %v11990_v47 = vor.u32 %v1012_v40, %v1009_v39  ;;  %v15563_v19 = vshrl.u32 %v12038_v8, 16  ;;  %v15564_v20 = vshll.u32 %v12038_v8, 16  ;;  %15811 = vst [vmem:[#allocation17_spill] sm:$0xff] %v12057_v24  ;;  %10204 = vmatmul.mubr.bf16.vlgmr.msra.gmra.mrb[0].mxu0 %v12045_v12  ;;  %9599 = vst [vmem:[#allocation2 + $0x60] sm:$0xff] %v9535_v38   ;;  %v12103_v54 = vcombine.low %v487_v13, %v488_v15  ;;  %v11379_v13 = vld [vmem:[%s15548_s1 + $0x98] sm:$0xff]  }
  0x34   : > { %v15560_v29 = vshrl.u32 %v12054_v21, 16  ;;  %v15562_v30 = vshll.u32 %v12054_v21, 16  ;;  %v15559_v34 = vshrl.u32 %v12060_v16, 16  ;;  %v15561_v35 = vshll.u32 %v12060_v16, 16  ;;  %v490_v36 = vld [vmem:[#allocation2 + $0x30] sm:$0xf]  ;;  %10316 = vmatpush3.bf16.msra.mxu0 %v11368_v5  ;;  %10207 = vmatprep.mubr.bf16.mxu0 %v12047_v14 }
  0x35   : > { %v1014_v58 = vsel %vm997_vm1, %v1005_v42, %v11990_v47  ;;  %v1018_v27 = vrot.slane %v15563_v19, 3  ;;  %v1021_v28 = vrot.slane %v15564_v20, 4  ;;  %v12078_v37 = vld [vmem:[#allocation2 + $0x34] sm:$0xf]  ;;  %v12087_v42 = vld [vmem:[#allocation2 + $0x3c] sm:$0xf]  ;;  %10317 = vmatprep.subr.bf16.mxu0 %v11371_v25 }
  0x36   : > { %10267 = vmatprep.mubr.bf16.mxu1 %v1014_v58  ;;  %v1027_v40 = vrot.slane %v15560_v29, 3  ;;  %v1030_v41 = vrot.slane %v15562_v30, 4  ;;  %v12089_v43 = vld [vmem:[#allocation2 + $0x40] sm:$0xf]  ;;  %v1036_v45 = vrot.slane %v15559_v34, 3  ;;  %v1039_v46 = vrot.slane %v15561_v35, 4 }
  0x37   : > { %v1022_v39 = vor.u32 %v1021_v28, %v1018_v27  ;;  %v12096_v50 = vcombine.low %v490_v36, %v12078_v37  ;;  %v12107_v56 = vcombine.low %v12065_v26, %v12087_v42  ;;  %v12110_v58 = vcombine.low %v12022_v63, %v490_v36  ;;  %v12118_v0 = vld [vmem:[#allocation2 + $0x4c] sm:$0xf]  ;;  %v498_v5 = vld [vmem:[#allocation2 + $0x50] sm:$0xf]  ;;  %v270_v29 = vld [vmem:[%s11942_s22 + $0x80] sm:$0xff] }
  0x38   : > { %v1031_v53 = vor.u32 %v1030_v41, %v1027_v40  ;;  %v12116_v62 = vcombine.low %v12089_v43, %v12073_v31  ;;  %v1040_v3 = vor.u32 %v1039_v46, %v1036_v45  ;;  %10318 = vmatpush3.bf16.msra.mxu0 %v11371_v25  ;;  %v268_v40 = vld [vmem:[%s11942_s22 + $0x70] sm:$0xff]  ;;  %v11384_v41 = vld [vmem:[%s15548_s1 + $0xa0] sm:$0xff]   ;;  %v11391_v35 = vld [vmem:[%s15548_s1 + $0xc8] sm:$0xff]   ;;  %v12192_v30 = vcombine.low %v12087_v42, %v12089_v43 }
  0x39   : > { %v1023_v52 = vsel %vm997_vm1, %v11990_v47, %v1022_v39  ;;  %v15556_v59 = vshrl.u32 %v12096_v50, 16  ;;  %v15558_v60 = vshll.u32 %v12096_v50, 16  ;;  %v496_v47 = vld [vmem:[#allocation2 + $0x48] sm:$0xf]  ;;  %v15553_v4 = vshrl.u32 %v12107_v56, 16  ;;  %10319 = vmatprep.subr.bf16.mxu0 %v11376_v51  ;;  %v273_v19 = vld [vmem:[%s11942_s22 + $0x98] sm:$0xff] }
  0x3a   : > { %10268 = vmatmul.mubr.bf16.vlgmr.msra.gmra.mrb[0].mxu1 %v1023_v52  ;;  %v1032_v2 = vsel %vm997_vm1, %v1022_v39, %v1031_v53  ;;  %v15557_v63 = vshll.u32 %v12107_v56, 16  ;;  %v12123_v6 = vld [vmem:[#allocation2 + $0x54] sm:$0xf]  ;;  %v15554_v11 = vshrl.u32 %v12116_v62, 16  ;;  %v15555_v15 = vshll.u32 %v12116_v62, 16  ;;  %v11387_v43 = vld [vmem:[%s15548_s1 + $0xa8] sm:$0xff]  }
  0x3b   : > { %10271 = vmatprep.mubr.bf16.mxu1 %v1032_v2  ;;  %v1045_v9 = vrot.slane %v15556_v59, 3  ;;  %v1048_v10 = vrot.slane %v15558_v60, 4  ;;  %v12135_v25 = vcombine.low %v496_v47, %v12118_v0  ;;  %10208 = vmatmul.mubr.bf16.gmra.mrb[4].mxu0 %v12103_v54  ;;  %v1054_v28 = vrot.slane %v15553_v4, 3  ;;  %v12145_v39 = vld [vmem:[#allocation2 + $0x5c] sm:$0xf] }
  0x3c   : > { %v1057_v36 = vrot.slane %v15557_v63, 4  ;;  %v12143_v38 = vcombine.low %v498_v5, %v12123_v6  ;;  %v12152_v45 = vsel %vm997_vm1, %v1031_v53, %v1040_v3  ;;  %10211 = vmatprep.mubr.bf16.mxu0 %v12110_v58  ;;  %v1063_v46 = vrot.slane %v15554_v11, 3  ;;  %10320 = vmatpush3.bf16.msra.mxu0 %v11376_v51  ;;  %v12168_v4 = vld [vmem:[#allocation2 + $0x60] sm:$0xf]  ;;  %v12170_v11 = vld [vmem:[#allocation2 + $0x64] sm:$0xf] }
  0x3d   : > { %v1049_v27 = vor.u32 %v1048_v10, %v1045_v9  ;;  %15812 = vst [vmem:[#allocation18_spill] sm:$0xff] %v12152_v45  ;;  %v1066_v52 = vrot.slane %v15555_v15, 4  ;;  %v15566_v2 = vshrl.u32 %v12135_v25, 16  ;;  %v12160_v9 = vld [vmem:[#allocation2 + $0x58] sm:$0xf]  ;;  %v11390_v10 = vld [vmem:[%s15548_s1 + $0xc0] sm:$0xff]   ;;  %10321 = vmatprep.subr.bf16.mxu0 %v11379_v13  ;;  %v12207_v60 = vcombine.low %v12073_v31, %v496_v47 }
  0x3e   : > { %v15568_v15 = vshll.u32 %v12135_v25, 16  ;;  %v15567_v51 = vshrl.u32 %v12143_v38, 16  ;;  %v269_v59 = vld [vmem:[%s11942_s22 + $0x78] sm:$0xff]  ;;  %10379 = vmatprep.subr.bf16.mxu1 %v11390_v10  ;;  %v1058_v63 = vor.u32 %v1057_v36, %v1054_v28  ;;  %v12183_v34 = vcombine.low %v12160_v9, %v12145_v39  ;;  %v271_v28 = vld [vmem:[%s11942_s22 + $0x88] sm:$0xff]  ;;  %v272_v36 = vld [vmem:[%s11942_s22 + $0x90] sm:$0xff] }
  0x3f   : > { %v12166_v53 = vsel %vm997_vm1, %v1040_v3, %v1049_v27  ;;  %v12178_v3 = vcombine.low %v12078_v37, %v12065_v26  ;;  %v12196_v26 = vcombine.low %v12168_v4, %v12170_v11  ;;  %v12199_v37 = vsel %vm286_vm0, %v268_v40, 0.0  ;;  %15815 = vst [vmem:[#allocation21_spill] sm:$0xff] %v12207_v60  ;;  %10380 = vmatpush3.bf16.msra.mxu1 %v11390_v10  ;;  %v274_v47 = vld [vmem:[%s11942_s22 + $0xa0] sm:$0xff]  ;;  %v11395_v10 = vld [vmem:[%s15548_s1 + $0xd0] sm:$0xff]   ;;  %v277_v24 = vld [vmem:[%s11942_s22 + $0xb8] sm:$0xff] }
  0x40   : > { %15813 = vst [vmem:[#allocation19_spill] sm:$0xff] %v12166_v53  ;;  %10322 = vmatpush3.bf16.msra.mxu0 %v11379_v13  ;;  %15814 = vst [vmem:[#allocation20_spill] sm:$0xff] %v12199_v37  ;;  %v12204_v20 = vor.u32 %v1066_v52, %v1063_v46  ;;  %v9467_v42 = vpack.c.bf16 %v12199_v37, %v12199_v37  ;;  %v1072_v13 = vrot.slane %v15566_v2, 3  ;;  %v1075_v40 = vrot.slane %v15568_v15, 4  ;;  %v275_v52 = vld [vmem:[%s11942_s22 + $0xa8] sm:$0xff]  ;;  %v276_v37 = vld [vmem:[%s11942_s22 + $0xb0] sm:$0xff] }
  0x41   : > { %10323 = vmatprep.subr.bf16.mxu0 %v11384_v41  ;;  %v12219_v46 = vcombine.low %v12118_v0, %v498_v5  ;;  %v1081_v31 = vrot.slane %v15567_v51, 3  ;;  %10381 = vmatprep.subr.bf16.mxu1 %v11391_v35  ;;  %v12231_v2 = vsel %vm997_vm1, %v1049_v27, %v1058_v63  ;;  %v15818_v0 = vshll.u32 %v12143_v38, 16 }
  0x42   : > { %10272 = vmatmul.mubr.bf16.gmra.mrb[4].mxu1 %v12152_v45  ;;  %15817 = vst [vmem:[#allocation23_spill] sm:$0xff] %v12231_v2  ;;  %462 = vst [vmem:[#allocation2 + $0x6c] sm:$0xf] %v9467_v42  ;;  %v12237_v15 = vsel %vm286_vm0, %v269_v59, 0.0  ;;  %v12246_v61 = vsel %vm286_vm0, %v270_v29, 0.0  ;;  %v279_v42 = vld [vmem:[%s11942_s22 + $0xc8] sm:$0xff]  ;;  %v12252_v59 = vsel %vm997_vm1, %v1058_v63, %v12204_v20 }
  0x43   : > { %10275 = vmatprep.mubr.bf16.mxu1 %v12166_v53  ;;  %15816 = vst [vmem:[#allocation22_spill] sm:$0xff] %v12219_v46  ;;  %10212 = vmatmul.mubr.bf16.gmra.mrb[8].mxu0 %v12178_v3  ;;  %v1084_v5 = vrot.slane %v15818_v0, 4  ;;  %15819 = vst [vmem:[#allocation24_spill] sm:$0xff] %v12237_v15  ;;  %v9468_v27 = vpack.c.bf16 %v12237_v15, %v12237_v15  ;;  %v278_v0 = vld [vmem:[%s11942_s22 + $0xc0] sm:$0xff]  ;;  %v12255_v51 = vsel %vm286_vm0, %v271_v28, 0.0  ;;  %v12258_v7 = vsel %vm286_vm0, %v272_v36, 0.0 }
  0x44   : > { %10215 = vmatprep.mubr.bf16.mxu0 %v12192_v30  ;;  %15820 = vst [vmem:[#allocation25_spill] sm:$0xff] %v12246_v61  ;;  %10324 = vmatpush3.bf16.msra.mxu0 %v11384_v41  ;;  %15821 = vst [vmem:[#allocation26_spill] sm:$0xff] %v12252_v59  ;;  %v12261_v18 = vsel %vm286_vm0, %v273_v19, 0.0  ;;  %v11394_v29 = vld [vmem:[%s15548_s1 + $0xb0] sm:$0xff]   ;;  %v9540_v63 = vpack.c.bf16 %v12255_v51, %v12246_v61  ;;  %v9471_v28 = vpack.c.bf16 %v12258_v7, %v12258_v7  ;;  %v12278_v41 = vld [vmem:[#allocation2 + $0x68] sm:$0xf] }
  0x45   : > { %15822 = vst [vmem:[#allocation27_spill] sm:$0xff] %v12255_v51  ;;  %15823 = vst [vmem:[#allocation28_spill] sm:$0xff] %v12258_v7  ;;  %10325 = vmatprep.subr.bf16.mxu0 %v11387_v43  ;;  %10382 = vmatpush3.bf16.msra.mxu1 %v11391_v35  ;;  %v9472_v19 = vpack.c.bf16 %v12261_v18, %v12261_v18  ;;  %v11396_v35 = vld [vmem:[%s15548_s1 + $0xd8] sm:$0xff]   ;;  %v280_v36 = vld [vmem:[%s11942_s22 + $0xd0] sm:$0xff]  ;;  %v1076_v15 = vor.u32 %v1075_v40, %v1072_v13  ;;  %v12284_v51 = vsel %vm286_vm0, %v275_v52, 0.0 }
  0x46   : > { %15824 = vst [vmem:[#allocation29_spill] sm:$0xff] %v12261_v18  ;;  %463 = vst [vmem:[#allocation2 + $0x70] sm:$0xf] %v9468_v27  ;;  %10383 = vmatprep.subr.bf16.mxu1 %v11395_v10  ;;  %v12281_v27 = vsel %vm286_vm0, %v274_v47, 0.0  ;;  %v12287_v7 = vsel %vm286_vm0, %v276_v37, 0.0  ;;  %v281_v18 = vld [vmem:[%s11942_s22 + $0xd8] sm:$0xff]  ;;  %v12291_v61 = vor.u32 %v1084_v5, %v1081_v31 }
  0x47   : > { %15825 = vst [vmem:[#allocation30_spill] sm:$0xff] %v12281_v27  ;;  %15826 = vst [vmem:[#allocation31_spill] sm:$0xff] %v12284_v51  ;;  %v9545_v13 = vpack.c.bf16 %v12284_v51, %v12281_v27  ;;  %v9475_v40 = vpack.c.bf16 %v12287_v7, %v12287_v7  ;;  %v12298_v47 = vsel %vm286_vm0, %v277_v24, 0.0  ;;  %v11399_v37 = vld [vmem:[%s15548_s1 + $0xe0] sm:$0xff]   ;;  %v12303_v31 = vld [vmem:[#allocation2 + $0x74] sm:$0xf] }
  0x48   : > { %15827 = vst [vmem:[#allocation32_spill] sm:$0xff] %v12287_v7  ;;  %9600 = vst [vmem:[#allocation2 + $0x78] sm:$0xff] %v9540_v63   ;;  %10326 = vmatpush3.bf16.msra.mxu0 %v11387_v43  ;;  %v9476_v52 = vpack.c.bf16 %v12298_v47, %v12298_v47  ;;  %v12308_v43 = vsel %vm286_vm0, %v278_v0, 0.0  ;;  %v12311_v5 = vsel %vm286_vm0, %v279_v42, 0.0  ;;  %v12314_v24 = vsel %vm286_vm0, %v280_v36, 0.0  ;;  %v11400_v63 = vld [vmem:[%s15548_s1 + $0xb8] sm:$0xff]  }
  0x49   : > { %466 = vst [vmem:[#allocation2 + $0x84] sm:$0xf] %v9471_v28  ;;  %467 = vst [vmem:[#allocation2 + $0x88] sm:$0xf] %v9472_v19  ;;  %10327 = vmatprep.subr.bf16.mxu0 %v11394_v29  ;;  %10384 = vmatpush3.bf16.msra.mxu1 %v11395_v10  ;;  %v12319_v28 = vld [vmem:[#allocation2 + $0x6c] sm:$0xf]  ;;  %v9550_v0 = vpack.c.bf16 %v12311_v5, %v12308_v43  ;;  %v9479_v42 = vpack.c.bf16 %v12314_v24, %v12314_v24 }
  0x4a   : > { %10276 = vmatmul.mubr.bf16.gmra.mrb[8].mxu1 %v12231_v2  ;;  %15828 = vst [vmem:[#allocation33_spill] sm:$0xff] %v12298_v47  ;;  %15829 = vst [vmem:[#allocation34_spill] sm:$0xff] %v12308_v43  ;;  %10385 = vmatprep.subr.bf16.mxu1 %v11396_v35  ;;  %v12326_v10 = vsel %vm286_vm0, %v281_v18, 0.0  ;;  %v282_v19 = vld [vmem:[%s11942_s22 + $0xe0] sm:$0xff]  ;;  %v15833_v36 = vshrl.u32 %v12183_v34, 16  ;;  %v15836_v18 = vshll.u32 %v12183_v34, 16 }
  0x4b   : > { %10279 = vmatprep.mubr.bf16.mxu1 %v12252_v59  ;;  %15830 = vst [vmem:[#allocation35_spill] sm:$0xff] %v12311_v5  ;;  %15831 = vst [vmem:[#allocation36_spill] sm:$0xff] %v12314_v24  ;;  %10216 = vmatmul.mubr.bf16.gmra.mrb[12].mxu0 %v12207_v60  ;;  %v12336_v5 = vsel %vm286_vm0, %v282_v19, 0.0  ;;  %v12340_v24 = vsel %vm997_vm1, %v12204_v20, %v1076_v15  ;;  %v12354_v19 = vsel %vm997_vm1, %v1076_v15, %v12291_v61  ;;  %v11401_v15 = vld [vmem:[%s15548_s1 + $0xe8] sm:$0xff]  }
  0x4c   : > { %9601 = vst [vmem:[#allocation2 + $0x90] sm:$0xff] %v9545_v13   ;;  %470 = vst [vmem:[#allocation2 + $0x9c] sm:$0xf] %v9475_v40  ;;  %v1090_v7 = vrot.slane %v15833_v36, 3  ;;  %v9480_v13 = vpack.c.bf16 %v12326_v10, %v12326_v10  ;;  %v283_v40 = vld [vmem:[%s11942_s22 + $0xe8] sm:$0xff]  ;;  %10219 = vmatprep.mubr.bf16.mxu0 %v12219_v46  ;;  %v1093_v43 = vrot.slane %v15836_v18, 4  ;;  %v12347_v36 = vcombine.low %v12278_v41, %v12319_v28 }
  0x4d   : > { %15832 = vst [vmem:[#allocation37_spill] sm:$0xff] %v12326_v10  ;;  %471 = vst [vmem:[#allocation2 + $0xa0] sm:$0xf] %v9476_v52  ;;  %10328 = vmatpush3.bf16.msra.mxu0 %v11394_v29  ;;  %v12350_v52 = vsel %vm286_vm0, %v283_v40, 0.0  ;;  %v15839_v20 = vshrl.u32 %v12196_v26, 16  ;;  %v15840_v47 = vshll.u32 %v12196_v26, 16  ;;  %10386 = vmatpush3.bf16.msra.mxu1 %v11396_v35  ;;  %v12376_v35 = vcombine.low %v12123_v6, %v12160_v9 }
  0x4e   : > { %15834 = vst [vmem:[#allocation38_spill] sm:$0xff] %v12336_v5  ;;  %15835 = vst [vmem:[#allocation39_spill] sm:$0xff] %v12340_v24  ;;  %v506_v51 = vld [vmem:[#allocation2 + $0x70] sm:$0xf]  ;;  %10329 = vmatprep.subr.bf16.mxu0 %v11400_v63  ;;  %v9555_v29 = vpack.c.bf16 %v12350_v52, %v12336_v5  ;;  %10387 = vmatprep.subr.bf16.mxu1 %v11399_v37  ;;  %v15590_v40 = vshrl.u32 %v12347_v36, 16 }
  0x4f   : > { %9602 = vst [vmem:[#allocation2 + $0xa8] sm:$0xff] %v9550_v0   ;;  %474 = vst [vmem:[#allocation2 + $0xb4] sm:$0xf] %v9479_v42  ;;  %v1099_v10 = vrot.slane %v15839_v20, 3  ;;  %v1102_v18 = vrot.slane %v15840_v47, 4  ;;  %v12363_v0 = vcombine.low %v506_v51, %v12303_v31  ;;  %v12371_v42 = vld [vmem:[%s15548_s1 + $0x100] sm:$0xff]   ;;  %v1094_v47 = vor.u32 %v1093_v43, %v1090_v7 }
  0x50   : > { %15837 = vst [vmem:[#allocation40_spill] sm:$0xff] %v12350_v52  ;;  %15838 = vst [vmem:[#allocation41_spill] sm:$0xff] %v12354_v19  ;;  %v15591_v20 = vshll.u32 %v12347_v36, 16  ;;  %v508_v52 = vld [vmem:[#allocation2 + $0x78] sm:$0xf]  ;;  %v11405_v7 = vld [vmem:[%s15548_s1 + $0xf0] sm:$0xff]  }
  0x51   : > { %475 = vst [vmem:[#allocation2 + $0xb8] sm:$0xf] %v9480_v13  ;;  %9603 = vst [vmem:[#allocation2 + $0xc0] sm:$0xff] %v9555_v29   ;;  %v12381_v13 = vcombine.low %v12145_v39, %v12168_v4  ;;  %v509_v5 = vld [vmem:[#allocation2 + $0x7c] sm:$0xf]  ;;  %10330 = vmatpush3.bf16.msra.mxu0 %v11400_v63  ;;  %v1103_v27 = vor.u32 %v1102_v18, %v1099_v10  ;;  %v15592_v1 = vshrl.u32 %v12363_v0, 16  ;;  %10388 = vmatpush3.bf16.msra.mxu1 %v11399_v37 }
  0x52   : > { %10280 = vmatmul.mubr.bf16.gmra.mrb[12].mxu1 %v12340_v24  ;;  %v15594_v6 = vshll.u32 %v12363_v0, 16  ;;  %v510_v9 = vld [vmem:[#allocation2 + $0x80] sm:$0xf]  ;;  %v12387_v29 = vld [vmem:[#allocation2 + $0x84] sm:$0xf]  ;;  %10389 = vmatprep.subr.bf16.mxu1 %v11401_v15  ;;  %v12394_v4 = vcombine.low %v508_v52, %v509_v5  ;;  %v12398_v39 = vsel %vm997_vm1, %v12291_v61, %v1094_v47  ;;  %v1108_v37 = vrot.slane %v15590_v40, 3 }
  0x53   : > { %10283 = vmatprep.mubr.bf16.mxu1 %v12354_v19  ;;  %10443 = vmatprep.subr.bf16.mxu0 %v12371_v42  ;;  %15841 = vst [vmem:[#allocation42_spill] sm:$0xff] %v12398_v39  ;;  %v1111_v43 = vrot.slane %v15591_v20, 4  ;;  %v12406_v63 = vcombine.low %v510_v9, %v12387_v29  ;;  %v12409_v10 = vsel %vm997_vm1, %v1094_v47, %v1103_v27  ;;  %v1117_v18 = vrot.slane %v15592_v1, 3  ;;  %v11406_v40 = vld [vmem:[%s15548_s1 + $0xf8] sm:$0xff]   ;;  %v512_v49 = vld [vmem:[#allocation2 + $0x88] sm:$0xf] }
  0x54   : > { %10220 = vmatmul.mubr.bf16.gmra.mrb[16].mxu0 %v12376_v35  ;;  %15843 = vst [vmem:[#allocation44_spill] sm:$0xff] %v12409_v10  ;;  %v1120_v61 = vrot.slane %v15594_v6, 4  ;;  %v12423_v47 = vcombine.low %v12170_v11, %v12278_v41  ;;  %v15599_v1 = vshll.u32 %v12394_v4, 16  ;;  %v12429_v6 = vcombine.low %v12319_v28, %v506_v51  ;;  %v514_v41 = vld [vmem:[#allocation2 + $0x90] sm:$0xf] }
  0x55   : > { %10223 = vmatprep.mubr.bf16.mxu0 %v12381_v13  ;;  %15842 = vst [vmem:[#allocation43_spill] sm:$0xff] %v12406_v63  ;;  %10390 = vmatpush3.bf16.msra.mxu1 %v11401_v15  ;;  %v1112_v15 = vor.u32 %v1111_v43, %v1108_v37  ;;  %v15600_v55 = vshrl.u32 %v12406_v63, 16  ;;  %v15601_v48 = vshll.u32 %v12406_v63, 16  ;;  %v12434_v11 = vcombine.low %v512_v49, %v12415_v57  ;;  %v12436_v20 = vld [vmem:[#allocation2 + $0x94] sm:$0xf] }
  0x56   : > { %10391 = vmatprep.subr.bf16.mxu1 %v11405_v7  ;;  %v1121_v33 = vor.u32 %v1120_v61, %v1117_v18  ;;  %v15845_v37 = vshrl.u32 %v12394_v4, 16  ;;  %v1129_v28 = vrot.slane %v15599_v1, 4  ;;  %v12454_v61 = vld [vmem:[%s15548_s1 + $0x140] sm:$0xff]   ;;  %v12461_v44 = vcombine.low %v514_v41, %v12436_v20  ;;  %v12472_v32 = vld [vmem:[#allocation2 + $0x9c] sm:$0xf] }
  0x57   : > { %15844 = vst [vmem:[#allocation45_spill] sm:$0xff] %v12434_v11  ;;  %v12442_v51 = vsel %vm997_vm1, %v1103_v27, %v1112_v15  ;;  %v1138_v18 = vrot.slane %v15601_v48, 4  ;;  %v12468_v48 = vcombine.low %v12303_v31, %v508_v52  ;;  %v12475_v22 = vcombine.low %v509_v5, %v510_v9  ;;  %v12477_v1 = vld [vmem:[#allocation2 + $0xa4] sm:$0xf]  ;;  %v520_v2 = vld [vmem:[#allocation2 + $0xa8] sm:$0xf] }
  0x58   : > { %v1126_v43 = vrot.slane %v15845_v37, 3  ;;  %15846 = vst [vmem:[#allocation46_spill] sm:$0xff] %v12442_v51  ;;  %v1527_v37 = vshll.u32 %v11949_v17, 16  ;;  %v12458_v27 = vsel %vm997_vm1, %v1112_v15, %v1121_v33  ;;  %15848 = vst [vmem:[#allocation48_spill] sm:$0xff] %v12461_v44  ;;  %v15850_v52 = vshll.u32 %v12434_v11, 16 }
  0x59   : > { %10392 = vmatpush3.bf16.msra.mxu1 %v11405_v7  ;;  %v1135_v7 = vrot.slane %v15600_v55, 3  ;;  %15847 = vst [vmem:[#allocation47_spill] sm:$0xff] %v12458_v27  ;;  %v15614_v55 = vshrl.u32 %v12461_v44, 16  ;;  %v12487_v19 = vcombine.low %v12470_v23, %v12472_v32  ;;  %v1536_v5 = vshrl.u32 %v12045_v12, 16  ;;  %v12515_v53 = vld [vmem:[#allocation2 + $0xac] sm:$0xf] }
  0x5a   : > { %10284 = vmatmul.mubr.bf16.gmra.mrb[16].mxu1 %v12398_v39  ;;  %10393 = vmatprep.subr.bf16.mxu1 %v11406_v40  ;;  %v1130_v15 = vor.u32 %v1129_v28, %v1126_v43  ;;  %v1147_v39 = vrot.slane %v15850_v52, 4  ;;  %v518_v43 = vld [vmem:[#allocation2 + $0xa0] sm:$0xf]  ;;  %v1540_v9 = vshll.u32 %v12047_v14, 16  ;;  %v1525_v28 = vshrl.u32 %v11949_v17, 16 }
  0x5b   : > { %10287 = vmatprep.mubr.bf16.mxu1 %v12409_v10  ;;  %15851 = vst [vmem:[#allocation49_spill] sm:$0xff] %v12487_v19  ;;  %v12502_v52 = vcombine.low %v12387_v29, %v512_v49  ;;  %v1153_v10 = vrot.slane %v15614_v55, 3  ;;  %v12509_v17 = vcombine.low %v518_v43, %v12477_v1  ;;  %v12512_v59 = vcombine.low %v12415_v57, %v514_v41  ;;  %v12520_v55 = vld [vmem:[#allocation2 + $0xb4] sm:$0xf] }
  0x5c   : > { %10224 = vmatmul.mubr.bf16.gmra.mrb[20].mxu0 %v12423_v47  ;;  %v1532_v49 = vshll.u32 %v12045_v12, 16  ;;  %v12523_v41 = vrot.slane %v1540_v9, 1 }
  0x5d   : > { %10227 = vmatprep.mubr.bf16.mxu0 %v12429_v6  ;;  %10394 = vmatpush3.bf16.msra.mxu1 %v11406_v40  ;;  %v1139_v40 = vor.u32 %v1138_v18, %v1135_v7  ;;  %15855 = vst [vmem:[#allocation52_spill] sm:$0xff] %v12509_v17  ;;  %v1529_v7 = vrot.slane %v1527_v37, 1  ;;  %v15623_v29 = vshll.u32 %v12509_v17, 16 }
  0x5e   : > { %10507 = vmatprep.subr.bf16.mxu1 %v12454_v61  ;;  %v1534_v57 = vrot.slane %v1532_v49, 1 }
  0x5f   : > { %v12499_v18 = vsel %vm997_vm1, %v1130_v15, %v1139_v40  ;;  %v1530_v37 = vor.u32 %v1529_v7, %v1525_v28 }
  0x60   : > { %15853 = vst [vmem:[#allocation51_spill] sm:$0xff] %v12499_v18  ;;  %v1538_v28 = vor.u32 %v1536_v5, %v1534_v57 }
  0x62   : > { %10288 = vmatmul.mubr.bf16.gmra.mrb[20].mxu1 %v12442_v51  ;;  %v15849_v51 = vshrl.u32 %v12434_v11, 16  ;;  %v12530_v11 = vsel %vm1523_vm2, %v1530_v37, %v1534_v57 }
  0x63   : > { %10291 = vmatprep.mubr.bf16.mxu1 %v12458_v27  ;;  %v15854_v27 = vshll.u32 %v12461_v44, 16  ;;  %v2060_v44 = vrot.slane %v1540_v9, 4  ;;  %v15860_v9 = vshll.u32 %v12487_v19, 16 }
  0x64   : > { %v1144_v31 = vrot.slane %v15849_v51, 3  ;;  %10228 = vmatmul.mubr.bf16.gmra.mrb[24].mxu0 %v12468_v48  ;;  %v12495_v51 = vsel %vm997_vm1, %v1121_v33, %v1130_v15  ;;  %v15856_v15 = vshrl.u32 %v12047_v14, 16 }
  0x65   : > { %15852 = vst [vmem:[#allocation50_spill] sm:$0xff] %v12495_v51  ;;  %10231 = vmatprep.mubr.bf16.mxu0 %v12475_v22  ;;  %v1156_v24 = vrot.slane %v15854_v27, 4  ;;  %v522_v27 = vld [vmem:[#allocation2 + $0xb0] sm:$0xf]  ;;  %v1165_v37 = vrot.slane %v15860_v9, 4 }
  0x66   : > { %v1148_v33 = vor.u32 %v1147_v39, %v1144_v31  ;;  %v2056_v39 = vrot.slane %v1536_v5, 3  ;;  %v2057_v31 = vrot.slane %v1532_v49, 4  ;;  %v2059_v45 = vrot.slane %v15856_v15, 3  ;;  %v525_v9 = vld [vmem:[#allocation2 + $0xbc] sm:$0xf] }
  0x67   : > { %v1157_v12 = vor.u32 %v1156_v24, %v1153_v10  ;;  %v12537_v49 = vcombine.low %v520_v2, %v12515_v53  ;;  %v15859_v24 = vshrl.u32 %v12487_v19, 16  ;;  %v12547_v5 = vcombine.low %v522_v27, %v12520_v55  ;;  %v526_v19 = vld [vmem:[#allocation2 + $0xc0] sm:$0xf] }
  0x68   : > { %v2058_v7 = vor.u32 %v2057_v31, %v2056_v39  ;;  %v12539_v15 = vor.u32 %v2060_v44, %v2059_v45  ;;  %v1174_v45 = vrot.slane %v15623_v29, 4  ;;  %v12567_v31 = vcombine.low %v12436_v20, %v12470_v23  ;;  %v527_v23 = vld [vmem:[#allocation2 + $0xc4] sm:$0xf] }
  0x69   : > { %15858 = vst [vmem:[#allocation54_spill] sm:$0xff] %v12537_v49  ;;  %v1162_v10 = vrot.slane %v15859_v24, 3  ;;  %15861 = vst [vmem:[#allocation55_spill] sm:$0xff] %v12547_v5  ;;  %v12554_v39 = vsel %vm997_vm1, %v1148_v33, %v1157_v12  ;;  %v524_v24 = vld [vmem:[#allocation2 + $0xb8] sm:$0xf]  ;;  %v12573_v29 = vcombine.low %v12472_v32, %v518_v43 }
  0x6a   : > { %10292 = vmatmul.mubr.bf16.gmra.mrb[24].mxu1 %v12495_v51  ;;  %v15622_v51 = vshrl.u32 %v12509_v17, 16  ;;  %15862 = vst [vmem:[#allocation56_spill] sm:$0xff] %v12554_v39  ;;  %v12562_v57 = vsel %vm997_vm1, %v2058_v7, %v12539_v15  ;;  %v15634_v17 = vshrl.u32 %v12547_v5, 16  ;;  %v12586_v43 = vcombine.low %v524_v24, %v525_v9 }
  0x6b   : > { %10295 = vmatprep.mubr.bf16.mxu1 %v12499_v18  ;;  %v12534_v18 = vsel %vm997_vm1, %v1139_v40, %v1148_v33  ;;  %v12551_v40 = vsel %vm1523_vm2, %v1538_v28, %v12523_v41  ;;  %v15629_v28 = vshrl.u32 %v12537_v49, 16  ;;  %v15631_v33 = vshll.u32 %v12537_v49, 16 }
  0x6c   : > { %10232 = vmatmul.mubr.bf16.gmra.mrb[28].mxu0 %v12502_v52  ;;  %15857 = vst [vmem:[#allocation53_spill] sm:$0xff] %v12534_v18  ;;  %v1171_v44 = vrot.slane %v15622_v51, 3  ;;  %v1166_v51 = vor.u32 %v1165_v37, %v1162_v10  ;;  %v15640_v49 = vshrl.u32 %v12586_v43, 16 }
  0x6d   : > { %10235 = vmatprep.mubr.bf16.mxu0 %v12512_v59  ;;  %v1180_v10 = vrot.slane %v15629_v28, 3  ;;  %v1183_v32 = vrot.slane %v15631_v33, 4  ;;  %v12599_v28 = vcombine.low %v12477_v1, %v520_v2 }
  0x6e   : > { %v1175_v7 = vor.u32 %v1174_v45, %v1171_v44  ;;  %v12579_v20 = vsel %vm997_vm1, %v1157_v12, %v1166_v51  ;;  %v1189_v44 = vrot.slane %v15634_v17, 3  ;;  %v12595_v45 = vcombine.low %v526_v19, %v527_v23 }
  0x6f   : > { %15863 = vst [vmem:[#allocation57_spill] sm:$0xff] %v12579_v20  ;;  %v1184_v33 = vor.u32 %v1183_v32, %v1180_v10  ;;  %v15641_v17 = vshll.u32 %v12586_v43, 16  ;;  %v1198_v2 = vrot.slane %v15640_v49, 3  ;;  %v12630_v49 = vcombine.low %v525_v9, %v526_v19 }
  0x70   : > { %v12589_v37 = vsel %vm997_vm1, %v1166_v51, %v1175_v7  ;;  %v12603_v51 = vcombine.low %v12515_v53, %v522_v27  ;;  %v15644_v63 = vshll.u32 %v12595_v45, 16  ;;  %v1548_v9 = vshll.u32 %v12103_v54, 16 }
  0x71   : > { %15864 = vst [vmem:[#allocation58_spill] sm:$0xff] %v12589_v37  ;;  %v12611_v1 = vsel %vm997_vm1, %v1175_v7, %v1184_v33  ;;  %v1201_v53 = vrot.slane %v15641_v17, 4  ;;  %v12627_v7 = vcombine.low %v12520_v55, %v524_v24 }
  0x72   : > { %10296 = vmatmul.mubr.bf16.gmra.mrb[28].mxu1 %v12534_v18  ;;  %v15637_v18 = vshll.u32 %v12547_v5, 16  ;;  %15865 = vst [vmem:[#allocation59_spill] sm:$0xff] %v12611_v1 }
  0x73   : > { %10299 = vmatprep.mubr.bf16.mxu1 %v12554_v39  ;;  %v528_v39 = vld [vmem:[#allocation2 + $0xc8] sm:$0xf] }
  0x74   : > { %10236 = vmatmul.mubr.bf16.gmra.mrb[32].mxu0 %v12567_v31  ;;  %v1192_v12 = vrot.slane %v15637_v18, 4  ;;  %v15643_v18 = vshrl.u32 %v12595_v45, 16  ;;  %v8903_v27 = vcombine.low %v528_v39, %v528_v39  ;;  %v12644_v19 = vcombine.low %v527_v23, %v528_v39 }
  0x75   : > { %10239 = vmatprep.mubr.bf16.mxu0 %v12573_v29  ;;  %v2064_v23 = vrot.slane %v1548_v9, 4 }
  0x76   : > { %v1193_v5 = vor.u32 %v1192_v12, %v1189_v44  ;;  %v1207_v32 = vrot.slane %v15643_v18, 3  ;;  %v1210_v44 = vrot.slane %v15644_v63, 4  ;;  %v1202_v12 = vor.u32 %v1201_v53, %v1198_v2  ;;  %15870 = vst [vmem:[#allocation64_spill] sm:$0xff] %v12644_v19 }
  0x77   : > { %v1214_v17 = vshrl.u32 %v8903_v27, 16  ;;  %v1556_v2 = vshll.u32 %v12110_v58, 16  ;;  %v1550_v53 = vrot.slane %v1548_v9, 1 }
  0x78   : > { %v12619_v10 = vsel %vm997_vm1, %v1184_v33, %v1193_v5  ;;  %v12632_v33 = vor.u32 %v1210_v44, %v1207_v32  ;;  %v12636_v18 = vsel %vm997_vm1, %v1193_v5, %v1202_v12  ;;  %v1552_v5 = vshrl.u32 %v12103_v54, 16 }
  0x79   : > { %15866 = vst [vmem:[#allocation60_spill] sm:$0xff] %v12619_v10  ;;  %15868 = vst [vmem:[#allocation62_spill] sm:$0xff] %v12636_v18  ;;  %v1216_v63 = vrot.slane %v1214_v17, 3  ;;  %v1560_v17 = vshrl.u32 %v12110_v58, 16  ;;  %v2068_v32 = vrot.slane %v1556_v2, 4  ;;  %v1564_v44 = vshll.u32 %v12178_v3, 16 }
  0x7a   : > { %10300 = vmatmul.mubr.bf16.gmra.mrb[32].mxu1 %v12579_v20  ;;  %15867 = vst [vmem:[#allocation61_spill] sm:$0xff] %v12632_v33  ;;  %v12641_v55 = vsel %vm997_vm1, %v1202_v12, %v12632_v33  ;;  %v2063_v39 = vrot.slane %v1552_v5, 3  ;;  %v1568_v12 = vshrl.u32 %v12178_v3, 16 }
  0x7b   : > { %10303 = vmatprep.mubr.bf16.mxu1 %v12589_v37  ;;  %v1217_v37 = vshll.u32 %v8903_v27, 16  ;;  %15869 = vst [vmem:[#allocation63_spill] sm:$0xff] %v12641_v55  ;;  %v2067_v27 = vrot.slane %v1560_v17, 3 }
  0x7c   : > { %10240 = vmatmul.mubr.bf16.gmra.mrb[36].mxu0 %v12599_v28 }
  0x7d   : > { %10243 = vmatprep.mubr.bf16.mxu0 %v12603_v51  ;;  %v2069_v9 = vor.u32 %v2068_v32, %v2067_v27 }
  0x82   : > { %10304 = vmatmul.mubr.bf16.gmra.mrb[36].mxu1 %v12611_v1  ;;  %v1219_v1 = vrot.slane %v1217_v37, 4 }
  0x83   : > { %10307 = vmatprep.mubr.bf16.mxu1 %v12619_v10 }
  0x84   : > { %10244 = vmatmul.mubr.bf16.gmra.mrb[40].mxu0 %v12627_v7  ;;  %v1220_v24 = vor.u32 %v1219_v1, %v1216_v63  ;;  %v15871_v63 = vshrl.u32 %v12047_v14, 16  ;;  %v1572_v14 = vshll.u32 %v12192_v30, 16 }
  0x85   : > { %10247 = vmatprep.mubr.bf16.mxu0 %v12630_v49 }
  0x86   : > { %v1221_v37 = vsel %vm997_vm1, %v12632_v33, %v1220_v24  ;;  %v1546_v1 = vor.u32 %v15871_v63, %v12523_v41  ;;  %v1576_v41 = vshrl.u32 %v12192_v30, 16  ;;  %v1558_v63 = vrot.slane %v1556_v2, 1 }
  0x87   : > { %v2071_v33 = vrot.slane %v1568_v12, 3  ;;  %v2076_v32 = vrot.slane %v1572_v14, 4 }
  0x88   : > { %v1551_v24 = vsel %vm1523_vm2, %v1546_v1, %v1550_v53  ;;  %v11409_v1 = vld [vmem:[%s15548_s1 + $0x110] sm:$0xff]   ;;  %v1562_v27 = vor.u32 %v1560_v17, %v1558_v63  ;;  %v1584_v17 = vshrl.u32 %v12207_v60, 16 }
  0x8a   : > { %10308 = vmatmul.mubr.bf16.gmra.mrb[40].mxu1 %v12636_v18  ;;  %v1588_v18 = vshll.u32 %v12219_v46, 16 }
  0x8b   : > { %10311 = vmatprep.mubr.bf16.mxu1 %v12641_v55  ;;  %v2065_v55 = vor.u32 %v2064_v23, %v2063_v39  ;;  %v1566_v23 = vrot.slane %v1564_v44, 1 }
  0x8c   : > { %10248 = vmatmul.mubr.bf16.gmra.mrb[44].mxu0 %v12644_v19 }
  0x8d   : > { %10331 = vmatprep.mubr.bf16.mxu0 %v12530_v11  ;;  %v11408_v11 = vld [vmem:[%s15548_s1 + $0x108] sm:$0xff]   ;;  %v2066_v39 = vsel %vm997_vm1, %v12539_v15, %v2065_v55  ;;  %v2070_v2 = vsel %vm997_vm1, %v2065_v55, %v2069_v9  ;;  %v11410_v55 = vld [vmem:[%s15548_s1 + $0x118] sm:$0xff]  }
  0x92   : > { %10312 = vmatmul.mubr.bf16.gmra.mrb[44].mxu1 %v1221_v37  ;;  %v1554_v37 = vor.u32 %v1552_v5, %v1550_v53  ;;  %v11414_v5 = vld [vmem:[%s15548_s1 + $0x148] sm:$0xff]   ;;  %v285_v53 = vld [vmem:[%s11942_s22 + $0xf8] sm:$0xff] }
  0x93   : > { %10395 = vmatprep.mubr.bf16.mxu1 %v12562_v57  ;;  %v2072_v57 = vrot.slane %v1564_v44, 4 }
  0x94   : > { %10332 = vmatmul.mubr.bf16.vlgmr.msra.gmra.mrb[48].mxu0 %v12551_v40  ;;  %v2075_v40 = vrot.slane %v1576_v41, 3  ;;  %v12681_v15 = vsel %vm1523_vm2, %v1554_v37, %v1558_v63  ;;  %v11416_v63 = vld [vmem:[%s15548_s1 + $0x150] sm:$0xff]   ;;  %v12697_v37 = vsel %vm1523_vm2, %v1562_v27, %v1566_v23 }
  0x95   : > { %10444 = vmatpush3.bf16.msra.mxu0 %v12371_v42  ;;  %10335 = vmatprep.mubr.bf16.mxu0 %v1551_v24  ;;  %v284_v42 = vld [vmem:[%s11942_s22 + $0xf0] sm:$0xff]  ;;  %15872 = vst [vmem:[#allocation65_spill] sm:$0xff] %v12681_v15  ;;  %v2073_v44 = vor.u32 %v2072_v57, %v2071_v33  ;;  %v1580_v24 = vshll.u32 %v12207_v60, 16  ;;  %15874 = vst [vmem:[#allocation67_spill] sm:$0xff] %v12697_v37  ;;  %v1574_v57 = vrot.slane %v1572_v14, 1  ;;  %v2084_v60 = vrot.slane %v1588_v18, 4  ;;  %s15346_s22 = scalar_lea.vmem %s15552_s5, %s9451_s11 }
  0x96   : > { %10445 = vmatprep.subr.bf16.mxu0 %v11408_v11  ;;  %v12694_v33 = vsel %vm286_vm0, %v284_v42, 0.0  ;;  %v1570_v42 = vor.u32 %v1568_v12, %v1566_v23  ;;  %v11417_v12 = vld [vmem:[%s15548_s1 + $0x158] sm:$0xff]   ;;  %v1596_v23 = vshll.u32 %v12376_v35, 16 }
  0x97   : > { %15873 = vst [vmem:[#allocation66_spill] sm:$0xff] %v12694_v33  ;;  %v2080_v27 = vrot.slane %v1580_v24, 4  ;;  %v1578_v20 = vor.u32 %v1576_v41, %v1574_v57  ;;  %v1582_v14 = vrot.slane %v1580_v24, 1  ;;  %v1604_v24 = vshll.u32 %v12381_v13, 16 }
  0x99   : > { %10446 = vmatpush3.bf16.msra.mxu0 %v11408_v11  ;;  %v12701_v11 = vsel %vm286_vm0, %v285_v53, 0.0  ;;  %v15876_v53 = vshrl.u32 %v12219_v46, 16 }
  0x9a   : > { %10396 = vmatmul.mubr.bf16.vlgmr.msra.gmra.mrb[48].mxu1 %v2066_v39  ;;  %v2077_v39 = vor.u32 %v2076_v32, %v2075_v40  ;;  %10447 = vmatprep.subr.bf16.mxu0 %v11409_v1  ;;  %15875 = vst [vmem:[#allocation68_spill] sm:$0xff] %v12701_v11  ;;  %v9484_v10 = vpack.c.bf16 %v12701_v11, %v12701_v11  ;;  %v2079_v32 = vrot.slane %v1584_v17, 3  ;;  %v2088_v11 = vrot.slane %v1596_v23, 4 }
  0x9b   : > { %10399 = vmatprep.mubr.bf16.mxu1 %v2070_v2  ;;  %10508 = vmatpush3.bf16.msra.mxu1 %v12454_v61  ;;  %v9483_v2 = vpack.c.bf16 %v12694_v33, %v12694_v33  ;;  %v11411_v61 = vld [vmem:[%s15548_s1 + $0x120] sm:$0xff]   ;;  %v2074_v40 = vsel %vm997_vm1, %v2069_v9, %v2073_v44  ;;  %v2083_v33 = vrot.slane %v15876_v53, 3  ;;  %v11412_v53 = vld [vmem:[%s15548_s1 + $0x128] sm:$0xff]   ;;  %v1590_v9 = vrot.slane %v1588_v18, 1 }
  0x9c   : > { %10509 = vmatprep.subr.bf16.mxu1 %v11414_v5  ;;  %10336 = vmatmul.mubr.bf16.gmra.mrb[52].mxu0 %v12681_v15  ;;  %479 = vst [vmem:[#allocation2 + $0xd0] sm:$0xf] %v9484_v10  ;;  %v2078_v41 = vsel %vm997_vm1, %v2073_v44, %v2077_v39  ;;  %v12727_v10 = vsel %vm1523_vm2, %v1570_v42, %v1574_v57  ;;  %v15879_v57 = vshrl.u32 %v12376_v35, 16  ;;  %v1620_v18 = vshll.u32 %v12429_v6, 16 }
  0x9d   : > { %10339 = vmatprep.mubr.bf16.mxu0 %v12697_v37  ;;  %10448 = vmatpush3.bf16.msra.mxu0 %v11409_v1  ;;  %478 = vst [vmem:[#allocation2 + $0xcc] sm:$0xf] %v9483_v2  ;;  %15877 = vst [vmem:[#allocation69_spill] sm:$0xff] %v12727_v10  ;;  %v2081_v44 = vor.u32 %v2080_v27, %v2079_v32  ;;  %v12730_v2 = vsel %vm1523_vm2, %v1578_v20, %v1582_v14  ;;  %v1598_v37 = vrot.slane %v1596_v23, 1 }
  0x9e   : > { %10449 = vmatprep.subr.bf16.mxu0 %v11410_v55  ;;  %15878 = vst [vmem:[#allocation70_spill] sm:$0xff] %v12730_v2  ;;  %v2085_v1 = vor.u32 %v2084_v60, %v2083_v33  ;;  %v2087_v42 = vrot.slane %v15879_v57, 3  ;;  %v1612_v27 = vshll.u32 %v12423_v47, 16  ;;  %v15659_v20 = vshrl.u32 %v12423_v47, 16  ;;  %v11420_v57 = vld [vmem:[%s15548_s1 + $0x168] sm:$0xff]  }
  0x9f   : > { %10510 = vmatpush3.bf16.msra.mxu1 %v11414_v5  ;;  %v11418_v5 = vld [vmem:[%s15548_s1 + $0x160] sm:$0xff]   ;;  %v2092_v33 = vrot.slane %v1604_v24, 4  ;;  %v2082_v32 = vsel %vm997_vm1, %v2077_v39, %v2081_v44  ;;  %v12759_v15 = vrot.slane %v1620_v18, 1 }
  0xa0   : > { %10511 = vmatprep.subr.bf16.mxu1 %v11416_v63  ;;  %v2095_v39 = vrot.slane %v15659_v20, 3  ;;  %v2089_v23 = vor.u32 %v2088_v11, %v2087_v42 }
  0xa1   : > { %10450 = vmatpush3.bf16.msra.mxu0 %v11410_v55  ;;  %v1606_v55 = vrot.slane %v1604_v24, 1  ;;  %v2086_v24 = vsel %vm997_vm1, %v2081_v44, %v2085_v1  ;;  %v11419_v44 = vld [vmem:[%s15548_s1 + $0x138] sm:$0xff]  }
  0xa2   : > { %10400 = vmatmul.mubr.bf16.gmra.mrb[52].mxu1 %v2074_v40  ;;  %v1586_v40 = vor.u32 %v1584_v17, %v1582_v14  ;;  %10451 = vmatprep.subr.bf16.mxu0 %v11411_v61  ;;  %v15880_v17 = vshrl.u32 %v12381_v13, 16 }
  0xa3   : > { %10403 = vmatprep.mubr.bf16.mxu1 %v2078_v41  ;;  %10512 = vmatpush3.bf16.msra.mxu1 %v11416_v63  ;;  %v11415_v63 = vld [vmem:[%s15548_s1 + $0x130] sm:$0xff]   ;;  %v1628_v41 = vshll.u32 %v12468_v48, 16 }
  0xa4   : > { %10513 = vmatprep.subr.bf16.mxu1 %v11417_v12  ;;  %10340 = vmatmul.mubr.bf16.gmra.mrb[56].mxu0 %v12727_v10  ;;  %v2091_v60 = vrot.slane %v15880_v17, 3  ;;  %v15881_v17 = vshrl.u32 %v12219_v46, 16  ;;  %v1614_v10 = vrot.slane %v1612_v27, 1  ;;  %v2100_v46 = vrot.slane %v1620_v18, 4 }
  0xa5   : > { %10343 = vmatprep.mubr.bf16.mxu0 %v12730_v2  ;;  %10452 = vmatpush3.bf16.msra.mxu0 %v11411_v61  ;;  %v2096_v2 = vrot.slane %v1612_v27, 4  ;;  %v12762_v61 = vsel %vm1523_vm2, %v1586_v40, %v1590_v9  ;;  %v2104_v20 = vrot.slane %v1628_v41, 4  ;;  %v1636_v27 = vshll.u32 %v12475_v22, 16 }
  0xa6   : > { %v1594_v14 = vor.u32 %v15881_v17, %v1590_v9  ;;  %10453 = vmatprep.subr.bf16.mxu0 %v11412_v53  ;;  %15882 = vst [vmem:[#allocation71_spill] sm:$0xff] %v12762_v61  ;;  %v2093_v11 = vor.u32 %v2092_v33, %v2091_v60  ;;  %v15885_v40 = vshrl.u32 %v12468_v48, 16  ;;  %v2090_v18 = vsel %vm997_vm1, %v2085_v1, %v2089_v23 }
  0xa7   : > { %10514 = vmatpush3.bf16.msra.mxu1 %v11417_v12  ;;  %v15883_v12 = vshrl.u32 %v12429_v6, 16  ;;  %v15886_v60 = vshrl.u32 %v12376_v35, 16  ;;  %v1644_v1 = vshll.u32 %v12502_v52, 16 }
  0xa8   : > { %10515 = vmatprep.subr.bf16.mxu1 %v11418_v5  ;;  %v12774_v9 = vsel %vm1523_vm2, %v1594_v14, %v1598_v37  ;;  %v2103_v42 = vrot.slane %v15885_v40, 3  ;;  %v1638_v14 = vrot.slane %v1636_v27, 1  ;;  %v15887_v40 = vshrl.u32 %v12381_v13, 16 }
  0xa9   : > { %v2099_v17 = vrot.slane %v15883_v12, 3  ;;  %10454 = vmatpush3.bf16.msra.mxu0 %v11412_v53  ;;  %15884 = vst [vmem:[#allocation72_spill] sm:$0xff] %v12774_v9  ;;  %v12782_v53 = vld [vmem:[%s15548_s1 + $0x180] sm:$0xff]   ;;  %v1602_v33 = vor.u32 %v15886_v60, %v1598_v37  ;;  %v2094_v12 = vsel %vm997_vm1, %v2089_v23, %v2093_v11 }
  0xaa   : > { %10404 = vmatmul.mubr.bf16.gmra.mrb[56].mxu1 %v2082_v32  ;;  %v11424_v32 = vld [vmem:[%s15548_s1 + $0x170] sm:$0xff]   ;;  %10455 = vmatprep.subr.bf16.mxu0 %v11415_v63 }
  0xab   : > { %10407 = vmatprep.mubr.bf16.mxu1 %v2086_v24  ;;  %v1630_v24 = vrot.slane %v1628_v41, 1  ;;  %10516 = vmatpush3.bf16.msra.mxu1 %v11418_v5  ;;  %v1640_v41 = vshrl.u32 %v12475_v22, 16  ;;  %v11425_v5 = vld [vmem:[%s15548_s1 + $0x178] sm:$0xff]   ;;  %v12798_v37 = vsel %vm1523_vm2, %v1602_v33, %v1606_v55  ;;  %v2101_v23 = vor.u32 %v2100_v46, %v2099_v17 }
  0xac   : > { %10517 = vmatprep.subr.bf16.mxu1 %v11420_v57  ;;  %10344 = vmatmul.mubr.bf16.gmra.mrb[60].mxu0 %v12762_v61  ;;  %v1610_v61 = vor.u32 %v15887_v40, %v1606_v55  ;;  %15888 = vst [vmem:[#allocation73_spill] sm:$0xff] %v12798_v37  ;;  %v15890_v55 = vshrl.u32 %v12423_v47, 16  ;;  %v15891_v46 = vshrl.u32 %v12429_v6, 16  ;;  %v1652_v33 = vshll.u32 %v12512_v59, 16 }
  0xad   : > { %10347 = vmatprep.mubr.bf16.mxu0 %v12774_v9  ;;  %10456 = vmatpush3.bf16.msra.mxu0 %v11415_v63  ;;  %v1648_v9 = vshrl.u32 %v12502_v52, 16  ;;  %v2097_v63 = vor.u32 %v2096_v2, %v2095_v39  ;;  %v2107_v40 = vrot.slane %v1640_v41, 3  ;;  %v2112_v39 = vrot.slane %v1644_v1, 4 }
  0xae   : > { %10457 = vmatprep.subr.bf16.mxu0 %v11419_v44  ;;  %v12801_v60 = vsel %vm1523_vm2, %v1610_v61, %v1614_v10  ;;  %v1618_v2 = vor.u32 %v15890_v55, %v1614_v10  ;;  %v1626_v17 = vor.u32 %v15891_v46, %v12759_v15  ;;  %v1642_v46 = vor.u32 %v1640_v41, %v1638_v14 }
  0xaf   : > { %10518 = vmatpush3.bf16.msra.mxu1 %v11420_v57  ;;  %15889 = vst [vmem:[#allocation74_spill] sm:$0xff] %v12801_v60  ;;  %v2108_v57 = vrot.slane %v1636_v27, 4  ;;  %v2102_v61 = vsel %vm997_vm1, %v2097_v63, %v2101_v23  ;;  %v1656_v27 = vshrl.u32 %v12512_v59, 16 }
  0xb0   : > { %10519 = vmatprep.subr.bf16.mxu1 %v11424_v32  ;;  %v12822_v10 = vsel %vm1523_vm2, %v1618_v2, %v12759_v15  ;;  %v15894_v15 = vshrl.u32 %v12468_v48, 16 }
  0xb1   : > { %10458 = vmatpush3.bf16.msra.mxu0 %v11419_v44  ;;  %v1646_v44 = vrot.slane %v1644_v1, 1  ;;  %15892 = vst [vmem:[#allocation75_spill] sm:$0xff] %v12822_v10  ;;  %v12825_v1 = vsel %vm1523_vm2, %v1626_v17, %v1630_v24 }
  0xb2   : > { %10408 = vmatmul.mubr.bf16.gmra.mrb[60].mxu1 %v2090_v18  ;;  %10571 = vmatprep.subr.bf16.mxu0 %v12782_v53  ;;  %v2098_v18 = vsel %vm997_vm1, %v2093_v11, %v2097_v63  ;;  %v12818_v11 = vld [vmem:[%s15548_s1 + $0x1c0] sm:$0xff]   ;;  %15893 = vst [vmem:[#allocation76_spill] sm:$0xff] %v12825_v1  ;;  %v1654_v63 = vrot.slane %v1652_v33, 1  ;;  %v1634_v2 = vor.u32 %v15894_v15, %v1630_v24 }
  0xb3   : > { %10411 = vmatprep.mubr.bf16.mxu1 %v2094_v12  ;;  %10520 = vmatpush3.bf16.msra.mxu1 %v11424_v32  ;;  %v2111_v32 = vrot.slane %v1648_v9, 3  ;;  %v2105_v12 = vor.u32 %v2104_v20, %v2103_v42  ;;  %v2116_v20 = vrot.slane %v1652_v33, 4  ;;  %v12842_v24 = vsel %vm1523_vm2, %v1642_v46, %v1646_v44 }
  0xb4   : > { %10521 = vmatprep.subr.bf16.mxu1 %v11425_v5  ;;  %10348 = vmatmul.mubr.bf16.gmra.mrb[64].mxu0 %v12798_v37  ;;  %15896 = vst [vmem:[#allocation78_spill] sm:$0xff] %v12842_v24 }
  0xb5   : > { %10351 = vmatprep.mubr.bf16.mxu0 %v12801_v60  ;;  %v2106_v55 = vsel %vm997_vm1, %v2101_v23, %v2105_v12  ;;  %v12839_v23 = vsel %vm1523_vm2, %v1634_v2, %v1638_v14  ;;  %v1658_v2 = vor.u32 %v1656_v27, %v1654_v63 }
  0xb6   : > { %15895 = vst [vmem:[#allocation77_spill] sm:$0xff] %v12839_v23 }
  0xb7   : > { %10522 = vmatpush3.bf16.msra.mxu1 %v11425_v5  ;;  %v2109_v5 = vor.u32 %v2108_v57, %v2107_v40  ;;  %v1664_v40 = vshrl.u32 %v12567_v31, 16  ;;  %v1668_v57 = vshll.u32 %v12573_v29, 16 }
  0xb8   : > { %10635 = vmatprep.subr.bf16.mxu1 %v12818_v11 }
  0xb9   : > { %v2110_v42 = vsel %vm997_vm1, %v2105_v12, %v2109_v5  ;;  %v2119_v41 = vrot.slane %v1664_v40, 3  ;;  %v2124_v37 = vrot.slane %v1668_v57, 4 }
  0xba   : > { %10412 = vmatmul.mubr.bf16.gmra.mrb[64].mxu1 %v2098_v18  ;;  %v1660_v18 = vshll.u32 %v12567_v31, 16 }
  0xbb   : > { %10415 = vmatprep.mubr.bf16.mxu1 %v2102_v61  ;;  %v2115_v61 = vrot.slane %v1656_v27, 3 }
  0xbc   : > { %10352 = vmatmul.mubr.bf16.gmra.mrb[68].mxu0 %v12822_v10  ;;  %v2120_v17 = vrot.slane %v1660_v18, 4  ;;  %v1672_v10 = vshrl.u32 %v12573_v29, 16  ;;  %v1662_v12 = vrot.slane %v1660_v18, 1 }
  0xbd   : > { %10355 = vmatprep.mubr.bf16.mxu0 %v12825_v1  ;;  %v2113_v1 = vor.u32 %v2112_v39, %v2111_v32  ;;  %v2117_v33 = vor.u32 %v2116_v20, %v2115_v61  ;;  %v1676_v39 = vshll.u32 %v12599_v28, 16  ;;  %v1680_v32 = vshrl.u32 %v12599_v28, 16 }
  0xbe   : > { %v2123_v60 = vrot.slane %v1672_v10, 3  ;;  %v1684_v61 = vshll.u32 %v12603_v51, 16  ;;  %v1688_v20 = vshrl.u32 %v12603_v51, 16  ;;  %v1666_v27 = vor.u32 %v1664_v40, %v1662_v12 }
  0xbf   : > { %v2114_v15 = vsel %vm997_vm1, %v2109_v5, %v2113_v1  ;;  %v2118_v14 = vsel %vm997_vm1, %v2113_v1, %v2117_v33  ;;  %v2121_v5 = vor.u32 %v2120_v17, %v2119_v41  ;;  %v1696_v40 = vshrl.u32 %v12627_v7, 16 }
  0xc0   : > { %v2125_v1 = vor.u32 %v2124_v37, %v2123_v60 }
  0xc2   : > { %10416 = vmatmul.mubr.bf16.gmra.mrb[68].mxu1 %v2106_v55  ;;  %v1650_v55 = vor.u32 %v1648_v9, %v1646_v44  ;;  %v12856_v9 = vsel %vm1523_vm2, %v1658_v2, %v1662_v12  ;;  %v1670_v44 = vrot.slane %v1668_v57, 1  ;;  %v2126_v17 = vsel %vm997_vm1, %v2121_v5, %v2125_v1  ;;  %v12872_v2 = vld [vmem:[#allocation2 + $0xcc] sm:$0xf] }
  0xc3   : > { %10419 = vmatprep.mubr.bf16.mxu1 %v2110_v42  ;;  %15898 = vst [vmem:[#allocation80_spill] sm:$0xff] %v12856_v9  ;;  %v2128_v42 = vrot.slane %v1676_v39, 4  ;;  %v1686_v57 = vrot.slane %v1684_v61, 1  ;;  %v1700_v12 = vshll.u32 %v12630_v49, 16 }
  0xc4   : > { %10356 = vmatmul.mubr.bf16.gmra.mrb[72].mxu0 %v12839_v23  ;;  %v12853_v18 = vsel %vm1523_vm2, %v1650_v55, %v1654_v63  ;;  %v1674_v46 = vor.u32 %v1672_v10, %v1670_v44  ;;  %v2127_v23 = vrot.slane %v1680_v32, 3  ;;  %v2131_v63 = vrot.slane %v1688_v20, 3 }
  0xc5   : > { %10359 = vmatprep.mubr.bf16.mxu0 %v12842_v24  ;;  %15897 = vst [vmem:[#allocation79_spill] sm:$0xff] %v12853_v18  ;;  %v2122_v24 = vsel %vm997_vm1, %v2117_v33, %v2121_v5  ;;  %v2132_v55 = vrot.slane %v1684_v61, 4  ;;  %v12863_v41 = vsel %vm1523_vm2, %v1666_v27, %v1670_v44  ;;  %v1692_v10 = vshll.u32 %v12627_v7, 16 }
  0xc6   : > { %15899 = vst [vmem:[#allocation81_spill] sm:$0xff] %v12863_v41  ;;  %v2129_v37 = vor.u32 %v2128_v42, %v2127_v23  ;;  %v2135_v44 = vrot.slane %v1696_v40, 3 }
  0xc7   : > { %v2133_v33 = vor.u32 %v2132_v55, %v2131_v63  ;;  %v2136_v27 = vrot.slane %v1692_v10, 4  ;;  %v1694_v61 = vrot.slane %v1692_v10, 1  ;;  %v2140_v63 = vrot.slane %v1700_v12, 4 }
  0xc8   : > { %v2130_v5 = vsel %vm997_vm1, %v2125_v1, %v2129_v37  ;;  %v1702_v1 = vrot.slane %v1700_v12, 1 }
  0xc9   : > { %v2134_v42 = vsel %vm997_vm1, %v2129_v37, %v2133_v33 }
  0xca   : > { %10420 = vmatmul.mubr.bf16.gmra.mrb[72].mxu1 %v2114_v15  ;;  %v1678_v15 = vrot.slane %v1676_v39, 1  ;;  %v1690_v39 = vor.u32 %v1688_v20, %v1686_v57  ;;  %v2137_v20 = vor.u32 %v2136_v27, %v2135_v44 }
  0xcb   : > { %10423 = vmatprep.mubr.bf16.mxu1 %v2118_v14  ;;  %v1704_v14 = vshrl.u32 %v12630_v49, 16 }
  0xcc   : > { %10360 = vmatmul.mubr.bf16.gmra.mrb[76].mxu0 %v12853_v18  ;;  %v12866_v60 = vsel %vm1523_vm2, %v1674_v46, %v1678_v15  ;;  %v1682_v23 = vor.u32 %v1680_v32, %v1678_v15  ;;  %v1712_v15 = vshrl.u32 %v12644_v19, 16  ;;  %v12890_v10 = vsel %vm1523_vm2, %v1690_v39, %v1694_v61 }
  0xcd   : > { %10363 = vmatprep.mubr.bf16.mxu0 %v12856_v9  ;;  %15900 = vst [vmem:[#allocation82_spill] sm:$0xff] %v12866_v60  ;;  %v2139_v46 = vrot.slane %v1704_v14, 3  ;;  %15903 = vst [vmem:[#allocation85_spill] sm:$0xff] %v12890_v10  ;;  %v12894_v9 = vld [vmem:[#allocation2 + $0xd4] sm:$0xf]  ;;  %v2138_v44 = vsel %vm997_vm1, %v2133_v33, %v2137_v20  ;;  %v8928_v39 = vcombine.low %v12872_v2, %v12872_v2 }
  0xce   : > { %v12886_v32 = vsel %vm1523_vm2, %v1682_v23, %v1686_v57  ;;  %v1706_v23 = vor.u32 %v1704_v14, %v1702_v1  ;;  %v2143_v12 = vrot.slane %v1712_v15, 3  ;;  %v8954_v27 = vcombine.low %v12894_v9, %v12894_v9 }
  0xcf   : > { %15902 = vst [vmem:[#allocation84_spill] sm:$0xff] %v12886_v32  ;;  %v2141_v37 = vor.u32 %v2140_v63, %v2139_v46 }
  0xd2   : > { %10424 = vmatmul.mubr.bf16.gmra.mrb[76].mxu1 %v2122_v24  ;;  %v12874_v24 = vld [vmem:[#allocation2 + $0xd0] sm:$0xf] }
  0xd3   : > { %10427 = vmatprep.mubr.bf16.mxu1 %v2126_v17  ;;  %v12882_v55 = vcombine.low %v12872_v2, %v12874_v24  ;;  %v1708_v17 = vshll.u32 %v12644_v19, 16 }
  0xd4   : > { %10364 = vmatmul.mubr.bf16.gmra.mrb[80].mxu0 %v12863_v41 }
  0xd5   : > { %10367 = vmatprep.mubr.bf16.mxu0 %v12866_v60  ;;  %15901 = vst [vmem:[#allocation83_spill] sm:$0xff] %v12882_v55  ;;  %v15674_v60 = vshrl.u32 %v12882_v55, 16  ;;  %v15675_v41 = vshll.u32 %v12882_v55, 16  ;;  %v2144_v57 = vrot.slane %v1708_v17, 4  ;;  %v1710_v46 = vrot.slane %v1708_v17, 1 }
  0xd7   : > { %v2150_v63 = vrot.slane %v15674_v60, 3  ;;  %v2145_v14 = vor.u32 %v2144_v57, %v2143_v12  ;;  %v12912_v18 = vsel %vm1523_vm2, %v1706_v23, %v1710_v46  ;;  %v12915_v17 = vor.u32 %v1712_v15, %v1710_v46 }
  0xd8   : > { %15905 = vst [vmem:[#allocation87_spill] sm:$0xff] %v12912_v18  ;;  %v15907_v12 = vshll.u32 %v12038_v8, 16  ;;  %v15908_v15 = vshrl.u32 %v12038_v8, 16 }
  0xd9   : > { %15906 = vst [vmem:[#allocation88_spill] sm:$0xff] %v12915_v17  ;;  %v2146_v60 = vsel %vm997_vm1, %v2141_v37, %v2145_v14 }
  0xda   : > { %10428 = vmatmul.mubr.bf16.gmra.mrb[80].mxu1 %v2130_v5  ;;  %v1698_v5 = vor.u32 %v1696_v40, %v1694_v61  ;;  %v2153_v40 = vrot.slane %v15675_v41, 4  ;;  %v1716_v61 = vshll.u32 %v8928_v39, 16  ;;  %v2830_v39 = vrot.slane %v15907_v12, 1  ;;  %v11428_v12 = vld [vmem:[%s15548_s1 + $0x190] sm:$0xff]   ;;  %v13147_v41 = vld [vmem:[#allocation2 + $0xd8] sm:$0xf] }
  0xdb   : > { %10431 = vmatprep.mubr.bf16.mxu1 %v2134_v42  ;;  %v2142_v42 = vsel %vm997_vm1, %v2137_v20, %v2141_v37  ;;  %v15909_v37 = vshll.u32 %v12054_v21, 16 }
  0xdc   : > { %10368 = vmatmul.mubr.bf16.gmra.mrb[84].mxu0 %v12886_v32  ;;  %v12909_v33 = vsel %vm1523_vm2, %v1698_v5, %v1702_v1  ;;  %v2160_v32 = vshll.u32 %v8954_v27, 16  ;;  %v2154_v20 = vor.u32 %v2153_v40, %v2150_v63  ;;  %v15911_v40 = vshrl.u32 %v12054_v21, 16 }
  0xdd   : > { %10371 = vmatprep.mubr.bf16.mxu0 %v12890_v10  ;;  %15904 = vst [vmem:[#allocation86_spill] sm:$0xff] %v12909_v33  ;;  %v2157_v10 = vshrl.u32 %v8954_v27, 16  ;;  %v2832_v46 = vrot.slane %v15909_v37, 1 }
  0xde   : > { %v2162_v5 = vrot.slane %v2160_v32, 4  ;;  %v2155_v57 = vsel %vm997_vm1, %v2145_v14, %v2154_v20 }
  0xdf   : > { %v2159_v1 = vrot.slane %v2157_v10, 3  ;;  %v2834_v14 = vor.u32 %v2832_v46, %v15911_v40 }
  0xe1   : > { %v2163_v27 = vor.u32 %v2162_v5, %v2159_v1  ;;  %v15913_v1 = vshll.u32 %v12096_v50, 16 }
  0xe2   : > { %10432 = vmatmul.mubr.bf16.gmra.mrb[84].mxu1 %v2138_v44  ;;  %v1718_v44 = vrot.slane %v1716_v61, 1  ;;  %v15912_v61 = vshrl.u32 %v12060_v16, 16 }
  0xe3   : > { %10435 = vmatprep.mubr.bf16.mxu1 %v2142_v42  ;;  %v2831_v42 = vor.u32 %v2830_v39, %v15908_v15  ;;  %v2164_v32 = vsel %vm997_vm1, %v2154_v20, %v2163_v27  ;;  %v2838_v5 = vrot.slane %v15913_v1, 1  ;;  %v11433_v39 = vld [vmem:[%s15548_s1 + $0x1c8] sm:$0xff]   ;;  %v15921_v1 = vshll.u32 %v12143_v38, 16 }
  0xe4   : > { %10372 = vmatmul.mubr.bf16.gmra.mrb[88].mxu0 %v12909_v33  ;;  %v1719_v23 = vsel %vm1523_vm2, %v12915_v17, %v1718_v44 }
  0xe5   : > { %10375 = vmatprep.mubr.bf16.mxu0 %v12912_v18  ;;  %v2833_v10 = vsel %vm1523_vm2, %v2831_v42, %v2832_v46  ;;  %v15917_v42 = vshll.u32 %v12116_v62, 16  ;;  %v11429_v46 = vld [vmem:[%s15548_s1 + $0x198] sm:$0xff]  }
  0xe7   : > { %v2844_v37 = vrot.slane %v15917_v42, 1 }
  0xea   : > { %10436 = vmatmul.mubr.bf16.gmra.mrb[88].mxu1 %v2146_v60  ;;  %v15910_v60 = vshll.u32 %v12060_v16, 16 }
  0xeb   : > { %10439 = vmatprep.mubr.bf16.mxu1 %v2155_v57 }
  0xec   : > { %10376 = vmatmul.mubr.bf16.gmra.mrb[92].mxu0 %v1719_v23  ;;  %v2835_v63 = vrot.slane %v15910_v60, 1 }
  0xed   : > { %10459 = vmatprep.mubr.bf16.mxu0 %v12038_v8  ;;  %v11427_v8 = vld [vmem:[%s15548_s1 + $0x188] sm:$0xff]  }
  0xee   : > { %v2837_v44 = vor.u32 %v2835_v63, %v15912_v61  ;;  %v2836_v20 = vsel %vm1523_vm2, %v2834_v14, %v2835_v63  ;;  %v11430_v63 = vld [vmem:[%s15548_s1 + $0x1a0] sm:$0xff]   ;;  %v15920_v61 = vshrl.u32 %v12135_v25, 16 }
  0xf0   : > { %v2839_v57 = vsel %vm1523_vm2, %v2837_v44, %v2838_v5 }
  0xf2   : > { %10440 = vmatmul.mubr.bf16.gmra.mrb[92].mxu1 %v2164_v32  ;;  %v11435_v32 = vld [vmem:[%s15548_s1 + $0x1d0] sm:$0xff]  }
  0xf3   : > { %10523 = vmatprep.mubr.bf16.mxu1 %v2833_v10 }
  0xf4   : > { %10460 = vmatmul.mubr.bf16.vlgmr.msra.gmra.mrb[96].mxu0 %v12054_v21  ;;  %v15914_v21 = vshll.u32 %v12107_v56, 16 }
  0xf5   : > { %10572 = vmatpush3.bf16.msra.mxu0 %v12782_v53  ;;  %10463 = vmatprep.mubr.bf16.mxu0 %v12060_v16  ;;  %v15915_v53 = vshrl.u32 %v12096_v50, 16  ;;  %v15916_v16 = vshrl.u32 %v12107_v56, 16 }
  0xf6   : > { %10573 = vmatprep.subr.bf16.mxu0 %v11427_v8  ;;  %v2841_v23 = vrot.slane %v15914_v21, 1 }
  0xf7   : > { %v2840_v27 = vor.u32 %v2838_v5, %v15915_v53  ;;  %v2850_v5 = vrot.slane %v15921_v1, 1  ;;  %v15922_v53 = vshll.u32 %v12183_v34, 16 }
  0xf8   : > { %v2843_v15 = vor.u32 %v2841_v23, %v15916_v16  ;;  %v15923_v16 = vshrl.u32 %v12143_v38, 16 }
  0xf9   : > { %10574 = vmatpush3.bf16.msra.mxu0 %v11427_v8  ;;  %v2842_v10 = vsel %vm1523_vm2, %v2840_v27, %v2841_v23  ;;  %v11431_v8 = vld [vmem:[%s15548_s1 + $0x1a8] sm:$0xff]  }
  0xfa   : > { %10524 = vmatmul.mubr.bf16.vlgmr.msra.gmra.mrb[96].mxu1 %v2836_v20  ;;  %10575 = vmatprep.subr.bf16.mxu0 %v11428_v12  ;;  %v2845_v60 = vsel %vm1523_vm2, %v2843_v15, %v2844_v37  ;;  %v11437_v20 = vld [vmem:[%s15548_s1 + $0x1e0] sm:$0xff]   ;;  %v11439_v23 = vld [vmem:[%s15548_s1 + $0x1e8] sm:$0xff]   ;;  %v2852_v15 = vor.u32 %v2850_v5, %v15923_v16 }
  0xfb   : > { %10527 = vmatprep.mubr.bf16.mxu1 %v2839_v57  ;;  %10636 = vmatpush3.bf16.msra.mxu1 %v12818_v11  ;;  %v11436_v11 = vld [vmem:[%s15548_s1 + $0x1d8] sm:$0xff]  }
  0xfc   : > { %10637 = vmatprep.subr.bf16.mxu1 %v11433_v39  ;;  %10464 = vmatmul.mubr.bf16.gmra.mrb[100].mxu0 %v12096_v50  ;;  %v15918_v50 = vshll.u32 %v12135_v25, 16 }
  0xfd   : > { %10467 = vmatprep.mubr.bf16.mxu0 %v12107_v56  ;;  %10576 = vmatpush3.bf16.msra.mxu0 %v11428_v12  ;;  %v15919_v56 = vshrl.u32 %v12116_v62, 16 }
  0xfe   : > { %10577 = vmatprep.subr.bf16.mxu0 %v11429_v46  ;;  %v2847_v40 = vrot.slane %v15918_v50, 1 }
  0xff   : > { %10638 = vmatpush3.bf16.msra.mxu1 %v11433_v39  ;;  %v2846_v14 = vor.u32 %v2844_v37, %v15919_v56  ;;  %v11434_v39 = vld [vmem:[%s15548_s1 + $0x1b0] sm:$0xff]   ;;  %v15924_v37 = vshrl.u32 %v12183_v34, 16 }
 0x100   : > { %10639 = vmatprep.subr.bf16.mxu1 %v11435_v32  ;;  %v2849_v44 = vor.u32 %v2847_v40, %v15920_v61 }
 0x101   : > { %10578 = vmatpush3.bf16.msra.mxu0 %v11429_v46  ;;  %v2848_v57 = vsel %vm1523_vm2, %v2846_v14, %v2847_v40 }
 0x102   : > { %10528 = vmatmul.mubr.bf16.gmra.mrb[100].mxu1 %v2842_v10  ;;  %10579 = vmatprep.subr.bf16.mxu0 %v11430_v63  ;;  %v2851_v12 = vsel %vm1523_vm2, %v2849_v44, %v2850_v5  ;;  %v13027_v5 = vld [vmem:[%s15548_s1 + $0x200] sm:$0xff]  }
 0x103   : > { %10531 = vmatprep.mubr.bf16.mxu1 %v2845_v60  ;;  %10640 = vmatpush3.bf16.msra.mxu1 %v11435_v32  ;;  %v15925_v32 = vshll.u32 %v12196_v26, 16  ;;  %v11438_v60 = vld [vmem:[%s15548_s1 + $0x1b8] sm:$0xff]  }
 0x104   : > { %10641 = vmatprep.subr.bf16.mxu1 %v11436_v11  ;;  %10468 = vmatmul.mubr.bf16.gmra.mrb[104].mxu0 %v12116_v62 }
 0x105   : > { %10471 = vmatprep.mubr.bf16.mxu0 %v12135_v25  ;;  %10580 = vmatpush3.bf16.msra.mxu0 %v11430_v63  ;;  %v2853_v25 = vrot.slane %v15922_v53, 1  ;;  %v2856_v10 = vrot.slane %v15925_v32, 1  ;;  %v15928_v53 = vshrl.u32 %v12347_v36, 16 }
 0x106   : > { %10581 = vmatprep.subr.bf16.mxu0 %v11431_v8  ;;  %v10205_v21 = vpop.f32.mrb[0].mxu0 }
 0x107   : > { %10642 = vmatpush3.bf16.msra.mxu1 %v11436_v11  ;;  %v795_v62 = vpop.f32.mrb[1].mxu0  ;;  %v2855_v46 = vor.u32 %v2853_v25, %v15924_v37  ;;  %v11442_v11 = vld [vmem:[%s15548_s1 + $0x1f0] sm:$0xff]   ;;  %v2854_v14 = vsel %vm1523_vm2, %v2852_v15, %v2853_v25  ;;  %v15927_v21 = vshrl.u32 %v12196_v26, 16 }
 0x108   : > { %10643 = vmatprep.subr.bf16.mxu1 %v11437_v20  ;;  %v10206_v27 = vpop.f32.mrb[2].mxu0 }
 0x109   : > { %10582 = vmatpush3.bf16.msra.mxu0 %v11431_v8  ;;  %v798_v42 = vpop.f32.mrb[3].mxu0  ;;  %v2857_v1 = vsel %vm1523_vm2, %v2855_v46, %v2856_v10 }
 0x10a   : > { %10532 = vmatmul.mubr.bf16.gmra.mrb[104].mxu1 %v2848_v57  ;;  %10583 = vmatprep.subr.bf16.mxu0 %v11434_v39  ;;  %v15926_v57 = vshll.u32 %v12347_v36, 16 }
 0x10b   : > { %10535 = vmatprep.mubr.bf16.mxu1 %v2851_v12  ;;  %10644 = vmatpush3.bf16.msra.mxu1 %v11437_v20 }
 0x10c   : > { %10645 = vmatprep.subr.bf16.mxu1 %v11439_v23  ;;  %10472 = vmatmul.mubr.bf16.gmra.mrb[108].mxu0 %v12143_v38  ;;  %v2859_v12 = vrot.slane %v15926_v57, 1 }
 0x10d   : > { %v10269_v63 = vpop.f32.mrb[0].mxu1  ;;  %10475 = vmatprep.mubr.bf16.mxu0 %v12183_v34  ;;  %10584 = vmatpush3.bf16.msra.mxu0 %v11434_v39  ;;  %v11443_v34 = vld [vmem:[%s15548_s1 + $0x1f8] sm:$0xff]  }
 0x10e   : > { %v1328_v50 = vpop.f32.mrb[1].mxu1  ;;  %10585 = vmatprep.subr.bf16.mxu0 %v11438_v60  ;;  %v10209_v8 = vpop.f32.mrb[4].mxu0  ;;  %v2861_v25 = vor.u32 %v2859_v12, %v15928_v53 }
 0x10f   : > { %v13017_v40 = vadd.f32 %v1328_v50, %v795_v62  ;;  %v10270_v56 = vpop.f32.mrb[2].mxu1  ;;  %10646 = vmatpush3.bf16.msra.mxu1 %v11439_v23  ;;  %v810_v20 = vpop.f32.mrb[5].mxu0  ;;  %v2858_v23 = vor.u32 %v2856_v10, %v15927_v21 }
 0x110   : > { %v13021_v61 = vadd.f32 %v10270_v56, %v10206_v27  ;;  %v1331_v44 = vpop.f32.mrb[3].mxu1  ;;  %10647 = vmatprep.subr.bf16.mxu1 %v11442_v11  ;;  %v10210_v39 = vpop.f32.mrb[6].mxu0  ;;  %v15929_v27 = vshll.u32 %v12363_v0, 16 }
 0x111   : > { %v13029_v38 = vadd.f32 %v1331_v44, %v798_v42  ;;  %10586 = vmatpush3.bf16.msra.mxu0 %v11438_v60  ;;  %v813_v62 = vpop.f32.mrb[7].mxu0  ;;  %v2860_v10 = vsel %vm1523_vm2, %v2858_v23, %v2859_v12  ;;  %v15933_v12 = vld [vmem:[#allocation43_spill] sm:$0xff] }
 0x112   : > { %10536 = vmatmul.mubr.bf16.gmra.mrb[108].mxu1 %v2854_v14  ;;  %v2862_v16 = vrot.slane %v15929_v27, 1  ;;  %10699 = vmatprep.subr.bf16.mxu0 %v13027_v5  ;;  %v15930_v14 = vshll.u32 %v12394_v4, 16 }
 0x113   : > { %10539 = vmatprep.mubr.bf16.mxu1 %v2857_v1  ;;  %10648 = vmatpush3.bf16.msra.mxu1 %v11442_v11  ;;  %v15931_v1 = vshrl.u32 %v12363_v0, 16 }
 0x114   : > { %10649 = vmatprep.subr.bf16.mxu1 %v11443_v34  ;;  %10476 = vmatmul.mubr.bf16.gmra.mrb[112].mxu0 %v12196_v26  ;;  %v2863_v11 = vsel %vm1523_vm2, %v2861_v25, %v2862_v16  ;;  %v2865_v44 = vrot.slane %v15930_v14, 1 }
 0x115   : > { %v10273_v15 = vpop.f32.mrb[4].mxu1  ;;  %10479 = vmatprep.mubr.bf16.mxu0 %v12347_v36  ;;  %v15932_v36 = vshrl.u32 %v12394_v4, 16 }
 0x116   : > { %v13043_v42 = vadd.f32 %v10273_v15, %v10209_v8  ;;  %v1343_v37 = vpop.f32.mrb[5].mxu1  ;;  %v10213_v50 = vpop.f32.mrb[8].mxu0  ;;  %v2864_v8 = vor.u32 %v2862_v16, %v15931_v1 }
 0x117   : > { %v13046_v46 = vadd.f32 %v1343_v37, %v810_v20  ;;  %v10274_v32 = vpop.f32.mrb[6].mxu1  ;;  %10650 = vmatpush3.bf16.msra.mxu1 %v11443_v34  ;;  %v825_v56 = vpop.f32.mrb[9].mxu0  ;;  %v2867_v57 = vor.u32 %v2865_v44, %v15932_v36 }
 0x118   : > { %v13050_v60 = vadd.f32 %v10274_v32, %v10210_v39  ;;  %v1346_v63 = vpop.f32.mrb[7].mxu1  ;;  %v10214_v26 = vpop.f32.mrb[10].mxu0  ;;  %v15934_v39 = vshll.u32 %v15933_v12, 16  ;;  %v2866_v25 = vsel %vm1523_vm2, %v2864_v8, %v2865_v44 }
 0x119   : > { %v827_v20 = vpop.f32.mrb[11].mxu0  ;;  %v15939_v26 = vld [vmem:[#allocation48_spill] sm:$0xff] }
 0x11a   : > { %10540 = vmatmul.mubr.bf16.gmra.mrb[112].mxu1 %v2860_v10  ;;  %v2868_v21 = vrot.slane %v15934_v39, 1  ;;  %v15935_v10 = vld [vmem:[#allocation45_spill] sm:$0xff]  ;;  %v15940_v1 = vshll.u32 %v15939_v26, 16 }
 0x11b   : > { %10543 = vmatprep.mubr.bf16.mxu1 %v2863_v11  ;;  %v15936_v63 = vshll.u32 %v15935_v10, 16  ;;  %v15938_v44 = vshrl.u32 %v15935_v10, 16 }
 0x11c   : > { %10480 = vmatmul.mubr.bf16.gmra.mrb[116].mxu0 %v12363_v0  ;;  %v2869_v16 = vsel %vm1523_vm2, %v2867_v57, %v2868_v21  ;;  %v15937_v0 = vshrl.u32 %v15933_v12, 16  ;;  %v2874_v8 = vrot.slane %v15940_v1, 1 }
 0x11d   : > { %v10277_v23 = vpop.f32.mrb[8].mxu1  ;;  %10483 = vmatprep.mubr.bf16.mxu0 %v12394_v4  ;;  %v2871_v11 = vrot.slane %v15936_v63, 1 }
 0x11e   : > { %v13061_v34 = vadd.f32 %v10277_v23, %v10213_v50  ;;  %v1358_v62 = vpop.f32.mrb[9].mxu1  ;;  %v10217_v37 = vpop.f32.mrb[12].mxu0  ;;  %v2870_v56 = vor.u32 %v2868_v21, %v15937_v0  ;;  %v15943_v0 = vshrl.u32 %v15939_v26, 16 }
 0x11f   : > { %v10278_v53 = vpop.f32.mrb[10].mxu1  ;;  %v839_v32 = vpop.f32.mrb[13].mxu0  ;;  %v2873_v4 = vor.u32 %v2871_v11, %v15938_v44  ;;  %v15941_v37 = vld [vmem:[#allocation49_spill] sm:$0xff]  ;;  %v15945_v44 = vld [vmem:[#allocation52_spill] sm:$0xff] }
 0x120   : > { %v1360_v27 = vpop.f32.mrb[11].mxu1  ;;  %v10218_v50 = vpop.f32.mrb[14].mxu0  ;;  %v2872_v23 = vsel %vm1523_vm2, %v2870_v56, %v2871_v11  ;;  %v15942_v63 = vshll.u32 %v15941_v37, 16  ;;  %v2876_v11 = vor.u32 %v2874_v8, %v15943_v0  ;;  %v15946_v1 = vshll.u32 %v15945_v44, 16 }
 0x121   : > { %v13067_v15 = vadd.f32 %v1360_v27, %v827_v20  ;;  %v842_v14 = vpop.f32.mrb[15].mxu0  ;;  %v2875_v53 = vsel %vm1523_vm2, %v2873_v4, %v2874_v8 }
 0x122   : > { %10544 = vmatmul.mubr.bf16.gmra.mrb[116].mxu1 %v2866_v25  ;;  %v2880_v4 = vrot.slane %v15946_v1, 1 }
 0x123   : > { %10547 = vmatprep.mubr.bf16.mxu1 %v2869_v16 }
 0x124   : > { %10484 = vmatmul.mubr.bf16.gmra.mrb[120].mxu0 %v15933_v12  ;;  %v2877_v12 = vrot.slane %v15942_v63, 1 }
 0x125   : > { %v10281_v20 = vpop.f32.mrb[12].mxu1  ;;  %10487 = vmatprep.mubr.bf16.mxu0 %v15935_v10  ;;  %v15944_v10 = vshrl.u32 %v15941_v37, 16 }
 0x126   : > { %v1372_v36 = vpop.f32.mrb[13].mxu1 }
 0x127   : > { %v13078_v57 = vadd.f32 %v1372_v36, %v839_v32  ;;  %v10282_v39 = vpop.f32.mrb[14].mxu1  ;;  %v10221_v27 = vpop.f32.mrb[16].mxu0 }
 0x128   : > { %v13082_v62 = vadd.f32 %v10282_v39, %v10218_v50  ;;  %v1375_v21 = vpop.f32.mrb[15].mxu1  ;;  %v854_v16 = vpop.f32.mrb[17].mxu0  ;;  %v2879_v50 = vor.u32 %v2877_v12, %v15944_v10 }
 0x129   : > { %v13085_v25 = vadd.f32 %v1375_v21, %v842_v14  ;;  %v10222_v32 = vpop.f32.mrb[18].mxu0  ;;  %v2878_v21 = vsel %vm1523_vm2, %v2876_v11, %v2877_v12 }
 0x12a   : > { %10548 = vmatmul.mubr.bf16.gmra.mrb[120].mxu1 %v2872_v23  ;;  %v857_v56 = vpop.f32.mrb[19].mxu0  ;;  %v2881_v63 = vsel %vm1523_vm2, %v2879_v50, %v2880_v4 }
 0x12b   : > { %10551 = vmatprep.mubr.bf16.mxu1 %v2875_v53 }
 0x12c   : > { %10488 = vmatmul.mubr.bf16.gmra.mrb[124].mxu0 %v15939_v26  ;;  %v15949_v26 = vshrl.u32 %v15945_v44, 16 }
 0x12d   : > { %v10285_v14 = vpop.f32.mrb[16].mxu1  ;;  %10491 = vmatprep.mubr.bf16.mxu0 %v15941_v37 }
 0x12e   : > { %v13095_v20 = vadd.f32 %v10285_v14, %v10221_v27  ;;  %v1387_v36 = vpop.f32.mrb[17].mxu1  ;;  %v15947_v27 = vld [vmem:[#allocation54_spill] sm:$0xff] }
 0x12f   : > { %v13098_v39 = vadd.f32 %v1387_v36, %v854_v16  ;;  %v10286_v23 = vpop.f32.mrb[18].mxu1  ;;  %v10225_v0 = vpop.f32.mrb[20].mxu0  ;;  %v15948_v10 = vshll.u32 %v15947_v27, 16  ;;  %v2882_v16 = vor.u32 %v2880_v4, %v15949_v26  ;;  %v15950_v12 = vshrl.u32 %v15947_v27, 16 }
 0x130   : > { %v13102_v8 = vadd.f32 %v10286_v23, %v10222_v32  ;;  %v1390_v53 = vpop.f32.mrb[19].mxu1  ;;  %v869_v56 = vpop.f32.mrb[21].mxu0  ;;  %v15951_v32 = vld [vmem:[#allocation55_spill] sm:$0xff] }
 0x131   : > { %v2883_v1 = vrot.slane %v15948_v10, 1  ;;  %v10226_v14 = vpop.f32.mrb[22].mxu0  ;;  %v15952_v11 = vshll.u32 %v15951_v32, 16 }
 0x132   : > { %10552 = vmatmul.mubr.bf16.gmra.mrb[124].mxu1 %v2878_v21  ;;  %v871_v36 = vpop.f32.mrb[23].mxu0 }
 0x133   : > { %10555 = vmatprep.mubr.bf16.mxu1 %v2881_v63  ;;  %v2885_v37 = vor.u32 %v2883_v1, %v15950_v12  ;;  %v2886_v23 = vrot.slane %v15952_v11, 1  ;;  %v2884_v10 = vsel %vm1523_vm2, %v2882_v16, %v2883_v1  ;;  %v11845_v12 = vld [vmem:[#allocation2 + $0xc8] sm:$0xf]  ;;  %v15954_v1 = vshrl.u32 %v15951_v32, 16 }
 0x134   : > { %10492 = vmatmul.mubr.bf16.gmra.mrb[128].mxu0 %v15945_v44  ;;  %v13122_v11 = vcombine.low %v11845_v12, %v12872_v2  ;;  %v13134_v2 = vcombine.low %v12874_v24, %v12894_v9 }
 0x135   : > { %v10289_v53 = vpop.f32.mrb[20].mxu1  ;;  %10495 = vmatprep.mubr.bf16.mxu0 %v15947_v27  ;;  %v2887_v4 = vsel %vm1523_vm2, %v2885_v37, %v2886_v23  ;;  %v2888_v27 = vor.u32 %v2886_v23, %v15954_v1  ;;  %v15955_v37 = vshrl.u32 %v12586_v43, 16 }
 0x136   : > { %v13113_v50 = vadd.f32 %v10289_v53, %v10225_v0  ;;  %v1402_v21 = vpop.f32.mrb[21].mxu1  ;;  %v15953_v53 = vshll.u32 %v12586_v43, 16  ;;  %v15679_v24 = vshrl.u32 %v13122_v11, 16 }
 0x137   : > { %v10290_v56 = vpop.f32.mrb[22].mxu1  ;;  %v10229_v26 = vpop.f32.mrb[24].mxu0 }
 0x138   : > { %v1404_v63 = vpop.f32.mrb[23].mxu1  ;;  %v883_v0 = vpop.f32.mrb[25].mxu0  ;;  %v2889_v44 = vrot.slane %v15953_v53, 1  ;;  %v15956_v56 = vshll.u32 %v12595_v45, 16 }
 0x139   : > { %v13119_v14 = vadd.f32 %v1404_v63, %v871_v36  ;;  %v10230_v21 = vpop.f32.mrb[26].mxu0 }
 0x13a   : > { %10556 = vmatmul.mubr.bf16.gmra.mrb[128].mxu1 %v2884_v10  ;;  %v886_v16 = vpop.f32.mrb[27].mxu0  ;;  %v2891_v36 = vor.u32 %v2889_v44, %v15955_v37  ;;  %v2892_v63 = vrot.slane %v15956_v56, 1  ;;  %v2890_v53 = vsel %vm1523_vm2, %v2888_v27, %v2889_v44 }
 0x13b   : > { %10559 = vmatprep.mubr.bf16.mxu1 %v2887_v4  ;;  %v15678_v4 = vshll.u32 %v13122_v11, 16 }
 0x13c   : > { %10496 = vmatmul.mubr.bf16.gmra.mrb[132].mxu0 %v15951_v32  ;;  %v2893_v56 = vsel %vm1523_vm2, %v2891_v36, %v2892_v63  ;;  %v9005_v36 = vcombine.low %v13147_v41, %v13147_v41 }
 0x13d   : > { %v10293_v10 = vpop.f32.mrb[24].mxu1  ;;  %10499 = vmatprep.mubr.bf16.mxu0 %v12586_v43  ;;  %v2898_v44 = vrot.slane %v15678_v4, 1 }
 0x13e   : > { %v1416_v26 = vpop.f32.mrb[25].mxu1 }
 0x13f   : > { %v13138_v12 = vadd.f32 %v1416_v26, %v883_v0  ;;  %v10294_v23 = vpop.f32.mrb[26].mxu1  ;;  %v10233_v0 = vpop.f32.mrb[28].mxu0  ;;  %v2902_v10 = vor.u32 %v15679_v24, %v2898_v44 }
 0x140   : > { %v13142_v1 = vadd.f32 %v10294_v23, %v10230_v21  ;;  %v1419_v37 = vpop.f32.mrb[27].mxu1  ;;  %v898_v26 = vpop.f32.mrb[29].mxu0  ;;  %v15957_v21 = vshrl.u32 %v12595_v45, 16 }
 0x141   : > { %v13149_v32 = vadd.f32 %v1419_v37, %v886_v16  ;;  %v10234_v43 = vpop.f32.mrb[30].mxu0  ;;  %v15958_v16 = vshll.u32 %v13134_v2, 16 }
 0x142   : > { %10560 = vmatmul.mubr.bf16.gmra.mrb[132].mxu1 %v2890_v53  ;;  %v2894_v27 = vor.u32 %v2892_v63, %v15957_v21  ;;  %v901_v23 = vpop.f32.mrb[31].mxu0  ;;  %v2908_v21 = vshrl.u32 %v13134_v2, 16 }
 0x143   : > { %10563 = vmatprep.mubr.bf16.mxu1 %v2893_v56  ;;  %v2906_v37 = vrot.slane %v15958_v16, 1  ;;  %v2912_v23 = vshll.u32 %v9005_v36, 16 }
 0x144   : > { %10500 = vmatmul.mubr.bf16.gmra.mrb[136].mxu0 %v12595_v45  ;;  %v2899_v63 = vsel %vm1523_vm2, %v2894_v27, %v2898_v44 }
 0x145   : > { %v10297_v53 = vpop.f32.mrb[28].mxu1  ;;  %10503 = vmatprep.mubr.bf16.mxu0 %v13122_v11  ;;  %v2907_v16 = vsel %vm1523_vm2, %v2902_v10, %v2906_v37  ;;  %v2910_v45 = vor.u32 %v2908_v21, %v2906_v37  ;;  %v15959_v10 = vld [vmem:[#allocation18_spill] sm:$0xff] }
 0x146   : > { %v13161_v18 = vadd.f32 %v10297_v53, %v10233_v0  ;;  %v1431_v17 = vpop.f32.mrb[29].mxu1 }
 0x147   : > { %v13164_v56 = vadd.f32 %v1431_v17, %v898_v26  ;;  %v10298_v4 = vpop.f32.mrb[30].mxu1  ;;  %v10237_v0 = vpop.f32.mrb[32].mxu0  ;;  %v2914_v17 = vrot.slane %v2912_v23, 1 }
 0x148   : > { %v13169_v24 = vadd.f32 %v10298_v4, %v10234_v43  ;;  %v1434_v33 = vpop.f32.mrb[31].mxu1  ;;  %v913_v53 = vpop.f32.mrb[33].mxu0 }
 0x149   : > { %v10238_v55 = vpop.f32.mrb[34].mxu0  ;;  %v2915_v33 = vsel %vm1523_vm2, %v2910_v45, %v2914_v17  ;;  %v15960_v53 = vld [vmem:[#allocation19_spill] sm:$0xff] }
 0x14a   : > { %10564 = vmatmul.mubr.bf16.gmra.mrb[136].mxu1 %v2899_v63  ;;  %v915_v26 = vpop.f32.mrb[35].mxu0 }
 0x14b   : > { %10567 = vmatprep.mubr.bf16.mxu1 %v2907_v16 }
 0x14c   : > { %10504 = vmatmul.mubr.bf16.gmra.mrb[140].mxu0 %v13134_v2 }
 0x14d   : > { %v10301_v44 = vpop.f32.mrb[32].mxu1  ;;  %10587 = vmatprep.mubr.bf16.mxu0 %v15959_v10 }
 0x14e   : > { %v13174_v27 = vadd.f32 %v10301_v44, %v10237_v0  ;;  %v1446_v19 = vpop.f32.mrb[33].mxu1 }
 0x14f   : > { %v10302_v4 = vpop.f32.mrb[34].mxu1  ;;  %v10241_v55 = vpop.f32.mrb[36].mxu0  ;;  %v11445_v19 = vld [vmem:[%s15548_s1 + $0x208] sm:$0xff]  }
 0x150   : > { %v1448_v43 = vpop.f32.mrb[35].mxu1  ;;  %v927_v63 = vpop.f32.mrb[37].mxu0 }
 0x151   : > { %v13179_v36 = vadd.f32 %v1448_v43, %v915_v26  ;;  %v10242_v37 = vpop.f32.mrb[38].mxu0  ;;  %v15961_v26 = vld [vmem:[#allocation23_spill] sm:$0xff] }
 0x152   : > { %10568 = vmatmul.mubr.bf16.gmra.mrb[140].mxu1 %v2915_v33  ;;  %v930_v23 = vpop.f32.mrb[39].mxu0 }
 0x153   : > { %10651 = vmatprep.mubr.bf16.mxu1 %v12103_v54  ;;  %v11446_v54 = vld [vmem:[%s15548_s1 + $0x210] sm:$0xff]  }
 0x154   : > { %10588 = vmatmul.mubr.bf16.vlgmr.msra.gmra.mrb[144].mxu0 %v15960_v53 }
 0x155   : > { %v10305_v16 = vpop.f32.mrb[36].mxu1  ;;  %10700 = vmatpush3.bf16.msra.mxu0 %v13027_v5  ;;  %10591 = vmatprep.mubr.bf16.mxu0 %v15961_v26  ;;  %v11448_v26 = vld [vmem:[%s15548_s1 + $0x220] sm:$0xff]  }
 0x156   : > { %v1460_v0 = vpop.f32.mrb[37].mxu1  ;;  %10701 = vmatprep.subr.bf16.mxu0 %v11445_v19 }
 0x157   : > { %v13186_v45 = vadd.f32 %v1460_v0, %v927_v63  ;;  %v10306_v17 = vpop.f32.mrb[38].mxu1  ;;  %v10245_v10 = vpop.f32.mrb[40].mxu0  ;;  %v11447_v63 = vld [vmem:[%s15548_s1 + $0x218] sm:$0xff]  }
 0x158   : > { %v13190_v44 = vadd.f32 %v10306_v17, %v10242_v37  ;;  %v1463_v4 = vpop.f32.mrb[39].mxu1  ;;  %v942_v43 = vpop.f32.mrb[41].mxu0  ;;  %v15963_v17 = vld [vmem:[#allocation39_spill] sm:$0xff] }
 0x159   : > { %v13195_v33 = vadd.f32 %v1463_v4, %v930_v23  ;;  %v10246_v55 = vpop.f32.mrb[42].mxu0  ;;  %10702 = vmatpush3.bf16.msra.mxu0 %v11445_v19  ;;  %v15962_v23 = vld [vmem:[#allocation26_spill] sm:$0xff] }
 0x15a   : > { %10652 = vmatmul.mubr.bf16.vlgmr.msra.gmra.mrb[144].mxu1 %v12110_v58  ;;  %v945_v5 = vpop.f32.mrb[43].mxu0  ;;  %10703 = vmatprep.subr.bf16.mxu0 %v11446_v54 }
 0x15b   : > { %10655 = vmatprep.mubr.bf16.mxu1 %v12178_v3 }
 0x15c   : > { %10592 = vmatmul.mubr.bf16.gmra.mrb[148].mxu0 %v15962_v23 }
 0x15d   : > { %v10309_v37 = vpop.f32.mrb[40].mxu1  ;;  %10595 = vmatprep.mubr.bf16.mxu0 %v15963_v17  ;;  %10704 = vmatpush3.bf16.msra.mxu0 %v11446_v54  ;;  %v11449_v54 = vld [vmem:[%s15548_s1 + $0x228] sm:$0xff]  }
 0x15e   : > { %v13202_v16 = vadd.f32 %v10309_v37, %v10245_v10  ;;  %v1475_v0 = vpop.f32.mrb[41].mxu1  ;;  %10705 = vmatprep.subr.bf16.mxu0 %v11447_v63  ;;  %v15964_v37 = vld [vmem:[#allocation21_spill] sm:$0xff] }
 0x15f   : > { %v13205_v53 = vadd.f32 %v1475_v0, %v942_v43  ;;  %v10310_v58 = vpop.f32.mrb[42].mxu1  ;;  %v10249_v4 = vpop.f32.mrb[44].mxu0 }
 0x160   : > { %v13208_v3 = vadd.f32 %v10310_v58, %v10246_v55  ;;  %v1478_v19 = vpop.f32.mrb[43].mxu1  ;;  %v957_v10 = vpop.f32.mrb[45].mxu0  ;;  %v15965_v58 = vld [vmem:[#allocation41_spill] sm:$0xff] }
 0x161   : > { %v10250_v5 = vpop.f32.mrb[46].mxu0  ;;  %10706 = vmatpush3.bf16.msra.mxu0 %v11447_v63  ;;  %v15966_v19 = vld [vmem:[#allocation42_spill] sm:$0xff] }
 0x162   : > { %10656 = vmatmul.mubr.bf16.gmra.mrb[148].mxu1 %v12192_v30  ;;  %v959_v43 = vpop.f32.mrb[47].mxu0  ;;  %10707 = vmatprep.subr.bf16.mxu0 %v11448_v26  ;;  %v11450_v63 = vld [vmem:[%s15548_s1 + $0x230] sm:$0xff]  }
 0x163   : > { %10659 = vmatprep.mubr.bf16.mxu1 %v15964_v37  ;;  %v15967_v37 = vld [vmem:[#allocation22_spill] sm:$0xff] }
 0x164   : > { %10596 = vmatmul.mubr.bf16.gmra.mrb[152].mxu0 %v15965_v58 }
 0x165   : > { %v10313_v55 = vpop.f32.mrb[44].mxu1  ;;  %10599 = vmatprep.mubr.bf16.mxu0 %v15966_v19  ;;  %10708 = vmatpush3.bf16.msra.mxu0 %v11448_v26 }
 0x166   : > { %v13218_v0 = vadd.f32 %v10313_v55, %v10249_v4  ;;  %v1490_v23 = vpop.f32.mrb[45].mxu1  ;;  %10709 = vmatprep.subr.bf16.mxu0 %v11449_v54 }
 0x167   : > { %v10314_v17 = vpop.f32.mrb[46].mxu1  ;;  %v10333_v5 = vpop.f32.mrb[48].mxu0 }
 0x168   : > { %v1492_v30 = vpop.f32.mrb[47].mxu1  ;;  %v1826_v4 = vpop.f32.mrb[49].mxu0  ;;  %v11451_v17 = vld [vmem:[%s15548_s1 + $0x238] sm:$0xff]   ;;  %v15968_v5 = vld [vmem:[#allocation44_spill] sm:$0xff] }
 0x169   : > { %v13225_v10 = vadd.f32 %v1492_v30, %v959_v43  ;;  %v2001_v55 = vadd.f32 %v1826_v4, %v13017_v40  ;;  %v10334_v23 = vpop.f32.mrb[50].mxu0  ;;  %10710 = vmatpush3.bf16.msra.mxu0 %v11449_v54  ;;  %v15969_v4 = vld [vmem:[#allocation46_spill] sm:$0xff] }
 0x16a   : > { %10660 = vmatmul.mubr.bf16.gmra.mrb[152].mxu1 %v15967_v37  ;;  %v2003_v26 = vadd.f32 %v10334_v23, %v13021_v61  ;;  %v1829_v58 = vpop.f32.mrb[51].mxu0  ;;  %10711 = vmatprep.subr.bf16.mxu0 %v11450_v63 }
 0x16b   : > { %10663 = vmatprep.mubr.bf16.mxu1 %v12376_v35  ;;  %v2002_v19 = vadd.f32 %v1829_v58, %v13029_v38 }
 0x16c   : > { %10600 = vmatmul.mubr.bf16.gmra.mrb[156].mxu0 %v15968_v5 }
 0x16d   : > { %v10397_v43 = vpop.f32.mrb[48].mxu1  ;;  %10603 = vmatprep.mubr.bf16.mxu0 %v15969_v4  ;;  %10712 = vmatpush3.bf16.msra.mxu0 %v11450_v63 }
 0x16e   : > { %v2271_v30 = vpop.f32.mrb[49].mxu1  ;;  %10713 = vmatprep.subr.bf16.mxu0 %v11451_v17 }
 0x16f   : > { %v13236_v37 = vadd.f32 %v2271_v30, %v2001_v55  ;;  %v10398_v40 = vpop.f32.mrb[50].mxu1  ;;  %v10337_v23 = vpop.f32.mrb[52].mxu0 }
 0x170   : > { %v13239_v35 = vadd.f32 %v10398_v40, %v2003_v26  ;;  %v2274_v61 = vpop.f32.mrb[51].mxu1  ;;  %v2005_v38 = vadd.f32 %v10337_v23, %v13043_v42  ;;  %v1841_v58 = vpop.f32.mrb[53].mxu0  ;;  %v15970_v40 = vld [vmem:[#allocation47_spill] sm:$0xff]  ;;  %v15971_v42 = vld [vmem:[#allocation50_spill] sm:$0xff] }
 0x171   : > { %v13241_v54 = vadd.f32 %v2274_v61, %v2002_v19  ;;  %v2004_v43 = vadd.f32 %v1841_v58, %v13046_v46  ;;  %v10338_v55 = vpop.f32.mrb[54].mxu0  ;;  %10714 = vmatpush3.bf16.msra.mxu0 %v11451_v17 }
 0x172   : > { %10664 = vmatmul.mubr.bf16.gmra.mrb[156].mxu1 %v12381_v13  ;;  %v2006_v63 = vadd.f32 %v10338_v55, %v13050_v60  ;;  %v1844_v26 = vpop.f32.mrb[55].mxu0 }
 0x173   : > { %10667 = vmatprep.mubr.bf16.mxu1 %v12423_v47 }
 0x174   : > { %10604 = vmatmul.mubr.bf16.gmra.mrb[160].mxu0 %v15970_v40 }
 0x175   : > { %v10401_v30 = vpop.f32.mrb[52].mxu1  ;;  %10607 = vmatprep.mubr.bf16.mxu0 %v15971_v42 }
 0x176   : > { %v13248_v5 = vadd.f32 %v10401_v30, %v2005_v38  ;;  %v2286_v19 = vpop.f32.mrb[53].mxu1  ;;  %v15972_v30 = vld [vmem:[#allocation51_spill] sm:$0xff] }
 0x177   : > { %v13251_v4 = vadd.f32 %v2286_v19, %v2004_v43  ;;  %v10402_v13 = vpop.f32.mrb[54].mxu1  ;;  %v10341_v23 = vpop.f32.mrb[56].mxu0  ;;  %v15973_v19 = vld [vmem:[#allocation53_spill] sm:$0xff] }
 0x178   : > { %v13254_v61 = vadd.f32 %v10402_v13, %v2006_v63  ;;  %v2289_v46 = vpop.f32.mrb[55].mxu1  ;;  %v2008_v47 = vadd.f32 %v10341_v23, %v13061_v34  ;;  %v1856_v60 = vpop.f32.mrb[57].mxu0 }
 0x179   : > { %v10342_v17 = vpop.f32.mrb[58].mxu0 }
 0x17a   : > { %10668 = vmatmul.mubr.bf16.gmra.mrb[160].mxu1 %v12429_v6  ;;  %v1858_v38 = vpop.f32.mrb[59].mxu0  ;;  %v15974_v17 = vld [vmem:[#allocation56_spill] sm:$0xff] }
 0x17b   : > { %10671 = vmatprep.mubr.bf16.mxu1 %v12468_v48  ;;  %v2007_v43 = vadd.f32 %v1858_v38, %v13067_v15  ;;  %v13274_v38 = vcombine.low %v12894_v9, %v13147_v41 }
 0x17c   : > { %10608 = vmatmul.mubr.bf16.gmra.mrb[164].mxu0 %v15972_v30 }
 0x17d   : > { %v10405_v58 = vpop.f32.mrb[56].mxu1  ;;  %10611 = vmatprep.mubr.bf16.mxu0 %v15973_v19  ;;  %v3906_v30 = vshll.u32 %v13274_v38, 16 }
 0x17e   : > { %v13260_v55 = vadd.f32 %v10405_v58, %v2008_v47  ;;  %v2301_v26 = vpop.f32.mrb[57].mxu1 }
 0x17f   : > { %v10406_v63 = vpop.f32.mrb[58].mxu1  ;;  %v10345_v34 = vpop.f32.mrb[60].mxu0  ;;  %v534_v26 = vld [vmem:[#allocation2 + $0xe0] sm:$0xf] }
 0x180   : > { %v2303_v40 = vpop.f32.mrb[59].mxu1  ;;  %v1870_v13 = vpop.f32.mrb[61].mxu0 }
 0x181   : > { %v13264_v6 = vadd.f32 %v2303_v40, %v2007_v43  ;;  %v2009_v48 = vadd.f32 %v1870_v13, %v13078_v57  ;;  %v10346_v42 = vpop.f32.mrb[62].mxu0  ;;  %v15975_v57 = vld [vmem:[#allocation57_spill] sm:$0xff] }
 0x182   : > { %10672 = vmatmul.mubr.bf16.gmra.mrb[164].mxu1 %v12475_v22  ;;  %v2011_v15 = vadd.f32 %v10346_v42, %v13082_v62  ;;  %v1873_v46 = vpop.f32.mrb[63].mxu0  ;;  %v533_v62 = vld [vmem:[#allocation2 + $0xdc] sm:$0xf] }
 0x183   : > { %10675 = vmatprep.mubr.bf16.mxu1 %v12502_v52  ;;  %v2010_v47 = vadd.f32 %v1873_v46, %v13085_v25  ;;  %v13284_v19 = vcombine.low %v533_v62, %v534_v26  ;;  %v13292_v46 = vrot.slane %v3906_v30, 1 }
 0x184   : > { %10612 = vmatmul.mubr.bf16.gmra.mrb[168].mxu0 %v15974_v17  ;;  %v15976_v17 = vld [vmem:[#allocation58_spill] sm:$0xff] }
 0x185   : > { %v10409_v23 = vpop.f32.mrb[60].mxu1  ;;  %10615 = vmatprep.mubr.bf16.mxu0 %v15975_v57  ;;  %v15977_v57 = vld [vmem:[#allocation59_spill] sm:$0xff] }
 0x186   : > { %v2315_v60 = vpop.f32.mrb[61].mxu1  ;;  %v3910_v23 = vshrl.u32 %v13274_v38, 16 }
 0x187   : > { %v13276_v22 = vadd.f32 %v2315_v60, %v2009_v48  ;;  %v10410_v58 = vpop.f32.mrb[62].mxu1  ;;  %v10349_v63 = vpop.f32.mrb[64].mxu0  ;;  %v3914_v48 = vshll.u32 %v13284_v19, 16 }
 0x188   : > { %v13279_v43 = vadd.f32 %v10410_v58, %v2011_v15  ;;  %v2318_v52 = vpop.f32.mrb[63].mxu1  ;;  %v2013_v9 = vadd.f32 %v10349_v63, %v13095_v20  ;;  %v1885_v40 = vpop.f32.mrb[65].mxu0 }
 0x189   : > { %v13282_v25 = vadd.f32 %v2318_v52, %v2010_v47  ;;  %v2012_v34 = vadd.f32 %v1885_v40, %v13098_v39  ;;  %v10350_v13 = vpop.f32.mrb[66].mxu0  ;;  %v13295_v60 = vrot.slane %v3914_v48, 1  ;;  %v3912_v39 = vor.u32 %v3910_v23, %v13292_v46 }
 0x18a   : > { %10676 = vmatmul.mubr.bf16.gmra.mrb[168].mxu1 %v12512_v59  ;;  %v2014_v42 = vadd.f32 %v10350_v13, %v13102_v8  ;;  %v1888_v15 = vpop.f32.mrb[67].mxu0  ;;  %v15978_v48 = vshrl.u32 %v13122_v11, 16 }
 0x18b   : > { %10679 = vmatprep.mubr.bf16.mxu1 %v12567_v31  ;;  %v13308_v30 = vsel %vm1523_vm2, %v3912_v39, %v13295_v60 }
 0x18c   : > { %10616 = vmatmul.mubr.bf16.gmra.mrb[172].mxu0 %v15976_v17  ;;  %v3252_v15 = vrot.slane %v15978_v48, 3 }
 0x18d   : > { %v10413_v47 = vpop.f32.mrb[64].mxu1  ;;  %10619 = vmatprep.mubr.bf16.mxu0 %v15977_v57  ;;  %v15981_v57 = vld [vmem:[#allocation62_spill] sm:$0xff] }
 0x18e   : > { %v13297_v59 = vadd.f32 %v10413_v47, %v2013_v9  ;;  %v2330_v20 = vpop.f32.mrb[65].mxu1  ;;  %v9030_v47 = vcombine.low %v13147_v41, %v533_v62 }
 0x18f   : > { %v13301_v31 = vadd.f32 %v2330_v20, %v2012_v34  ;;  %v10414_v58 = vpop.f32.mrb[66].mxu1  ;;  %v10353_v63 = vpop.f32.mrb[68].mxu0 }
 0x190   : > { %v13304_v8 = vadd.f32 %v10414_v58, %v2014_v42  ;;  %v2333_v52 = vpop.f32.mrb[67].mxu1  ;;  %v2016_v9 = vadd.f32 %v10353_v63, %v13113_v50  ;;  %v1900_v40 = vpop.f32.mrb[69].mxu0  ;;  %v15979_v42 = vshll.u32 %v13122_v11, 16  ;;  %v15980_v50 = vld [vmem:[#allocation60_spill] sm:$0xff]  ;;  %v3261_v63 = vshrl.u32 %v9030_v47, 16 }
 0x191   : > { %v10354_v13 = vpop.f32.mrb[70].mxu0  ;;  %v3264_v40 = vshll.u32 %v9030_v47, 16  ;;  %v15983_v47 = vld [vmem:[#allocation61_spill] sm:$0xff] }
 0x192   : > { %10680 = vmatmul.mubr.bf16.gmra.mrb[172].mxu1 %v12573_v29  ;;  %v1902_v34 = vpop.f32.mrb[71].mxu0  ;;  %v3253_v23 = vrot.slane %v15979_v42, 4 }
 0x193   : > { %10683 = vmatprep.mubr.bf16.mxu1 %v12599_v28  ;;  %v2015_v17 = vadd.f32 %v1902_v34, %v13119_v14  ;;  %v15982_v34 = vshll.u32 %v13134_v2, 16 }
 0x194   : > { %10620 = vmatmul.mubr.bf16.gmra.mrb[176].mxu0 %v15980_v50  ;;  %v3254_v52 = vor.u32 %v3253_v23, %v3252_v15  ;;  %v9031_v15 = vcombine.low %v534_v26, %v534_v26 }
 0x195   : > { %v10417_v20 = vpop.f32.mrb[68].mxu1  ;;  %10623 = vmatprep.mubr.bf16.mxu0 %v15981_v57  ;;  %v3257_v48 = vrot.slane %v15982_v34, 4 }
 0x196   : > { %v13319_v39 = vadd.f32 %v10417_v20, %v2016_v9  ;;  %v2345_v29 = vpop.f32.mrb[69].mxu1  ;;  %v3256_v9 = vrot.slane %v2908_v21, 3  ;;  %v3255_v20 = vsel %vm997_vm1, %v15983_v47, %v3254_v52  ;;  %v3270_v26 = vshrl.u32 %v9031_v15, 16 }
 0x197   : > { %v10418_v58 = vpop.f32.mrb[70].mxu1  ;;  %v10357_v11 = vpop.f32.mrb[72].mxu0  ;;  %v3273_v57 = vshll.u32 %v9031_v15, 16 }
 0x198   : > { %v2347_v28 = vpop.f32.mrb[71].mxu1  ;;  %v1914_v41 = vpop.f32.mrb[73].mxu0  ;;  %v3258_v2 = vor.u32 %v3257_v48, %v3256_v9  ;;  %v15985_v9 = vld [vmem:[#allocation64_spill] sm:$0xff]  ;;  %v3272_v48 = vrot.slane %v3270_v26, 3 }
 0x199   : > { %v13323_v13 = vadd.f32 %v2347_v28, %v2015_v17  ;;  %v2017_v14 = vadd.f32 %v1914_v41, %v13138_v12  ;;  %v10358_v62 = vpop.f32.mrb[74].mxu0  ;;  %v3266_v17 = vrot.slane %v3264_v40, 4  ;;  %v3275_v15 = vrot.slane %v3273_v57, 4 }
 0x19a   : > { %10684 = vmatmul.mubr.bf16.gmra.mrb[176].mxu1 %v12603_v51  ;;  %v2019_v42 = vadd.f32 %v10358_v62, %v13142_v1  ;;  %v1917_v23 = vpop.f32.mrb[75].mxu0  ;;  %v3263_v51 = vrot.slane %v3261_v63, 3  ;;  %v3259_v34 = vsel %vm997_vm1, %v3254_v52, %v3258_v2 }
 0x19b   : > { %10687 = vmatprep.mubr.bf16.mxu1 %v12627_v7  ;;  %v2018_v12 = vadd.f32 %v1917_v23, %v13149_v32  ;;  %v15984_v7 = vld [vmem:[#allocation63_spill] sm:$0xff] }
 0x19c   : > { %10624 = vmatmul.mubr.bf16.gmra.mrb[180].mxu0 %v15984_v7  ;;  %v3267_v11 = vor.u32 %v3266_v17, %v3263_v51  ;;  %v3276_v17 = vor.u32 %v3275_v15, %v3272_v48 }
 0x19d   : > { %v10421_v29 = vpop.f32.mrb[72].mxu1  ;;  %10627 = vmatprep.mubr.bf16.mxu0 %v3255_v20 }
 0x19e   : > { %v2359_v50 = vpop.f32.mrb[73].mxu1  ;;  %v3268_v47 = vsel %vm997_vm1, %v3258_v2, %v3267_v11  ;;  %v3277_v2 = vsel %vm997_vm1, %v3267_v11, %v3276_v17 }
 0x19f   : > { %v13337_v58 = vadd.f32 %v2359_v50, %v2017_v14  ;;  %v10422_v21 = vpop.f32.mrb[74].mxu1  ;;  %v10361_v63 = vpop.f32.mrb[76].mxu0  ;;  %v15986_v50 = vld [vmem:[#allocation83_spill] sm:$0xff] }
 0x1a0   : > { %v13339_v1 = vadd.f32 %v10422_v21, %v2019_v42  ;;  %v2362_v28 = vpop.f32.mrb[75].mxu1  ;;  %v2021_v32 = vadd.f32 %v10361_v63, %v13161_v18  ;;  %v1929_v40 = vpop.f32.mrb[77].mxu0 }
 0x1a1   : > { %v13341_v41 = vadd.f32 %v2362_v28, %v2018_v12  ;;  %v2020_v14 = vadd.f32 %v1929_v40, %v13164_v56  ;;  %v10362_v62 = vpop.f32.mrb[78].mxu0 }
 0x1a2   : > { %10688 = vmatmul.mubr.bf16.gmra.mrb[180].mxu1 %v12630_v49  ;;  %v2022_v42 = vadd.f32 %v10362_v62, %v13169_v24  ;;  %v1932_v23 = vpop.f32.mrb[79].mxu0 }
 0x1a3   : > { %10691 = vmatprep.mubr.bf16.mxu1 %v15985_v9 }
 0x1a4   : > { %10628 = vmatmul.mubr.bf16.gmra.mrb[184].mxu0 %v3259_v34 }
 0x1a5   : > { %v10425_v20 = vpop.f32.mrb[76].mxu1  ;;  %10631 = vmatprep.mubr.bf16.mxu0 %v3268_v47  ;;  %v15988_v47 = vld [vmem:[#allocation67_spill] sm:$0xff] }
 0x1a6   : > { %v13350_v51 = vadd.f32 %v10425_v20, %v2021_v32  ;;  %v2374_v49 = vpop.f32.mrb[77].mxu1 }
 0x1a7   : > { %v13352_v18 = vadd.f32 %v2374_v49, %v2020_v14  ;;  %v10426_v56 = vpop.f32.mrb[78].mxu1  ;;  %v10365_v12 = vpop.f32.mrb[80].mxu0  ;;  %v15987_v14 = vld [vmem:[#allocation65_spill] sm:$0xff] }
 0x1a8   : > { %v13354_v52 = vadd.f32 %v10426_v56, %v2022_v42  ;;  %v2377_v29 = vpop.f32.mrb[79].mxu1  ;;  %v2024_v24 = vadd.f32 %v10365_v12, %v13174_v27  ;;  %v1944_v7 = vpop.f32.mrb[81].mxu0  ;;  %v15989_v56 = vld [vmem:[#allocation69_spill] sm:$0xff] }
 0x1a9   : > { %v10366_v21 = vpop.f32.mrb[82].mxu0 }
 0x1aa   : > { %10692 = vmatmul.mubr.bf16.gmra.mrb[184].mxu1 %v15986_v50  ;;  %v1946_v26 = vpop.f32.mrb[83].mxu0 }
 0x1ab   : > { %10695 = vmatprep.mubr.bf16.mxu1 %v13274_v38  ;;  %v2023_v28 = vadd.f32 %v1946_v26, %v13179_v36 }
 0x1ac   : > { %10632 = vmatmul.mubr.bf16.gmra.mrb[188].mxu0 %v3277_v2 }
 0x1ad   : > { %v10429_v57 = vpop.f32.mrb[80].mxu1  ;;  %10715 = vmatprep.mubr.bf16.mxu0 %v15987_v14 }
 0x1ae   : > { %v13361_v63 = vadd.f32 %v10429_v57, %v2024_v24  ;;  %v2389_v32 = vpop.f32.mrb[81].mxu1 }
 0x1af   : > { %v10430_v40 = vpop.f32.mrb[82].mxu1  ;;  %v10369_v27 = vpop.f32.mrb[84].mxu0  ;;  %v15990_v32 = vld [vmem:[#allocation70_spill] sm:$0xff] }
 0x1b0   : > { %v2391_v62 = vpop.f32.mrb[83].mxu1  ;;  %v1958_v11 = vpop.f32.mrb[85].mxu0 }
 0x1b1   : > { %v13364_v34 = vadd.f32 %v2391_v62, %v2023_v28  ;;  %v2025_v38 = vadd.f32 %v1958_v11, %v13186_v45  ;;  %v10370_v9 = vpop.f32.mrb[86].mxu0  ;;  %v15991_v62 = vld [vmem:[#allocation71_spill] sm:$0xff] }
 0x1b2   : > { %10696 = vmatmul.mubr.bf16.gmra.mrb[188].mxu1 %v13284_v19  ;;  %v2027_v48 = vadd.f32 %v10370_v9, %v13190_v44  ;;  %v1961_v36 = vpop.f32.mrb[87].mxu0 }
 0x1b3   : > { %v2026_v42 = vadd.f32 %v1961_v36, %v13195_v33 }
 0x1b4   : > { %10716 = vmatmul.mubr.bf16.vlgmr.msra.gmra.mrb[192].mxu0 %v15988_v47 }
 0x1b5   : > { %v10433_v15 = vpop.f32.mrb[84].mxu1  ;;  %10719 = vmatprep.mubr.bf16.mxu0 %v15989_v56 }
 0x1b6   : > { %v2403_v23 = vpop.f32.mrb[85].mxu1 }
 0x1b7   : > { %v13371_v20 = vadd.f32 %v2403_v23, %v2025_v38  ;;  %v10434_v49 = vpop.f32.mrb[86].mxu1  ;;  %v10373_v45 = vpop.f32.mrb[88].mxu0  ;;  %v15992_v23 = vld [vmem:[#allocation72_spill] sm:$0xff] }
 0x1b8   : > { %v13374_v17 = vadd.f32 %v10434_v49, %v2027_v48  ;;  %v2406_v29 = vpop.f32.mrb[87].mxu1  ;;  %v2029_v44 = vadd.f32 %v10373_v45, %v13202_v16  ;;  %v1973_v24 = vpop.f32.mrb[89].mxu0  ;;  %v15993_v49 = vld [vmem:[#allocation73_spill] sm:$0xff] }
 0x1b9   : > { %v13376_v12 = vadd.f32 %v2406_v29, %v2026_v42  ;;  %v2028_v7 = vadd.f32 %v1973_v24, %v13205_v53  ;;  %v10374_v33 = vpop.f32.mrb[90].mxu0 }
 0x1ba   : > { %v2030_v21 = vadd.f32 %v10374_v33, %v13208_v3  ;;  %v1976_v2 = vpop.f32.mrb[91].mxu0 }
 0x1bc   : > { %10720 = vmatmul.mubr.bf16.gmra.mrb[196].mxu0 %v15990_v32 }
 0x1bd   : > { %v10437_v26 = vpop.f32.mrb[88].mxu1  ;;  %10723 = vmatprep.mubr.bf16.mxu0 %v15991_v62 }
 0x1be   : > { %v13381_v57 = vadd.f32 %v10437_v26, %v2029_v44  ;;  %v2418_v28 = vpop.f32.mrb[89].mxu1  ;;  %v15994_v26 = vld [vmem:[#allocation74_spill] sm:$0xff] }
 0x1bf   : > { %v13384_v40 = vadd.f32 %v2418_v28, %v2028_v7  ;;  %v10438_v14 = vpop.f32.mrb[90].mxu1  ;;  %v10377_v11 = vpop.f32.mrb[92].mxu0 }
 0x1c0   : > { %v13387_v27 = vadd.f32 %v10438_v14, %v2030_v21  ;;  %v2421_v16 = vpop.f32.mrb[91].mxu1  ;;  %v2032_v53 = vadd.f32 %v10377_v11, %v13218_v0  ;;  %v1988_v38 = vpop.f32.mrb[93].mxu0  ;;  %v15995_v14 = vld [vmem:[#allocation75_spill] sm:$0xff] }
 0x1c1   : > { %v10378_v3 = vpop.f32.mrb[94].mxu0 }
 0x1c2   : > { %v1990_v9 = vpop.f32.mrb[95].mxu0 }
 0x1c3   : > { %v2031_v36 = vadd.f32 %v1990_v9, %v13225_v10 }
 0x1c4   : > { %10724 = vmatmul.mubr.bf16.gmra.mrb[200].mxu0 %v15992_v23  ;;  %v15996_v23 = vld [vmem:[#allocation76_spill] sm:$0xff] }
 0x1c5   : > { %v10441_v48 = vpop.f32.mrb[92].mxu1  ;;  %10727 = vmatprep.mubr.bf16.mxu0 %v15993_v49 }
 0x1c6   : > { %v13391_v15 = vadd.f32 %v10441_v48, %v2032_v53  ;;  %v2433_v42 = vpop.f32.mrb[93].mxu1 }
 0x1c7   : > { %v10442_v47 = vpop.f32.mrb[94].mxu1  ;;  %v10461_v45 = vpop.f32.mrb[96].mxu0 }
 0x1c8   : > { %v2435_v56 = vpop.f32.mrb[95].mxu1  ;;  %v2603_v44 = vpop.f32.mrb[97].mxu0 }
 0x1c9   : > { %v13395_v29 = vadd.f32 %v2435_v56, %v2031_v36  ;;  %v2778_v0 = vadd.f32 %v2603_v44, %v13236_v37  ;;  %v10462_v24 = vpop.f32.mrb[98].mxu0  ;;  %v15997_v56 = vld [vmem:[#allocation77_spill] sm:$0xff] }
 0x1ca   : > { %v2780_v7 = vadd.f32 %v10462_v24, %v13239_v35  ;;  %v2606_v33 = vpop.f32.mrb[99].mxu0 }
 0x1cb   : > { %v2779_v21 = vadd.f32 %v2606_v33, %v13241_v54 }
 0x1cc   : > { %10728 = vmatmul.mubr.bf16.gmra.mrb[204].mxu0 %v15994_v26  ;;  %v15998_v26 = vld [vmem:[#allocation78_spill] sm:$0xff] }
 0x1cd   : > { %v10525_v10 = vpop.f32.mrb[96].mxu1  ;;  %10731 = vmatprep.mubr.bf16.mxu0 %v15995_v14  ;;  %v15999_v14 = vld [vmem:[#allocation79_spill] sm:$0xff] }
 0x1ce   : > { %v3022_v2 = vpop.f32.mrb[97].mxu1 }
 0x1cf   : > { %v13401_v28 = vadd.f32 %v3022_v2, %v2778_v0  ;;  %v10526_v32 = vpop.f32.mrb[98].mxu1  ;;  %v10465_v37 = vpop.f32.mrb[100].mxu0 }
 0x1d0   : > { %v13404_v62 = vadd.f32 %v10526_v32, %v2780_v7  ;;  %v3025_v16 = vpop.f32.mrb[99].mxu1  ;;  %v2782_v35 = vadd.f32 %v10465_v37, %v13248_v5  ;;  %v2618_v53 = vpop.f32.mrb[101].mxu0 }
 0x1d1   : > { %v13406_v11 = vadd.f32 %v3025_v16, %v2779_v21  ;;  %v2781_v38 = vadd.f32 %v2618_v53, %v13251_v4  ;;  %v10466_v54 = vpop.f32.mrb[102].mxu0  ;;  %v11457_v4 = vld [vmem:[%s15550_s3 + $0x40] sm:$0xff]  }
 0x1d2   : > { %v2783_v3 = vadd.f32 %v10466_v54, %v13254_v61  ;;  %v2621_v9 = vpop.f32.mrb[103].mxu0  ;;  %10763 = vmatprep.subr.bf16.mxu1 %v11457_v4 }
 0x1d3   : > { %10764 = vmatpush3.bf16.msra.mxu1 %v11457_v4 }
 0x1d4   : > { %10732 = vmatmul.mubr.bf16.gmra.mrb[208].mxu0 %v15996_v23 }
 0x1d5   : > { %v10529_v48 = vpop.f32.mrb[100].mxu1  ;;  %10735 = vmatprep.mubr.bf16.mxu0 %v15997_v56  ;;  %v16001_v56 = vld [vmem:[#allocation81_spill] sm:$0xff] }
 0x1d6   : > { %v13411_v36 = vadd.f32 %v10529_v48, %v2782_v35  ;;  %v3037_v42 = vpop.f32.mrb[101].mxu1 }
 0x1d7   : > { %v13414_v47 = vadd.f32 %v3037_v42, %v2781_v38  ;;  %v10530_v49 = vpop.f32.mrb[102].mxu1  ;;  %v10469_v44 = vpop.f32.mrb[104].mxu0  ;;  %v16000_v42 = vld [vmem:[#allocation80_spill] sm:$0xff] }
 0x1d8   : > { %v13417_v45 = vadd.f32 %v10530_v49, %v2783_v3  ;;  %v3040_v5 = vpop.f32.mrb[103].mxu1  ;;  %v2785_v61 = vadd.f32 %v10469_v44, %v13260_v55  ;;  %v2633_v0 = vpop.f32.mrb[105].mxu0 }
 0x1d9   : > { %v10470_v24 = vpop.f32.mrb[106].mxu0  ;;  %v11458_v5 = vld [vmem:[%s15550_s3 + $0x48] sm:$0xff]  }
 0x1da   : > { %v2635_v7 = vpop.f32.mrb[107].mxu0  ;;  %10765 = vmatprep.subr.bf16.mxu1 %v11458_v5 }
 0x1db   : > { %v2784_v10 = vadd.f32 %v2635_v7, %v13264_v6  ;;  %10766 = vmatpush3.bf16.msra.mxu1 %v11458_v5  ;;  %v16005_v5 = vld [vmem:[#allocation86_spill] sm:$0xff] }
 0x1dc   : > { %10736 = vmatmul.mubr.bf16.gmra.mrb[212].mxu0 %v15998_v26 }
 0x1dd   : > { %v10533_v33 = vpop.f32.mrb[104].mxu1  ;;  %10739 = vmatprep.mubr.bf16.mxu0 %v15999_v14 }
 0x1de   : > { %v13424_v21 = vadd.f32 %v10533_v33, %v2785_v61  ;;  %v3052_v2 = vpop.f32.mrb[105].mxu1 }
 0x1df   : > { %v10534_v32 = vpop.f32.mrb[106].mxu1  ;;  %v10473_v55 = vpop.f32.mrb[108].mxu0 }
 0x1e0   : > { %v3054_v16 = vpop.f32.mrb[107].mxu1  ;;  %v2647_v35 = vpop.f32.mrb[109].mxu0  ;;  %v16002_v32 = vld [vmem:[#allocation82_spill] sm:$0xff]  ;;  %v16003_v55 = vld [vmem:[#allocation84_spill] sm:$0xff] }
 0x1e1   : > { %v13428_v37 = vadd.f32 %v3054_v16, %v2784_v10  ;;  %v2786_v53 = vadd.f32 %v2647_v35, %v13276_v22  ;;  %v10474_v38 = vpop.f32.mrb[110].mxu0 }
 0x1e2   : > { %v2788_v54 = vadd.f32 %v10474_v38, %v13279_v43  ;;  %v2650_v3 = vpop.f32.mrb[111].mxu0 }
 0x1e3   : > { %v2787_v9 = vadd.f32 %v2650_v3, %v13282_v25 }
 0x1e4   : > { %10740 = vmatmul.mubr.bf16.gmra.mrb[216].mxu0 %v16000_v42 }
 0x1e5   : > { %v10537_v6 = vpop.f32.mrb[108].mxu1  ;;  %10743 = vmatprep.mubr.bf16.mxu0 %v16001_v56 }
 0x1e6   : > { %v3066_v48 = vpop.f32.mrb[109].mxu1 }
 0x1e7   : > { %v13434_v23 = vadd.f32 %v3066_v48, %v2786_v53  ;;  %v10538_v49 = vpop.f32.mrb[110].mxu1  ;;  %v10477_v4 = vpop.f32.mrb[112].mxu0 }
 0x1e8   : > { %v13440_v22 = vadd.f32 %v10538_v49, %v2788_v54  ;;  %v3069_v44 = vpop.f32.mrb[111].mxu1  ;;  %v2790_v25 = vadd.f32 %v10477_v4, %v13297_v59  ;;  %v2662_v61 = vpop.f32.mrb[113].mxu0  ;;  %v16004_v49 = vld [vmem:[#allocation85_spill] sm:$0xff]  ;;  %v16006_v4 = vshll.u32 %v15986_v50, 16 }
 0x1e9   : > { %v13442_v43 = vadd.f32 %v3069_v44, %v2787_v9  ;;  %v2789_v0 = vadd.f32 %v2662_v61, %v13301_v31  ;;  %v10478_v24 = vpop.f32.mrb[114].mxu0  ;;  %v11459_v31 = vld [vmem:[%s15550_s3 + $0x50] sm:$0xff]  }
 0x1ea   : > { %v2791_v7 = vadd.f32 %v10478_v24, %v13304_v8  ;;  %v2665_v33 = vpop.f32.mrb[115].mxu0  ;;  %10767 = vmatprep.subr.bf16.mxu1 %v11459_v31 }
 0x1eb   : > { %10768 = vmatpush3.bf16.msra.mxu1 %v11459_v31 }
 0x1ec   : > { %10744 = vmatmul.mubr.bf16.gmra.mrb[220].mxu0 %v16002_v32 }
 0x1ed   : > { %v10541_v10 = vpop.f32.mrb[112].mxu1  ;;  %10747 = vmatprep.mubr.bf16.mxu0 %v16003_v55 }
 0x1ee   : > { %v13447_v2 = vadd.f32 %v10541_v10, %v2790_v25  ;;  %v3081_v26 = vpop.f32.mrb[113].mxu1  ;;  %v16007_v10 = vld [vmem:[#allocation88_spill] sm:$0xff] }
 0x1ef   : > { %v13450_v14 = vadd.f32 %v3081_v26, %v2789_v0  ;;  %v10542_v16 = vpop.f32.mrb[114].mxu1  ;;  %v10481_v53 = vpop.f32.mrb[116].mxu0 }
 0x1f0   : > { %v13453_v59 = vadd.f32 %v10542_v16, %v2791_v7  ;;  %v3084_v35 = vpop.f32.mrb[115].mxu1  ;;  %v2793_v8 = vadd.f32 %v10481_v53, %v13319_v39  ;;  %v2677_v38 = vpop.f32.mrb[117].mxu0  ;;  %v3902_v39 = vrot.slane %v16006_v4, 1 }
 0x1f1   : > { %v10482_v54 = vpop.f32.mrb[118].mxu0  ;;  %v16008_v35 = vld [vmem:[#allocation87_spill] sm:$0xff]  ;;  %v11456_v38 = vld [vmem:[#allocation2 + $0xe4] ss:$0 sps:$4 sm:$0xff]  }
 0x1f2   : > { %v2679_v3 = vpop.f32.mrb[119].mxu0  ;;  %v3903_v26 = vsel %vm1523_vm2, %v16007_v10, %v3902_v39 }
 0x1f3   : > { %v2792_v9 = vadd.f32 %v2679_v3, %v13323_v13  ;;  %v11460_v3 = vld [vmem:[%s15550_s3 + $0x58] sm:$0xff]  }
 0x1f4   : > { %10748 = vmatmul.mubr.bf16.gmra.mrb[224].mxu0 %v16004_v49  ;;  %10769 = vmatprep.subr.bf16.mxu1 %v11460_v3 }
 0x1f5   : > { %v10545_v6 = vpop.f32.mrb[116].mxu1  ;;  %10751 = vmatprep.mubr.bf16.mxu0 %v16005_v5  ;;  %v3918_v5 = vshrl.u32 %v13284_v19, 16  ;;  %10770 = vmatpush3.bf16.msra.mxu1 %v11460_v3 }
 0x1f6   : > { %v13460_v48 = vadd.f32 %v10545_v6, %v2793_v8  ;;  %v3096_v42 = vpop.f32.mrb[117].mxu1  ;;  %v16009_v8 = vshrl.u32 %v15986_v50, 16 }
 0x1f7   : > { %v10546_v56 = vpop.f32.mrb[118].mxu1  ;;  %v10485_v61 = vpop.f32.mrb[120].mxu0 }
 0x1f8   : > { %v3098_v44 = vpop.f32.mrb[119].mxu1  ;;  %v2691_v0 = vpop.f32.mrb[121].mxu0 }
 0x1f9   : > { %v13466_v25 = vadd.f32 %v3098_v44, %v2792_v9  ;;  %v2794_v24 = vadd.f32 %v2691_v0, %v13337_v58  ;;  %v10486_v7 = vpop.f32.mrb[122].mxu0  ;;  %v3904_v58 = vor.u32 %v3902_v39, %v16009_v8  ;;  %v3922_v44 = vshll.u32 %v11456_v38, 16 }
 0x1fa   : > { %v2796_v13 = vadd.f32 %v10486_v7, %v13339_v1  ;;  %v2694_v33 = vpop.f32.mrb[123].mxu0 }
 0x1fb   : > { %v2795_v16 = vadd.f32 %v2694_v33, %v13341_v41  ;;  %v3909_v50 = vsel %vm1523_vm2, %v3904_v58, %v13292_v46  ;;  %v3924_v46 = vrot.slane %v3922_v44, 1 }
 0x1fc   : > { %10752 = vmatmul.mubr.bf16.gmra.mrb[228].mxu0 %v16008_v35 }
 0x1fd   : > { %v10549_v32 = vpop.f32.mrb[120].mxu1  ;;  %10755 = vmatprep.mubr.bf16.mxu0 %v3903_v26 }
 0x1fe   : > { %v3110_v55 = vpop.f32.mrb[121].mxu1 }
 0x1ff   : > { %v13474_v53 = vadd.f32 %v3110_v55, %v2794_v24  ;;  %v10550_v31 = vpop.f32.mrb[122].mxu1  ;;  %v10489_v41 = vpop.f32.mrb[124].mxu0 }
 0x200   : > { %v13478_v54 = vadd.f32 %v10550_v31, %v2796_v13  ;;  %v3113_v1 = vpop.f32.mrb[123].mxu1  ;;  %v2798_v9 = vadd.f32 %v10489_v41, %v13350_v51  ;;  %v2706_v42 = vpop.f32.mrb[125].mxu0 }
 0x201   : > { %v13483_v6 = vadd.f32 %v3113_v1, %v2795_v16  ;;  %v2797_v49 = vadd.f32 %v2706_v42, %v13352_v18  ;;  %v10490_v56 = vpop.f32.mrb[126].mxu0  ;;  %v3920_v18 = vor.u32 %v3918_v5, %v13295_v60 }
 0x202   : > { %v2799_v4 = vadd.f32 %v10490_v56, %v13354_v52  ;;  %v2709_v39 = vpop.f32.mrb[127].mxu0  ;;  %v11461_v52 = vld [vmem:[%s15550_s3 + $0x60] sm:$0xff]  }
 0x203   : > { %v3925_v16 = vsel %vm1523_vm2, %v3920_v18, %v3924_v46  ;;  %10771 = vmatprep.subr.bf16.mxu1 %v11461_v52 }
 0x204   : > { %10756 = vmatmul.mubr.bf16.gmra.mrb[232].mxu0 %v3909_v50  ;;  %10772 = vmatpush3.bf16.msra.mxu1 %v11461_v52 }
 0x205   : > { %v10553_v61 = vpop.f32.mrb[124].mxu1  ;;  %10759 = vmatprep.mubr.bf16.mxu0 %v13308_v30 }
 0x206   : > { %v13491_v0 = vadd.f32 %v10553_v61, %v2798_v9  ;;  %v3125_v24 = vpop.f32.mrb[125].mxu1 }
 0x207   : > { %v13493_v51 = vadd.f32 %v3125_v24, %v2797_v49  ;;  %v10554_v7 = vpop.f32.mrb[126].mxu1  ;;  %v10493_v33 = vpop.f32.mrb[128].mxu0 }
 0x208   : > { %v13497_v13 = vadd.f32 %v10554_v7, %v2799_v4  ;;  %v3128_v19 = vpop.f32.mrb[127].mxu1  ;;  %v2801_v10 = vadd.f32 %v10493_v33, %v13361_v63  ;;  %v2721_v26 = vpop.f32.mrb[129].mxu0 }
 0x209   : > { %v10494_v32 = vpop.f32.mrb[130].mxu0 }
 0x20a   : > { %v2723_v55 = vpop.f32.mrb[131].mxu0 }
 0x20b   : > { %v2800_v60 = vadd.f32 %v2723_v55, %v13364_v34 }
 0x20c   : > { %10760 = vmatmul.mubr.bf16.gmra.mrb[236].mxu0 %v3925_v16 }
 0x20d   : > { %v10557_v30 = vpop.f32.mrb[128].mxu1 }
 0x20e   : > { %v3140_v35 = vpop.f32.mrb[129].mxu1  ;;  %v13505_v31 = vadd.f32 %v10557_v30, %v2801_v10 }
 0x20f   : > { %v10558_v8 = vpop.f32.mrb[130].mxu1  ;;  %v10497_v38 = vpop.f32.mrb[132].mxu0 }
 0x210   : > { %v3142_v58 = vpop.f32.mrb[131].mxu1  ;;  %v2735_v63 = vpop.f32.mrb[133].mxu0  ;;  %v11465_v38 = vld [vmem:[%s15550_s3 + $0x8] sm:$0xff]  }
 0x211   : > { %v13507_v1 = vadd.f32 %v3142_v58, %v2800_v60  ;;  %v2802_v3 = vadd.f32 %v2735_v63, %v13371_v20  ;;  %v10498_v41 = vpop.f32.mrb[134].mxu0 }
 0x212   : > { %v2804_v9 = vadd.f32 %v10498_v41, %v13374_v17  ;;  %v2738_v42 = vpop.f32.mrb[135].mxu0 }
 0x213   : > { %v2803_v56 = vadd.f32 %v2738_v42, %v13376_v12 }
 0x215   : > { %v10561_v49 = vpop.f32.mrb[132].mxu1 }
 0x216   : > { %v3154_v34 = vpop.f32.mrb[133].mxu1 }
 0x217   : > { %v10562_v50 = vpop.f32.mrb[134].mxu1  ;;  %v13512_v5 = vadd.f32 %v3154_v34, %v2802_v3  ;;  %v10501_v39 = vpop.f32.mrb[136].mxu0 }
 0x218   : > { %v3157_v44 = vpop.f32.mrb[135].mxu1  ;;  %v13514_v4 = vadd.f32 %v10562_v50, %v2804_v9  ;;  %v2806_v24 = vadd.f32 %v10501_v39, %v13381_v57  ;;  %v2750_v20 = vpop.f32.mrb[137].mxu0 }
 0x219   : > { %v13516_v61 = vadd.f32 %v3157_v44, %v2803_v56  ;;  %v2805_v7 = vadd.f32 %v2750_v20, %v13384_v40  ;;  %v10502_v17 = vpop.f32.mrb[138].mxu0  ;;  %v11463_v40 = vld [vmem:[%s15550_s3] sm:$0xff]  }
 0x21a   : > { %v2807_v18 = vadd.f32 %v10502_v17, %v13387_v27  ;;  %v2753_v46 = vpop.f32.mrb[139].mxu0  ;;  %10827 = vmatprep.subr.bf16.mxu0 %v11463_v40 }
 0x21b   : > { %10828 = vmatpush3.bf16.msra.mxu0 %v11463_v40 }
 0x21c   : > { %10829 = vmatprep.subr.bf16.mxu0 %v11465_v38 }
 0x21d   : > { %v10565_v12 = vpop.f32.mrb[136].mxu1 }
 0x21e   : > { %v3169_v19 = vpop.f32.mrb[137].mxu1  ;;  %v13521_v33 = vadd.f32 %v10565_v12, %v2806_v24  ;;  %v11467_v24 = vld [vmem:[%s15550_s3 + $0x18] sm:$0xff]  }
 0x21f   : > { %v10566_v52 = vpop.f32.mrb[138].mxu1  ;;  %v13523_v10 = vadd.f32 %v3169_v19, %v2805_v7  ;;  %v10505_v16 = vpop.f32.mrb[140].mxu0  ;;  %10830 = vmatpush3.bf16.msra.mxu0 %v11465_v38  ;;  %v11469_v19 = vld [vmem:[%s15550_s3 + $0x20] sm:$0xff]   ;;  %v4672_v38 = vld [vmem:[#allocation3 + $0xc] sm:$0xf] }
 0x220   : > { %v3172_v26 = vpop.f32.mrb[139].mxu1  ;;  %v13525_v32 = vadd.f32 %v10566_v52, %v2807_v18  ;;  %v2809_v57 = vadd.f32 %v10505_v16, %v13391_v15  ;;  %v2765_v55 = vpop.f32.mrb[141].mxu0  ;;  %v11464_v16 = vld [vmem:[%s15550_s3 + $0x70] sm:$0xff]  }
 0x221   : > { %v10506_v27 = vpop.f32.mrb[142].mxu0 }
 0x222   : > { %v2767_v30 = vpop.f32.mrb[143].mxu0 }
 0x223   : > { %v2808_v35 = vadd.f32 %v2767_v30, %v13395_v29  ;;  %v11466_v29 = vld [vmem:[%s15550_s3 + $0x10] sm:$0xff]  }
 0x224   : > { %10831 = vmatprep.subr.bf16.mxu0 %v11466_v29 }
 0x225   : > { %v10569_v60 = vpop.f32.mrb[140].mxu1  ;;  %10832 = vmatpush3.bf16.msra.mxu0 %v11466_v29 }
 0x226   : > { %v3184_v8 = vpop.f32.mrb[141].mxu1  ;;  %v13532_v58 = vadd.f32 %v10569_v60, %v2809_v57  ;;  %10833 = vmatprep.subr.bf16.mxu0 %v11467_v24 }
 0x227   : > { %v10570_v15 = vpop.f32.mrb[142].mxu1  ;;  %v10589_v3 = vpop.f32.mrb[144].mxu0 }
 0x228   : > { %v3186_v63 = vpop.f32.mrb[143].mxu1  ;;  %v3364_v9 = vpop.f32.mrb[145].mxu0  ;;  %v4673_v15 = vld [vmem:[#allocation3 + $0x10] sm:$0xf]  ;;  %v4671_v3 = vld [vmem:[#allocation3 + $0x8] sm:$0xf] }
 0x229   : > { %v13537_v41 = vadd.f32 %v3186_v63, %v2808_v35  ;;  %v3539_v42 = vadd.f32 %v3364_v9, %v13401_v28  ;;  %v10590_v49 = vpop.f32.mrb[146].mxu0  ;;  %v11462_v28 = vld [vmem:[%s15550_s3 + $0x68] sm:$0xff]   ;;  %10834 = vmatpush3.bf16.msra.mxu0 %v11467_v24  ;;  %v13578_v9 = vld [vmem:[#allocation3 + $0x14] sm:$0xf]  ;;  %v13580_v29 = vcombine.low %v4672_v38, %v4673_v15 }
 0x22a   : > { %v3541_v56 = vadd.f32 %v10590_v49, %v13404_v62  ;;  %v3367_v34 = vpop.f32.mrb[147].mxu0  ;;  %10773 = vmatprep.subr.bf16.mxu1 %v11462_v28  ;;  %10835 = vmatprep.subr.bf16.mxu0 %v11469_v19 }
 0x22b   : > { %v3540_v44 = vadd.f32 %v3367_v34, %v13406_v11  ;;  %10774 = vmatpush3.bf16.msra.mxu1 %v11462_v28  ;;  %v9205_v34 = vcombine.low %v4673_v15, %v13578_v9  ;;  %10779 = vmatprep.mubr.bf16.mxu1 %v13580_v29 }
 0x22c   : > { %10775 = vmatprep.subr.bf16.mxu1 %v11464_v16 }
 0x22d   : > { %v10653_v50 = vpop.f32.mrb[144].mxu1  ;;  %10836 = vmatpush3.bf16.msra.mxu0 %v11469_v19  ;;  %v5197_v28 = vshrl.u32 %v9205_v34, 16  ;;  %v11480_v19 = vld [vmem:[%s15550_s3 + $0x38] sm:$0xff]  }
 0x22e   : > { %v3675_v39 = vpop.f32.mrb[145].mxu1  ;;  %v11475_v50 = vld [vmem:[%s15550_s3 + $0x30] sm:$0xff]  }
 0x22f   : > { %v10654_v20 = vpop.f32.mrb[146].mxu1  ;;  %v13548_v7 = vadd.f32 %v3675_v39, %v3539_v42  ;;  %v10593_v18 = vpop.f32.mrb[148].mxu0  ;;  %10776 = vmatpush3.bf16.msra.mxu1 %v11464_v16  ;;  %v5199_v16 = vrot.slane %v5197_v28, 3 }
 0x230   : > { %v3678_v17 = vpop.f32.mrb[147].mxu1  ;;  %v13553_v62 = vadd.f32 %v10654_v20, %v3541_v56  ;;  %v3543_v11 = vadd.f32 %v10593_v18, %v13411_v36  ;;  %v3379_v12 = vpop.f32.mrb[149].mxu0  ;;  %v9204_v56 = vcombine.low %v4671_v3, %v4672_v38 }
 0x231   : > { %v13555_v46 = vadd.f32 %v3678_v17, %v3540_v44  ;;  %v3542_v52 = vadd.f32 %v3379_v12, %v13414_v47  ;;  %v10594_v26 = vpop.f32.mrb[150].mxu0  ;;  %v11470_v47 = vld [vmem:[%s15550_s3 + $0x28] sm:$0xff]   ;;  %v5200_v17 = vshll.u32 %v9205_v34, 16 }
 0x232   : > { %v3544_v57 = vadd.f32 %v10594_v26, %v13417_v45  ;;  %v3382_v55 = vpop.f32.mrb[151].mxu0  ;;  %v11468_v45 = vld [vmem:[%s15550_s3 + $0x78] sm:$0xff]   ;;  %10837 = vmatprep.subr.bf16.mxu0 %v11470_v47  ;;  %v5189_v24 = vshrl.u32 %v9204_v56, 16  ;;  %v5192_v20 = vshll.u32 %v9204_v56, 16 }
 0x233   : > { %10777 = vmatprep.subr.bf16.mxu1 %v11468_v45  ;;  %10838 = vmatpush3.bf16.msra.mxu0 %v11470_v47  ;;  %v5202_v55 = vrot.slane %v5200_v17, 4 }
 0x234   : > { %10778 = vmatpush3.bf16.msra.mxu1 %v11468_v45  ;;  %10839 = vmatprep.subr.bf16.mxu0 %v11475_v50  ;;  %v5194_v26 = vrot.slane %v5192_v20, 4 }
 0x235   : > { %v10657_v40 = vpop.f32.mrb[148].mxu1 }
 0x236   : > { %v3690_v36 = vpop.f32.mrb[149].mxu1  ;;  %v13566_v27 = vadd.f32 %v10657_v40, %v3543_v11 }
 0x237   : > { %v10658_v30 = vpop.f32.mrb[150].mxu1  ;;  %v13571_v60 = vadd.f32 %v3690_v36, %v3542_v52  ;;  %v10597_v63 = vpop.f32.mrb[152].mxu0  ;;  %10840 = vmatpush3.bf16.msra.mxu0 %v11475_v50  ;;  %v5191_v52 = vrot.slane %v5189_v24, 3 }
 0x238   : > { %v3693_v35 = vpop.f32.mrb[151].mxu1  ;;  %v13576_v8 = vadd.f32 %v10658_v30, %v3544_v57  ;;  %v3546_v42 = vadd.f32 %v10597_v63, %v13424_v21  ;;  %v3394_v49 = vpop.f32.mrb[153].mxu0  ;;  %10841 = vmatprep.subr.bf16.mxu0 %v11480_v19 }
 0x239   : > { %v10598_v44 = vpop.f32.mrb[154].mxu0  ;;  %v5195_v36 = vor.u32 %v5194_v26, %v5191_v52 }
 0x23a   : > { %v3396_v39 = vpop.f32.mrb[155].mxu0 }
 0x23b   : > { %v3545_v21 = vadd.f32 %v3396_v39, %v13428_v37  ;;  %10842 = vmatpush3.bf16.msra.mxu0 %v11480_v19  ;;  %v13596_v37 = vor.u32 %v5202_v55, %v5199_v16 }
 0x23d   : > { %v10661_v18 = vpop.f32.mrb[152].mxu1  ;;  %v5204_v15 = vsel %vm997_vm1, %v5195_v36, %v13596_v37 }
 0x23e   : > { %v3705_v11 = vpop.f32.mrb[153].mxu1  ;;  %v13589_v12 = vadd.f32 %v10661_v18, %v3546_v42  ;;  %10843 = vmatprep.mubr.bf16.mxu0 %v5204_v15  ;;  %v13625_v15 = vld [vmem:[%s15550_s3 + $0x80] sm:$0xff]  }
 0x23f   : > { %v10662_v57 = vpop.f32.mrb[154].mxu1  ;;  %v10601_v47 = vpop.f32.mrb[156].mxu0  ;;  %10891 = vmatprep.subr.bf16.mxu1 %v13625_v15 }
 0x240   : > { %v3707_v40 = vpop.f32.mrb[155].mxu1  ;;  %v3408_v45 = vpop.f32.mrb[157].mxu0 }
 0x241   : > { %v13594_v30 = vadd.f32 %v3707_v40, %v3545_v21  ;;  %v3547_v35 = vadd.f32 %v3408_v45, %v13434_v23  ;;  %v10602_v38 = vpop.f32.mrb[158].mxu0 }
 0x242   : > { %v3549_v63 = vadd.f32 %v10602_v38, %v13440_v22  ;;  %v3411_v3 = vpop.f32.mrb[159].mxu0 }
 0x243   : > { %v3548_v49 = vadd.f32 %v3411_v3, %v13442_v43 }
 0x245   : > { %v10665_v42 = vpop.f32.mrb[156].mxu1 }
 0x246   : > { %v3719_v56 = vpop.f32.mrb[157].mxu1 }
 0x247   : > { %v10666_v34 = vpop.f32.mrb[158].mxu1  ;;  %v13603_v50 = vadd.f32 %v3719_v56, %v3547_v35  ;;  %v10605_v24 = vpop.f32.mrb[160].mxu0 }
 0x248   : > { %v3722_v44 = vpop.f32.mrb[159].mxu1  ;;  %v13605_v39 = vadd.f32 %v10666_v34, %v3549_v63  ;;  %v3551_v20 = vadd.f32 %v10605_v24, %v13447_v2  ;;  %v3423_v28 = vpop.f32.mrb[161].mxu0 }
 0x249   : > { %v13607_v23 = vadd.f32 %v3722_v44, %v3548_v49  ;;  %v3550_v22 = vadd.f32 %v3423_v28, %v13450_v14  ;;  %v10606_v17 = vpop.f32.mrb[162].mxu0 }
 0x24a   : > { %v3552_v18 = vadd.f32 %v10606_v17, %v13453_v59  ;;  %v3426_v21 = vpop.f32.mrb[163].mxu0 }
 0x24d   : > { %v10669_v43 = vpop.f32.mrb[160].mxu1 }
 0x24e   : > { %v3734_v11 = vpop.f32.mrb[161].mxu1  ;;  %v13612_v19 = vadd.f32 %v10669_v43, %v3551_v20 }
 0x24f   : > { %v10670_v52 = vpop.f32.mrb[162].mxu1  ;;  %v13614_v26 = vadd.f32 %v3734_v11, %v3550_v22  ;;  %v10609_v55 = vpop.f32.mrb[164].mxu0 }
 0x250   : > { %v3737_v16 = vpop.f32.mrb[163].mxu1  ;;  %v13616_v57 = vadd.f32 %v10670_v52, %v3552_v18  ;;  %v3554_v2 = vadd.f32 %v10609_v55, %v13460_v48  ;;  %v3438_v40 = vpop.f32.mrb[165].mxu0 }
 0x251   : > { %v10610_v36 = vpop.f32.mrb[166].mxu0 }
 0x252   : > { %v3440_v14 = vpop.f32.mrb[167].mxu0 }
 0x253   : > { %v3553_v59 = vadd.f32 %v3440_v14, %v13466_v25 }
 0x255   : > { %v10673_v47 = vpop.f32.mrb[164].mxu1 }
 0x256   : > { %v3749_v45 = vpop.f32.mrb[165].mxu1  ;;  %v13620_v35 = vadd.f32 %v10673_v47, %v3554_v2 }
 0x257   : > { %v10674_v38 = vpop.f32.mrb[166].mxu1  ;;  %v10613_v3 = vpop.f32.mrb[168].mxu0 }
 0x258   : > { %v3751_v63 = vpop.f32.mrb[167].mxu1  ;;  %v3452_v48 = vpop.f32.mrb[169].mxu0 }
 0x259   : > { %v13627_v42 = vadd.f32 %v3751_v63, %v3553_v59  ;;  %v3555_v49 = vadd.f32 %v3452_v48, %v13474_v53  ;;  %v10614_v56 = vpop.f32.mrb[170].mxu0 }
 0x25a   : > { %v3557_v25 = vadd.f32 %v10614_v56, %v13478_v54  ;;  %v3455_v34 = vpop.f32.mrb[171].mxu0 }
 0x25b   : > { %v3556_v24 = vadd.f32 %v3455_v34, %v13483_v6 }
 0x25d   : > { %v10677_v44 = vpop.f32.mrb[168].mxu1 }
 0x25e   : > { %v3763_v20 = vpop.f32.mrb[169].mxu1 }
 0x25f   : > { %v10678_v28 = vpop.f32.mrb[170].mxu1  ;;  %v13633_v22 = vadd.f32 %v3763_v20, %v3555_v49  ;;  %v10617_v21 = vpop.f32.mrb[172].mxu0 }
 0x260   : > { %v3766_v17 = vpop.f32.mrb[171].mxu1  ;;  %v13635_v18 = vadd.f32 %v10678_v28, %v3557_v25  ;;  %v3559_v11 = vadd.f32 %v10617_v21, %v13491_v0  ;;  %v3467_v53 = vpop.f32.mrb[173].mxu0 }
 0x261   : > { %v13637_v43 = vadd.f32 %v3766_v17, %v3556_v24  ;;  %v3558_v52 = vadd.f32 %v3467_v53, %v13493_v51  ;;  %v10618_v54 = vpop.f32.mrb[174].mxu0 }
 0x262   : > { %v3560_v16 = vadd.f32 %v10618_v54, %v13497_v13  ;;  %v3470_v55 = vpop.f32.mrb[175].mxu0 }
 0x265   : > { %v10681_v6 = vpop.f32.mrb[172].mxu1 }
 0x266   : > { %v3778_v2 = vpop.f32.mrb[173].mxu1  ;;  %v13642_v40 = vadd.f32 %v10681_v6, %v3559_v11 }
 0x267   : > { %v10682_v36 = vpop.f32.mrb[174].mxu1  ;;  %v13644_v14 = vadd.f32 %v3778_v2, %v3558_v52  ;;  %v10621_v45 = vpop.f32.mrb[176].mxu0 }
 0x268   : > { %v3781_v47 = vpop.f32.mrb[175].mxu1  ;;  %v13646_v59 = vadd.f32 %v10682_v36, %v3560_v16  ;;  %v3562_v0 = vadd.f32 %v10621_v45, %v13505_v31  ;;  %v3482_v38 = vpop.f32.mrb[177].mxu0 }
 0x269   : > { %v10622_v63 = vpop.f32.mrb[178].mxu0 }
 0x26a   : > { %v3484_v51 = vpop.f32.mrb[179].mxu0 }
 0x26b   : > { %v3561_v13 = vadd.f32 %v3484_v51, %v13507_v1 }
 0x26d   : > { %v10685_v3 = vpop.f32.mrb[176].mxu1 }
 0x26e   : > { %v13650_v48 = vadd.f32 %v10685_v3, %v3562_v0  ;;  %v3793_v49 = vpop.f32.mrb[177].mxu1 }
 0x26f   : > { %v10686_v56 = vpop.f32.mrb[178].mxu1  ;;  %v10625_v44 = vpop.f32.mrb[180].mxu0 }
 0x270   : > { %v3795_v25 = vpop.f32.mrb[179].mxu1  ;;  %v3496_v24 = vpop.f32.mrb[181].mxu0 }
 0x271   : > { %v13652_v34 = vadd.f32 %v3795_v25, %v3561_v13  ;;  %v3563_v20 = vadd.f32 %v3496_v24, %v13512_v5  ;;  %v10626_v28 = vpop.f32.mrb[182].mxu0 }
 0x272   : > { %v3565_v31 = vadd.f32 %v10626_v28, %v13514_v4  ;;  %v3499_v17 = vpop.f32.mrb[183].mxu0 }
 0x273   : > { %v3564_v11 = vadd.f32 %v3499_v17, %v13516_v61 }
 0x275   : > { %v10689_v21 = vpop.f32.mrb[180].mxu1 }
 0x276   : > { %v3807_v53 = vpop.f32.mrb[181].mxu1 }
 0x277   : > { %v13657_v1 = vadd.f32 %v3807_v53, %v3563_v20  ;;  %v10690_v52 = vpop.f32.mrb[182].mxu1  ;;  %v10629_v6 = vpop.f32.mrb[184].mxu0  ;;  %v13681_v53 = vld [vmem:[%s15549_s2] ss:$0 sm:$0xff] }
 0x278   : > { %v13659_v54 = vadd.f32 %v10690_v52, %v3565_v31  ;;  %v3810_v16 = vpop.f32.mrb[183].mxu1  ;;  %v3567_v2 = vadd.f32 %v10629_v6, %v13521_v33  ;;  %v3511_v5 = vpop.f32.mrb[185].mxu0 }
 0x279   : > { %v13661_v55 = vadd.f32 %v3810_v16, %v3564_v11  ;;  %v3566_v36 = vadd.f32 %v3511_v5, %v13523_v10  ;;  %v10630_v4 = vpop.f32.mrb[186].mxu0 }
 0x27a   : > { %v3568_v47 = vadd.f32 %v10630_v4, %v13525_v32  ;;  %v3514_v45 = vpop.f32.mrb[187].mxu0 }
 0x27b   : > { %v13701_v45 = vld [vmem:[%s15550_s3 + $0xc0] sm:$0xff]  }
 0x27c   : > { %10955 = vmatprep.subr.bf16.mxu0 %v13701_v45 }
 0x27d   : > { %v10693_v61 = vpop.f32.mrb[184].mxu1 }
 0x27e   : > { %v13666_v0 = vadd.f32 %v10693_v61, %v3567_v2  ;;  %v3822_v38 = vpop.f32.mrb[185].mxu1 }
 0x27f   : > { %v13668_v63 = vadd.f32 %v3822_v38, %v3566_v36  ;;  %v10694_v51 = vpop.f32.mrb[186].mxu1  ;;  %v10633_v49 = vpop.f32.mrb[188].mxu0 }
 0x280   : > { %v13670_v3 = vadd.f32 %v10694_v51, %v3568_v47  ;;  %v3825_v13 = vpop.f32.mrb[187].mxu1  ;;  %v3570_v33 = vadd.f32 %v10633_v49, %v13532_v58  ;;  %v3526_v56 = vpop.f32.mrb[189].mxu0 }
 0x281   : > { %v10634_v25 = vpop.f32.mrb[190].mxu0 }
 0x282   : > { %v3528_v10 = vpop.f32.mrb[191].mxu0 }
 0x283   : > { %v3569_v32 = vadd.f32 %v3528_v10, %v13537_v41 }
 0x285   : > { %v10697_v44 = vpop.f32.mrb[188].mxu1 }
 0x286   : > { %v13674_v24 = vadd.f32 %v10697_v44, %v3570_v33  ;;  %v3837_v20 = vpop.f32.mrb[189].mxu1 }
 0x287   : > { %v10698_v28 = vpop.f32.mrb[190].mxu1  ;;  %v10717_v21 = vpop.f32.mrb[192].mxu0 }
 0x288   : > { %v3839_v31 = vpop.f32.mrb[191].mxu1  ;;  %v4012_v11 = vpop.f32.mrb[193].mxu0 }
 0x289   : > { %v13676_v17 = vadd.f32 %v3839_v31, %v3569_v32  ;;  %v4187_v58 = vadd.f32 %v4012_v11, %v13548_v7  ;;  %v10718_v52 = vpop.f32.mrb[194].mxu0 }
 0x28a   : > { %v4189_v16 = vadd.f32 %v10718_v52, %v13553_v62  ;;  %v4015_v41 = vpop.f32.mrb[195].mxu0 }
 0x28b   : > { %v13686_v6 = vadd.f32 %v13681_v53, %v4187_v58  ;;  %v4188_v2 = vadd.f32 %v4015_v41, %v13555_v46 }
 0x28c   : > { %v13690_v5 = vadd.f32 %v13681_v53, %v4189_v16 }
 0x28d   : > { %v9092_v36 = vmul.f32 -1.442695, %v13686_v6  ;;  %v13694_v4 = vadd.f32 %v13681_v53, %v4188_v2 }
 0x28e   : > { %v9094_v47 = vmul.f32 -1.442695, %v13690_v5 }
 0x28f   : > { %11589 = vpow2.f32 %v9092_v36  ;;  %v9093_v7 = vmul.f32 -1.442695, %v13694_v4  ;;  %v10721_v62 = vpop.f32.mrb[196].mxu0 }
 0x290   : > { %11591 = vpow2.f32 %v9094_v47  ;;  %v4191_v46 = vadd.f32 %v10721_v62, %v13566_v27  ;;  %v4027_v61 = vpop.f32.mrb[197].mxu0 }
 0x291   : > { %11593 = vpow2.f32 %v9093_v7  ;;  %v4190_v38 = vadd.f32 %v4027_v61, %v13571_v60  ;;  %v10722_v51 = vpop.f32.mrb[198].mxu0 }
 0x292   : > { %v13707_v13 = vadd.f32 %v13681_v53, %v4191_v46  ;;  %v4192_v49 = vadd.f32 %v10722_v51, %v13576_v8  ;;  %v4030_v33 = vpop.f32.mrb[199].mxu0 }
 0x293   : > { %v13711_v56 = vadd.f32 %v13681_v53, %v4190_v38 }
 0x294   : > { %v9096_v25 = vmul.f32 -1.442695, %v13707_v13  ;;  %v13715_v27 = vadd.f32 %v13681_v53, %v4192_v49 }
 0x295   : > { %v9095_v10 = vmul.f32 -1.442695, %v13711_v56 }
 0x296   : > { %11595 = vpow2.f32 %v9096_v25  ;;  %v9097_v60 = vmul.f32 -1.442695, %v13715_v27 }
 0x297   : > { %11597 = vpow2.f32 %v9095_v10  ;;  %v10725_v44 = vpop.f32.mrb[200].mxu0 }
 0x298   : > { %11599 = vpow2.f32 %v9097_v60  ;;  %v4194_v32 = vadd.f32 %v10725_v44, %v13589_v12  ;;  %v4042_v8 = vpop.f32.mrb[201].mxu0 }
 0x299   : > { %v11590_v20 = vpop.eup %11589  ;;  %v10726_v28 = vpop.f32.mrb[202].mxu0 }
 0x29a   : > { %v11592_v31 = vpop.eup %11591  ;;  %v4354_v21 = vadd.f32 1.0, %v11590_v20  ;;  %v13721_v11 = vadd.f32 %v13681_v53, %v4194_v32  ;;  %v4044_v58 = vpop.f32.mrb[203].mxu0 }
 0x29b   : > { %v11594_v52 = vpop.eup %11593  ;;  %v4356_v16 = vadd.f32 1.0, %v11592_v31  ;;  %v4193_v41 = vadd.f32 %v4044_v58, %v13594_v30 }
 0x29c   : > { %11601 = vrcp.f32 %v4354_v21  ;;  %v4355_v2 = vadd.f32 1.0, %v11594_v52  ;;  %v9099_v36 = vmul.f32 -1.442695, %v13721_v11 }
 0x29d   : > { %11603 = vrcp.f32 %v4356_v16  ;;  %v13726_v12 = vadd.f32 %v13681_v53, %v4193_v41 }
 0x29e   : > { %11605 = vrcp.f32 %v4355_v2 }
 0x29f   : > { %11607 = vpow2.f32 %v9099_v36  ;;  %v9098_v47 = vmul.f32 -1.442695, %v13726_v12  ;;  %v10729_v7 = vpop.f32.mrb[204].mxu0 }
 0x2a0   : > { %v11596_v62 = vpop.eup %11595  ;;  %v4056_v46 = vpop.f32.mrb[205].mxu0 }
 0x2a1   : > { %v11598_v61 = vpop.eup %11597  ;;  %v4358_v38 = vadd.f32 1.0, %v11596_v62  ;;  %11609 = vpow2.f32 %v9098_v47  ;;  %v4195_v30 = vadd.f32 %v4056_v46, %v13603_v50  ;;  %v10730_v51 = vpop.f32.mrb[206].mxu0 }
 0x2a2   : > { %v11600_v49 = vpop.eup %11599  ;;  %v4357_v33 = vadd.f32 1.0, %v11598_v61  ;;  %v4197_v25 = vadd.f32 %v10730_v51, %v13605_v39  ;;  %v4059_v10 = vpop.f32.mrb[207].mxu0 }
 0x2a3   : > { %11611 = vrcp.f32 %v4358_v38  ;;  %v4359_v60 = vadd.f32 1.0, %v11600_v49  ;;  %v13732_v44 = vadd.f32 %v13681_v53, %v4195_v30  ;;  %v4196_v32 = vadd.f32 %v4059_v10, %v13607_v23 }
 0x2a4   : > { %11613 = vrcp.f32 %v4357_v33  ;;  %v13736_v8 = vadd.f32 %v13681_v53, %v4197_v25 }
 0x2a5   : > { %11615 = vrcp.f32 %v4359_v60  ;;  %v9100_v50 = vmul.f32 -1.442695, %v13732_v44  ;;  %v13740_v20 = vadd.f32 %v13681_v53, %v4196_v32 }
 0x2a6   : > { %v11602_v28 = vpop.eup %11601  ;;  %v9102_v39 = vmul.f32 -1.442695, %v13736_v8 }
 0x2a7   : > { %v11604_v31 = vpop.eup %11603  ;;  %11617 = vpow2.f32 %v9100_v50  ;;  %v9101_v21 = vmul.f32 -1.442695, %v13740_v20  ;;  %v10733_v58 = vpop.f32.mrb[208].mxu0  ;;  %v4450_v36 = vmul.f32 %v11602_v28, %v13686_v6 }
 0x2a8   : > { %v11606_v52 = vpop.eup %11605  ;;  %v4452_v23 = vmul.f32 %v11604_v31, %v13690_v5  ;;  %11619 = vpow2.f32 %v9102_v39  ;;  %v4199_v16 = vadd.f32 %v10733_v58, %v13612_v19  ;;  %v4071_v41 = vpop.f32.mrb[209].mxu0 }
 0x2a9   : > { %v11608_v2 = vpop.eup %11607  ;;  %v4451_v47 = vmul.f32 %v11606_v52, %v13694_v4  ;;  %11621 = vpow2.f32 %v9101_v21  ;;  %v4198_v7 = vadd.f32 %v4071_v41, %v13614_v26  ;;  %v10734_v62 = vpop.f32.mrb[210].mxu0 }
 0x2aa   : > { %v9487_v46 = vpack.c.bf16 %v4452_v23, %v4452_v23  ;;  %v4361_v61 = vadd.f32 1.0, %v11608_v2  ;;  %v13750_v38 = vadd.f32 %v13681_v53, %v4199_v16  ;;  %v4200_v5 = vadd.f32 %v10734_v62, %v13616_v57  ;;  %v4074_v30 = vpop.f32.mrb[211].mxu0  ;;  %v4677_v16 = vld [vmem:[#allocation3 + $0x20] sm:$0xf] }
 0x2ab   : > { %v11610_v51 = vpop.eup %11609  ;;  %v9560_v19 = vpack.c.bf16 %v4451_v47, %v4450_v36  ;;  %v13754_v49 = vadd.f32 %v13681_v53, %v4198_v7 }
 0x2ac   : > { %4641 = vst [vmem:[#allocation3 + $0x24] sm:$0xf] %v9487_v46  ;;  %11623 = vrcp.f32 %v4361_v61  ;;  %v4360_v6 = vadd.f32 1.0, %v11610_v51  ;;  %v9104_v4 = vmul.f32 -1.442695, %v13750_v38  ;;  %v13758_v26 = vadd.f32 %v13681_v53, %v4200_v5 }
 0x2ad   : > { %v11612_v33 = vpop.eup %11611  ;;  %9561 = vst [vmem:[#allocation3 + $0x18] sm:$0xff] %v9560_v19   ;;  %v9103_v25 = vmul.f32 -1.442695, %v13754_v49 }
 0x2ae   : > { %v11614_v10 = vpop.eup %11613  ;;  %11625 = vrcp.f32 %v4360_v6  ;;  %v9105_v57 = vmul.f32 -1.442695, %v13758_v26  ;;  %v4454_v28 = vmul.f32 %v11612_v33, %v13707_v13 }
 0x2af   : > { %v11616_v60 = vpop.eup %11615  ;;  %v4453_v32 = vmul.f32 %v11614_v10, %v13711_v56  ;;  %11627 = vpow2.f32 %v9104_v4  ;;  %v10737_v50 = vpop.f32.mrb[212].mxu0 }
 0x2b0   : > { %v4455_v39 = vmul.f32 %v11616_v60, %v13715_v27  ;;  %11629 = vpow2.f32 %v9103_v25  ;;  %v4202_v31 = vadd.f32 %v10737_v50, %v13620_v35  ;;  %v4086_v21 = vpop.f32.mrb[213].mxu0 }
 0x2b1   : > { %v11618_v58 = vpop.eup %11617  ;;  %v9488_v52 = vpack.c.bf16 %v4453_v32, %v4453_v32  ;;  %11631 = vpow2.f32 %v9105_v57  ;;  %v10738_v23 = vpop.f32.mrb[214].mxu0 }
 0x2b2   : > { %v11620_v41 = vpop.eup %11619  ;;  %v9565_v2 = vpack.c.bf16 %v4455_v39, %v4454_v28  ;;  %v4362_v36 = vadd.f32 1.0, %v11618_v58  ;;  %v13767_v56 = vadd.f32 %v13681_v53, %v4202_v31  ;;  %v4088_v47 = vpop.f32.mrb[215].mxu0  ;;  %v11491_v23 = vld [vmem:[%s15550_s3 + $0x90] sm:$0xff]  }
 0x2b3   : > { %v11622_v7 = vpop.eup %11621  ;;  %4642 = vst [vmem:[#allocation3 + $0x28] sm:$0xf] %v9488_v52  ;;  %v4364_v13 = vadd.f32 1.0, %v11620_v41  ;;  %v4201_v27 = vadd.f32 %v4088_v47, %v13627_v42  ;;  %v4678_v62 = vld [vmem:[#allocation3 + $0x24] sm:$0xf]  ;;  %v11484_v42 = vld [vmem:[%s15550_s3 + $0x88] sm:$0xff]  }
 0x2b4   : > { %9604 = vst [vmem:[#allocation3 + $0x30] sm:$0xff] %v9565_v2   ;;  %11633 = vrcp.f32 %v4362_v36  ;;  %v4363_v35 = vadd.f32 1.0, %v11622_v7  ;;  %v9107_v46 = vmul.f32 -1.442695, %v13767_v56  ;;  %v4675_v61 = vld [vmem:[#allocation3 + $0x18] sm:$0xf]  ;;  %v13771_v5 = vcombine.low %v4677_v16, %v4678_v62 }
 0x2b5   : > { %11635 = vrcp.f32 %v4364_v13  ;;  %v13774_v30 = vadd.f32 %v13681_v53, %v4201_v27  ;;  %v13777_v51 = vcombine.low %v13578_v9, %v4675_v61  ;;  %v4676_v19 = vld [vmem:[#allocation3 + $0x1c] sm:$0xf] }
 0x2b6   : > { %v11624_v6 = vpop.eup %11623  ;;  %11637 = vrcp.f32 %v4363_v35  ;;  %v13782_v4 = vcombine.low %v4676_v19, %v4677_v16  ;;  %v13784_v33 = vcombine.low %v4675_v61, %v4676_v19  ;;  %v15686_v28 = vshrl.u32 %v13771_v5, 16 }
 0x2b7   : > { %v4457_v25 = vmul.f32 %v11624_v6, %v13721_v11  ;;  %11639 = vpow2.f32 %v9107_v46  ;;  %v9106_v10 = vmul.f32 -1.442695, %v13774_v30  ;;  %v10741_v57 = vpop.f32.mrb[216].mxu0  ;;  %10780 = vmatmul.mubr.bf16.vlgmr.msra.gmra.mrb[192].mxu1 %v13777_v51  ;;  %v15696_v11 = vshll.u32 %v13771_v5, 16 }
 0x2b8   : > { %v11626_v9 = vpop.eup %11625  ;;  %v4100_v60 = vpop.f32.mrb[217].mxu0  ;;  %10783 = vmatprep.mubr.bf16.mxu1 %v13782_v4  ;;  %v15704_v32 = vshrl.u32 %v13784_v33, 16  ;;  %v15705_v50 = vshll.u32 %v13784_v33, 16  ;;  %10892 = vmatpush3.bf16.msra.mxu1 %v13625_v15  ;;  %v11523_v57 = vld [vmem:[%s15550_s3 + $0xc8] sm:$0xff]  }
 0x2b9   : > { %v11628_v39 = vpop.eup %11627  ;;  %v9492_v31 = vpack.c.bf16 %v4457_v25, %v4457_v25  ;;  %v4456_v21 = vmul.f32 %v11626_v9, %v13726_v12  ;;  %11641 = vpow2.f32 %v9106_v10  ;;  %v4203_v58 = vadd.f32 %v4100_v60, %v13633_v22  ;;  %v10742_v52 = vpop.f32.mrb[218].mxu0  ;;  %10893 = vmatprep.subr.bf16.mxu1 %v11484_v42  ;;  %v4680_v10 = vld [vmem:[#allocation3 + $0x2c] sm:$0xf] }
 0x2ba   : > { %v11630_v16 = vpop.eup %11629  ;;  %v4366_v41 = vadd.f32 1.0, %v11628_v39  ;;  %v4205_v15 = vadd.f32 %v10742_v52, %v13635_v18  ;;  %v4103_v2 = vpop.f32.mrb[219].mxu0  ;;  %v5208_v36 = vrot.slane %v15704_v32, 3  ;;  %v5211_v12 = vrot.slane %v15705_v50, 4  ;;  %v4679_v47 = vld [vmem:[#allocation3 + $0x28] sm:$0xf] }
 0x2bb   : > { %v11632_v7 = vpop.eup %11631  ;;  %4646 = vst [vmem:[#allocation3 + $0x40] sm:$0xf] %v9492_v31  ;;  %v9491_v22 = vpack.c.bf16 %v4456_v21, %v4456_v21  ;;  %v4365_v13 = vadd.f32 1.0, %v11630_v16  ;;  %v13806_v27 = vadd.f32 %v13681_v53, %v4203_v58  ;;  %v4204_v35 = vadd.f32 %v4103_v2, %v13637_v43  ;;  %v11498_v43 = vld [vmem:[%s15550_s3 + $0x98] sm:$0xff]   ;;  %v4681_v39 = vld [vmem:[#allocation3 + $0x30] sm:$0xf] }
 0x2bc   : > { %11643 = vrcp.f32 %v4366_v41  ;;  %v4367_v46 = vadd.f32 1.0, %v11632_v7  ;;  %v13810_v18 = vadd.f32 %v13681_v53, %v4205_v15  ;;  %v5212_v61 = vor.u32 %v5211_v12, %v5208_v36  ;;  %10894 = vmatpush3.bf16.msra.mxu1 %v11484_v42  ;;  %v4704_v32 = vld [vmem:[#allocation3 + $0x8c] sm:$0xf] }
 0x2bd   : > { %4645 = vst [vmem:[#allocation3 + $0x3c] sm:$0xf] %v9491_v22  ;;  %11645 = vrcp.f32 %v4365_v13  ;;  %v9108_v19 = vmul.f32 -1.442695, %v13806_v27  ;;  %v13814_v6 = vadd.f32 %v13681_v53, %v4204_v35  ;;  %v13816_v25 = vcombine.low %v4678_v62, %v4679_v47  ;;  %10895 = vmatprep.subr.bf16.mxu1 %v11491_v23 }
 0x2be   : > { %v11634_v42 = vpop.eup %11633  ;;  %11647 = vrcp.f32 %v4367_v46  ;;  %v9110_v9 = vmul.f32 -1.442695, %v13810_v18  ;;  %v5213_v60 = vsel %vm997_vm1, %v13596_v37, %v5212_v61  ;;  %v5217_v62 = vrot.slane %v15686_v28, 3 }
 0x2bf   : > { %16010 = vst [vmem:[#allocation43_spill] sm:$0xff] %v13816_v25  ;;  %v11636_v31 = vpop.eup %11635  ;;  %v4458_v21 = vmul.f32 %v11634_v42, %v13732_v44  ;;  %11649 = vpow2.f32 %v9108_v19  ;;  %v9109_v58 = vmul.f32 -1.442695, %v13814_v6  ;;  %10844 = vmatmul.mubr.bf16.vlgmr.msra.gmra.mrb[240].mxu0 %v5213_v60  ;;  %v10745_v52 = vpop.f32.mrb[220].mxu0  ;;  %10784 = vmatmul.mubr.bf16.gmra.mrb[196].mxu1 %v13816_v25  ;;  %v5220_v15 = vrot.slane %v15696_v11, 4 }
 0x2c0   : > { %v11638_v16 = vpop.eup %11637  ;;  %v4460_v41 = vmul.f32 %v11636_v31, %v13736_v8  ;;  %11651 = vpow2.f32 %v9110_v9  ;;  %v4207_v37 = vadd.f32 %v10745_v52, %v13642_v40  ;;  %v4115_v2 = vpop.f32.mrb[221].mxu0  ;;  %10896 = vmatpush3.bf16.msra.mxu1 %v11491_v23  ;;  %10956 = vmatpush3.bf16.msra.mxu0 %v13701_v45  ;;  %v13839_v7 = vcombine.low %v4680_v10, %v4681_v39  ;;  %v11505_v40 = vld [vmem:[%s15550_s3 + $0xa0] sm:$0xff]   ;;  %v13859_v31 = vld [vmem:[#allocation3 + $0x38] sm:$0xf]  ;;  %v4695_v11 = vld [vmem:[#allocation3 + $0x68] sm:$0xf] }
 0x2c1   : > { %v11640_v44 = vpop.eup %11639  ;;  %v4459_v36 = vmul.f32 %v11638_v16, %v13740_v20  ;;  %11653 = vpow2.f32 %v9109_v58  ;;  %v4206_v12 = vadd.f32 %v4115_v2, %v13644_v14  ;;  %v10746_v22 = vpop.f32.mrb[222].mxu0  ;;  %10897 = vmatprep.subr.bf16.mxu1 %v11498_v43  ;;  %10957 = vmatprep.subr.bf16.mxu0 %v11523_v57  ;;  %v13847_v45 = vor.u32 %v5220_v15, %v5217_v62  ;;  %v11524_v14 = vld [vmem:[%s15550_s3 + $0xd0] sm:$0xff]   ;;  %v4682_v60 = vld [vmem:[#allocation3 + $0x34] sm:$0xf]  ;;  %v11512_v15 = vld [vmem:[%s15550_s3 + $0xa8] sm:$0xff]  }
 0x2c2   : > { %16011 = vst [vmem:[#allocation45_spill] sm:$0xff] %v13839_v7  ;;  %v9495_v8 = vpack.c.bf16 %v4460_v41, %v4460_v41  ;;  %v4369_v13 = vadd.f32 1.0, %v11640_v44  ;;  %v13845_v23 = vadd.f32 %v13681_v53, %v4207_v37  ;;  %v4118_v20 = vpop.f32.mrb[223].mxu0  ;;  %10787 = vmatprep.mubr.bf16.mxu1 %v13839_v7  ;;  %v13856_v42 = vcombine.low %v4679_v47, %v4680_v10  ;;  %v13872_v41 = vld [vmem:[#allocation3 + $0x40] sm:$0xf]  ;;  %v11529_v2 = vld [vmem:[%s15550_s3 + $0xd8] sm:$0xff]  }
 0x2c3   : > { %v11642_v35 = vpop.eup %11641  ;;  %v9570_v46 = vpack.c.bf16 %v4459_v36, %v4458_v21  ;;  %v13853_v19 = vadd.f32 %v13681_v53, %v4206_v12  ;;  %v4208_v9 = vadd.f32 %v10746_v22, %v13646_v59  ;;  %v5222_v21 = vsel %vm997_vm1, %v5212_v61, %v13847_v45 }
 0x2c4   : > { %4649 = vst [vmem:[#allocation3 + $0x54] sm:$0xf] %v9495_v8  ;;  %11655 = vrcp.f32 %v4369_v13  ;;  %v4368_v62 = vadd.f32 1.0, %v11642_v35  ;;  %v9112_v58 = vmul.f32 -1.442695, %v13845_v23  ;;  %10898 = vmatpush3.bf16.msra.mxu1 %v11498_v43  ;;  %10958 = vmatpush3.bf16.msra.mxu0 %v11523_v57  ;;  %v15688_v10 = vshrl.u32 %v13856_v42, 16 }
 0x2c5   : > { %v13864_v52 = vld [vmem:[#allocation3 + $0x3c] sm:$0xf]  ;;  %9605 = vst [vmem:[#allocation3 + $0x48] sm:$0xff] %v9570_v46   ;;  %10847 = vmatprep.mubr.bf16.mxu0 %v5222_v21  ;;  %v9111_v47 = vmul.f32 -1.442695, %v13853_v19  ;;  %v13868_v59 = vadd.f32 %v13681_v53, %v4208_v9  ;;  %v15690_v16 = vshll.u32 %v13856_v42, 16  ;;  %10899 = vmatprep.subr.bf16.mxu1 %v11505_v40  ;;  %v13875_v61 = vcombine.low %v4682_v60, %v13859_v31 }
 0x2c6   : > { %v11644_v37 = vpop.eup %11643  ;;  %11657 = vrcp.f32 %v4368_v62  ;;  %v13877_v43 = vcombine.low %v4681_v39, %v4682_v60  ;;  %v13881_v57 = vcombine.low %v13864_v52, %v13872_v41  ;;  %10959 = vmatprep.subr.bf16.mxu0 %v11524_v14  ;;  %v5226_v39 = vrot.slane %v15688_v10, 3 }
 0x2c7   : > { %16012 = vst [vmem:[#allocation48_spill] sm:$0xff] %v13875_v61  ;;  %v11646_v44 = vpop.eup %11645  ;;  %11659 = vpow2.f32 %v9112_v58  ;;  %v9113_v36 = vmul.f32 -1.442695, %v13868_v59  ;;  %v10749_v12 = vpop.f32.mrb[224].mxu0  ;;  %v5229_v13 = vrot.slane %v15690_v16, 4  ;;  %10788 = vmatmul.mubr.bf16.gmra.mrb[200].mxu1 %v13875_v61  ;;  %v4462_v46 = vmul.f32 %v11644_v37, %v13750_v38  ;;  %v11520_v38 = vld [vmem:[%s15550_s3 + $0xb0] sm:$0xff]  }
 0x2c8   : > { %16013 = vst [vmem:[#allocation49_spill] sm:$0xff] %v13881_v57  ;;  %v11648_v22 = vpop.eup %11647  ;;  %v4461_v8 = vmul.f32 %v11646_v44, %v13754_v49  ;;  %11661 = vpow2.f32 %v9111_v47  ;;  %v4130_v20 = vpop.f32.mrb[225].mxu0  ;;  %10960 = vmatpush3.bf16.msra.mxu0 %v11524_v14  ;;  %v4210_v60 = vadd.f32 %v10749_v12, %v13650_v48  ;;  %10791 = vmatprep.mubr.bf16.mxu1 %v13881_v57  ;;  %v15684_v44 = vshrl.u32 %v13877_v43, 16  ;;  %v11531_v48 = vld [vmem:[%s15550_s3 + $0xe0] sm:$0xff]  }
 0x2c9   : > { %v11650_v35 = vpop.eup %11649  ;;  %v4463_v9 = vmul.f32 %v11648_v22, %v13758_v26  ;;  %11663 = vpow2.f32 %v9113_v36  ;;  %v10750_v62 = vpop.f32.mrb[226].mxu0  ;;  %10900 = vmatpush3.bf16.msra.mxu1 %v11505_v40  ;;  %v5230_v47 = vor.u32 %v5229_v13, %v5226_v39  ;;  %10961 = vmatprep.subr.bf16.mxu0 %v11529_v2  ;;  %v15687_v36 = vshll.u32 %v13877_v43, 16  ;;  %v4686_v39 = vld [vmem:[#allocation3 + $0x44] sm:$0xf] }
 0x2ca   : > { %v11652_v49 = vpop.eup %11651  ;;  %v9496_v58 = vpack.c.bf16 %v4461_v8, %v4461_v8  ;;  %v4370_v21 = vadd.f32 1.0, %v11650_v35  ;;  %v4132_v20 = vpop.f32.mrb[227].mxu0  ;;  %10901 = vmatprep.subr.bf16.mxu1 %v11512_v15  ;;  %v13908_v37 = vadd.f32 %v13681_v53, %v4210_v60  ;;  %v5235_v8 = vrot.slane %v15684_v44, 3 }
 0x2cb   : > { %v11654_v26 = vpop.eup %11653  ;;  %v9575_v14 = vpack.c.bf16 %v4463_v9, %v4462_v46  ;;  %v4372_v40 = vadd.f32 1.0, %v11652_v49  ;;  %v13913_v22 = vsel %vm997_vm1, %v13847_v45, %v5230_v47  ;;  %v5238_v46 = vrot.slane %v15687_v36, 4  ;;  %v11535_v45 = vld [vmem:[%s15550_s3 + $0xe8] sm:$0xff]  }
 0x2cc   : > { %4650 = vst [vmem:[#allocation3 + $0x58] sm:$0xf] %v9496_v58  ;;  %11665 = vrcp.f32 %v4370_v21  ;;  %v4371_v12 = vadd.f32 1.0, %v11654_v26  ;;  %16014 = vst [vmem:[#allocation52_spill] sm:$0xff] %v13913_v22  ;;  %v13917_v13 = vld [vmem:[#allocation3 + $0x48] sm:$0xf]  ;;  %10962 = vmatpush3.bf16.msra.mxu0 %v11529_v2  ;;  %v13925_v9 = vcombine.low %v13859_v31, %v13864_v52  ;;  %v4209_v2 = vadd.f32 %v4132_v20, %v13652_v34 }
 0x2cd   : > { %9606 = vst [vmem:[#allocation3 + $0x60] sm:$0xff] %v9575_v14   ;;  %11667 = vrcp.f32 %v4372_v40  ;;  %10848 = vmatmul.mubr.bf16.gmra.mrb[244].mxu0 %v13913_v22  ;;  %v9115_v35 = vmul.f32 -1.442695, %v13908_v37  ;;  %10902 = vmatpush3.bf16.msra.mxu1 %v11512_v15  ;;  %v13932_v62 = vcombine.low %v4686_v39, %v13917_v13  ;;  %v13935_v49 = vcombine.low %v13872_v41, %v4686_v39  ;;  %v11530_v31 = vld [vmem:[%s15550_s3 + $0xb8] sm:$0xff]   ;;  %v13948_v40 = vld [vmem:[#allocation3 + $0x50] sm:$0xf] }
 0x2ce   : > { %v11656_v60 = vpop.eup %11655  ;;  %11669 = vrcp.f32 %v4371_v12  ;;  %10903 = vmatprep.subr.bf16.mxu1 %v11520_v38  ;;  %10963 = vmatprep.subr.bf16.mxu0 %v11531_v48  ;;  %v5239_v15 = vor.u32 %v5238_v46, %v5235_v8  ;;  %v15685_v58 = vshrl.u32 %v13925_v9, 16  ;;  %v13943_v20 = vadd.f32 %v13681_v53, %v4209_v2  ;;  %v4688_v46 = vld [vmem:[#allocation3 + $0x4c] sm:$0xf]  ;;  %v11536_v2 = vld [vmem:[%s15550_s3 + $0xf0] sm:$0xff]  }
 0x2cf   : > { %16015 = vst [vmem:[#allocation54_spill] sm:$0xff] %v13932_v62  ;;  %v4465_v52 = vmul.f32 %v11656_v60, %v13767_v56  ;;  %11671 = vpow2.f32 %v9115_v35  ;;  %v10753_v21 = vpop.f32.mrb[228].mxu0  ;;  %v15689_v41 = vshll.u32 %v13925_v9, 16  ;;  %10792 = vmatmul.mubr.bf16.gmra.mrb[204].mxu1 %v13932_v62  ;;  %v15691_v26 = vshrl.u32 %v13935_v49, 16 }
 0x2d0   : > { %v11658_v34 = vpop.eup %11657  ;;  %v4144_v14 = vpop.f32.mrb[229].mxu0  ;;  %10964 = vmatpush3.bf16.msra.mxu0 %v11531_v48  ;;  %v13952_v8 = vsel %vm997_vm1, %v5230_v47, %v5239_v15  ;;  %v5244_v35 = vrot.slane %v15685_v58, 3  ;;  %v15694_v28 = vshll.u32 %v13935_v49, 16 }
 0x2d1   : > { %v11660_v56 = vpop.eup %11659  ;;  %v9500_v39 = vpack.c.bf16 %v4465_v52, %v4465_v52  ;;  %v4464_v12 = vmul.f32 %v11658_v34, %v13774_v30  ;;  %16016 = vst [vmem:[#allocation55_spill] sm:$0xff] %v13952_v8  ;;  %v10754_v60 = vpop.f32.mrb[230].mxu0  ;;  %10904 = vmatpush3.bf16.msra.mxu1 %v11520_v38  ;;  %10965 = vmatprep.subr.bf16.mxu0 %v11535_v45  ;;  %v9114_v30 = vmul.f32 -1.442695, %v13943_v20  ;;  %v5247_v47 = vrot.slane %v15689_v41, 4  ;;  %v13966_v38 = vld [vmem:[%s15550_s3 + $0x100] sm:$0xff]  }
 0x2d2   : > { %v11662_v21 = vpop.eup %11661  ;;  %v4374_v48 = vadd.f32 1.0, %v11660_v56  ;;  %10851 = vmatprep.mubr.bf16.mxu0 %v13952_v8  ;;  %v4147_v52 = vpop.f32.mrb[231].mxu0  ;;  %10905 = vmatprep.subr.bf16.mxu1 %v11530_v31  ;;  %v5253_v56 = vrot.slane %v15691_v26, 3  ;;  %v4211_v41 = vadd.f32 %v4144_v14, %v13657_v1  ;;  %v5256_v16 = vrot.slane %v15694_v28, 4  ;;  %v4713_v8 = vld [vmem:[#allocation3 + $0xb0] sm:$0xf] }
 0x2d3   : > { %v11664_v34 = vpop.eup %11663  ;;  %4654 = vst [vmem:[#allocation3 + $0x70] sm:$0xf] %v9500_v39  ;;  %v9499_v44 = vpack.c.bf16 %v4464_v12, %v4464_v12  ;;  %v4373_v58 = vadd.f32 1.0, %v11662_v21  ;;  %v5248_v10 = vor.u32 %v5247_v47, %v5244_v35  ;;  %v13975_v39 = vcombine.low %v4688_v46, %v13948_v40  ;;  %v11538_v35 = vld [vmem:[%s15550_s3 + $0xf8] sm:$0xff]   ;;  %v4691_v47 = vld [vmem:[#allocation3 + $0x58] sm:$0xf] }
 0x2d4   : > { %11673 = vrcp.f32 %v4374_v48  ;;  %v4375_v36 = vadd.f32 1.0, %v11664_v34  ;;  %10966 = vmatpush3.bf16.msra.mxu0 %v11535_v45  ;;  %v13978_v12 = vcombine.low %v13917_v13, %v4688_v46  ;;  %v4213_v45 = vadd.f32 %v10754_v60, %v13659_v54  ;;  %v14018_v26 = vld [vmem:[#allocation3 + $0x60] sm:$0xf] }
 0x2d5   : > { %4653 = vst [vmem:[#allocation3 + $0x6c] sm:$0xf] %v9499_v44  ;;  %11675 = vrcp.f32 %v4373_v58  ;;  %16017 = vst [vmem:[#allocation18_spill] sm:$0xff] %v13975_v39  ;;  %10906 = vmatpush3.bf16.msra.mxu1 %v11530_v31  ;;  %10967 = vmatprep.subr.bf16.mxu0 %v11536_v2  ;;  %v13984_v1 = vsel %vm997_vm1, %v5239_v15, %v5248_v10  ;;  %v13987_v44 = vadd.f32 %v13681_v53, %v4211_v41 }
 0x2d6   : > { %v11666_v21 = vpop.eup %11665  ;;  %11677 = vrcp.f32 %v4375_v36  ;;  %16018 = vst [vmem:[#allocation19_spill] sm:$0xff] %v13984_v1  ;;  %11019 = vmatprep.subr.bf16.mxu1 %v13966_v38  ;;  %10852 = vmatmul.mubr.bf16.gmra.mrb[248].mxu0 %v13984_v1  ;;  %v5257_v58 = vor.u32 %v5256_v16, %v5253_v56  ;;  %v4212_v36 = vadd.f32 %v4147_v52, %v13661_v55  ;;  %v15692_v60 = vshrl.u32 %v13978_v12, 16  ;;  %v4692_v52 = vld [vmem:[#allocation3 + $0x5c] sm:$0xf] }
 0x2d7   : > { %v11668_v13 = vpop.eup %11667  ;;  %v4466_v31 = vmul.f32 %v11666_v21, %v13806_v27  ;;  %11679 = vpow2.f32 %v9114_v30  ;;  %10795 = vmatprep.mubr.bf16.mxu1 %v13975_v39  ;;  %v10757_v15 = vpop.f32.mrb[232].mxu0  ;;  %v9116_v46 = vmul.f32 -1.442695, %v13987_v44  ;;  %v13998_v54 = vadd.f32 %v13681_v53, %v4213_v45 }
 0x2d8   : > { %v11670_v14 = vpop.eup %11669  ;;  %v4468_v41 = vmul.f32 %v11668_v13, %v13810_v18  ;;  %v4159_v27 = vpop.f32.mrb[233].mxu0  ;;  %10968 = vmatpush3.bf16.msra.mxu0 %v11536_v2  ;;  %v14003_v30 = vsel %vm997_vm1, %v5248_v10, %v5257_v58  ;;  %v14006_v55 = vadd.f32 %v13681_v53, %v4212_v36  ;;  %v15693_v18 = vshll.u32 %v13978_v12, 16  ;;  %v4690_v2 = vld [vmem:[#allocation3 + $0x54] sm:$0xf] }
 0x2d9   : > { %v11672_v48 = vpop.eup %11671  ;;  %v4467_v16 = vmul.f32 %v11670_v14, %v13814_v6  ;;  %16019 = vst [vmem:[#allocation23_spill] sm:$0xff] %v14003_v30  ;;  %v14009_v34 = vpop.f32.mrb[234].mxu0  ;;  %10969 = vmatprep.subr.bf16.mxu0 %v11538_v35  ;;  %10855 = vmatprep.mubr.bf16.mxu0 %v14003_v30  ;;  %11681 = vpow2.f32 %v9116_v46  ;;  %v9118_v6 = vmul.f32 -1.442695, %v13998_v54  ;;  %v5262_v36 = vrot.slane %v15692_v60, 3 }
 0x2da   : > { %v9503_v56 = vpack.c.bf16 %v4468_v41, %v4468_v41  ;;  %v4377_v21 = vadd.f32 1.0, %v11672_v48  ;;  %v4162_v10 = vpop.f32.mrb[235].mxu0  ;;  %v9117_v13 = vmul.f32 -1.442695, %v14006_v55  ;;  %v5265_v14 = vrot.slane %v15693_v18, 4 }
 0x2db   : > { %v9580_v45 = vpack.c.bf16 %v4467_v16, %v4466_v31  ;;  %v4215_v41 = vadd.f32 %v10757_v15, %v13666_v0  ;;  %v14021_v46 = vcombine.low %v4690_v2, %v4691_v47  ;;  %v14024_v48 = vcombine.low %v13948_v40, %v4690_v2 }
 0x2dc   : > { %4657 = vst [vmem:[#allocation3 + $0x84] sm:$0xf] %v9503_v56  ;;  %11683 = vrcp.f32 %v4377_v21  ;;  %10970 = vmatpush3.bf16.msra.mxu0 %v11538_v35  ;;  %v5266_v31 = vor.u32 %v5265_v14, %v5262_v36  ;;  %v4214_v16 = vadd.f32 %v4159_v27, %v13668_v63  ;;  %v14032_v0 = vcombine.low %v4692_v52, %v14018_v26 }
 0x2dd   : > { %16020 = vst [vmem:[#allocation26_spill] sm:$0xff] %v14021_v46  ;;  %9607 = vst [vmem:[#allocation3 + $0x78] sm:$0xff] %v9580_v45   ;;  %11685 = vpow2.f32 %v9118_v6  ;;  %v14028_v60 = vadd.f32 %v13681_v53, %v4215_v41  ;;  %10796 = vmatmul.mubr.bf16.gmra.mrb[208].mxu1 %v14021_v46  ;;  %v14034_v15 = vcombine.low %v4691_v47, %v4692_v52  ;;  %v15695_v63 = vshrl.u32 %v14024_v48, 16 }
 0x2de   : > { %v11674_v10 = vpop.eup %11673  ;;  %11687 = vpow2.f32 %v9117_v13  ;;  %16021 = vst [vmem:[#allocation39_spill] sm:$0xff] %v14032_v0  ;;  %v14038_v40 = vsel %vm997_vm1, %v5257_v58, %v5266_v31  ;;  %v15697_v27 = vshll.u32 %v14024_v48, 16  ;;  %v14046_v47 = vadd.f32 %v13681_v53, %v4214_v16  ;;  %10799 = vmatprep.mubr.bf16.mxu1 %v14032_v0 }
 0x2df   : > { %v11676_v35 = vpop.eup %11675  ;;  %v4470_v56 = vmul.f32 %v11674_v10, %v13845_v23  ;;  %16022 = vst [vmem:[#allocation21_spill] sm:$0xff] %v14038_v40  ;;  %v10761_v21 = vpop.f32.mrb[236].mxu0  ;;  %10856 = vmatmul.mubr.bf16.gmra.mrb[252].mxu0 %v14038_v40  ;;  %v9120_v45 = vmul.f32 -1.442695, %v14028_v60  ;;  %v15700_v23 = vshrl.u32 %v14034_v15, 16  ;;  %v5271_v36 = vrot.slane %v15695_v63, 3 }
 0x2e0   : > { %v11678_v6 = vpop.eup %11677  ;;  %v4469_v2 = vmul.f32 %v11676_v35, %v13853_v19  ;;  %v4174_v58 = vpop.f32.mrb[237].mxu0  ;;  %v5274_v19 = vrot.slane %v15697_v27, 4  ;;  %v15701_v14 = vshll.u32 %v14034_v15, 16  ;;  %v9119_v35 = vmul.f32 -1.442695, %v14046_v47 }
 0x2e1   : > { %v11680_v52 = vpop.eup %11679  ;;  %v4471_v13 = vmul.f32 %v11678_v6, %v13868_v59  ;;  %v10762_v41 = vpop.f32.mrb[238].mxu0  ;;  %11689 = vpow2.f32 %v9120_v45  ;;  %v5280_v59 = vrot.slane %v15700_v23, 3  ;;  %v4694_v63 = vld [vmem:[#allocation3 + $0x64] sm:$0xf]  ;;  %v4696_v45 = vld [vmem:[#allocation3 + $0x6c] sm:$0xf] }
 0x2e2   : > { %v9504_v10 = vpack.c.bf16 %v4469_v2, %v4469_v2  ;;  %v4376_v16 = vadd.f32 1.0, %v11680_v52  ;;  %v4176_v18 = vpop.f32.mrb[239].mxu0  ;;  %v5275_v58 = vor.u32 %v5274_v19, %v5271_v36  ;;  %v5283_v6 = vrot.slane %v15701_v14, 4 }
 0x2e3   : > { %v9585_v28 = vpack.c.bf16 %v4471_v13, %v4470_v56  ;;  %v11682_v27 = vpop.eup %11681  ;;  %v4216_v2 = vadd.f32 %v14009_v34, %v13670_v3  ;;  %v4218_v41 = vadd.f32 %v10761_v21, %v13674_v24  ;;  %v14074_v3 = vcombine.low %v14018_v26, %v4694_v63 }
 0x2e4   : > { %4658 = vst [vmem:[#allocation3 + $0x88] sm:$0xf] %v9504_v10  ;;  %11691 = vrcp.f32 %v4376_v16  ;;  %v4378_v52 = vadd.f32 1.0, %v11682_v27  ;;  %v14064_v56 = vsel %vm997_vm1, %v5266_v31, %v5275_v58  ;;  %v5284_v13 = vor.u32 %v5283_v6, %v5280_v59 }
 0x2e5   : > { %9608 = vst [vmem:[#allocation3 + $0x90] sm:$0xff] %v9585_v28   ;;  %16023 = vst [vmem:[#allocation41_spill] sm:$0xff] %v14064_v56  ;;  %11693 = vpow2.f32 %v9119_v35  ;;  %10859 = vmatprep.mubr.bf16.mxu0 %v14064_v56  ;;  %v14068_v19 = vadd.f32 %v13681_v53, %v4216_v2  ;;  %v14071_v10 = vcombine.low %v4694_v63, %v4695_v11  ;;  %v4697_v28 = vld [vmem:[#allocation3 + $0x70] sm:$0xf]  ;;  %v15698_v26 = vshrl.u32 %v14074_v3, 16 }
 0x2e6   : > { %v11684_v36 = vpop.eup %11683  ;;  %11695 = vrcp.f32 %v4378_v52  ;;  %v14078_v27 = vsel %vm997_vm1, %v5275_v58, %v5284_v13  ;;  %v14080_v16 = vcombine.low %v4696_v45, %v4697_v28  ;;  %v14085_v24 = vadd.f32 %v13681_v53, %v4218_v41  ;;  %v4698_v2 = vld [vmem:[#allocation3 + $0x74] sm:$0xf]  ;;  %v4699_v52 = vld [vmem:[#allocation3 + $0x78] sm:$0xf] }
 0x2e7   : > { %16024 = vst [vmem:[#allocation42_spill] sm:$0xff] %v14071_v10  ;;  %v11686_v34 = vpop.eup %11685  ;;  %v4473_v31 = vmul.f32 %v11684_v36, %v13908_v37  ;;  %16025 = vst [vmem:[#allocation22_spill] sm:$0xff] %v14078_v27  ;;  %v9121_v6 = vmul.f32 -1.442695, %v14068_v19  ;;  %10860 = vmatmul.mubr.bf16.gmra.mrb[0].mxu0 %v14078_v27  ;;  %10800 = vmatmul.mubr.bf16.gmra.mrb[212].mxu1 %v14071_v10  ;;  %v15699_v21 = vshll.u32 %v14074_v3, 16  ;;  %v5289_v53 = vrot.slane %v15698_v26, 3 }
 0x2e8   : > { %16026 = vst [vmem:[#allocation44_spill] sm:$0xff] %v14080_v16  ;;  %v11688_v35 = vpop.eup %11687  ;;  %v4380_v59 = vadd.f32 1.0, %v11686_v34  ;;  %10803 = vmatprep.mubr.bf16.mxu1 %v14080_v16  ;;  %v14091_v58 = vcombine.low %v4695_v11, %v4696_v45  ;;  %v9123_v36 = vmul.f32 -1.442695, %v14085_v24  ;;  %v14103_v11 = vld [vmem:[%s15550_s3 + $0x140] sm:$0xff]  }
 0x2e9   : > { %v9508_v37 = vpack.c.bf16 %v4473_v31, %v4473_v31  ;;  %v4379_v63 = vadd.f32 1.0, %v11688_v35  ;;  %v5292_v41 = vrot.slane %v15699_v21, 4  ;;  %v4217_v35 = vadd.f32 %v4176_v18, %v13676_v17  ;;  %11083 = vmatprep.subr.bf16.mxu0 %v14103_v11  ;;  %v11846_v17 = vld [vmem:[%s15549_s2] ss:$0 sm:$0xff] }
 0x2ea   : > { %11697 = vrcp.f32 %v4380_v59  ;;  %v15702_v34 = vshrl.u32 %v14091_v58, 16  ;;  %v15703_v31 = vshll.u32 %v14091_v58, 16  ;;  %v14106_v59 = vcombine.low %v4698_v2, %v4699_v52 }
 0x2eb   : > { %4662 = vst [vmem:[#allocation3 + $0xa0] sm:$0xf] %v9508_v37  ;;  %11699 = vrcp.f32 %v4379_v63  ;;  %v11690_v45 = vpop.eup %11689  ;;  %v14108_v37 = vcombine.low %v4697_v28, %v4698_v2  ;;  %v5293_v26 = vor.u32 %v5292_v41, %v5289_v53  ;;  %v14118_v18 = vadd.f32 %v11846_v17, %v4217_v35  ;;  %v4701_v2 = vld [vmem:[#allocation3 + $0x80] sm:$0xf] }
 0x2ec   : > { %11701 = vpow2.f32 %v9121_v6  ;;  %16027 = vst [vmem:[#allocation46_spill] sm:$0xff] %v14106_v59  ;;  %v4382_v63 = vadd.f32 1.0, %v11690_v45  ;;  %v5298_v21 = vrot.slane %v15702_v34, 3  ;;  %v5301_v14 = vrot.slane %v15703_v31, 4  ;;  %v4700_v6 = vld [vmem:[#allocation3 + $0x7c] sm:$0xf] }
 0x2ed   : > { %11703 = vpow2.f32 %v9123_v36  ;;  %v15707_v28 = vshrl.u32 %v14108_v37, 16  ;;  %v14123_v41 = vsel %vm997_vm1, %v5284_v13, %v5293_v26  ;;  %v15708_v45 = vshll.u32 %v14108_v37, 16 }
 0x2ee   : > { %v11692_v23 = vpop.eup %11691  ;;  %11705 = vrcp.f32 %v4382_v63  ;;  %16028 = vst [vmem:[#allocation47_spill] sm:$0xff] %v14123_v41  ;;  %10863 = vmatprep.mubr.bf16.mxu0 %v14123_v41  ;;  %v9122_v31 = vmul.f32 -1.442695, %v14118_v18  ;;  %v5302_v35 = vor.u32 %v5301_v14, %v5298_v21  ;;  %v14133_v13 = vcombine.low %v4700_v6, %v4701_v2  ;;  %v4703_v41 = vld [vmem:[#allocation3 + $0x88] sm:$0xf] }
 0x2ef   : > { %v11694_v36 = vpop.eup %11693  ;;  %v4472_v53 = vmul.f32 %v11692_v23, %v13943_v20  ;;  %10804 = vmatmul.mubr.bf16.gmra.mrb[216].mxu1 %v14106_v59  ;;  %v5307_v17 = vrot.slane %v15707_v28, 3  ;;  %v5310_v23 = vrot.slane %v15708_v45, 4  ;;  %v14135_v63 = vcombine.low %v4699_v52, %v4700_v6  ;;  %v4705_v45 = vld [vmem:[#allocation3 + $0x90] sm:$0xf] }
 0x2f0   : > { %v4381_v34 = vadd.f32 1.0, %v11694_v36  ;;  %v11696_v50 = vpop.eup %11695  ;;  %16029 = vst [vmem:[#allocation50_spill] sm:$0xff] %v14133_v13  ;;  %v4702_v36 = vld [vmem:[#allocation3 + $0x84] sm:$0xf]  ;;  %v14138_v14 = vsel %vm997_vm1, %v5293_v26, %v5302_v35  ;;  %10807 = vmatprep.mubr.bf16.mxu1 %v14133_v13  ;;  %v14149_v26 = vcombine.low %v4703_v41, %v4704_v32 }
 0x2f1   : > { %v9507_v20 = vpack.c.bf16 %v4472_v53, %v4472_v53  ;;  %16030 = vst [vmem:[#allocation51_spill] sm:$0xff] %v14138_v14  ;;  %10864 = vmatmul.mubr.bf16.gmra.mrb[4].mxu0 %v14138_v14  ;;  %v5311_v21 = vor.u32 %v5310_v23, %v5307_v17  ;;  %v15712_v53 = vshrl.u32 %v14135_v63, 16  ;;  %v15715_v28 = vshll.u32 %v14135_v63, 16 }
 0x2f2   : > { %11707 = vrcp.f32 %v4381_v34  ;;  %v4474_v6 = vmul.f32 %v11696_v50, %v13987_v44  ;;  %v14145_v27 = vcombine.low %v4702_v36, %v4703_v41  ;;  %v14147_v34 = vcombine.low %v4701_v2, %v4702_v36  ;;  %16033 = vst [vmem:[#allocation57_spill] sm:$0xff] %v14149_v26 }
 0x2f3   : > { %4661 = vst [vmem:[#allocation3 + $0x9c] sm:$0xf] %v9507_v20  ;;  %11709 = vpow2.f32 %v9122_v31  ;;  %v14153_v17 = vsel %vm997_vm1, %v5302_v35, %v5311_v21  ;;  %v5316_v23 = vrot.slane %v15712_v53, 3  ;;  %v5319_v14 = vrot.slane %v15715_v28, 4  ;;  %v4706_v28 = vld [vmem:[#allocation3 + $0x94] sm:$0xf] }
 0x2f4   : > { %v11698_v52 = vpop.eup %11697  ;;  %16031 = vst [vmem:[#allocation53_spill] sm:$0xff] %v14145_v27  ;;  %16032 = vst [vmem:[#allocation56_spill] sm:$0xff] %v14147_v34  ;;  %10867 = vmatprep.mubr.bf16.mxu0 %v14153_v17  ;;  %v15717_v44 = vshrl.u32 %v14147_v34, 16  ;;  %v15718_v2 = vshll.u32 %v14147_v34, 16  ;;  %v14163_v41 = vcombine.low %v4704_v32, %v4705_v45  ;;  %v15719_v53 = vshrl.u32 %v14149_v26, 16 }
 0x2f5   : > { %v11700_v31 = vpop.eup %11699  ;;  %v4476_v20 = vmul.f32 %v11698_v52, %v13998_v54  ;;  %16034 = vst [vmem:[#allocation58_spill] sm:$0xff] %v14153_v17  ;;  %v5320_v52 = vor.u32 %v5319_v14, %v5316_v23  ;;  %v4707_v14 = vld [vmem:[#allocation3 + $0x98] sm:$0xf] }
 0x2f6   : > { %v11702_v56 = vpop.eup %11701  ;;  %v4475_v50 = vmul.f32 %v11700_v31, %v14006_v55  ;;  %16035 = vst [vmem:[#allocation59_spill] sm:$0xff] %v14163_v41  ;;  %v5325_v55 = vrot.slane %v15717_v44, 3  ;;  %v5328_v31 = vrot.slane %v15718_v2, 4  ;;  %v5334_v23 = vrot.slane %v15719_v53, 3 }
 0x2f7   : > { %v11704_v54 = vpop.eup %11703  ;;  %v9511_v35 = vpack.c.bf16 %v4476_v20, %v4476_v20  ;;  %v4383_v36 = vadd.f32 1.0, %v11702_v56  ;;  %10808 = vmatmul.mubr.bf16.gmra.mrb[220].mxu1 %v14145_v27  ;;  %v14172_v32 = vsel %vm997_vm1, %v5311_v21, %v5320_v52  ;;  %v15720_v56 = vshll.u32 %v14149_v26, 16 }
 0x2f8   : > { %v9590_v40 = vpack.c.bf16 %v4475_v50, %v4474_v6  ;;  %v4385_v30 = vadd.f32 1.0, %v11704_v54  ;;  %v11706_v17 = vpop.eup %11705  ;;  %16036 = vst [vmem:[#allocation60_spill] sm:$0xff] %v14172_v32  ;;  %10811 = vmatprep.mubr.bf16.mxu1 %v14163_v41  ;;  %v4710_v6 = vld [vmem:[#allocation3 + $0xa4] sm:$0xf]  ;;  %v5329_v20 = vor.u32 %v5328_v31, %v5325_v55  ;;  %v4709_v54 = vld [vmem:[#allocation3 + $0xa0] sm:$0xf]  ;;  %v14186_v2 = vcombine.low %v4706_v28, %v4707_v14 }
 0x2f9   : > { %4665 = vst [vmem:[#allocation3 + $0xb4] sm:$0xf] %v9511_v35  ;;  %11711 = vrcp.f32 %v4383_v36  ;;  %10868 = vmatmul.mubr.bf16.gmra.mrb[8].mxu0 %v14172_v32  ;;  %v5337_v21 = vrot.slane %v15720_v56, 4  ;;  %v14181_v35 = vcombine.low %v4705_v45, %v4706_v28  ;;  %v14196_v56 = vcombine.low %v4709_v54, %v4710_v6 }
 0x2fa   : > { %9609 = vst [vmem:[#allocation3 + $0xa8] sm:$0xff] %v9590_v40   ;;  %11713 = vrcp.f32 %v4385_v30  ;;  %v4708_v50 = vld [vmem:[#allocation3 + $0x9c] sm:$0xf]  ;;  %v14184_v44 = vsel %vm997_vm1, %v5320_v52, %v5329_v20 }
 0x2fb   : > { %16037 = vst [vmem:[#allocation62_spill] sm:$0xff] %v14181_v35  ;;  %16038 = vst [vmem:[#allocation61_spill] sm:$0xff] %v14184_v44  ;;  %v14188_v30 = vcombine.low %v4708_v50, %v4709_v54  ;;  %v14190_v40 = vcombine.low %v4707_v14, %v4708_v50  ;;  %10871 = vmatprep.mubr.bf16.mxu0 %v14184_v44  ;;  %v15724_v53 = vshrl.u32 %v14181_v35, 16  ;;  %v15725_v45 = vshll.u32 %v14181_v35, 16 }
 0x2fc   : > { %v11708_v36 = vpop.eup %11707  ;;  %16040 = vst [vmem:[#allocation64_spill] sm:$0xff] %v14196_v56  ;;  %v5338_v52 = vor.u32 %v5337_v21, %v5334_v23  ;;  %v4478_v44 = vmul.f32 %v11706_v17, %v14028_v60 }
 0x2fd   : > { %16039 = vst [vmem:[#allocation63_spill] sm:$0xff] %v14190_v40  ;;  %v11710_v55 = vpop.eup %11709  ;;  %v4477_v31 = vmul.f32 %v11708_v36, %v14046_v47  ;;  %v15727_v28 = vshrl.u32 %v14190_v40, 16  ;;  %v15729_v1 = vshll.u32 %v14190_v40, 16  ;;  %v5343_v50 = vrot.slane %v15724_v53, 3 }
 0x2fe   : > { %v4384_v32 = vadd.f32 1.0, %v11710_v55  ;;  %v5346_v47 = vrot.slane %v15725_v45, 4  ;;  %v15738_v53 = vshll.u32 %v14196_v56, 16 }
 0x2ff   : > { %v9512_v14 = vpack.c.bf16 %v4477_v31, %v4477_v31  ;;  %10812 = vmatmul.mubr.bf16.gmra.mrb[224].mxu1 %v14186_v2  ;;  %v5352_v54 = vrot.slane %v15727_v28, 3  ;;  %v5355_v23 = vrot.slane %v15729_v1, 4  ;;  %v15735_v31 = vshrl.u32 %v14196_v56, 16 }
 0x300   : > { %11715 = vrcp.f32 %v4384_v32  ;;  %v4714_v21 = vld [vmem:[#allocation3 + $0xb4] sm:$0xf]  ;;  %v5347_v36 = vor.u32 %v5346_v47, %v5343_v50  ;;  %10815 = vmatprep.mubr.bf16.mxu1 %v14188_v30  ;;  %v14216_v28 = vsel %vm997_vm1, %v5329_v20, %v5338_v52  ;;  %v5364_v40 = vrot.slane %v15738_v53, 4 }
 0x301   : > { %4666 = vst [vmem:[#allocation3 + $0xb8] sm:$0xf] %v9512_v14  ;;  %v4711_v55 = vld [vmem:[#allocation3 + $0xa8] sm:$0xf]  ;;  %v4712_v45 = vld [vmem:[#allocation3 + $0xac] sm:$0xf]  ;;  %v14212_v32 = vcombine.low %v4713_v8, %v4714_v21  ;;  %10872 = vmatmul.mubr.bf16.gmra.mrb[12].mxu0 %v14216_v28  ;;  %v5356_v50 = vor.u32 %v5355_v23, %v5352_v54 }
 0x302   : > { %16042 = vst [vmem:[#allocation65_spill] sm:$0xff] %v14216_v28  ;;  %v14218_v22 = vcombine.low %v4711_v55, %v4712_v45  ;;  %v14222_v14 = vsel %vm997_vm1, %v5338_v52, %v5347_v36  ;;  %v5361_v47 = vrot.slane %v15735_v31, 3  ;;  %v14230_v17 = vcombine.low %v4710_v6, %v4711_v55 }
 0x303   : > { %16041 = vst [vmem:[#allocation83_spill] sm:$0xff] %v14212_v32  ;;  %v11712_v1 = vpop.eup %11711  ;;  %16044 = vst [vmem:[#allocation69_spill] sm:$0xff] %v14222_v14  ;;  %10875 = vmatprep.mubr.bf16.mxu0 %v14222_v14  ;;  %v14235_v54 = vcombine.low %v4712_v45, %v4713_v8  ;;  %v15741_v23 = vshrl.u32 %v14212_v32, 16  ;;  %v15742_v26 = vshll.u32 %v14212_v32, 16  ;;  %v5716_v55 = vshll.u32 %v13580_v29, 16 }
 0x304   : > { %16043 = vst [vmem:[#allocation67_spill] sm:$0xff] %v14218_v22  ;;  %v11714_v35 = vpop.eup %11713  ;;  %v4479_v60 = vmul.f32 %v11712_v1, %v14068_v19  ;;  %v15743_v20 = vshrl.u32 %v14218_v22, 16  ;;  %v15744_v28 = vshll.u32 %v14218_v22, 16  ;;  %v5365_v53 = vor.u32 %v5364_v40, %v5361_v47  ;;  %v4716_v1 = vld [vmem:[#allocation3 + $0xbc] sm:$0xf] }
 0x305   : > { %v4481_v52 = vmul.f32 %v11714_v35, %v14085_v24  ;;  %v14240_v19 = vsel %vm997_vm1, %v5347_v36, %v5356_v50  ;;  %v5379_v35 = vrot.slane %v15741_v23, 3  ;;  %v5382_v40 = vrot.slane %v15742_v26, 4  ;;  %v14265_v26 = vld [vmem:[#allocation3 + $0xc8] sm:$0xf] }
 0x306   : > { %v9595_v31 = vpack.c.bf16 %v4479_v60, %v4478_v44  ;;  %16045 = vst [vmem:[#allocation70_spill] sm:$0xff] %v14240_v19  ;;  %v5370_v6 = vrot.slane %v15743_v20, 3  ;;  %v5373_v8 = vrot.slane %v15744_v28, 4  ;;  %v14248_v44 = vsel %vm997_vm1, %v5356_v50, %v5365_v53 }
 0x307   : > { %v9516_v56 = vpack.c.bf16 %v4481_v52, %v4481_v52  ;;  %10816 = vmatmul.mubr.bf16.gmra.mrb[228].mxu1 %v14230_v17  ;;  %16046 = vst [vmem:[#allocation71_spill] sm:$0xff] %v14248_v44  ;;  %v5383_v47 = vor.u32 %v5382_v40, %v5379_v35  ;;  %v9228_v35 = vcombine.low %v14265_v26, %v14265_v26 }
 0x308   : > { %9610 = vst [vmem:[#allocation3 + $0xc0] sm:$0xff] %v9595_v31   ;;  %v4715_v24 = vld [vmem:[#allocation3 + $0xb8] sm:$0xf]  ;;  %10819 = vmatprep.mubr.bf16.mxu1 %v14235_v54 }
 0x309   : > { %4670 = vst [vmem:[#allocation3 + $0xd0] sm:$0xf] %v9516_v56  ;;  %v14255_v36 = vcombine.low %v4715_v24, %v4716_v1  ;;  %10876 = vmatmul.mubr.bf16.gmra.mrb[16].mxu0 %v14240_v19  ;;  %v5374_v56 = vor.u32 %v5373_v8, %v5370_v6  ;;  %v14261_v60 = vcombine.low %v4714_v21, %v4715_v24  ;;  %v5721_v8 = vshll.u32 %v13777_v51, 16 }
 0x30a   : > { %v11716_v45 = vpop.eup %11715  ;;  %10879 = vmatprep.mubr.bf16.mxu0 %v14248_v44  ;;  %v5733_v44 = vshrl.u32 %v13782_v4, 16 }
 0x30b   : > { %v4480_v31 = vmul.f32 %v11716_v45, %v14118_v18  ;;  %v15746_v52 = vshrl.u32 %v14255_v36, 16  ;;  %v15747_v23 = vshll.u32 %v14255_v36, 16  ;;  %v5714_v18 = vshrl.u32 %v13580_v29, 16 }
 0x30c   : > { %v5718_v45 = vrot.slane %v5716_v55, 1  ;;  %v14269_v19 = vsel %vm997_vm1, %v5365_v53, %v5374_v56  ;;  %v14278_v24 = vsel %vm997_vm1, %v5374_v56, %v5383_v47  ;;  %v5723_v56 = vrot.slane %v5721_v8, 1 }
 0x30d   : > { %v9515_v50 = vpack.c.bf16 %v4480_v31, %v4480_v31  ;;  %16047 = vst [vmem:[#allocation72_spill] sm:$0xff] %v14269_v19  ;;  %16048 = vst [vmem:[#allocation73_spill] sm:$0xff] %v14278_v24  ;;  %v5388_v29 = vrot.slane %v15746_v52, 3  ;;  %v5391_v53 = vrot.slane %v15747_v23, 4  ;;  %v5404_v52 = vshrl.u32 %v9228_v35, 16 }
 0x30e   : > { %v5719_v31 = vor.u32 %v5718_v45, %v5714_v18  ;;  %v5407_v23 = vshll.u32 %v9228_v35, 16  ;;  %v5737_v18 = vshll.u32 %v13816_v25, 16 }
 0x30f   : > { %4669 = vst [vmem:[#allocation3 + $0xcc] sm:$0xf] %v9515_v50  ;;  %v4717_v20 = vld [vmem:[#allocation3 + $0xc0] sm:$0xf]  ;;  %v4718_v28 = vld [vmem:[#allocation3 + $0xc4] sm:$0xf]  ;;  %10820 = vmatmul.mubr.bf16.gmra.mrb[232].mxu1 %v14261_v60  ;;  %v5392_v14 = vor.u32 %v5391_v53, %v5388_v29 }
 0x310   : > { %v14272_v6 = vcombine.low %v4716_v1, %v4717_v20  ;;  %v14274_v21 = vcombine.low %v4717_v20, %v4718_v28  ;;  %v5729_v50 = vshll.u32 %v13782_v4, 16  ;;  %v14298_v32 = vcombine.low %v4718_v28, %v14265_v26 }
 0x311   : > { %10880 = vmatmul.mubr.bf16.gmra.mrb[20].mxu0 %v14269_v19  ;;  %v5406_v45 = vrot.slane %v5404_v52, 3  ;;  %v14307_v35 = vsel %vm997_vm1, %v5383_v47, %v5392_v14  ;;  %v6248_v28 = vrot.slane %v5733_v44, 3  ;;  %v5739_v52 = vrot.slane %v5737_v18, 1 }
 0x312   : > { %10823 = vmatprep.mubr.bf16.mxu1 %v14272_v6  ;;  %v15754_v1 = vshrl.u32 %v14274_v21, 16  ;;  %v15755_v20 = vshll.u32 %v14274_v21, 16  ;;  %10883 = vmatprep.mubr.bf16.mxu0 %v14278_v24  ;;  %v5725_v24 = vshrl.u32 %v13777_v51, 16  ;;  %16049 = vst [vmem:[#allocation74_spill] sm:$0xff] %v14307_v35  ;;  %v5731_v4 = vrot.slane %v5729_v50, 1 }
 0x313   : > { %v5741_v47 = vshrl.u32 %v13816_v25, 16 }
 0x314   : > { %v5397_v40 = vrot.slane %v15754_v1, 3  ;;  %v5400_v55 = vrot.slane %v15755_v20, 4  ;;  %v5724_v1 = vsel %vm1523_vm2, %v5719_v31, %v5723_v56  ;;  %v5409_v20 = vrot.slane %v5407_v23, 4 }
 0x315   : > { %v6245_v29 = vrot.slane %v5725_v24, 3  ;;  %v5727_v53 = vor.u32 %v5725_v24, %v5723_v56  ;;  %v5745_v23 = vshll.u32 %v13839_v7, 16  ;;  %v5735_v31 = vor.u32 %v5733_v44, %v5731_v4 }
 0x316   : > { %v14301_v19 = vor.u32 %v5400_v55, %v5397_v40  ;;  %v6246_v40 = vrot.slane %v5721_v8, 4  ;;  %v6249_v55 = vrot.slane %v5729_v50, 4  ;;  %v5749_v8 = vshrl.u32 %v13839_v7, 16 }
 0x317   : > { %10824 = vmatmul.mubr.bf16.gmra.mrb[236].mxu1 %v14298_v32  ;;  %v5732_v22 = vsel %vm1523_vm2, %v5727_v53, %v5731_v4  ;;  %v5740_v24 = vsel %vm1523_vm2, %v5735_v31, %v5739_v52  ;;  %v5747_v56 = vrot.slane %v5745_v23, 1  ;;  %v6253_v50 = vrot.slane %v5737_v18, 4  ;;  %v11540_v4 = vld [vmem:[%s15550_s3 + $0x110] sm:$0xff]   ;;  %v11541_v31 = vld [vmem:[%s15550_s3 + $0x118] sm:$0xff]  }
 0x318   : > { %10907 = vmatprep.mubr.bf16.mxu1 %v5724_v1  ;;  %v14312_v51 = vsel %vm997_vm1, %v5392_v14, %v14301_v19  ;;  %v5410_v1 = vor.u32 %v5409_v20, %v5406_v45  ;;  %v6247_v14 = vor.u32 %v6246_v40, %v6245_v29  ;;  %v6250_v34 = vor.u32 %v6249_v55, %v6248_v28 }
 0x319   : > { %10884 = vmatmul.mubr.bf16.gmra.mrb[24].mxu0 %v14307_v35  ;;  %16050 = vst [vmem:[#allocation75_spill] sm:$0xff] %v14312_v51  ;;  %v11539_v35 = vld [vmem:[%s15550_s3 + $0x108] sm:$0xff]   ;;  %v6252_v20 = vrot.slane %v5741_v47, 3  ;;  %v5753_v45 = vshll.u32 %v13875_v61, 16  ;;  %v5743_v29 = vor.u32 %v5741_v47, %v5739_v52  ;;  %v6256_v28 = vrot.slane %v5749_v8, 3 }
 0x31a   : > { %10887 = vmatprep.mubr.bf16.mxu0 %v14312_v51  ;;  %v5411_v44 = vsel %vm997_vm1, %v14301_v19, %v5410_v1  ;;  %v6257_v53 = vrot.slane %v5745_v23, 4  ;;  %v5757_v40 = vshrl.u32 %v13875_v61, 16  ;;  %v5761_v1 = vshll.u32 %v13881_v57, 16 }
 0x31b   : > { %v6254_v55 = vor.u32 %v6253_v50, %v6252_v20  ;;  %v5755_v18 = vrot.slane %v5753_v45, 1  ;;  %v5765_v23 = vshrl.u32 %v13881_v57, 16  ;;  %v5769_v47 = vshll.u32 %v13932_v62, 16  ;;  %v11542_v50 = vld [vmem:[%s15550_s3 + $0x120] sm:$0xff]  }
 0x31c   : > { %v6258_v52 = vor.u32 %v6257_v53, %v6256_v28  ;;  %v5763_v20 = vrot.slane %v5761_v1, 1  ;;  %v6265_v28 = vrot.slane %v5761_v1, 4  ;;  %v11547_v1 = vld [vmem:[%s15550_s3 + $0x150] sm:$0xff]  }
 0x31d   : > { %v5759_v53 = vor.u32 %v5757_v40, %v5755_v18 }
 0x31f   : > { %10908 = vmatmul.mubr.bf16.vlgmr.msra.gmra.mrb[240].mxu1 %v5732_v22  ;;  %v6251_v22 = vsel %vm997_vm1, %v6247_v14, %v6250_v34  ;;  %v11546_v14 = vld [vmem:[%s15550_s3 + $0x148] sm:$0xff]  }
 0x320   : > { %10911 = vmatprep.mubr.bf16.mxu1 %v5740_v24  ;;  %11020 = vmatpush3.bf16.msra.mxu1 %v13966_v38  ;;  %v5751_v38 = vor.u32 %v5749_v8, %v5747_v56  ;;  %v14337_v24 = vsel %vm1523_vm2, %v5743_v29, %v5747_v56  ;;  %v6255_v8 = vsel %vm997_vm1, %v6250_v34, %v6254_v55  ;;  %v6260_v56 = vrot.slane %v5757_v40, 3 }
 0x321   : > { %11021 = vmatprep.subr.bf16.mxu1 %v11539_v35  ;;  %10888 = vmatmul.mubr.bf16.gmra.mrb[28].mxu0 %v5411_v44  ;;  %16051 = vst [vmem:[#allocation76_spill] sm:$0xff] %v14337_v24  ;;  %v6261_v44 = vrot.slane %v5753_v45, 4  ;;  %v6264_v29 = vrot.slane %v5765_v23, 3  ;;  %v5773_v34 = vshrl.u32 %v13932_v62, 16 }
 0x322   : > { %10971 = vmatprep.mubr.bf16.mxu0 %v6251_v22  ;;  %v6259_v22 = vsel %vm997_vm1, %v6254_v55, %v6258_v52  ;;  %v11543_v55 = vld [vmem:[%s15550_s3 + $0x128] sm:$0xff]  }
 0x323   : > { %v6262_v45 = vor.u32 %v6261_v44, %v6260_v56  ;;  %v6266_v40 = vor.u32 %v6265_v28, %v6264_v29  ;;  %v6268_v44 = vrot.slane %v5773_v34, 3  ;;  %v11545_v29 = vld [vmem:[%s15550_s3 + $0x130] sm:$0xff]  }
 0x324   : > { %11022 = vmatpush3.bf16.msra.mxu1 %v11539_v35  ;;  %v14342_v35 = vsel %vm1523_vm2, %v5751_v38, %v5755_v18  ;;  %v5767_v38 = vor.u32 %v5765_v23, %v5763_v20  ;;  %v5781_v18 = vshrl.u32 %v13975_v39, 16  ;;  %v5785_v23 = vshll.u32 %v14021_v46, 16 }
 0x325   : > { %11023 = vmatprep.subr.bf16.mxu1 %v11540_v4  ;;  %16052 = vst [vmem:[#allocation77_spill] sm:$0xff] %v14342_v35  ;;  %v6263_v56 = vsel %vm997_vm1, %v6258_v52, %v6262_v45 }
 0x327   : > { %10912 = vmatmul.mubr.bf16.gmra.mrb[244].mxu1 %v14337_v24  ;;  %v5833_v24 = vshll.u32 %v14145_v27, 16 }
 0x328   : > { %10915 = vmatprep.mubr.bf16.mxu1 %v14342_v35  ;;  %11024 = vmatpush3.bf16.msra.mxu1 %v11540_v4  ;;  %v5771_v4 = vrot.slane %v5769_v47, 1  ;;  %v5777_v35 = vshll.u32 %v13975_v39, 16 }
 0x329   : > { %11025 = vmatprep.subr.bf16.mxu1 %v11541_v31  ;;  %10972 = vmatmul.mubr.bf16.vlgmr.msra.gmra.mrb[32].mxu0 %v6255_v8  ;;  %v11548_v8 = vld [vmem:[%s15550_s3 + $0x158] sm:$0xff]  }
 0x32a   : > { %10975 = vmatprep.mubr.bf16.mxu0 %v6259_v22  ;;  %11084 = vmatpush3.bf16.msra.mxu0 %v14103_v11  ;;  %v14364_v11 = vsel %vm1523_vm2, %v5759_v53, %v5763_v20  ;;  %v6269_v20 = vrot.slane %v5769_v47, 4  ;;  %v5779_v22 = vrot.slane %v5777_v35, 1  ;;  %v5775_v28 = vor.u32 %v5773_v34, %v5771_v4 }
 0x32b   : > { %11085 = vmatprep.subr.bf16.mxu0 %v11546_v14  ;;  %16053 = vst [vmem:[#allocation78_spill] sm:$0xff] %v14364_v11  ;;  %v6273_v53 = vrot.slane %v5777_v35, 4  ;;  %v11550_v35 = vld [vmem:[%s15550_s3 + $0x160] sm:$0xff]  }
 0x32c   : > { %11026 = vmatpush3.bf16.msra.mxu1 %v11541_v31  ;;  %v14369_v31 = vsel %vm1523_vm2, %v5767_v38, %v5771_v4  ;;  %v5793_v38 = vshll.u32 %v14032_v0, 16  ;;  %v6270_v52 = vor.u32 %v6269_v20, %v6268_v44  ;;  %v5783_v47 = vor.u32 %v5781_v18, %v5779_v22 }
 0x32d   : > { %11027 = vmatprep.subr.bf16.mxu1 %v11542_v50  ;;  %16054 = vst [vmem:[#allocation79_spill] sm:$0xff] %v14369_v31  ;;  %v14390_v4 = vsel %vm1523_vm2, %v5775_v28, %v5779_v22  ;;  %v6277_v22 = vrot.slane %v5785_v23, 4  ;;  %v14406_v28 = vld [vmem:[%s15550_s3 + $0x180] sm:$0xff]  }
 0x32e   : > { %11086 = vmatpush3.bf16.msra.mxu0 %v11546_v14  ;;  %v6267_v14 = vsel %vm997_vm1, %v6262_v45, %v6266_v40  ;;  %16055 = vst [vmem:[#allocation80_spill] sm:$0xff] %v14390_v4  ;;  %v5797_v45 = vshrl.u32 %v14032_v0, 16  ;;  %v6271_v44 = vsel %vm997_vm1, %v6266_v40, %v6270_v52  ;;  %v5805_v40 = vshrl.u32 %v14071_v10, 16 }
 0x32f   : > { %10916 = vmatmul.mubr.bf16.gmra.mrb[248].mxu1 %v14364_v11  ;;  %11087 = vmatprep.subr.bf16.mxu0 %v11547_v1  ;;  %v5789_v11 = vshrl.u32 %v14021_v46, 16 }
 0x330   : > { %10919 = vmatprep.mubr.bf16.mxu1 %v14369_v31  ;;  %11028 = vmatpush3.bf16.msra.mxu1 %v11542_v50  ;;  %v6272_v50 = vrot.slane %v5781_v18, 3  ;;  %v5787_v31 = vrot.slane %v5785_v23, 1  ;;  %v11555_v18 = vld [vmem:[%s15550_s3 + $0x168] sm:$0xff]   ;;  %v11556_v23 = vld [vmem:[%s15550_s3 + $0x170] sm:$0xff]  }
 0x331   : > { %11029 = vmatprep.subr.bf16.mxu1 %v11543_v55  ;;  %10976 = vmatmul.mubr.bf16.gmra.mrb[36].mxu0 %v6263_v56  ;;  %v11549_v56 = vld [vmem:[%s15550_s3 + $0x138] sm:$0xff]   ;;  %v6276_v20 = vrot.slane %v5789_v11, 3 }
 0x332   : > { %10979 = vmatprep.mubr.bf16.mxu0 %v6267_v14  ;;  %11088 = vmatpush3.bf16.msra.mxu0 %v11547_v1  ;;  %v6274_v34 = vor.u32 %v6273_v53, %v6272_v50  ;;  %v5795_v1 = vrot.slane %v5793_v38, 1  ;;  %v5801_v14 = vshll.u32 %v14071_v10, 16  ;;  %v6280_v50 = vrot.slane %v5797_v45, 3 }
 0x333   : > { %11089 = vmatprep.subr.bf16.mxu0 %v11548_v8  ;;  %v6281_v53 = vrot.slane %v5793_v38, 4  ;;  %v5813_v38 = vshrl.u32 %v14080_v16, 16 }
 0x334   : > { %11030 = vmatpush3.bf16.msra.mxu1 %v11543_v55  ;;  %v14395_v55 = vsel %vm1523_vm2, %v5783_v47, %v5787_v31  ;;  %v5799_v47 = vor.u32 %v5797_v45, %v5795_v1  ;;  %v5817_v45 = vshll.u32 %v14106_v59, 16 }
 0x335   : > { %11031 = vmatprep.subr.bf16.mxu1 %v11545_v29  ;;  %16056 = vst [vmem:[#allocation81_spill] sm:$0xff] %v14395_v55 }
 0x336   : > { %11090 = vmatpush3.bf16.msra.mxu0 %v11548_v8  ;;  %v6275_v8 = vsel %vm997_vm1, %v6270_v52, %v6274_v34 }
 0x337   : > { %10920 = vmatmul.mubr.bf16.gmra.mrb[252].mxu1 %v14390_v4  ;;  %11091 = vmatprep.subr.bf16.mxu0 %v11550_v35  ;;  %v6278_v4 = vor.u32 %v6277_v22, %v6276_v20  ;;  %v5825_v20 = vshll.u32 %v14133_v13, 16  ;;  %v5829_v22 = vshrl.u32 %v14133_v13, 16  ;;  %v6293_v13 = vrot.slane %v5817_v45, 4 }
 0x338   : > { %10923 = vmatprep.mubr.bf16.mxu1 %v14395_v55  ;;  %11032 = vmatpush3.bf16.msra.mxu1 %v11545_v29  ;;  %v5791_v29 = vor.u32 %v5789_v11, %v5787_v31  ;;  %v5809_v55 = vshll.u32 %v14080_v16, 16  ;;  %v6282_v31 = vor.u32 %v6281_v53, %v6280_v50 }
 0x339   : > { %11033 = vmatprep.subr.bf16.mxu1 %v11549_v56  ;;  %10980 = vmatmul.mubr.bf16.gmra.mrb[40].mxu0 %v6271_v44  ;;  %v5803_v44 = vrot.slane %v5801_v14, 1  ;;  %v6297_v16 = vrot.slane %v5825_v20, 4 }
 0x33a   : > { %10983 = vmatprep.mubr.bf16.mxu0 %v6275_v8  ;;  %11092 = vmatpush3.bf16.msra.mxu0 %v11550_v35  ;;  %v14416_v11 = vsel %vm1523_vm2, %v5791_v29, %v5795_v1  ;;  %v6285_v35 = vrot.slane %v5801_v14, 4  ;;  %v5821_v1 = vshrl.u32 %v14106_v59, 16  ;;  %v11558_v8 = vld [vmem:[%s15550_s3 + $0x178] sm:$0xff]   ;;  %v6279_v29 = vsel %vm997_vm1, %v6274_v34, %v6278_v4 }
 0x33b   : > { %11093 = vmatprep.subr.bf16.mxu0 %v11555_v18  ;;  %16057 = vst [vmem:[#allocation82_spill] sm:$0xff] %v14416_v11  ;;  %v14421_v52 = vsel %vm1523_vm2, %v5799_v47, %v5803_v44  ;;  %v5811_v50 = vrot.slane %v5809_v55, 1  ;;  %v6283_v14 = vsel %vm997_vm1, %v6278_v4, %v6282_v31  ;;  %v6289_v53 = vrot.slane %v5809_v55, 4 }
 0x33c   : > { %11034 = vmatpush3.bf16.msra.mxu1 %v11549_v56  ;;  %16058 = vst [vmem:[#allocation84_spill] sm:$0xff] %v14421_v52  ;;  %v6284_v56 = vrot.slane %v5805_v40, 3  ;;  %v5807_v47 = vor.u32 %v5805_v40, %v5803_v44  ;;  %v6292_v51 = vrot.slane %v5821_v1, 3  ;;  %v6296_v59 = vrot.slane %v5829_v22, 3 }
 0x33d   : > { %11147 = vmatprep.subr.bf16.mxu1 %v14406_v28  ;;  %v5841_v34 = vshll.u32 %v14163_v41, 16  ;;  %v5815_v10 = vor.u32 %v5813_v38, %v5811_v50  ;;  %v5827_v40 = vrot.slane %v5825_v20, 1 }
 0x33e   : > { %11094 = vmatpush3.bf16.msra.mxu0 %v11555_v18  ;;  %v6288_v18 = vrot.slane %v5813_v38, 3  ;;  %v14437_v4 = vsel %vm1523_vm2, %v5807_v47, %v5811_v50  ;;  %v6294_v38 = vor.u32 %v6293_v13, %v6292_v51  ;;  %v14448_v50 = vld [vmem:[#allocation3 + $0xd4] sm:$0xf]  ;;  %v4721_v47 = vld [vmem:[#allocation3 + $0xd0] sm:$0xf] }
 0x33f   : > { %10924 = vmatmul.mubr.bf16.gmra.mrb[0].mxu1 %v14416_v11  ;;  %11095 = vmatprep.subr.bf16.mxu0 %v11556_v23  ;;  %v5819_v11 = vrot.slane %v5817_v45, 1  ;;  %16059 = vst [vmem:[#allocation85_spill] sm:$0xff] %v14437_v4  ;;  %v5831_v13 = vor.u32 %v5829_v22, %v5827_v40  ;;  %v14472_v22 = vcombine.low %v4721_v47, %v14448_v50 }
 0x340   : > { %10927 = vmatprep.mubr.bf16.mxu1 %v14421_v52  ;;  %v6286_v52 = vor.u32 %v6285_v35, %v6284_v56  ;;  %v6290_v55 = vor.u32 %v6289_v53, %v6288_v18  ;;  %v5845_v56 = vshrl.u32 %v14163_v41, 16  ;;  %v6301_v18 = vrot.slane %v5833_v24, 4 }
 0x341   : > { %10984 = vmatmul.mubr.bf16.gmra.mrb[44].mxu0 %v6279_v29  ;;  %v5837_v29 = vshrl.u32 %v14145_v27, 16  ;;  %v14441_v44 = vsel %vm1523_vm2, %v5815_v10, %v5819_v11  ;;  %v5823_v45 = vor.u32 %v5821_v1, %v5819_v11  ;;  %v5843_v53 = vrot.slane %v5841_v34, 1  ;;  %v14463_v1 = vld [vmem:[#allocation3 + $0xcc] sm:$0xf]  ;;  %16063 = vst [vmem:[#allocation87_spill] sm:$0xff] %v14472_v22 }
 0x342   : > { %10987 = vmatprep.mubr.bf16.mxu0 %v6283_v14  ;;  %11096 = vmatpush3.bf16.msra.mxu0 %v11556_v23  ;;  %16060 = vst [vmem:[#allocation86_spill] sm:$0xff] %v14441_v44  ;;  %v5835_v23 = vrot.slane %v5833_v24, 1  ;;  %v6287_v35 = vsel %vm997_vm1, %v6282_v31, %v6286_v52  ;;  %v14446_v14 = vor.u32 %v6297_v16, %v6296_v59  ;;  %v15777_v10 = vshll.u32 %v14186_v2, 16  ;;  %v14460_v16 = vld [vmem:[%s15550_s3 + $0x1c0] sm:$0xff]  }
 0x343   : > { %11097 = vmatprep.subr.bf16.mxu0 %v11558_v8  ;;  %v6300_v20 = vrot.slane %v5837_v29, 3  ;;  %v6291_v11 = vsel %vm997_vm1, %v6286_v52, %v6290_v55  ;;  %v6304_v51 = vrot.slane %v5845_v56, 3  ;;  %v6305_v24 = vrot.slane %v5841_v34, 4 }
 0x344   : > { %v5839_v59 = vor.u32 %v5837_v29, %v5835_v23  ;;  %v6299_v52 = vsel %vm997_vm1, %v6294_v38, %v14446_v14  ;;  %v14476_v29 = vsel %vm1523_vm2, %v5831_v13, %v5835_v23  ;;  %v16066_v31 = vshll.u32 %v14274_v21, 16  ;;  %v14505_v13 = vld [vmem:[#allocation3 + $0xd8] sm:$0xf] }
 0x345   : > { %16064 = vst [vmem:[#allocation89_spill] sm:$0xff] %v14476_v29  ;;  %v6302_v34 = vor.u32 %v6301_v18, %v6300_v20  ;;  %v16067_v20 = vshll.u32 %v14298_v32, 16  ;;  %v5861_v27 = vshrl.u32 %v14188_v30, 16 }
 0x346   : > { %11098 = vmatpush3.bf16.msra.mxu0 %v11558_v8  ;;  %v16061_v8 = vshll.u32 %v14255_v36, 16  ;;  %v14493_v23 = vsel %vm1523_vm2, %v5839_v59, %v5843_v53 }
 0x347   : > { %10928 = vmatmul.mubr.bf16.gmra.mrb[4].mxu1 %v14437_v4  ;;  %11211 = vmatprep.subr.bf16.mxu0 %v14460_v16  ;;  %v14480_v4 = vrot.slane %v15777_v10, 1  ;;  %v14499_v18 = vrot.slane %v16067_v20, 1 }
 0x348   : > { %10931 = vmatprep.mubr.bf16.mxu1 %v14441_v44  ;;  %v14454_v41 = vrot.slane %v16061_v8, 1  ;;  %v6295_v8 = vsel %vm997_vm1, %v6290_v55, %v6294_v38  ;;  %v5853_v55 = vshrl.u32 %v14186_v2, 16  ;;  %v7081_v44 = vrot.slane %v16066_v31, 1 }
 0x349   : > { %10988 = vmatmul.mubr.bf16.gmra.mrb[48].mxu0 %v6287_v35  ;;  %v14467_v35 = vsel %vm1523_vm2, %v5823_v45, %v5827_v40  ;;  %v14484_v40 = vcombine.low %v14463_v1, %v4721_v47  ;;  %v16065_v45 = vshrl.u32 %v14255_v36, 16  ;;  %v14503_v47 = vcombine.low %v14265_v26, %v14463_v1 }
 0x34a   : > { %10991 = vmatprep.mubr.bf16.mxu0 %v6291_v11  ;;  %16062 = vst [vmem:[#allocation88_spill] sm:$0xff] %v14467_v35  ;;  %v5847_v11 = vor.u32 %v5845_v56, %v5843_v53  ;;  %v14495_v56 = vor.u32 %v6305_v24, %v6304_v51  ;;  %v16068_v53 = vshrl.u32 %v14274_v21, 16  ;;  %v7093_v51 = vshll.u32 %v14472_v22, 16 }
 0x34b   : > { %v7080_v38 = vor.u32 %v14454_v41, %v16065_v45  ;;  %v4724_v45 = vld [vmem:[#allocation3 + $0xdc] sm:$0xf]  ;;  %v15786_v24 = vshrl.u32 %v14472_v22, 16  ;;  %v15793_v26 = vshrl.u32 %v14298_v32, 16  ;;  %v7085_v10 = vshll.u32 %v14503_v47, 16 }
 0x34c   : > { %v7083_v59 = vor.u32 %v7081_v44, %v16068_v53  ;;  %v14517_v20 = vsel %vm1523_vm2, %v5847_v11, %v14480_v4  ;;  %v7446_v53 = vrot.slane %v7093_v51, 4  ;;  %v14535_v61 = vrot.slane %v7093_v51, 1 }
 0x34d   : > { %v14509_v31 = vsel %vm1523_vm2, %v7080_v38, %v7081_v44  ;;  %16069 = vst [vmem:[#allocation90_spill] sm:$0xff] %v14517_v20  ;;  %v7445_v44 = vrot.slane %v15786_v24, 3  ;;  %v7087_v11 = vrot.slane %v7085_v10, 1  ;;  %v7442_v46 = vrot.slane %v7085_v10, 4 }
 0x34e   : > { %v14530_v39 = vor.u32 %v15793_v26, %v14499_v18  ;;  %v16070_v10 = vshll.u32 %v14484_v40, 16  ;;  %v6303_v51 = vsel %vm997_vm1, %v14446_v14, %v6302_v34 }
 0x34f   : > { %10932 = vmatmul.mubr.bf16.gmra.mrb[8].mxu1 %v14467_v35  ;;  %v9355_v35 = vcombine.low %v14505_v13, %v4724_v45  ;;  %v14533_v57 = vsel %vm1523_vm2, %v7083_v59, %v7087_v11  ;;  %v15792_v45 = vshrl.u32 %v14484_v40, 16 }
 0x350   : > { %10935 = vmatprep.mubr.bf16.mxu1 %v14476_v29  ;;  %v7089_v29 = vshrl.u32 %v14503_v47, 16  ;;  %v8091_v22 = vrot.slane %v16070_v10, 1 }
 0x351   : > { %10992 = vmatmul.mubr.bf16.gmra.mrb[52].mxu0 %v6295_v8  ;;  %v7447_v8 = vor.u32 %v7446_v53, %v7445_v44  ;;  %v7450_v62 = vshrl.u32 %v9355_v35, 16  ;;  %v7453_v38 = vshll.u32 %v9355_v35, 16  ;;  %v5865_v44 = vshll.u32 %v14230_v17, 16 }
 0x352   : > { %10995 = vmatprep.mubr.bf16.mxu0 %v6299_v52  ;;  %v7441_v0 = vrot.slane %v7089_v29, 3  ;;  %v7091_v24 = vor.u32 %v7089_v29, %v7087_v11  ;;  %v14562_v59 = vor.u32 %v8091_v22, %v15792_v45  ;;  %v16074_v53 = vshll.u32 %v14188_v30, 16 }
 0x353   : > { %v7452_v7 = vrot.slane %v7450_v62, 3  ;;  %v7455_v25 = vrot.slane %v7453_v38, 4  ;;  %v5867_v14 = vrot.slane %v5865_v44, 1  ;;  %v5855_v45 = vor.u32 %v5853_v55, %v14480_v4 }
 0x354   : > { %v7443_v52 = vor.u32 %v7442_v46, %v7441_v0  ;;  %v14544_v35 = vsel %vm1523_vm2, %v7091_v24, %v14535_v61  ;;  %v14558_v0 = vsel %vm1523_vm2, %v14530_v39, %v8091_v22  ;;  %16072 = vst [vmem:[#allocation92_spill] sm:$0xff] %v14562_v59  ;;  %v16073_v24 = vshll.u32 %v14186_v2, 16 }
 0x355   : > { %v14554_v62 = vor.u32 %v7455_v25, %v7452_v7  ;;  %16071 = vst [vmem:[#allocation91_spill] sm:$0xff] %v14558_v0  ;;  %v5859_v11 = vrot.slane %v16074_v53, 1  ;;  %v6307_v25 = vsel %vm997_vm1, %v6302_v34, %v14495_v56  ;;  %v6312_v7 = vrot.slane %v5861_v27, 3 }
 0x356   : > { %v14548_v29 = vsel %vm997_vm1, %v14301_v19, %v7443_v52  ;;  %v14551_v46 = vsel %vm997_vm1, %v7443_v52, %v7447_v8  ;;  %v6308_v19 = vrot.slane %v5853_v55, 3  ;;  %v6309_v38 = vrot.slane %v16073_v24, 4 }
 0x357   : > { %10936 = vmatmul.mubr.bf16.gmra.mrb[12].mxu1 %v14493_v23  ;;  %v16075_v52 = vmov %v16074_v53  ;;  %v14576_v22 = vsel %vm997_vm1, %v7447_v8, %v14554_v62  ;;  %v5873_v24 = vshll.u32 %v14235_v54, 16  ;;  %v5863_v53 = vor.u32 %v5861_v27, %v5859_v11 }
 0x358   : > { %10939 = vmatprep.mubr.bf16.mxu1 %v14517_v20  ;;  %v6313_v10 = vrot.slane %v16075_v52, 4  ;;  %v6310_v26 = vor.u32 %v6309_v38, %v6308_v19  ;;  %v14582_v34 = vsel %vm1523_vm2, %v5855_v45, %v5859_v11  ;;  %v5877_v52 = vshrl.u32 %v14235_v54, 16 }
 0x359   : > { %10996 = vmatmul.mubr.bf16.gmra.mrb[56].mxu0 %v6303_v51  ;;  %v5869_v51 = vshrl.u32 %v14230_v17, 16  ;;  %16076 = vst [vmem:[#allocation93_spill] sm:$0xff] %v14582_v34  ;;  %v14587_v8 = vsel %vm1523_vm2, %v5863_v53, %v5867_v14  ;;  %v6317_v55 = vrot.slane %v5865_v44, 4  ;;  %v5875_v19 = vrot.slane %v5873_v24, 1 }
 0x35a   : > { %10999 = vmatprep.mubr.bf16.mxu0 %v6307_v25  ;;  %v6314_v59 = vor.u32 %v6313_v10, %v6312_v7  ;;  %16077 = vst [vmem:[#allocation94_spill] sm:$0xff] %v14587_v8  ;;  %v5881_v25 = vshll.u32 %v14261_v60, 16  ;;  %v6311_v27 = vsel %vm997_vm1, %v14495_v56, %v6310_v26  ;;  %v6320_v11 = vrot.slane %v5877_v52, 3 }
 0x35b   : > { %v6316_v4 = vrot.slane %v5869_v51, 3  ;;  %v5871_v38 = vor.u32 %v5869_v51, %v5867_v14  ;;  %v6321_v7 = vrot.slane %v5873_v24, 4  ;;  %v5889_v10 = vshll.u32 %v14272_v6, 16 }
 0x35c   : > { %v6315_v45 = vsel %vm997_vm1, %v6310_v26, %v6314_v59  ;;  %v5883_v53 = vrot.slane %v5881_v25, 1  ;;  %v5893_v44 = vshrl.u32 %v14272_v6, 16 }
 0x35d   : > { %v6318_v0 = vor.u32 %v6317_v55, %v6316_v4  ;;  %v14597_v20 = vsel %vm1523_vm2, %v5871_v38, %v5875_v19  ;;  %v6322_v56 = vor.u32 %v6321_v7, %v6320_v11  ;;  %v5891_v14 = vrot.slane %v5889_v10, 1 }
 0x35e   : > { %v6328_v55 = vrot.slane %v5893_v44, 3 }
 0x35f   : > { %10940 = vmatmul.mubr.bf16.gmra.mrb[16].mxu1 %v14582_v34  ;;  %v5879_v34 = vor.u32 %v5877_v52, %v5875_v19  ;;  %v6319_v24 = vsel %vm997_vm1, %v6314_v59, %v6318_v0  ;;  %v6323_v4 = vsel %vm997_vm1, %v6318_v0, %v6322_v56  ;;  %v6329_v19 = vrot.slane %v5889_v10, 4 }
 0x360   : > { %10943 = vmatprep.mubr.bf16.mxu1 %v14587_v8  ;;  %v5885_v8 = vshrl.u32 %v14261_v60, 16  ;;  %v5895_v38 = vor.u32 %v5893_v44, %v5891_v14 }
 0x361   : > { %11000 = vmatmul.mubr.bf16.gmra.mrb[60].mxu0 %v6311_v27  ;;  %v14602_v26 = vsel %vm1523_vm2, %v5879_v34, %v5883_v53  ;;  %v6325_v27 = vrot.slane %v5881_v25, 4  ;;  %v6330_v7 = vor.u32 %v6329_v19, %v6328_v55  ;;  %v16080_v25 = vshll.u32 %v14298_v32, 16 }
 0x362   : > { %11003 = vmatprep.mubr.bf16.mxu0 %v6315_v45  ;;  %16078 = vst [vmem:[#allocation95_spill] sm:$0xff] %v14602_v26  ;;  %v5887_v51 = vor.u32 %v5885_v8, %v5883_v53  ;;  %v6324_v52 = vrot.slane %v5885_v8, 3  ;;  %v9253_v45 = vcombine.low %v14463_v1, %v14463_v1  ;;  %v14615_v59 = vsel %vm1523_vm2, %v5895_v38, %v14499_v18 }
 0x363   : > { %v16079_v1 = vshrl.u32 %v14298_v32, 16  ;;  %v6333_v10 = vrot.slane %v16080_v25, 4  ;;  %v9279_v53 = vcombine.low %v14448_v50, %v14448_v50  ;;  %v16081_v18 = vshrl.u32 %v14484_v40, 16 }
 0x364   : > { %v6326_v34 = vor.u32 %v6325_v27, %v6324_v52  ;;  %v14610_v11 = vsel %vm1523_vm2, %v5887_v51, %v5891_v14  ;;  %v16082_v51 = vshll.u32 %v14484_v40, 16 }
 0x365   : > { %v6332_v8 = vrot.slane %v16079_v1, 3  ;;  %v6346_v27 = vshrl.u32 %v9279_v53, 16 }
 0x366   : > { %v6327_v0 = vsel %vm997_vm1, %v6322_v56, %v6326_v34  ;;  %v6331_v44 = vsel %vm997_vm1, %v6326_v34, %v6330_v7  ;;  %v6342_v52 = vrot.slane %v16082_v51, 4  ;;  %v16083_v34 = vshll.u32 %v13784_v33, 16 }
 0x367   : > { %10944 = vmatmul.mubr.bf16.gmra.mrb[20].mxu1 %v14597_v20  ;;  %v6334_v56 = vor.u32 %v6333_v10, %v6332_v8  ;;  %v16084_v8 = vshrl.u32 %v13784_v33, 16 }
 0x368   : > { %10947 = vmatprep.mubr.bf16.mxu1 %v14602_v26  ;;  %v5905_v26 = vshll.u32 %v9253_v45, 16 }
 0x369   : > { %11004 = vmatmul.mubr.bf16.gmra.mrb[64].mxu0 %v6319_v24  ;;  %v6339_v24 = vrot.slane %v16081_v18, 3  ;;  %v6335_v50 = vsel %vm997_vm1, %v6330_v7, %v6334_v56  ;;  %v16085_v7 = vshll.u32 %v13771_v5, 16 }
 0x36a   : > { %11007 = vmatprep.mubr.bf16.mxu0 %v6323_v4  ;;  %v5907_v14 = vrot.slane %v5905_v26, 1  ;;  %v6349_v4 = vshll.u32 %v9279_v53, 16  ;;  %v6348_v26 = vrot.slane %v6346_v27, 3  ;;  %v16089_v27 = vshrl.u32 %v13771_v5, 16 }
 0x36b   : > { %v6343_v19 = vor.u32 %v6342_v52, %v6339_v24  ;;  %v7021_v10 = vrot.slane %v16085_v7, 1  ;;  %v16087_v24 = vshrl.u32 %v13856_v42, 16  ;;  %v16088_v52 = vshll.u32 %v13877_v43, 16 }
 0x36c   : > { %v5908_v55 = vsel %vm1523_vm2, %v14530_v39, %v5907_v14  ;;  %v6351_v45 = vrot.slane %v6349_v4, 4  ;;  %v11559_v39 = vld [vmem:[%s15550_s3 + $0x188] sm:$0xff]   ;;  %v16086_v14 = vshll.u32 %v13856_v42, 16  ;;  %v16092_v7 = vshrl.u32 %v13877_v43, 16 }
 0x36d   : > { %v6344_v38 = vsel %vm997_vm1, %v6334_v56, %v6343_v19  ;;  %v7027_v56 = vrot.slane %v16088_v52, 1  ;;  %v7023_v4 = vor.u32 %v7021_v10, %v16089_v27 }
 0x36e   : > { %v6352_v1 = vor.u32 %v6351_v45, %v6348_v26 }
 0x36f   : > { %10948 = vmatmul.mubr.bf16.gmra.mrb[24].mxu1 %v14610_v11 }
 0x370   : > { %10951 = vmatprep.mubr.bf16.mxu1 %v14615_v59  ;;  %v6353_v53 = vsel %vm997_vm1, %v6343_v19, %v6352_v1  ;;  %v11563_v1 = vld [vmem:[%s15550_s3 + $0x1a8] sm:$0xff]  }
 0x371   : > { %11008 = vmatmul.mubr.bf16.gmra.mrb[68].mxu0 %v6327_v0  ;;  %v7019_v0 = vrot.slane %v16083_v34, 1 }
 0x372   : > { %11011 = vmatprep.mubr.bf16.mxu0 %v6331_v44  ;;  %v11560_v44 = vld [vmem:[%s15550_s3 + $0x190] sm:$0xff]  }
 0x373   : > { %v7020_v25 = vor.u32 %v7019_v0, %v16084_v8  ;;  %v16091_v8 = vshrl.u32 %v13925_v9, 16 }
 0x375   : > { %v7022_v18 = vsel %vm1523_vm2, %v7020_v25, %v7021_v10  ;;  %v7029_v10 = vor.u32 %v7027_v56, %v16092_v7 }
 0x377   : > { %10952 = vmatmul.mubr.bf16.gmra.mrb[28].mxu1 %v5908_v55  ;;  %v11566_v55 = vld [vmem:[%s15550_s3 + $0x1c8] sm:$0xff]  }
 0x378   : > { %11035 = vmatprep.mubr.bf16.mxu1 %v13784_v33  ;;  %v7024_v33 = vrot.slane %v16086_v14, 1 }
 0x379   : > { %11012 = vmatmul.mubr.bf16.gmra.mrb[72].mxu0 %v6335_v50 }
 0x37a   : > { %11015 = vmatprep.mubr.bf16.mxu0 %v6344_v38  ;;  %v7026_v51 = vor.u32 %v7024_v33, %v16087_v24  ;;  %v7025_v19 = vsel %vm1523_vm2, %v7023_v4, %v7024_v33 }
 0x37c   : > { %v7028_v45 = vsel %vm1523_vm2, %v7026_v51, %v7027_v56 }
 0x37f   : > { %11036 = vmatmul.mubr.bf16.vlgmr.msra.gmra.mrb[32].mxu1 %v13771_v5  ;;  %v16090_v5 = vshll.u32 %v13925_v9, 16 }
 0x380   : > { %11039 = vmatprep.mubr.bf16.mxu1 %v13856_v42  ;;  %11148 = vmatpush3.bf16.msra.mxu1 %v14406_v28  ;;  %v11561_v28 = vld [vmem:[%s15550_s3 + $0x198] sm:$0xff]   ;;  %v11562_v42 = vld [vmem:[%s15550_s3 + $0x1a0] sm:$0xff]  }
 0x381   : > { %11149 = vmatprep.subr.bf16.mxu1 %v11559_v39  ;;  %11016 = vmatmul.mubr.bf16.gmra.mrb[76].mxu0 %v6353_v53  ;;  %v7030_v26 = vrot.slane %v16090_v5, 1  ;;  %v11570_v5 = vld [vmem:[%s15550_s3 + $0x1b8] sm:$0xff]  }
 0x382   : > { %11099 = vmatprep.mubr.bf16.mxu0 %v7022_v18  ;;  %v16094_v18 = vshll.u32 %v13978_v12, 16 }
 0x383   : > { %v7032_v25 = vor.u32 %v7030_v26, %v16091_v8  ;;  %v7031_v14 = vsel %vm1523_vm2, %v7029_v10, %v7030_v26  ;;  %v11571_v26 = vld [vmem:[%s15550_s3 + $0x1e0] sm:$0xff]   ;;  %v11572_v8 = vld [vmem:[%s15550_s3 + $0x1e8] sm:$0xff]  }
 0x384   : > { %11150 = vmatpush3.bf16.msra.mxu1 %v11559_v39  ;;  %v11567_v39 = vld [vmem:[%s15550_s3 + $0x1d0] sm:$0xff]  }
 0x385   : > { %11151 = vmatprep.subr.bf16.mxu1 %v11560_v44 }
 0x387   : > { %11040 = vmatmul.mubr.bf16.gmra.mrb[36].mxu1 %v13877_v43  ;;  %v11565_v43 = vld [vmem:[%s15550_s3 + $0x1b0] sm:$0xff]  }
 0x388   : > { %11043 = vmatprep.mubr.bf16.mxu1 %v13925_v9  ;;  %11152 = vmatpush3.bf16.msra.mxu1 %v11560_v44  ;;  %v11569_v44 = vld [vmem:[%s15550_s3 + $0x1d8] sm:$0xff]  }
 0x389   : > { %11153 = vmatprep.subr.bf16.mxu1 %v11561_v28  ;;  %11100 = vmatmul.mubr.bf16.vlgmr.msra.gmra.mrb[80].mxu0 %v7025_v19 }
 0x38a   : > { %v10781_v50 = vpop.f32.mrb[192].mxu1  ;;  %11103 = vmatprep.mubr.bf16.mxu0 %v7028_v45  ;;  %11212 = vmatpush3.bf16.msra.mxu0 %v14460_v16  ;;  %v16093_v16 = vshll.u32 %v13935_v49, 16  ;;  %v16095_v45 = vshrl.u32 %v13978_v12, 16 }
 0x38b   : > { %v4986_v38 = vpop.f32.mrb[193].mxu1  ;;  %11213 = vmatprep.subr.bf16.mxu0 %v11566_v55 }
 0x38c   : > { %v10782_v34 = vpop.f32.mrb[194].mxu1  ;;  %11154 = vmatpush3.bf16.msra.mxu1 %v11561_v28  ;;  %v7033_v53 = vrot.slane %v16093_v16, 1  ;;  %v7036_v28 = vrot.slane %v16094_v18, 1 }
 0x38d   : > { %v4989_v0 = vpop.f32.mrb[195].mxu1  ;;  %11155 = vmatprep.subr.bf16.mxu1 %v11562_v42 }
 0x38e   : > { %11214 = vmatpush3.bf16.msra.mxu0 %v11566_v55  ;;  %v7034_v24 = vsel %vm1523_vm2, %v7032_v25, %v7033_v53 }
 0x38f   : > { %11044 = vmatmul.mubr.bf16.gmra.mrb[40].mxu1 %v13935_v49  ;;  %11215 = vmatprep.subr.bf16.mxu0 %v11567_v39 }
 0x390   : > { %11047 = vmatprep.mubr.bf16.mxu1 %v13978_v12  ;;  %11156 = vmatpush3.bf16.msra.mxu1 %v11562_v42  ;;  %v16098_v12 = vshll.u32 %v14034_v15, 16 }
 0x391   : > { %11157 = vmatprep.subr.bf16.mxu1 %v11563_v1  ;;  %11104 = vmatmul.mubr.bf16.gmra.mrb[84].mxu0 %v7031_v14  ;;  %v11574_v14 = vld [vmem:[%s15550_s3 + $0x1f0] sm:$0xff]  }
 0x392   : > { %v10845_v9 = vpop.f32.mrb[240].mxu0  ;;  %v10785_v33 = vpop.f32.mrb[196].mxu1  ;;  %11107 = vmatprep.mubr.bf16.mxu0 %v7034_v24  ;;  %11216 = vmatpush3.bf16.msra.mxu0 %v11567_v39  ;;  %v7042_v7 = vrot.slane %v16098_v12, 1 }
 0x393   : > { %v5518_v51 = vpop.f32.mrb[241].mxu0  ;;  %v5001_v52 = vpop.f32.mrb[197].mxu1  ;;  %11217 = vmatprep.subr.bf16.mxu0 %v11569_v44 }
 0x394   : > { %v14700_v56 = vadd.f32 %v5518_v51, %v4986_v38  ;;  %v10846_v27 = vpop.f32.mrb[242].mxu0  ;;  %v10786_v4 = vpop.f32.mrb[198].mxu1  ;;  %11158 = vmatpush3.bf16.msra.mxu1 %v11563_v1  ;;  %v7038_v38 = vor.u32 %v7036_v28, %v16095_v45  ;;  %v16101_v51 = vshrl.u32 %v14024_v48, 16 }
 0x395   : > { %v14702_v55 = vadd.f32 %v10846_v27, %v10782_v34  ;;  %v5521_v19 = vpop.f32.mrb[243].mxu0  ;;  %v5004_v50 = vpop.f32.mrb[199].mxu1  ;;  %11159 = vmatprep.subr.bf16.mxu1 %v11565_v43  ;;  %v16096_v34 = vshrl.u32 %v13935_v49, 16  ;;  %v14727_v49 = vld [vmem:[%s15550_s3 + $0x200] sm:$0xff]  }
 0x396   : > { %v14704_v42 = vadd.f32 %v5521_v19, %v4989_v0  ;;  %11218 = vmatpush3.bf16.msra.mxu0 %v11569_v44  ;;  %v16097_v0 = vshll.u32 %v14024_v48, 16 }
 0x397   : > { %v7035_v39 = vor.u32 %v7033_v53, %v16096_v34  ;;  %11048 = vmatmul.mubr.bf16.gmra.mrb[44].mxu1 %v14024_v48  ;;  %11219 = vmatprep.subr.bf16.mxu0 %v11571_v26 }
 0x398   : > { %v7039_v1 = vrot.slane %v16097_v0, 1  ;;  %11051 = vmatprep.mubr.bf16.mxu1 %v14034_v15  ;;  %11160 = vmatpush3.bf16.msra.mxu1 %v11565_v43  ;;  %v16099_v43 = vshrl.u32 %v14034_v15, 16  ;;  %v11576_v15 = vld [vmem:[%s15550_s3 + $0x1f8] sm:$0xff]  }
 0x399   : > { %v7037_v25 = vsel %vm1523_vm2, %v7035_v39, %v7036_v28  ;;  %11161 = vmatprep.subr.bf16.mxu1 %v11570_v5  ;;  %v16100_v28 = vshll.u32 %v14074_v3, 16 }
 0x39a   : > { %11108 = vmatmul.mubr.bf16.gmra.mrb[88].mxu0 %v7037_v25  ;;  %v7040_v10 = vsel %vm1523_vm2, %v7038_v38, %v7039_v1  ;;  %v10789_v16 = vpop.f32.mrb[200].mxu1  ;;  %v7044_v18 = vor.u32 %v7042_v7, %v16099_v43  ;;  %v7041_v27 = vor.u32 %v7039_v1, %v16101_v51  ;;  %v16102_v38 = vshll.u32 %v14091_v58, 16 }
 0x39b   : > { %11111 = vmatprep.mubr.bf16.mxu0 %v7040_v10  ;;  %v5016_v53 = vpop.f32.mrb[201].mxu1  ;;  %11220 = vmatpush3.bf16.msra.mxu0 %v11571_v26  ;;  %v7045_v24 = vrot.slane %v16100_v28, 1  ;;  %v16104_v10 = vshrl.u32 %v14074_v3, 16 }
 0x39c   : > { %v10790_v44 = vpop.f32.mrb[202].mxu1  ;;  %11162 = vmatpush3.bf16.msra.mxu1 %v11570_v5  ;;  %11221 = vmatprep.subr.bf16.mxu0 %v11572_v8  ;;  %v7043_v26 = vsel %vm1523_vm2, %v7041_v27, %v7042_v7  ;;  %v7048_v34 = vrot.slane %v16102_v38, 1  ;;  %v16109_v38 = vld [vmem:[#allocation56_spill] sm:$0xff] }
 0x39d   : > { %v5018_v9 = vpop.f32.mrb[203].mxu1  ;;  %11275 = vmatprep.subr.bf16.mxu1 %v14727_v49  ;;  %v7046_v39 = vsel %vm1523_vm2, %v7044_v18, %v7045_v24  ;;  %v7047_v53 = vor.u32 %v7045_v24, %v16104_v10  ;;  %v16106_v18 = vshll.u32 %v14135_v63, 16 }
 0x39f   : > { %11052 = vmatmul.mubr.bf16.gmra.mrb[48].mxu1 %v14074_v3  ;;  %11222 = vmatpush3.bf16.msra.mxu0 %v11572_v8  ;;  %v7049_v43 = vsel %vm1523_vm2, %v7047_v53, %v7048_v34  ;;  %v7054_v28 = vrot.slane %v16106_v18, 1 }
 0x3a0   : > { %v10849_v19 = vpop.f32.mrb[244].mxu0  ;;  %11055 = vmatprep.mubr.bf16.mxu1 %v14091_v58  ;;  %11223 = vmatprep.subr.bf16.mxu0 %v11574_v14 }
 0x3a1   : > { %v14744_v50 = vadd.f32 %v10849_v19, %v10785_v33  ;;  %v5533_v5 = vpop.f32.mrb[245].mxu0 }
 0x3a2   : > { %v14750_v45 = vadd.f32 %v5533_v5, %v5001_v52  ;;  %v10850_v48 = vpop.f32.mrb[246].mxu0  ;;  %11112 = vmatmul.mubr.bf16.gmra.mrb[92].mxu0 %v7043_v26  ;;  %v10793_v1 = vpop.f32.mrb[204].mxu1  ;;  %v16103_v52 = vshrl.u32 %v14091_v58, 16  ;;  %v16107_v5 = vshrl.u32 %v14135_v63, 16  ;;  %v16108_v26 = vshrl.u32 %v14108_v37, 16 }
 0x3a3   : > { %v14755_v0 = vadd.f32 %v10850_v48, %v10786_v4  ;;  %v5536_v33 = vpop.f32.mrb[247].mxu0  ;;  %11115 = vmatprep.mubr.bf16.mxu0 %v7046_v39  ;;  %v5030_v8 = vpop.f32.mrb[205].mxu1  ;;  %11224 = vmatpush3.bf16.msra.mxu0 %v11574_v14  ;;  %v16105_v4 = vshll.u32 %v14108_v37, 16 }
 0x3a4   : > { %v10794_v25 = vpop.f32.mrb[206].mxu1  ;;  %11225 = vmatprep.subr.bf16.mxu0 %v11576_v15  ;;  %v7050_v7 = vor.u32 %v7048_v34, %v16103_v52  ;;  %v16110_v34 = vshll.u32 %v16109_v38, 16  ;;  %v16111_v33 = vld [vmem:[#allocation57_spill] sm:$0xff] }
 0x3a5   : > { %v5033_v12 = vpop.f32.mrb[207].mxu1  ;;  %v7051_v44 = vrot.slane %v16105_v4, 1 }
 0x3a6   : > { %v7057_v39 = vrot.slane %v16110_v34, 1 }
 0x3a7   : > { %11056 = vmatmul.mubr.bf16.gmra.mrb[52].mxu1 %v14108_v37  ;;  %11226 = vmatpush3.bf16.msra.mxu0 %v11576_v15  ;;  %v7052_v58 = vsel %vm1523_vm2, %v7050_v7, %v7051_v44  ;;  %v7056_v15 = vor.u32 %v7054_v28, %v16107_v5  ;;  %v7053_v48 = vor.u32 %v7051_v44, %v16108_v26 }
 0x3a8   : > { %11059 = vmatprep.mubr.bf16.mxu1 %v14135_v63 }
 0x3a9   : > { %v10853_v14 = vpop.f32.mrb[248].mxu0  ;;  %v7055_v1 = vsel %vm1523_vm2, %v7053_v48, %v7054_v28  ;;  %v7058_v63 = vsel %vm1523_vm2, %v7056_v15, %v7057_v39  ;;  %v16113_v28 = vshrl.u32 %v16111_v33, 16  ;;  %v16116_v15 = vshrl.u32 %v16109_v38, 16  ;;  %v16117_v48 = vld [vmem:[#allocation63_spill] sm:$0xff] }
 0x3aa   : > { %11116 = vmatmul.mubr.bf16.gmra.mrb[96].mxu0 %v7049_v43  ;;  %v14769_v51 = vadd.f32 %v10853_v14, %v10789_v16  ;;  %v5548_v3 = vpop.f32.mrb[249].mxu0 }
 0x3ab   : > { %11119 = vmatprep.mubr.bf16.mxu0 %v7052_v58  ;;  %v10854_v24 = vpop.f32.mrb[250].mxu0  ;;  %v7059_v26 = vor.u32 %v7057_v39, %v16116_v15  ;;  %v16121_v15 = vld [vmem:[#allocation64_spill] sm:$0xff] }
 0x3ac   : > { %v5550_v27 = vpop.f32.mrb[251].mxu0  ;;  %v16114_v24 = vld [vmem:[#allocation62_spill] sm:$0xff] }
 0x3ad   : > { %v14771_v19 = vadd.f32 %v5550_v27, %v5018_v9  ;;  %v16112_v9 = vshll.u32 %v16111_v33, 16  ;;  %v16115_v27 = vshll.u32 %v16114_v24, 16 }
 0x3af   : > { %11060 = vmatmul.mubr.bf16.gmra.mrb[56].mxu1 %v16109_v38  ;;  %v7060_v7 = vrot.slane %v16112_v9, 1  ;;  %v7063_v5 = vrot.slane %v16115_v27, 1 }
 0x3b0   : > { %11063 = vmatprep.mubr.bf16.mxu1 %v16111_v33  ;;  %v10797_v16 = vpop.f32.mrb[208].mxu1 }
 0x3b1   : > { %v5045_v52 = vpop.f32.mrb[209].mxu1  ;;  %v7062_v3 = vor.u32 %v7060_v7, %v16113_v28 }
 0x3b2   : > { %11120 = vmatmul.mubr.bf16.gmra.mrb[100].mxu0 %v7055_v1  ;;  %v10857_v10 = vpop.f32.mrb[252].mxu0  ;;  %v10798_v37 = vpop.f32.mrb[210].mxu1 }
 0x3b3   : > { %11123 = vmatprep.mubr.bf16.mxu0 %v7058_v63  ;;  %v5562_v53 = vpop.f32.mrb[253].mxu0  ;;  %v5048_v4 = vpop.f32.mrb[211].mxu1 }
 0x3b4   : > { %v14785_v44 = vadd.f32 %v5562_v53, %v5030_v8  ;;  %v10858_v43 = vpop.f32.mrb[254].mxu0  ;;  %v7061_v8 = vsel %vm1523_vm2, %v7059_v26, %v7060_v7 }
 0x3b5   : > { %v14787_v14 = vadd.f32 %v10858_v43, %v10794_v25  ;;  %v5565_v18 = vpop.f32.mrb[255].mxu0  ;;  %v16118_v25 = vshll.u32 %v16117_v48, 16 }
 0x3b6   : > { %v14789_v58 = vadd.f32 %v5565_v18, %v5033_v12  ;;  %v7064_v12 = vsel %vm1523_vm2, %v7062_v3, %v7063_v5  ;;  %v16119_v18 = vshrl.u32 %v16117_v48, 16  ;;  %v16120_v3 = vshrl.u32 %v16114_v24, 16 }
 0x3b7   : > { %11064 = vmatmul.mubr.bf16.gmra.mrb[60].mxu1 %v16114_v24  ;;  %v7066_v34 = vrot.slane %v16118_v25, 1 }
 0x3b8   : > { %11067 = vmatprep.mubr.bf16.mxu1 %v16117_v48  ;;  %v7065_v27 = vor.u32 %v7063_v5, %v16120_v3 }
 0x3b9   : > { %v7068_v28 = vor.u32 %v7066_v34, %v16119_v18 }
 0x3ba   : > { %11124 = vmatmul.mubr.bf16.gmra.mrb[104].mxu0 %v7061_v8  ;;  %v10861_v33 = vpop.f32.mrb[0].mxu0  ;;  %v10801_v1 = vpop.f32.mrb[212].mxu1  ;;  %v16123_v8 = vld [vmem:[#allocation67_spill] sm:$0xff] }
 0x3bb   : > { %11127 = vmatprep.mubr.bf16.mxu0 %v7064_v12  ;;  %v14803_v9 = vadd.f32 %v10861_v33, %v10797_v16  ;;  %v5577_v63 = vpop.f32.mrb[1].mxu0  ;;  %v5060_v38 = vpop.f32.mrb[213].mxu1  ;;  %v16122_v16 = vshll.u32 %v16121_v15, 16 }
 0x3bc   : > { %v14805_v39 = vadd.f32 %v5577_v63, %v5045_v52  ;;  %v10862_v10 = vpop.f32.mrb[2].mxu0  ;;  %v10802_v53 = vpop.f32.mrb[214].mxu1  ;;  %v7067_v52 = vsel %vm1523_vm2, %v7065_v27, %v7066_v34  ;;  %v16126_v34 = vshrl.u32 %v16121_v15, 16  ;;  %v16127_v27 = vld [vmem:[#allocation83_spill] sm:$0xff] }
 0x3bd   : > { %v14807_v4 = vadd.f32 %v10862_v10, %v10798_v37  ;;  %v5580_v7 = vpop.f32.mrb[3].mxu0  ;;  %v5062_v43 = vpop.f32.mrb[215].mxu1  ;;  %v7069_v26 = vrot.slane %v16122_v16, 1  ;;  %v16124_v37 = vshll.u32 %v16123_v8, 16  ;;  %v16125_v53 = vshrl.u32 %v16123_v8, 16 }
 0x3bf   : > { %11068 = vmatmul.mubr.bf16.gmra.mrb[64].mxu1 %v16121_v15  ;;  %v7072_v25 = vrot.slane %v16124_v37, 1  ;;  %v7070_v12 = vsel %vm1523_vm2, %v7068_v28, %v7069_v26  ;;  %v7071_v18 = vor.u32 %v7069_v26, %v16126_v34  ;;  %v16128_v28 = vshll.u32 %v16127_v27, 16 }
 0x3c0   : > { %11071 = vmatprep.mubr.bf16.mxu1 %v16123_v8 }
 0x3c1   : > { %v7074_v7 = vor.u32 %v7072_v25, %v16125_v53  ;;  %v16129_v53 = vshrl.u32 %v16127_v27, 16 }
 0x3c2   : > { %11128 = vmatmul.mubr.bf16.gmra.mrb[108].mxu0 %v7067_v52  ;;  %v10805_v48 = vpop.f32.mrb[216].mxu1  ;;  %v7075_v52 = vrot.slane %v16128_v28, 1 }
 0x3c3   : > { %11131 = vmatprep.mubr.bf16.mxu0 %v7070_v12  ;;  %v5074_v33 = vpop.f32.mrb[217].mxu1 }
 0x3c4   : > { %v10806_v24 = vpop.f32.mrb[218].mxu1  ;;  %v10865_v5 = vpop.f32.mrb[4].mxu0  ;;  %v7076_v8 = vsel %vm1523_vm2, %v7074_v7, %v7075_v52  ;;  %v7077_v34 = vor.u32 %v7075_v52, %v16129_v53 }
 0x3c5   : > { %v5077_v63 = vpop.f32.mrb[219].mxu1  ;;  %v14821_v38 = vadd.f32 %v10865_v5, %v10801_v1  ;;  %v5592_v10 = vpop.f32.mrb[5].mxu0  ;;  %v7073_v1 = vsel %vm1523_vm2, %v7071_v18, %v7072_v25 }
 0x3c6   : > { %v10866_v3 = vpop.f32.mrb[6].mxu0  ;;  %v7079_v18 = vsel %vm1523_vm2, %v7077_v34, %v14454_v41 }
 0x3c7   : > { %11072 = vmatmul.mubr.bf16.gmra.mrb[68].mxu1 %v16127_v27  ;;  %v5594_v16 = vpop.f32.mrb[7].mxu0 }
 0x3c8   : > { %11075 = vmatprep.mubr.bf16.mxu1 %v14255_v36  ;;  %v14831_v37 = vadd.f32 %v5594_v16, %v5062_v43 }
 0x3ca   : > { %11132 = vmatmul.mubr.bf16.gmra.mrb[112].mxu0 %v7073_v1  ;;  %v10809_v12 = vpop.f32.mrb[220].mxu1 }
 0x3cb   : > { %11135 = vmatprep.mubr.bf16.mxu0 %v7076_v8  ;;  %v5089_v15 = vpop.f32.mrb[221].mxu1  ;;  %v16130_v8 = vld [vmem:[#allocation87_spill] sm:$0xff] }
 0x3cc   : > { %v10810_v26 = vpop.f32.mrb[222].mxu1  ;;  %v10869_v48 = vpop.f32.mrb[8].mxu0 }
 0x3cd   : > { %v5092_v5 = vpop.f32.mrb[223].mxu1  ;;  %v5606_v10 = vpop.f32.mrb[9].mxu0 }
 0x3ce   : > { %v14837_v3 = vadd.f32 %v5606_v10, %v5074_v33  ;;  %v10870_v36 = vpop.f32.mrb[10].mxu0  ;;  %v16131_v5 = vld [vmem:[#allocation52_spill] sm:$0xff] }
 0x3cf   : > { %11076 = vmatmul.mubr.bf16.gmra.mrb[72].mxu1 %v14274_v21  ;;  %v14840_v43 = vadd.f32 %v10870_v36, %v10806_v24  ;;  %v5609_v25 = vpop.f32.mrb[11].mxu0  ;;  %v9330_v21 = vcombine.low %v14505_v13, %v14505_v13 }
 0x3d0   : > { %11079 = vmatprep.mubr.bf16.mxu1 %v14503_v47  ;;  %v14843_v7 = vadd.f32 %v5609_v25, %v5077_v63 }
 0x3d2   : > { %11136 = vmatmul.mubr.bf16.gmra.mrb[116].mxu0 %v7079_v18  ;;  %v10813_v16 = vpop.f32.mrb[224].mxu1 }
 0x3d3   : > { %11139 = vmatprep.mubr.bf16.mxu0 %v14509_v31  ;;  %v5104_v27 = vpop.f32.mrb[225].mxu1  ;;  %v7101_v31 = vshll.u32 %v9330_v21, 16 }
 0x3d4   : > { %v10814_v33 = vpop.f32.mrb[226].mxu1  ;;  %v10873_v28 = vpop.f32.mrb[12].mxu0 }
 0x3d5   : > { %v5106_v52 = vpop.f32.mrb[227].mxu1  ;;  %v14850_v24 = vadd.f32 %v10873_v28, %v10809_v12  ;;  %v5621_v1 = vpop.f32.mrb[13].mxu0  ;;  %v7103_v25 = vrot.slane %v7101_v31, 1  ;;  %v16133_v33 = vld [vmem:[#allocation55_spill] sm:$0xff] }
 0x3d6   : > { %v14852_v47 = vadd.f32 %v5621_v1, %v5089_v15  ;;  %v10874_v63 = vpop.f32.mrb[14].mxu0  ;;  %v16132_v15 = vshrl.u32 %v16130_v8, 16  ;;  %v16134_v28 = vld [vmem:[#allocation19_spill] sm:$0xff]  ;;  %v11578_v1 = vld [vmem:[%s15550_s3 + $0x210] sm:$0xff]  }
 0x3d7   : > { %11080 = vmatmul.mubr.bf16.gmra.mrb[76].mxu1 %v16130_v8  ;;  %v14855_v41 = vadd.f32 %v10874_v63, %v10810_v26  ;;  %v5624_v48 = vpop.f32.mrb[15].mxu0  ;;  %v11577_v26 = vld [vmem:[%s15550_s3 + $0x208] sm:$0xff]   ;;  %v16135_v63 = vld [vmem:[#allocation43_spill] sm:$0xff] }
 0x3d8   : > { %11163 = vmatprep.mubr.bf16.mxu1 %v16131_v5  ;;  %v7099_v53 = vor.u32 %v16132_v15, %v14535_v61 }
 0x3da   : > { %11140 = vmatmul.mubr.bf16.gmra.mrb[120].mxu0 %v14533_v57  ;;  %v10817_v10 = vpop.f32.mrb[228].mxu1  ;;  %v7104_v61 = vsel %vm1523_vm2, %v7099_v53, %v7103_v25  ;;  %v16136_v53 = vld [vmem:[#allocation23_spill] sm:$0xff] }
 0x3db   : > { %11143 = vmatprep.mubr.bf16.mxu0 %v14544_v35  ;;  %v5118_v13 = vpop.f32.mrb[229].mxu1 }
 0x3dc   : > { %v10818_v12 = vpop.f32.mrb[230].mxu1  ;;  %v10877_v34 = vpop.f32.mrb[16].mxu0 }
 0x3dd   : > { %v5121_v36 = vpop.f32.mrb[231].mxu1  ;;  %v14866_v18 = vadd.f32 %v10877_v34, %v10813_v16  ;;  %v5636_v27 = vpop.f32.mrb[17].mxu0 }
 0x3de   : > { %v10878_v57 = vpop.f32.mrb[18].mxu0  ;;  %v16137_v27 = vld [vmem:[#allocation21_spill] sm:$0xff] }
 0x3df   : > { %11164 = vmatmul.mubr.bf16.vlgmr.msra.gmra.mrb[80].mxu1 %v16133_v33  ;;  %v5638_v35 = vpop.f32.mrb[19].mxu0  ;;  %v11580_v57 = vld [vmem:[%s15550_s3 + $0x220] sm:$0xff]   ;;  %v16138_v33 = vld [vmem:[#allocation45_spill] sm:$0xff] }
 0x3e0   : > { %11167 = vmatprep.mubr.bf16.mxu1 %v16134_v28  ;;  %11276 = vmatpush3.bf16.msra.mxu1 %v14727_v49  ;;  %v14871_v21 = vadd.f32 %v5638_v35, %v5106_v52  ;;  %v11579_v49 = vld [vmem:[%s15550_s3 + $0x218] sm:$0xff]   ;;  %v16139_v35 = vld [vmem:[#allocation48_spill] sm:$0xff] }
 0x3e1   : > { %11277 = vmatprep.subr.bf16.mxu1 %v11577_v26 }
 0x3e2   : > { %11144 = vmatmul.mubr.bf16.gmra.mrb[124].mxu0 %v7104_v61  ;;  %v10821_v16 = vpop.f32.mrb[232].mxu1 }
 0x3e3   : > { %11227 = vmatprep.mubr.bf16.mxu0 %v16135_v63  ;;  %v5133_v8 = vpop.f32.mrb[233].mxu1 }
 0x3e4   : > { %v10822_v48 = vpop.f32.mrb[234].mxu1  ;;  %11278 = vmatpush3.bf16.msra.mxu1 %v11577_v26  ;;  %v10881_v5 = vpop.f32.mrb[20].mxu0 }
 0x3e5   : > { %v5136_v31 = vpop.f32.mrb[235].mxu1  ;;  %11279 = vmatprep.subr.bf16.mxu1 %v11578_v1  ;;  %v5650_v52 = vpop.f32.mrb[21].mxu0 }
 0x3e6   : > { %v14881_v10 = vadd.f32 %v5650_v52, %v5118_v13  ;;  %v10882_v15 = vpop.f32.mrb[22].mxu0 }
 0x3e7   : > { %11168 = vmatmul.mubr.bf16.gmra.mrb[84].mxu1 %v16136_v53  ;;  %v14884_v34 = vadd.f32 %v10882_v15, %v10818_v12  ;;  %v5653_v25 = vpop.f32.mrb[23].mxu0  ;;  %v16140_v15 = vld [vmem:[#allocation41_spill] sm:$0xff] }
 0x3e8   : > { %11171 = vmatprep.mubr.bf16.mxu1 %v16137_v27  ;;  %11280 = vmatpush3.bf16.msra.mxu1 %v11578_v1  ;;  %v14887_v26 = vadd.f32 %v5653_v25, %v5121_v36  ;;  %v11581_v36 = vld [vmem:[%s15550_s3 + $0x228] sm:$0xff]   ;;  %v16141_v27 = vld [vmem:[#allocation22_spill] sm:$0xff] }
 0x3e9   : > { %11281 = vmatprep.subr.bf16.mxu1 %v11579_v49 }
 0x3ea   : > { %11228 = vmatmul.mubr.bf16.vlgmr.msra.gmra.mrb[128].mxu0 %v16138_v33  ;;  %v10825_v13 = vpop.f32.mrb[236].mxu1  ;;  %v16142_v33 = vld [vmem:[#allocation49_spill] sm:$0xff] }
 0x3eb   : > { %11231 = vmatprep.mubr.bf16.mxu0 %v16139_v35  ;;  %v5148_v28 = vpop.f32.mrb[237].mxu1  ;;  %v16143_v35 = vld [vmem:[#allocation54_spill] sm:$0xff] }
 0x3ec   : > { %v10826_v61 = vpop.f32.mrb[238].mxu1  ;;  %11282 = vmatpush3.bf16.msra.mxu1 %v11579_v49  ;;  %v10885_v12 = vpop.f32.mrb[24].mxu0  ;;  %v11582_v49 = vld [vmem:[%s15550_s3 + $0x230] sm:$0xff]  }
 0x3ed   : > { %v5150_v63 = vpop.f32.mrb[239].mxu1  ;;  %11283 = vmatprep.subr.bf16.mxu1 %v11580_v57  ;;  %v14897_v1 = vadd.f32 %v10885_v12, %v10821_v16  ;;  %v5665_v5 = vpop.f32.mrb[25].mxu0 }
 0x3ee   : > { %v14899_v31 = vadd.f32 %v5665_v5, %v5133_v8  ;;  %v10886_v52 = vpop.f32.mrb[26].mxu0 }
 0x3ef   : > { %11172 = vmatmul.mubr.bf16.gmra.mrb[88].mxu1 %v16140_v15  ;;  %v14902_v53 = vadd.f32 %v10886_v52, %v10822_v48  ;;  %v5668_v25 = vpop.f32.mrb[27].mxu0 }
 0x3f0   : > { %11175 = vmatprep.mubr.bf16.mxu1 %v16141_v27  ;;  %11284 = vmatpush3.bf16.msra.mxu1 %v11580_v57  ;;  %v11586_v57 = vld [vmem:[%s15550_s3 + $0x238] sm:$0xff]  }
 0x3f1   : > { %11285 = vmatprep.subr.bf16.mxu1 %v11581_v36 }
 0x3f2   : > { %11232 = vmatmul.mubr.bf16.gmra.mrb[132].mxu0 %v16142_v33  ;;  %v10909_v16 = vpop.f32.mrb[240].mxu1  ;;  %v16144_v33 = vld [vmem:[#allocation47_spill] sm:$0xff] }
 0x3f3   : > { %11235 = vmatprep.mubr.bf16.mxu0 %v16143_v35  ;;  %v6015_v8 = vpop.f32.mrb[241].mxu1  ;;  %v16145_v16 = vld [vmem:[#allocation51_spill] sm:$0xff] }
 0x3f4   : > { %v6190_v28 = vadd.f32 %v6015_v8, %v14700_v56  ;;  %v10910_v61 = vpop.f32.mrb[242].mxu1  ;;  %11286 = vmatpush3.bf16.msra.mxu1 %v11581_v36  ;;  %v10889_v48 = vpop.f32.mrb[28].mxu0  ;;  %v16147_v8 = vld [vmem:[#allocation26_spill] sm:$0xff] }
 0x3f5   : > { %v6192_v12 = vadd.f32 %v10910_v61, %v14702_v55  ;;  %v6018_v5 = vpop.f32.mrb[243].mxu1  ;;  %11287 = vmatprep.subr.bf16.mxu1 %v11582_v49  ;;  %v14915_v52 = vadd.f32 %v10889_v48, %v10825_v13  ;;  %v5680_v15 = vpop.f32.mrb[29].mxu0  ;;  %v16146_v55 = vld [vmem:[#allocation18_spill] sm:$0xff] }
 0x3f6   : > { %v6191_v25 = vadd.f32 %v6018_v5, %v14704_v42  ;;  %v10890_v27 = vpop.f32.mrb[30].mxu0 }
 0x3f7   : > { %11176 = vmatmul.mubr.bf16.gmra.mrb[92].mxu1 %v16144_v33  ;;  %v5682_v56 = vpop.f32.mrb[31].mxu0 }
 0x3f8   : > { %11179 = vmatprep.mubr.bf16.mxu1 %v16145_v16  ;;  %11288 = vmatpush3.bf16.msra.mxu1 %v11582_v49  ;;  %v14920_v36 = vadd.f32 %v5682_v56, %v5150_v63  ;;  %v16148_v56 = vld [vmem:[#allocation58_spill] sm:$0xff] }
 0x3f9   : > { %11289 = vmatprep.subr.bf16.mxu1 %v11586_v57 }
 0x3fa   : > { %11236 = vmatmul.mubr.bf16.gmra.mrb[136].mxu0 %v16146_v55  ;;  %v10913_v35 = vpop.f32.mrb[244].mxu1 }
 0x3fb   : > { %11239 = vmatprep.mubr.bf16.mxu0 %v16147_v8  ;;  %v6194_v13 = vadd.f32 %v10913_v35, %v14744_v50  ;;  %v6030_v61 = vpop.f32.mrb[245].mxu1  ;;  %v16149_v8 = vld [vmem:[#allocation60_spill] sm:$0xff]  ;;  %v16151_v35 = vld [vmem:[#allocation42_spill] sm:$0xff] }
 0x3fc   : > { %v6193_v42 = vadd.f32 %v6030_v61, %v14750_v45  ;;  %v10914_v48 = vpop.f32.mrb[246].mxu1  ;;  %11290 = vmatpush3.bf16.msra.mxu1 %v11586_v57  ;;  %v10973_v5 = vpop.f32.mrb[32].mxu0  ;;  %v16150_v45 = vld [vmem:[#allocation39_spill] sm:$0xff] }
 0x3fd   : > { %v6195_v15 = vadd.f32 %v10914_v48, %v14755_v0  ;;  %v6033_v27 = vpop.f32.mrb[247].mxu1  ;;  %v6460_v49 = vpop.f32.mrb[33].mxu0 }
 0x3fe   : > { %v14927_v63 = vadd.f32 %v6460_v49, %v6190_v28  ;;  %v10974_v33 = vpop.f32.mrb[34].mxu0 }
 0x3ff   : > { %11180 = vmatmul.mubr.bf16.gmra.mrb[96].mxu1 %v16148_v56  ;;  %v14930_v16 = vadd.f32 %v10974_v33, %v6192_v12  ;;  %v6463_v55 = vpop.f32.mrb[35].mxu0  ;;  %v16152_v56 = vld [vmem:[#allocation61_spill] sm:$0xff] }
 0x400   : > { %11183 = vmatprep.mubr.bf16.mxu1 %v16149_v8  ;;  %v14933_v50 = vadd.f32 %v6463_v55, %v6191_v25 }
 0x402   : > { %11240 = vmatmul.mubr.bf16.gmra.mrb[140].mxu0 %v16150_v45  ;;  %v10917_v57 = vpop.f32.mrb[248].mxu1  ;;  %v16153_v45 = vld [vmem:[#allocation65_spill] sm:$0xff] }
 0x403   : > { %11243 = vmatprep.mubr.bf16.mxu0 %v16151_v35  ;;  %v6197_v0 = vadd.f32 %v10917_v57, %v14769_v51  ;;  %v6045_v61 = vpop.f32.mrb[249].mxu1  ;;  %v16154_v51 = vld [vmem:[#allocation44_spill] sm:$0xff]  ;;  %v16155_v35 = vld [vmem:[#allocation46_spill] sm:$0xff] }
 0x404   : > { %v10918_v28 = vpop.f32.mrb[250].mxu1  ;;  %v10977_v48 = vpop.f32.mrb[36].mxu0 }
 0x405   : > { %v6047_v5 = vpop.f32.mrb[251].mxu1  ;;  %v14938_v27 = vadd.f32 %v10977_v48, %v6194_v13  ;;  %v6475_v12 = vpop.f32.mrb[37].mxu0 }
 0x406   : > { %v6196_v49 = vadd.f32 %v6047_v5, %v14771_v19  ;;  %v14941_v33 = vadd.f32 %v6475_v12, %v6193_v42  ;;  %v10978_v25 = vpop.f32.mrb[38].mxu0 }
 0x407   : > { %11184 = vmatmul.mubr.bf16.gmra.mrb[100].mxu1 %v16152_v56  ;;  %v14944_v55 = vadd.f32 %v10978_v25, %v6195_v15  ;;  %v6478_v8 = vpop.f32.mrb[39].mxu0  ;;  %v16156_v56 = vld [vmem:[#allocation69_spill] sm:$0xff] }
 0x408   : > { %11187 = vmatprep.mubr.bf16.mxu1 %v16153_v45  ;;  %v16157_v45 = vld [vmem:[#allocation70_spill] sm:$0xff] }
 0x40a   : > { %11244 = vmatmul.mubr.bf16.gmra.mrb[144].mxu0 %v16154_v51  ;;  %v10921_v57 = vpop.f32.mrb[252].mxu1 }
 0x40b   : > { %11247 = vmatprep.mubr.bf16.mxu0 %v16155_v35  ;;  %v6059_v13 = vpop.f32.mrb[253].mxu1  ;;  %v16158_v57 = vld [vmem:[#allocation50_spill] sm:$0xff]  ;;  %v16159_v35 = vld [vmem:[#allocation53_spill] sm:$0xff] }
 0x40c   : > { %v6198_v61 = vadd.f32 %v6059_v13, %v14785_v44  ;;  %v10922_v28 = vpop.f32.mrb[254].mxu1  ;;  %v10981_v19 = vpop.f32.mrb[40].mxu0 }
 0x40d   : > { %v6200_v42 = vadd.f32 %v10922_v28, %v14787_v14  ;;  %v6062_v48 = vpop.f32.mrb[255].mxu1  ;;  %v14951_v5 = vadd.f32 %v10981_v19, %v6197_v0  ;;  %v6490_v15 = vpop.f32.mrb[41].mxu0 }
 0x40e   : > { %v6199_v12 = vadd.f32 %v6062_v48, %v14789_v58  ;;  %v10982_v25 = vpop.f32.mrb[42].mxu0 }
 0x40f   : > { %11188 = vmatmul.mubr.bf16.gmra.mrb[104].mxu1 %v16156_v56  ;;  %v6492_v8 = vpop.f32.mrb[43].mxu0  ;;  %v16160_v56 = vld [vmem:[#allocation71_spill] sm:$0xff] }
 0x410   : > { %11191 = vmatprep.mubr.bf16.mxu1 %v16157_v45  ;;  %v14956_v51 = vadd.f32 %v6492_v8, %v6196_v49 }
 0x412   : > { %11248 = vmatmul.mubr.bf16.gmra.mrb[148].mxu0 %v16158_v57  ;;  %v10925_v44 = vpop.f32.mrb[0].mxu1  ;;  %v16161_v57 = vld [vmem:[#allocation72_spill] sm:$0xff] }
 0x413   : > { %11251 = vmatprep.mubr.bf16.mxu0 %v16159_v35  ;;  %v6202_v14 = vadd.f32 %v10925_v44, %v14803_v9  ;;  %v6074_v0 = vpop.f32.mrb[1].mxu1  ;;  %v16162_v44 = vld [vmem:[#allocation59_spill] sm:$0xff] }
 0x414   : > { %v6201_v13 = vadd.f32 %v6074_v0, %v14805_v39  ;;  %v10926_v28 = vpop.f32.mrb[2].mxu1  ;;  %v10985_v58 = vpop.f32.mrb[44].mxu0 }
 0x415   : > { %v6203_v19 = vadd.f32 %v10926_v28, %v14807_v4  ;;  %v6077_v48 = vpop.f32.mrb[3].mxu1  ;;  %v6504_v15 = vpop.f32.mrb[45].mxu0 }
 0x416   : > { %v14963_v25 = vadd.f32 %v6504_v15, %v6198_v61  ;;  %v10986_v49 = vpop.f32.mrb[46].mxu0 }
 0x417   : > { %11192 = vmatmul.mubr.bf16.gmra.mrb[108].mxu1 %v16160_v56  ;;  %v14966_v8 = vadd.f32 %v10986_v49, %v6200_v42  ;;  %v6507_v45 = vpop.f32.mrb[47].mxu0  ;;  %v16163_v49 = vld [vmem:[#allocation73_spill] sm:$0xff] }
 0x418   : > { %11195 = vmatprep.mubr.bf16.mxu1 %v16161_v57  ;;  %v14969_v9 = vadd.f32 %v6507_v45, %v6199_v12 }
 0x41a   : > { %11252 = vmatmul.mubr.bf16.gmra.mrb[152].mxu0 %v16162_v44  ;;  %v10929_v39 = vpop.f32.mrb[4].mxu1 }
 0x41b   : > { %11255 = vmatprep.mubr.bf16.mxu0 %v14186_v2  ;;  %v6205_v4 = vadd.f32 %v10929_v39, %v14821_v38  ;;  %v6089_v35 = vpop.f32.mrb[5].mxu1  ;;  %v16164_v2 = vld [vmem:[#allocation74_spill] sm:$0xff] }
 0x41c   : > { %v10930_v61 = vpop.f32.mrb[6].mxu1  ;;  %v10989_v0 = vpop.f32.mrb[48].mxu0  ;;  %v14983_v38 = vld [vmem:[#allocation3 + $0xe0] sm:$0xf] }
 0x41d   : > { %v6091_v28 = vpop.f32.mrb[7].mxu1  ;;  %v14974_v58 = vadd.f32 %v10989_v0, %v6202_v14  ;;  %v6519_v42 = vpop.f32.mrb[49].mxu0  ;;  %v9356_v44 = vcombine.low %v14983_v38, %v14983_v38 }
 0x41e   : > { %v6204_v48 = vadd.f32 %v6091_v28, %v14831_v37  ;;  %v14977_v15 = vadd.f32 %v6519_v42, %v6201_v13  ;;  %v10990_v12 = vpop.f32.mrb[50].mxu0  ;;  %v16165_v42 = vld [vmem:[#allocation75_spill] sm:$0xff] }
 0x41f   : > { %11196 = vmatmul.mubr.bf16.gmra.mrb[112].mxu1 %v16163_v49  ;;  %v14980_v56 = vadd.f32 %v10990_v12, %v6203_v19  ;;  %v6522_v45 = vpop.f32.mrb[51].mxu0  ;;  %v7462_v12 = vshll.u32 %v9356_v44, 16 }
 0x420   : > { %11199 = vmatprep.mubr.bf16.mxu1 %v16164_v2 }
 0x422   : > { %11256 = vmatmul.mubr.bf16.gmra.mrb[156].mxu0 %v14188_v30  ;;  %v10933_v57 = vpop.f32.mrb[8].mxu1 }
 0x423   : > { %11259 = vmatprep.mubr.bf16.mxu0 %v14230_v17  ;;  %v6103_v14 = vpop.f32.mrb[9].mxu1 }
 0x424   : > { %v6206_v37 = vadd.f32 %v6103_v14, %v14837_v3  ;;  %v10934_v13 = vpop.f32.mrb[10].mxu1  ;;  %v10993_v39 = vpop.f32.mrb[52].mxu0  ;;  %v7459_v3 = vshrl.u32 %v9356_v44, 16  ;;  %v7464_v14 = vrot.slane %v7462_v12, 4 }
 0x425   : > { %v6208_v19 = vadd.f32 %v10934_v13, %v14840_v43  ;;  %v6106_v35 = vpop.f32.mrb[11].mxu1  ;;  %v14991_v61 = vadd.f32 %v10993_v39, %v6205_v4  ;;  %v6534_v0 = vpop.f32.mrb[53].mxu0 }
 0x426   : > { %v6207_v28 = vadd.f32 %v6106_v35, %v14843_v7  ;;  %v10994_v30 = vpop.f32.mrb[54].mxu0  ;;  %v7461_v57 = vrot.slane %v7459_v3, 3 }
 0x427   : > { %11200 = vmatmul.mubr.bf16.gmra.mrb[116].mxu1 %v16165_v42  ;;  %v6536_v17 = vpop.f32.mrb[55].mxu0 }
 0x428   : > { %11203 = vmatprep.mubr.bf16.mxu1 %v14548_v29  ;;  %v14996_v49 = vadd.f32 %v6536_v17, %v6204_v48 }
 0x42a   : > { %11260 = vmatmul.mubr.bf16.gmra.mrb[160].mxu0 %v14235_v54  ;;  %v10937_v45 = vpop.f32.mrb[12].mxu1 }
 0x42b   : > { %11263 = vmatprep.mubr.bf16.mxu0 %v14261_v60  ;;  %v6210_v43 = vadd.f32 %v10937_v45, %v14850_v24  ;;  %v6118_v4 = vpop.f32.mrb[13].mxu1  ;;  %v7465_v24 = vor.u32 %v7464_v14, %v7461_v57  ;;  %v11847_v45 = vld [vmem:[#allocation3 + $0xd4] sm:$0xf] }
 0x42c   : > { %v6209_v7 = vadd.f32 %v6118_v4, %v14852_v47  ;;  %v10938_v2 = vpop.f32.mrb[14].mxu1  ;;  %v10997_v13 = vpop.f32.mrb[56].mxu0  ;;  %v11848_v4 = vld [vmem:[#allocation3 + $0xd8] sm:$0xf] }
 0x42d   : > { %v6211_v29 = vadd.f32 %v10938_v2, %v14855_v41  ;;  %v6121_v39 = vpop.f32.mrb[15].mxu1  ;;  %v6548_v44 = vpop.f32.mrb[57].mxu0  ;;  %v7466_v30 = vsel %vm997_vm1, %v14554_v62, %v7465_v24  ;;  %v15024_v62 = vcombine.low %v11847_v45, %v11848_v4  ;;  %v16167_v24 = vld [vmem:[#allocation77_spill] sm:$0xff]  ;;  %v16170_v4 = vld [vmem:[#allocation80_spill] sm:$0xff] }
 0x42e   : > { %v15003_v48 = vadd.f32 %v6548_v44, %v6206_v37  ;;  %v10998_v35 = vpop.f32.mrb[58].mxu0 }
 0x42f   : > { %11204 = vmatmul.mubr.bf16.gmra.mrb[120].mxu1 %v14551_v46  ;;  %v15006_v54 = vadd.f32 %v10998_v35, %v6208_v19  ;;  %v6551_v60 = vpop.f32.mrb[59].mxu0 }
 0x430   : > { %11207 = vmatprep.mubr.bf16.mxu1 %v14576_v22  ;;  %v15009_v47 = vadd.f32 %v6551_v60, %v6207_v28 }
 0x432   : > { %11264 = vmatmul.mubr.bf16.gmra.mrb[164].mxu0 %v14272_v6  ;;  %v10941_v0 = vpop.f32.mrb[16].mxu1 }
 0x433   : > { %11267 = vmatprep.mubr.bf16.mxu0 %v14298_v32  ;;  %v6213_v41 = vadd.f32 %v10941_v0, %v14866_v18  ;;  %v6133_v37 = vpop.f32.mrb[17].mxu1  ;;  %v16166_v18 = vld [vmem:[#allocation76_spill] sm:$0xff] }
 0x434   : > { %v10942_v46 = vpop.f32.mrb[18].mxu1  ;;  %v11001_v19 = vpop.f32.mrb[60].mxu0  ;;  %v16168_v37 = vld [vmem:[#allocation78_spill] sm:$0xff] }
 0x435   : > { %v6135_v42 = vpop.f32.mrb[19].mxu1  ;;  %v15016_v17 = vadd.f32 %v11001_v19, %v6210_v43  ;;  %v6563_v3 = vpop.f32.mrb[61].mxu0 }
 0x436   : > { %v6212_v22 = vadd.f32 %v6135_v42, %v14871_v21  ;;  %v15019_v28 = vadd.f32 %v6563_v3, %v6209_v7  ;;  %v11002_v6 = vpop.f32.mrb[62].mxu0 }
 0x437   : > { %11208 = vmatmul.mubr.bf16.gmra.mrb[124].mxu1 %v7466_v30  ;;  %v15021_v12 = vadd.f32 %v11002_v6, %v6211_v29  ;;  %v6566_v32 = vpop.f32.mrb[63].mxu0  ;;  %v11849_v29 = vld [vmem:[#allocation3 + $0xdc] sm:$0xf] }
 0x438   : > { %11291 = vmatprep.mubr.bf16.mxu1 %v16166_v18  ;;  %v15031_v39 = vcombine.low %v11849_v29, %v14983_v38  ;;  %v16169_v18 = vld [vmem:[#allocation79_spill] sm:$0xff] }
 0x43a   : > { %11268 = vmatmul.mubr.bf16.gmra.mrb[168].mxu0 %v14484_v40  ;;  %v10945_v43 = vpop.f32.mrb[20].mxu1 }
 0x43b   : > { %v6147_v2 = vpop.f32.mrb[21].mxu1  ;;  %11271 = vmatprep.mubr.bf16.mxu0 %v15024_v62 }
 0x43c   : > { %v6214_v21 = vadd.f32 %v6147_v2, %v14881_v10  ;;  %v10946_v7 = vpop.f32.mrb[22].mxu1  ;;  %v11005_v57 = vpop.f32.mrb[64].mxu0 }
 0x43d   : > { %v6216_v14 = vadd.f32 %v10946_v7, %v14884_v34  ;;  %v6150_v13 = vpop.f32.mrb[23].mxu1  ;;  %v15033_v44 = vadd.f32 %v11005_v57, %v6213_v41  ;;  %v6578_v35 = vpop.f32.mrb[65].mxu0 }
 0x43e   : > { %v6215_v40 = vadd.f32 %v6150_v13, %v14887_v26  ;;  %v11006_v60 = vpop.f32.mrb[66].mxu0 }
 0x43f   : > { %11292 = vmatmul.mubr.bf16.vlgmr.msra.gmra.mrb[128].mxu1 %v16167_v24  ;;  %v6580_v0 = vpop.f32.mrb[67].mxu0  ;;  %v16171_v60 = vld [vmem:[#allocation81_spill] sm:$0xff] }
 0x440   : > { %11295 = vmatprep.mubr.bf16.mxu1 %v16168_v37  ;;  %v15038_v10 = vadd.f32 %v6580_v0, %v6212_v22  ;;  %v16172_v0 = vld [vmem:[#allocation82_spill] sm:$0xff] }
 0x442   : > { %11272 = vmatmul.mubr.bf16.gmra.mrb[172].mxu0 %v15031_v39  ;;  %v10949_v34 = vpop.f32.mrb[24].mxu1 }
 0x443   : > { %v6218_v30 = vadd.f32 %v10949_v34, %v14897_v1  ;;  %v6162_v38 = vpop.f32.mrb[25].mxu1 }
 0x444   : > { %v6217_v41 = vadd.f32 %v6162_v38, %v14899_v31  ;;  %v10950_v46 = vpop.f32.mrb[26].mxu1  ;;  %v11009_v19 = vpop.f32.mrb[68].mxu0 }
 0x445   : > { %v6219_v26 = vadd.f32 %v10950_v46, %v14902_v53  ;;  %v6165_v42 = vpop.f32.mrb[27].mxu1  ;;  %v6592_v3 = vpop.f32.mrb[69].mxu0 }
 0x446   : > { %v15044_v6 = vadd.f32 %v6592_v3, %v6214_v21  ;;  %v11010_v32 = vpop.f32.mrb[70].mxu0 }
 0x447   : > { %11296 = vmatmul.mubr.bf16.gmra.mrb[132].mxu1 %v16169_v18  ;;  %v15047_v22 = vadd.f32 %v11010_v32, %v6216_v14  ;;  %v6595_v45 = vpop.f32.mrb[71].mxu0  ;;  %v16174_v18 = vld [vmem:[#allocation85_spill] sm:$0xff] }
 0x448   : > { %11299 = vmatprep.mubr.bf16.mxu1 %v16170_v4  ;;  %v15050_v1 = vadd.f32 %v6595_v45, %v6215_v40 }
 0x44a   : > { %v10953_v43 = vpop.f32.mrb[28].mxu1 }
 0x44b   : > { %v6221_v31 = vadd.f32 %v10953_v43, %v14915_v52  ;;  %v6177_v2 = vpop.f32.mrb[29].mxu1 }
 0x44c   : > { %v10954_v7 = vpop.f32.mrb[30].mxu1  ;;  %v11013_v53 = vpop.f32.mrb[72].mxu0 }
 0x44d   : > { %v6179_v57 = vpop.f32.mrb[31].mxu1  ;;  %v15053_v13 = vadd.f32 %v11013_v53, %v6218_v30  ;;  %v6607_v21 = vpop.f32.mrb[73].mxu0 }
 0x44e   : > { %v6220_v29 = vadd.f32 %v6179_v57, %v14920_v36  ;;  %v15056_v35 = vadd.f32 %v6607_v21, %v6217_v41  ;;  %v11014_v14 = vpop.f32.mrb[74].mxu0 }
 0x44f   : > { %11300 = vmatmul.mubr.bf16.gmra.mrb[136].mxu1 %v16171_v60  ;;  %v15059_v24 = vadd.f32 %v11014_v14, %v6219_v26  ;;  %v6610_v40 = vpop.f32.mrb[75].mxu0  ;;  %v16173_v26 = vld [vmem:[#allocation84_spill] sm:$0xff]  ;;  %v16175_v14 = vld [vmem:[#allocation86_spill] sm:$0xff] }
 0x450   : > { %11303 = vmatprep.mubr.bf16.mxu1 %v16172_v0  ;;  %v16176_v40 = vld [vmem:[#allocation88_spill] sm:$0xff] }
 0x452   : > { %v11037_v52 = vpop.f32.mrb[32].mxu1 }
 0x453   : > { %v6792_v37 = vpop.f32.mrb[33].mxu1 }
 0x454   : > { %v6967_v34 = vadd.f32 %v6792_v37, %v14927_v63  ;;  %v11038_v38 = vpop.f32.mrb[34].mxu1  ;;  %v11017_v30 = vpop.f32.mrb[76].mxu0 }
 0x455   : > { %v6969_v46 = vadd.f32 %v11038_v38, %v14930_v16  ;;  %v6795_v19 = vpop.f32.mrb[35].mxu1  ;;  %v15064_v36 = vadd.f32 %v11017_v30, %v6221_v31  ;;  %v6622_v41 = vpop.f32.mrb[77].mxu0 }
 0x456   : > { %v6968_v42 = vadd.f32 %v6795_v19, %v14933_v50  ;;  %v11018_v3 = vpop.f32.mrb[78].mxu0 }
 0x457   : > { %11304 = vmatmul.mubr.bf16.gmra.mrb[140].mxu1 %v16173_v26  ;;  %v6624_v32 = vpop.f32.mrb[79].mxu0  ;;  %v16177_v3 = vld [vmem:[#allocation89_spill] sm:$0xff] }
 0x458   : > { %11307 = vmatprep.mubr.bf16.mxu1 %v16174_v18  ;;  %v15069_v45 = vadd.f32 %v6624_v32, %v6220_v29 }
 0x45a   : > { %v11041_v4 = vpop.f32.mrb[36].mxu1 }
 0x45b   : > { %v6971_v63 = vadd.f32 %v11041_v4, %v14938_v27  ;;  %v6807_v43 = vpop.f32.mrb[37].mxu1 }
 0x45c   : > { %v6970_v16 = vadd.f32 %v6807_v43, %v14941_v33  ;;  %v11042_v2 = vpop.f32.mrb[38].mxu1  ;;  %v11101_v31 = vpop.f32.mrb[80].mxu0 }
 0x45d   : > { %v6972_v7 = vadd.f32 %v11042_v2, %v14944_v55  ;;  %v6810_v53 = vpop.f32.mrb[39].mxu1  ;;  %v7211_v50 = vpop.f32.mrb[81].mxu0 }
 0x45e   : > { %v15074_v57 = vadd.f32 %v7211_v50, %v6967_v34  ;;  %v11102_v21 = vpop.f32.mrb[82].mxu0 }
 0x45f   : > { %11308 = vmatmul.mubr.bf16.gmra.mrb[144].mxu1 %v16175_v14  ;;  %v15077_v60 = vadd.f32 %v11102_v21, %v6969_v46  ;;  %v7214_v29 = vpop.f32.mrb[83].mxu0  ;;  %v16179_v21 = vld [vmem:[#allocation93_spill] sm:$0xff] }
 0x460   : > { %11311 = vmatprep.mubr.bf16.mxu1 %v16176_v40  ;;  %v15080_v27 = vadd.f32 %v7214_v29, %v6968_v42 }
 0x462   : > { %v11045_v0 = vpop.f32.mrb[40].mxu1 }
 0x463   : > { %v6974_v33 = vadd.f32 %v11045_v0, %v14951_v5  ;;  %v6822_v52 = vpop.f32.mrb[41].mxu1 }
 0x464   : > { %v11046_v37 = vpop.f32.mrb[42].mxu1  ;;  %v11105_v55 = vpop.f32.mrb[84].mxu0 }
 0x465   : > { %v6824_v38 = vpop.f32.mrb[43].mxu1  ;;  %v15083_v30 = vadd.f32 %v11105_v55, %v6971_v63  ;;  %v7226_v34 = vpop.f32.mrb[85].mxu0 }
 0x466   : > { %v6973_v19 = vadd.f32 %v6824_v38, %v14956_v51  ;;  %v15086_v41 = vadd.f32 %v7226_v34, %v6970_v16  ;;  %v11106_v46 = vpop.f32.mrb[86].mxu0  ;;  %v16180_v38 = vld [vmem:[#allocation94_spill] sm:$0xff] }
 0x467   : > { %11312 = vmatmul.mubr.bf16.gmra.mrb[148].mxu1 %v16177_v3  ;;  %v15089_v26 = vadd.f32 %v11106_v46, %v6972_v7  ;;  %v7229_v42 = vpop.f32.mrb[87].mxu0  ;;  %v16178_v7 = vld [vmem:[#allocation90_spill] sm:$0xff] }
 0x468   : > { %11315 = vmatprep.mubr.bf16.mxu1 %v14493_v23 }
 0x46a   : > { %v11049_v5 = vpop.f32.mrb[44].mxu1 }
 0x46b   : > { %v6836_v32 = vpop.f32.mrb[45].mxu1 }
 0x46c   : > { %v6975_v18 = vadd.f32 %v6836_v32, %v14963_v25  ;;  %v11050_v4 = vpop.f32.mrb[46].mxu1 }
 0x46d   : > { %v11109_v63 = vpop.f32.mrb[88].mxu0  ;;  %v6977_v43 = vadd.f32 %v11050_v4, %v14966_v8  ;;  %v6839_v2 = vpop.f32.mrb[47].mxu1 }
 0x46e   : > { %v15094_v51 = vadd.f32 %v11109_v63, %v6974_v33  ;;  %v7241_v16 = vpop.f32.mrb[89].mxu0  ;;  %v6976_v31 = vadd.f32 %v6839_v2, %v14969_v9  ;;  %v16181_v2 = vld [vmem:[#allocation95_spill] sm:$0xff] }
 0x46f   : > { %v11110_v53 = vpop.f32.mrb[90].mxu0  ;;  %11316 = vmatmul.mubr.bf16.gmra.mrb[152].mxu1 %v16178_v7 }
 0x470   : > { %v7243_v50 = vpop.f32.mrb[91].mxu0  ;;  %11319 = vmatprep.mubr.bf16.mxu1 %v16179_v21 }
 0x471   : > { %v15099_v23 = vadd.f32 %v7243_v50, %v6973_v19 }
 0x472   : > { %v11053_v14 = vpop.f32.mrb[48].mxu1 }
 0x473   : > { %v6979_v25 = vadd.f32 %v11053_v14, %v14974_v58  ;;  %v6851_v29 = vpop.f32.mrb[49].mxu1 }
 0x474   : > { %v6978_v8 = vadd.f32 %v6851_v29, %v14977_v15  ;;  %v11054_v40 = vpop.f32.mrb[50].mxu1  ;;  %v8103_v29 = vshll.u32 %v15031_v39, 16 }
 0x475   : > { %v11113_v0 = vpop.f32.mrb[92].mxu0  ;;  %v6980_v33 = vadd.f32 %v11054_v40, %v14980_v56  ;;  %v6854_v52 = vpop.f32.mrb[51].mxu1 }
 0x476   : > { %v7255_v9 = vpop.f32.mrb[93].mxu0 }
 0x477   : > { %v15104_v37 = vadd.f32 %v7255_v9, %v6975_v18  ;;  %v11114_v55 = vpop.f32.mrb[94].mxu0  ;;  %11320 = vmatmul.mubr.bf16.gmra.mrb[156].mxu1 %v16180_v38  ;;  %v11588_v9 = vld [vmem:[#allocation3 + $0xe4] ss:$0 sps:$4 sm:$0xff]   ;;  %v8105_v38 = vrot.slane %v8103_v29, 1 }
 0x478   : > { %v15107_v34 = vadd.f32 %v11114_v55, %v6977_v43  ;;  %v7258_v19 = vpop.f32.mrb[95].mxu0  ;;  %11323 = vmatprep.mubr.bf16.mxu1 %v14597_v20 }
 0x479   : > { %v15110_v58 = vadd.f32 %v7258_v19, %v6976_v31  ;;  %v8095_v31 = vshll.u32 %v15024_v62, 16 }
 0x47a   : > { %v11057_v46 = vpop.f32.mrb[52].mxu1 }
 0x47b   : > { %v6982_v15 = vadd.f32 %v11057_v46, %v14991_v61  ;;  %v6866_v3 = vpop.f32.mrb[53].mxu1  ;;  %v8097_v0 = vrot.slane %v8095_v31, 1 }
 0x47c   : > { %v11058_v42 = vpop.f32.mrb[54].mxu1 }
 0x47d   : > { %v11117_v56 = vpop.f32.mrb[96].mxu0  ;;  %v6868_v5 = vpop.f32.mrb[55].mxu1  ;;  %v8111_v42 = vshll.u32 %v11588_v9, 16 }
 0x47e   : > { %v15113_v32 = vadd.f32 %v11117_v56, %v6979_v25  ;;  %v7270_v18 = vpop.f32.mrb[97].mxu0  ;;  %v6981_v4 = vadd.f32 %v6868_v5, %v14996_v49  ;;  %v8099_v25 = vshrl.u32 %v15024_v62, 16 }
 0x47f   : > { %v15116_v63 = vadd.f32 %v7270_v18, %v6978_v8  ;;  %v11118_v43 = vpop.f32.mrb[98].mxu0  ;;  %11324 = vmatmul.mubr.bf16.gmra.mrb[160].mxu1 %v16181_v2 }
 0x480   : > { %v15119_v20 = vadd.f32 %v11118_v43, %v6980_v33  ;;  %v7273_v16 = vpop.f32.mrb[99].mxu0  ;;  %11327 = vmatprep.mubr.bf16.mxu1 %v14610_v11  ;;  %v16183_v43 = vld [vmem:[#allocation92_spill] sm:$0xff] }
 0x481   : > { %v8098_v2 = vsel %vm1523_vm2, %v16183_v43, %v8097_v0 }
 0x482   : > { %v11061_v61 = vpop.f32.mrb[56].mxu1 }
 0x483   : > { %v6880_v53 = vpop.f32.mrb[57].mxu1 }
 0x484   : > { %v6983_v7 = vadd.f32 %v6880_v53, %v15003_v48  ;;  %v11062_v50 = vpop.f32.mrb[58].mxu1  ;;  %v16182_v48 = vld [vmem:[#allocation91_spill] sm:$0xff] }
 0x485   : > { %v11121_v21 = vpop.f32.mrb[100].mxu0  ;;  %v6985_v49 = vadd.f32 %v11062_v50, %v15006_v54  ;;  %v6883_v14 = vpop.f32.mrb[59].mxu1  ;;  %v8101_v54 = vor.u32 %v8099_v25, %v8097_v0 }
 0x486   : > { %v15127_v8 = vadd.f32 %v11121_v21, %v6982_v15  ;;  %v7285_v40 = vpop.f32.mrb[101].mxu0  ;;  %v6984_v11 = vadd.f32 %v6883_v14, %v15009_v47  ;;  %v8107_v47 = vshrl.u32 %v15031_v39, 16  ;;  %v8113_v39 = vrot.slane %v8111_v42, 1 }
 0x487   : > { %v11122_v33 = vpop.f32.mrb[102].mxu0  ;;  %11328 = vmatmul.mubr.bf16.gmra.mrb[164].mxu1 %v14615_v59  ;;  %v8106_v18 = vsel %vm1523_vm2, %v8101_v54, %v8105_v38 }
 0x488   : > { %v7287_v52 = vpop.f32.mrb[103].mxu0  ;;  %11331 = vmatprep.mubr.bf16.mxu1 %v16182_v48  ;;  %v8109_v31 = vor.u32 %v8107_v47, %v8105_v38 }
 0x489   : > { %v15132_v55 = vadd.f32 %v7287_v52, %v6981_v4 }
 0x48a   : > { %v11065_v62 = vpop.f32.mrb[60].mxu1  ;;  %v8114_v25 = vsel %vm1523_vm2, %v8109_v31, %v8113_v39 }
 0x48b   : > { %v6987_v19 = vadd.f32 %v11065_v62, %v15016_v17  ;;  %v6895_v46 = vpop.f32.mrb[61].mxu1 }
 0x48c   : > { %v6986_v15 = vadd.f32 %v6895_v46, %v15019_v28  ;;  %v11066_v3 = vpop.f32.mrb[62].mxu1 }
 0x48d   : > { %v11125_v56 = vpop.f32.mrb[104].mxu0  ;;  %v6988_v59 = vadd.f32 %v11066_v3, %v15021_v12  ;;  %v6898_v5 = vpop.f32.mrb[63].mxu1 }
 0x48e   : > { %v7299_v4 = vpop.f32.mrb[105].mxu0 }
 0x48f   : > { %v15141_v16 = vadd.f32 %v7299_v4, %v6983_v7  ;;  %v11126_v17 = vpop.f32.mrb[106].mxu0  ;;  %11332 = vmatmul.mubr.bf16.gmra.mrb[168].mxu1 %v8098_v2 }
 0x490   : > { %v15143_v61 = vadd.f32 %v11126_v17, %v6985_v49  ;;  %v7302_v28 = vpop.f32.mrb[107].mxu0  ;;  %11335 = vmatprep.mubr.bf16.mxu1 %v8106_v18 }
 0x491   : > { %v15145_v53 = vadd.f32 %v7302_v28, %v6984_v11 }
 0x492   : > { %v11069_v12 = vpop.f32.mrb[64].mxu1 }
 0x493   : > { %v6990_v50 = vadd.f32 %v11069_v12, %v15033_v44  ;;  %v6910_v21 = vpop.f32.mrb[65].mxu1 }
 0x494   : > { %v11070_v14 = vpop.f32.mrb[66].mxu1 }
 0x495   : > { %v11129_v29 = vpop.f32.mrb[108].mxu0  ;;  %v6912_v7 = vpop.f32.mrb[67].mxu1 }
 0x496   : > { %v15149_v40 = vadd.f32 %v11129_v29, %v6987_v19  ;;  %v7314_v0 = vpop.f32.mrb[109].mxu0  ;;  %v6989_v49 = vadd.f32 %v6912_v7, %v15038_v10 }
 0x497   : > { %v15152_v33 = vadd.f32 %v7314_v0, %v6986_v15  ;;  %v11130_v52 = vpop.f32.mrb[110].mxu0  ;;  %11336 = vmatmul.mubr.bf16.gmra.mrb[172].mxu1 %v8114_v25 }
 0x498   : > { %v15154_v11 = vadd.f32 %v11130_v52, %v6988_v59  ;;  %v7317_v48 = vpop.f32.mrb[111].mxu0 }
 0x49a   : > { %v11073_v9 = vpop.f32.mrb[68].mxu1 }
 0x49b   : > { %v6924_v44 = vpop.f32.mrb[69].mxu1 }
 0x49c   : > { %v6991_v54 = vadd.f32 %v6924_v44, %v15044_v6  ;;  %v11074_v38 = vpop.f32.mrb[70].mxu1 }
 0x49d   : > { %v11133_v62 = vpop.f32.mrb[112].mxu0  ;;  %v6993_v46 = vadd.f32 %v11074_v38, %v15047_v22  ;;  %v6927_v19 = vpop.f32.mrb[71].mxu1 }
 0x49e   : > { %v15158_v3 = vadd.f32 %v11133_v62, %v6990_v50  ;;  %v7329_v47 = vpop.f32.mrb[113].mxu0  ;;  %v6992_v10 = vadd.f32 %v6927_v19, %v15050_v1 }
 0x49f   : > { %v11134_v15 = vpop.f32.mrb[114].mxu0 }
 0x4a0   : > { %v7331_v42 = vpop.f32.mrb[115].mxu0 }
 0x4a1   : > { %v15161_v56 = vadd.f32 %v7331_v42, %v6989_v49 }
 0x4a2   : > { %v11077_v59 = vpop.f32.mrb[72].mxu1 }
 0x4a3   : > { %v6995_v5 = vadd.f32 %v11077_v59, %v15053_v13  ;;  %v6939_v18 = vpop.f32.mrb[73].mxu1 }
 0x4a4   : > { %v6994_v6 = vadd.f32 %v6939_v18, %v15056_v35  ;;  %v11078_v4 = vpop.f32.mrb[74].mxu1 }
 0x4a5   : > { %v11137_v43 = vpop.f32.mrb[116].mxu0  ;;  %v6996_v22 = vadd.f32 %v11078_v4, %v15059_v24  ;;  %v6942_v2 = vpop.f32.mrb[75].mxu1 }
 0x4a6   : > { %v7343_v17 = vpop.f32.mrb[117].mxu0 }
 0x4a7   : > { %v15166_v28 = vadd.f32 %v7343_v17, %v6991_v54  ;;  %v11138_v31 = vpop.f32.mrb[118].mxu0 }
 0x4a8   : > { %v15168_v1 = vadd.f32 %v11138_v31, %v6993_v46  ;;  %v7346_v39 = vpop.f32.mrb[119].mxu0 }
 0x4a9   : > { %v15170_v12 = vadd.f32 %v7346_v39, %v6992_v10 }
 0x4aa   : > { %v11081_v50 = vpop.f32.mrb[76].mxu1 }
 0x4ab   : > { %v6998_v13 = vadd.f32 %v11081_v50, %v15064_v36  ;;  %v6954_v21 = vpop.f32.mrb[77].mxu1 }
 0x4ac   : > { %v11082_v14 = vpop.f32.mrb[78].mxu1 }
 0x4ad   : > { %v11141_v35 = vpop.f32.mrb[120].mxu0  ;;  %v6956_v25 = vpop.f32.mrb[79].mxu1 }
 0x4ae   : > { %v15173_v29 = vadd.f32 %v11141_v35, %v6995_v5  ;;  %v7358_v24 = vpop.f32.mrb[121].mxu0  ;;  %v6997_v7 = vadd.f32 %v6956_v25, %v15069_v45 }
 0x4af   : > { %v15176_v0 = vadd.f32 %v7358_v24, %v6994_v6  ;;  %v11142_v49 = vpop.f32.mrb[122].mxu0 }
 0x4b0   : > { %v15178_v52 = vadd.f32 %v11142_v49, %v6996_v22  ;;  %v7361_v48 = vpop.f32.mrb[123].mxu0 }
 0x4b2   : > { %v11165_v9 = vpop.f32.mrb[80].mxu1 }
 0x4b3   : > { %v7553_v44 = vpop.f32.mrb[81].mxu1 }
 0x4b4   : > { %v7728_v54 = vadd.f32 %v7553_v44, %v15074_v57  ;;  %v11166_v36 = vpop.f32.mrb[82].mxu1 }
 0x4b5   : > { %v11145_v38 = vpop.f32.mrb[124].mxu0  ;;  %v7730_v62 = vadd.f32 %v11166_v36, %v15077_v60  ;;  %v7556_v46 = vpop.f32.mrb[83].mxu1 }
 0x4b6   : > { %v15182_v19 = vadd.f32 %v11145_v38, %v6998_v13  ;;  %v7373_v47 = vpop.f32.mrb[125].mxu0  ;;  %v7729_v45 = vadd.f32 %v7556_v46, %v15080_v27 }
 0x4b7   : > { %v11146_v10 = vpop.f32.mrb[126].mxu0 }
 0x4b8   : > { %v7375_v15 = vpop.f32.mrb[127].mxu0 }
 0x4b9   : > { %v15185_v42 = vadd.f32 %v7375_v15, %v6997_v7 }
 0x4ba   : > { %v11169_v59 = vpop.f32.mrb[84].mxu1 }
 0x4bb   : > { %v7732_v5 = vadd.f32 %v11169_v59, %v15083_v30  ;;  %v7568_v18 = vpop.f32.mrb[85].mxu1 }
 0x4bc   : > { %v7731_v57 = vadd.f32 %v7568_v18, %v15086_v41  ;;  %v11170_v6 = vpop.f32.mrb[86].mxu1 }
 0x4bd   : > { %v11229_v4 = vpop.f32.mrb[128].mxu0  ;;  %v7733_v60 = vadd.f32 %v11170_v6, %v15089_v26  ;;  %v7571_v43 = vpop.f32.mrb[87].mxu1 }
 0x4be   : > { %v7864_v22 = vpop.f32.mrb[129].mxu0 }
 0x4bf   : > { %v15190_v2 = vadd.f32 %v7864_v22, %v7728_v54  ;;  %v11230_v17 = vpop.f32.mrb[130].mxu0 }
 0x4c0   : > { %v15192_v27 = vadd.f32 %v11230_v17, %v7730_v62  ;;  %v7867_v31 = vpop.f32.mrb[131].mxu0 }
 0x4c1   : > { %v15194_v39 = vadd.f32 %v7867_v31, %v7729_v45 }
 0x4c2   : > { %v11173_v50 = vpop.f32.mrb[88].mxu1 }
 0x4c3   : > { %v7735_v30 = vadd.f32 %v11173_v50, %v15094_v51  ;;  %v7583_v13 = vpop.f32.mrb[89].mxu1 }
 0x4c4   : > { %v11174_v21 = vpop.f32.mrb[90].mxu1 }
 0x4c5   : > { %v11233_v41 = vpop.f32.mrb[132].mxu0  ;;  %v7585_v14 = vpop.f32.mrb[91].mxu1 }
 0x4c6   : > { %v15197_v35 = vadd.f32 %v11233_v41, %v7732_v5  ;;  %v7879_v26 = vpop.f32.mrb[133].mxu0  ;;  %v7734_v25 = vadd.f32 %v7585_v14, %v15099_v23 }
 0x4c7   : > { %v15200_v24 = vadd.f32 %v7879_v26, %v7731_v57  ;;  %v11234_v7 = vpop.f32.mrb[134].mxu0 }
 0x4c8   : > { %v15202_v49 = vadd.f32 %v11234_v7, %v7733_v60  ;;  %v7882_v48 = vpop.f32.mrb[135].mxu0 }
 0x4ca   : > { %v11177_v9 = vpop.f32.mrb[92].mxu1 }
 0x4cb   : > { %v7597_v44 = vpop.f32.mrb[93].mxu1 }
 0x4cc   : > { %v7736_v54 = vadd.f32 %v7597_v44, %v15104_v37  ;;  %v11178_v51 = vpop.f32.mrb[94].mxu1 }
 0x4cd   : > { %v11237_v36 = vpop.f32.mrb[136].mxu0  ;;  %v7738_v38 = vadd.f32 %v11178_v51, %v15107_v34  ;;  %v7600_v62 = vpop.f32.mrb[95].mxu1 }
 0x4ce   : > { %v15206_v46 = vadd.f32 %v11237_v36, %v7735_v30  ;;  %v7894_v47 = vpop.f32.mrb[137].mxu0  ;;  %v7737_v23 = vadd.f32 %v7600_v62, %v15110_v58 }
 0x4cf   : > { %v11238_v45 = vpop.f32.mrb[138].mxu0 }
 0x4d0   : > { %v7896_v10 = vpop.f32.mrb[139].mxu0 }
 0x4d1   : > { %v15209_v15 = vadd.f32 %v7896_v10, %v7734_v25 }
 0x4d2   : > { %v11181_v59 = vpop.f32.mrb[96].mxu1 }
 0x4d3   : > { %v7740_v5 = vadd.f32 %v11181_v59, %v15113_v32  ;;  %v7612_v18 = vpop.f32.mrb[97].mxu1 }
 0x4d4   : > { %v7739_v37 = vadd.f32 %v7612_v18, %v15116_v63  ;;  %v11182_v57 = vpop.f32.mrb[98].mxu1 }
 0x4d5   : > { %v11241_v6 = vpop.f32.mrb[140].mxu0  ;;  %v7741_v34 = vadd.f32 %v11182_v57, %v15119_v20  ;;  %v7615_v4 = vpop.f32.mrb[99].mxu1 }
 0x4d6   : > { %v7908_v60 = vpop.f32.mrb[141].mxu0 }
 0x4d7   : > { %v15214_v43 = vadd.f32 %v7908_v60, %v7736_v54  ;;  %v11242_v22 = vpop.f32.mrb[142].mxu0 }
 0x4d8   : > { %v15216_v58 = vadd.f32 %v11242_v22, %v7738_v38  ;;  %v7911_v17 = vpop.f32.mrb[143].mxu0 }
 0x4d9   : > { %v15218_v31 = vadd.f32 %v7911_v17, %v7737_v23 }
 0x4da   : > { %v11185_v50 = vpop.f32.mrb[100].mxu1 }
 0x4db   : > { %v7743_v32 = vadd.f32 %v11185_v50, %v15127_v8  ;;  %v7627_v30 = vpop.f32.mrb[101].mxu1 }
 0x4dc   : > { %v11186_v13 = vpop.f32.mrb[102].mxu1 }
 0x4dd   : > { %v11245_v63 = vpop.f32.mrb[144].mxu0  ;;  %v7629_v21 = vpop.f32.mrb[103].mxu1 }
 0x4de   : > { %v15221_v41 = vadd.f32 %v11245_v63, %v7740_v5  ;;  %v7923_v20 = vpop.f32.mrb[145].mxu0  ;;  %v7742_v14 = vadd.f32 %v7629_v21, %v15132_v55 }
 0x4df   : > { %v15224_v26 = vadd.f32 %v7923_v20, %v7739_v37  ;;  %v11246_v25 = vpop.f32.mrb[146].mxu0 }
 0x4e0   : > { %v15226_v7 = vadd.f32 %v11246_v25, %v7741_v34  ;;  %v7926_v48 = vpop.f32.mrb[147].mxu0 }
 0x4e2   : > { %v11189_v9 = vpop.f32.mrb[104].mxu1 }
 0x4e3   : > { %v7641_v44 = vpop.f32.mrb[105].mxu1 }
 0x4e4   : > { %v7744_v54 = vadd.f32 %v7641_v44, %v15141_v16  ;;  %v11190_v8 = vpop.f32.mrb[106].mxu1 }
 0x4e5   : > { %v11249_v51 = vpop.f32.mrb[148].mxu0  ;;  %v7746_v36 = vadd.f32 %v11190_v8, %v15143_v61  ;;  %v7644_v38 = vpop.f32.mrb[107].mxu1 }
 0x4e6   : > { %v15230_v62 = vadd.f32 %v11249_v51, %v7743_v32  ;;  %v7938_v47 = vpop.f32.mrb[149].mxu0  ;;  %v7745_v55 = vadd.f32 %v7644_v38, %v15145_v53 }
 0x4e7   : > { %v11250_v23 = vpop.f32.mrb[150].mxu0 }
 0x4e8   : > { %v7940_v45 = vpop.f32.mrb[151].mxu0 }
 0x4e9   : > { %v15233_v10 = vadd.f32 %v7940_v45, %v7742_v14 }
 0x4ea   : > { %v11193_v59 = vpop.f32.mrb[108].mxu1 }
 0x4eb   : > { %v7748_v5 = vadd.f32 %v11193_v59, %v15149_v40  ;;  %v7656_v18 = vpop.f32.mrb[109].mxu1 }
 0x4ec   : > { %v7747_v16 = vadd.f32 %v7656_v18, %v15152_v33  ;;  %v11194_v37 = vpop.f32.mrb[110].mxu1 }
 0x4ed   : > { %v11253_v57 = vpop.f32.mrb[152].mxu0  ;;  %v7749_v61 = vadd.f32 %v11194_v37, %v15154_v11  ;;  %v7659_v6 = vpop.f32.mrb[111].mxu1 }
 0x4ee   : > { %v7952_v34 = vpop.f32.mrb[153].mxu0 }
 0x4ef   : > { %v15238_v4 = vadd.f32 %v7952_v34, %v7744_v54  ;;  %v11254_v60 = vpop.f32.mrb[154].mxu0 }
 0x4f0   : > { %v15240_v53 = vadd.f32 %v11254_v60, %v7746_v36  ;;  %v7955_v22 = vpop.f32.mrb[155].mxu0 }
 0x4f1   : > { %v15242_v17 = vadd.f32 %v7955_v22, %v7745_v55 }
 0x4f2   : > { %v11197_v50 = vpop.f32.mrb[112].mxu1 }
 0x4f3   : > { %v7751_v40 = vadd.f32 %v11197_v50, %v15158_v3  ;;  %v7671_v32 = vpop.f32.mrb[113].mxu1 }
 0x4f4   : > { %v11198_v30 = vpop.f32.mrb[114].mxu1 }
 0x4f5   : > { %v11257_v33 = vpop.f32.mrb[156].mxu0  ;;  %v7673_v13 = vpop.f32.mrb[115].mxu1 }
 0x4f6   : > { %v15245_v63 = vadd.f32 %v11257_v33, %v7748_v5  ;;  %v7967_v11 = vpop.f32.mrb[157].mxu0  ;;  %v7750_v21 = vadd.f32 %v7673_v13, %v15161_v56 }
 0x4f7   : > { %v15248_v20 = vadd.f32 %v7967_v11, %v7747_v16  ;;  %v11258_v14 = vpop.f32.mrb[158].mxu0 }
 0x4f8   : > { %v15250_v25 = vadd.f32 %v11258_v14, %v7749_v61  ;;  %v7970_v48 = vpop.f32.mrb[159].mxu0 }
 0x4fa   : > { %v11201_v9 = vpop.f32.mrb[116].mxu1 }
 0x4fb   : > { %v7685_v44 = vpop.f32.mrb[117].mxu1 }
 0x4fc   : > { %v7752_v54 = vadd.f32 %v7685_v44, %v15166_v28  ;;  %v11202_v3 = vpop.f32.mrb[118].mxu1 }
 0x4fd   : > { %v11261_v8 = vpop.f32.mrb[160].mxu0  ;;  %v7754_v51 = vadd.f32 %v11202_v3, %v15168_v1  ;;  %v7688_v36 = vpop.f32.mrb[119].mxu1 }
 0x4fe   : > { %v15254_v38 = vadd.f32 %v11261_v8, %v7751_v40  ;;  %v7982_v47 = vpop.f32.mrb[161].mxu0  ;;  %v7753_v56 = vadd.f32 %v7688_v36, %v15170_v12 }
 0x4ff   : > { %v11262_v55 = vpop.f32.mrb[162].mxu0 }
 0x500   : > { %v7984_v23 = vpop.f32.mrb[163].mxu0 }
 0x501   : > { %v15257_v45 = vadd.f32 %v7984_v23, %v7750_v21 }
 0x502   : > { %v11205_v59 = vpop.f32.mrb[120].mxu1 }
 0x503   : > { %v7756_v5 = vadd.f32 %v11205_v59, %v15173_v29  ;;  %v7700_v18 = vpop.f32.mrb[121].mxu1 }
 0x504   : > { %v7755_v28 = vadd.f32 %v7700_v18, %v15176_v0  ;;  %v11206_v16 = vpop.f32.mrb[122].mxu1 }
 0x505   : > { %v11265_v37 = vpop.f32.mrb[164].mxu0  ;;  %v7757_v1 = vadd.f32 %v11206_v16, %v15178_v52  ;;  %v7703_v57 = vpop.f32.mrb[123].mxu1 }
 0x506   : > { %v7996_v61 = vpop.f32.mrb[165].mxu0 }
 0x507   : > { %v15262_v6 = vadd.f32 %v7996_v61, %v7752_v54  ;;  %v11266_v34 = vpop.f32.mrb[166].mxu0 }
 0x508   : > { %v15264_v12 = vadd.f32 %v11266_v34, %v7754_v51  ;;  %v7999_v60 = vpop.f32.mrb[167].mxu0 }
 0x509   : > { %v15266_v22 = vadd.f32 %v7999_v60, %v7753_v56 }
 0x50a   : > { %v11209_v50 = vpop.f32.mrb[124].mxu1 }
 0x50b   : > { %v7759_v29 = vadd.f32 %v11209_v50, %v15182_v19  ;;  %v7715_v40 = vpop.f32.mrb[125].mxu1  ;;  %v15279_v19 = vld [vmem:[%s15551_s4] ss:$0 sm:$0xff] }
 0x50c   : > { %v11210_v32 = vpop.f32.mrb[126].mxu1 }
 0x50d   : > { %v11269_v0 = vpop.f32.mrb[168].mxu0  ;;  %v7717_v30 = vpop.f32.mrb[127].mxu1 }
 0x50e   : > { %v15269_v33 = vadd.f32 %v11269_v0, %v7756_v5  ;;  %v8011_v52 = vpop.f32.mrb[169].mxu0  ;;  %v7758_v13 = vadd.f32 %v7717_v30, %v15185_v42 }
 0x50f   : > { %v15272_v11 = vadd.f32 %v8011_v52, %v7755_v28  ;;  %v11270_v21 = vpop.f32.mrb[170].mxu0 }
 0x510   : > { %v15274_v14 = vadd.f32 %v11270_v21, %v7757_v1  ;;  %v8014_v48 = vpop.f32.mrb[171].mxu0 }
 0x512   : > { %v11293_v9 = vpop.f32.mrb[128].mxu1 }
 0x513   : > { %v8201_v44 = vpop.f32.mrb[129].mxu1 }
 0x514   : > { %v8376_v54 = vadd.f32 %v8201_v44, %v15190_v2  ;;  %v11294_v3 = vpop.f32.mrb[130].mxu1 }
 0x515   : > { %v11273_v8 = vpop.f32.mrb[172].mxu0  ;;  %v8378_v51 = vadd.f32 %v11294_v3, %v15192_v27  ;;  %v8204_v42 = vpop.f32.mrb[131].mxu1 }
 0x516   : > { %v15283_v36 = vadd.f32 %v11273_v8, %v7759_v29  ;;  %v8026_v47 = vpop.f32.mrb[173].mxu0  ;;  %v15286_v56 = vadd.f32 %v15279_v19, %v8376_v54  ;;  %v8377_v55 = vadd.f32 %v8204_v42, %v15194_v39 }
 0x517   : > { %v11274_v23 = vpop.f32.mrb[174].mxu0  ;;  %v15290_v59 = vadd.f32 %v15279_v19, %v8378_v51 }
 0x518   : > { %v9417_v5 = vmul.f32 -1.442695, %v15286_v56  ;;  %v8028_v2 = vpop.f32.mrb[175].mxu0  ;;  %v15294_v18 = vadd.f32 %v15279_v19, %v8377_v55 }
 0x519   : > { %v15296_v27 = vadd.f32 %v8028_v2, %v7758_v13  ;;  %v9419_v28 = vmul.f32 -1.442695, %v15290_v59 }
 0x51a   : > { %11717 = vpow2.f32 %v9417_v5  ;;  %v9418_v16 = vmul.f32 -1.442695, %v15294_v18  ;;  %v11297_v37 = vpop.f32.mrb[132].mxu1 }
 0x51b   : > { %11719 = vpow2.f32 %v9419_v28  ;;  %v8380_v39 = vadd.f32 %v11297_v37, %v15197_v35  ;;  %v8216_v1 = vpop.f32.mrb[133].mxu1 }
 0x51c   : > { %11721 = vpow2.f32 %v9418_v16  ;;  %v8379_v57 = vadd.f32 %v8216_v1, %v15200_v24  ;;  %v11298_v61 = vpop.f32.mrb[134].mxu1 }
 0x51d   : > { %v15303_v34 = vadd.f32 %v15279_v19, %v8380_v39  ;;  %v8381_v60 = vadd.f32 %v11298_v61, %v15202_v49  ;;  %v8219_v50 = vpop.f32.mrb[135].mxu1 }
 0x51e   : > { %v15307_v29 = vadd.f32 %v15279_v19, %v8379_v57 }
 0x51f   : > { %v9421_v40 = vmul.f32 -1.442695, %v15303_v34  ;;  %v15311_v32 = vadd.f32 %v15279_v19, %v8381_v60 }
 0x520   : > { %v9420_v35 = vmul.f32 -1.442695, %v15307_v29 }
 0x521   : > { %11723 = vpow2.f32 %v9421_v40  ;;  %v9422_v24 = vmul.f32 -1.442695, %v15311_v32 }
 0x522   : > { %11725 = vpow2.f32 %v9420_v35  ;;  %v11301_v0 = vpop.f32.mrb[136].mxu1 }
 0x523   : > { %11727 = vpow2.f32 %v9422_v24  ;;  %v8383_v30 = vadd.f32 %v11301_v0, %v15206_v46  ;;  %v8231_v49 = vpop.f32.mrb[137].mxu1 }
 0x524   : > { %v11718_v52 = vpop.eup %11717  ;;  %v11302_v13 = vpop.f32.mrb[138].mxu1 }
 0x525   : > { %v11720_v21 = vpop.eup %11719  ;;  %v8543_v48 = vadd.f32 1.0, %v11718_v52  ;;  %v15317_v9 = vadd.f32 %v15279_v19, %v8383_v30  ;;  %v8233_v44 = vpop.f32.mrb[139].mxu1 }
 0x526   : > { %v11722_v54 = vpop.eup %11721  ;;  %v8545_v3 = vadd.f32 1.0, %v11720_v21  ;;  %v8382_v8 = vadd.f32 %v8233_v44, %v15209_v15  ;;  %v16184_v44 = vld [vmem:[#allocation4_spill] sm:$0xff] }
 0x527   : > { %11729 = vrcp.f32 %v8543_v48  ;;  %v8544_v51 = vadd.f32 1.0, %v11722_v54  ;;  %v9424_v42 = vmul.f32 -1.442695, %v15317_v9 }
 0x528   : > { %11731 = vrcp.f32 %v8545_v3  ;;  %v15322_v46 = vadd.f32 %v15279_v19, %v8382_v8 }
 0x529   : > { %11733 = vrcp.f32 %v8544_v51 }
 0x52a   : > { %11735 = vpow2.f32 %v9424_v42  ;;  %v9423_v47 = vmul.f32 -1.442695, %v15322_v46  ;;  %v11305_v55 = vpop.f32.mrb[140].mxu1  ;;  %v16185_v42 = vld [vmem:[#allocation6_spill] sm:$0xff] }
 0x52b   : > { %v11724_v23 = vpop.eup %11723  ;;  %v8245_v5 = vpop.f32.mrb[141].mxu1 }
 0x52c   : > { %v11726_v2 = vpop.eup %11725  ;;  %v8547_v28 = vadd.f32 1.0, %v11724_v23  ;;  %11737 = vpow2.f32 %v9423_v47  ;;  %v8384_v15 = vadd.f32 %v8245_v5, %v15214_v43  ;;  %v11306_v16 = vpop.f32.mrb[142].mxu1 }
 0x52d   : > { %v11728_v37 = vpop.eup %11727  ;;  %v8546_v39 = vadd.f32 1.0, %v11726_v2  ;;  %v8386_v1 = vadd.f32 %v11306_v16, %v15216_v58  ;;  %v8248_v57 = vpop.f32.mrb[143].mxu1  ;;  %v16186_v2 = vld [vmem:[#allocation5_spill] sm:$0xff] }
 0x52e   : > { %11739 = vrcp.f32 %v8547_v28  ;;  %v8548_v61 = vadd.f32 1.0, %v11728_v37  ;;  %v15328_v60 = vadd.f32 %v15279_v19, %v8384_v15  ;;  %v8385_v50 = vadd.f32 %v8248_v57, %v15218_v31 }
 0x52f   : > { %11741 = vrcp.f32 %v8546_v39  ;;  %v15332_v40 = vadd.f32 %v15279_v19, %v8386_v1 }
 0x530   : > { %11743 = vrcp.f32 %v8548_v61  ;;  %v9425_v43 = vmul.f32 -1.442695, %v15328_v60  ;;  %v15336_v35 = vadd.f32 %v15279_v19, %v8385_v50 }
 0x531   : > { %v11730_v58 = vpop.eup %11729  ;;  %v9427_v24 = vmul.f32 -1.442695, %v15332_v40 }
 0x532   : > { %v11732_v0 = vpop.eup %11731  ;;  %v8639_v30 = vmul.f32 %v11730_v58, %v15286_v56  ;;  %11745 = vpow2.f32 %v9425_v43  ;;  %v9426_v49 = vmul.f32 -1.442695, %v15336_v35  ;;  %v11309_v31 = vpop.f32.mrb[144].mxu1  ;;  %v16187_v58 = vld [vmem:[#allocation8_spill] sm:$0xff] }
 0x533   : > { %v11734_v52 = vpop.eup %11733  ;;  %v8641_v13 = vmul.f32 %v11732_v0, %v15290_v59  ;;  %11747 = vpow2.f32 %v9427_v24  ;;  %v8388_v21 = vadd.f32 %v11309_v31, %v15221_v41  ;;  %v8260_v48 = vpop.f32.mrb[145].mxu1  ;;  %v16188_v31 = vld [vmem:[#allocation7_spill] sm:$0xff] }
 0x534   : > { %v11736_v56 = vpop.eup %11735  ;;  %v8671_v54 = vadd.f32 %v8639_v30, %v16184_v44  ;;  %v8640_v3 = vmul.f32 %v11734_v52, %v15294_v18  ;;  %11749 = vpow2.f32 %v9426_v49  ;;  %v8387_v8 = vadd.f32 %v8260_v48, %v15224_v26  ;;  %v11310_v51 = vpop.f32.mrb[146].mxu1 }
 0x535   : > { %v8673_v47 = vadd.f32 %v8641_v13, %v16185_v42  ;;  %v8550_v55 = vadd.f32 1.0, %v11736_v56  ;;  %v15355_v59 = vadd.f32 %v15279_v19, %v8388_v21  ;;  %v8389_v41 = vadd.f32 %v11310_v51, %v15226_v7  ;;  %v8263_v23 = vpop.f32.mrb[147].mxu1 }
 0x536   : > { %v11738_v5 = vpop.eup %11737  ;;  %8703 = vst [vmem:[%s15346_s22] sm:$0xff] %v8671_v54  ;;  %v8672_v28 = vadd.f32 %v8640_v3, %v16186_v2  ;;  %v15361_v18 = vadd.f32 %v15279_v19, %v8387_v8 }
 0x537   : > { %8705 = vst [vmem:[%s15346_s22 + $0x10] sm:$0xff] %v8673_v47  ;;  %11751 = vrcp.f32 %v8550_v55  ;;  %v8549_v26 = vadd.f32 1.0, %v11738_v5  ;;  %v9429_v15 = vmul.f32 -1.442695, %v15355_v59  ;;  %v15366_v16 = vadd.f32 %v15279_v19, %v8389_v41 }
 0x538   : > { %v11740_v37 = vpop.eup %11739  ;;  %8704 = vst [vmem:[%s15346_s22 + $0x8] sm:$0xff] %v8672_v28  ;;  %v9428_v7 = vmul.f32 -1.442695, %v15361_v18  ;;  %v16190_v28 = vld [vmem:[#allocation11_spill] sm:$0xff] }
 0x539   : > { %v11742_v39 = vpop.eup %11741  ;;  %v8643_v1 = vmul.f32 %v11740_v37, %v15303_v34  ;;  %11753 = vrcp.f32 %v8549_v26  ;;  %v9430_v57 = vmul.f32 -1.442695, %v15366_v16 }
 0x53a   : > { %v11744_v61 = vpop.eup %11743  ;;  %v8642_v50 = vmul.f32 %v11742_v39, %v15307_v29  ;;  %11755 = vpow2.f32 %v9429_v15  ;;  %v11313_v43 = vpop.f32.mrb[148].mxu1  ;;  %v16189_v29 = vld [vmem:[#allocation9_spill] sm:$0xff] }
 0x53b   : > { %v8675_v24 = vadd.f32 %v8643_v1, %v16187_v58  ;;  %v8644_v0 = vmul.f32 %v11744_v61, %v15311_v32  ;;  %11757 = vpow2.f32 %v9428_v7  ;;  %v8391_v30 = vadd.f32 %v11313_v43, %v15230_v62  ;;  %v8275_v49 = vpop.f32.mrb[149].mxu1 }
 0x53c   : > { %v11746_v34 = vpop.eup %11745  ;;  %v8674_v52 = vadd.f32 %v8642_v50, %v16188_v31  ;;  %11759 = vpow2.f32 %v9430_v57  ;;  %v11314_v13 = vpop.f32.mrb[150].mxu1  ;;  %v16191_v50 = vld [vmem:[#allocation10_spill] sm:$0xff] }
 0x53d   : > { %v11748_v21 = vpop.eup %11747  ;;  %8707 = vst [vmem:[%s15346_s22 + $0x20] sm:$0xff] %v8675_v24  ;;  %v8676_v48 = vadd.f32 %v8644_v0, %v16189_v29  ;;  %v8551_v56 = vadd.f32 1.0, %v11746_v34  ;;  %v15380_v44 = vadd.f32 %v15279_v19, %v8391_v30  ;;  %v8277_v54 = vpop.f32.mrb[151].mxu1 }
 0x53e   : > { %v11750_v32 = vpop.eup %11749  ;;  %8706 = vst [vmem:[%s15346_s22 + $0x18] sm:$0xff] %v8674_v52  ;;  %v8553_v3 = vadd.f32 1.0, %v11748_v21  ;;  %v8390_v62 = vadd.f32 %v8277_v54, %v15233_v10 }
 0x53f   : > { %8708 = vst [vmem:[%s15346_s22 + $0x28] sm:$0xff] %v8676_v48  ;;  %11761 = vrcp.f32 %v8551_v56  ;;  %v8552_v8 = vadd.f32 1.0, %v11750_v32  ;;  %v9432_v51 = vmul.f32 -1.442695, %v15380_v44  ;;  %v16192_v32 = vld [vmem:[#allocation12_spill] sm:$0xff] }
 0x540   : > { %11763 = vrcp.f32 %v8553_v3  ;;  %v15387_v42 = vadd.f32 %v15279_v19, %v8390_v62 }
 0x541   : > { %v11752_v47 = vpop.eup %11751  ;;  %11765 = vrcp.f32 %v8552_v8 }
 0x542   : > { %v8646_v55 = vmul.f32 %v11752_v47, %v15317_v9  ;;  %11767 = vpow2.f32 %v9432_v51  ;;  %v9431_v41 = vmul.f32 -1.442695, %v15387_v42  ;;  %v11317_v23 = vpop.f32.mrb[152].mxu1  ;;  %v16193_v51 = vld [vmem:[#allocation14_spill] sm:$0xff] }
 0x543   : > { %v11754_v5 = vpop.eup %11753  ;;  %v8289_v10 = vpop.f32.mrb[153].mxu1 }
 0x544   : > { %v11756_v2 = vpop.eup %11755  ;;  %v8678_v26 = vadd.f32 %v8646_v55, %v16190_v28  ;;  %v8645_v15 = vmul.f32 %v11754_v5, %v15322_v46  ;;  %11769 = vpow2.f32 %v9431_v41  ;;  %v8392_v37 = vadd.f32 %v8289_v10, %v15238_v4  ;;  %v11318_v7 = vpop.f32.mrb[154].mxu1  ;;  %v16194_v5 = vld [vmem:[#allocation13_spill] sm:$0xff] }
 0x545   : > { %v11758_v39 = vpop.eup %11757  ;;  %v8555_v1 = vadd.f32 1.0, %v11756_v2  ;;  %v8394_v9 = vadd.f32 %v11318_v7, %v15240_v53  ;;  %v8292_v57 = vpop.f32.mrb[155].mxu1 }
 0x546   : > { %v11760_v61 = vpop.eup %11759  ;;  %8710 = vst [vmem:[%s15346_s22 + $0x38] sm:$0xff] %v8678_v26  ;;  %v8677_v43 = vadd.f32 %v8645_v15, %v16191_v50  ;;  %v8554_v58 = vadd.f32 1.0, %v11758_v39  ;;  %v15398_v24 = vadd.f32 %v15279_v19, %v8392_v37  ;;  %v8393_v46 = vadd.f32 %v8292_v57, %v15242_v17 }
 0x547   : > { %11771 = vrcp.f32 %v8555_v1  ;;  %v8556_v0 = vadd.f32 1.0, %v11760_v61  ;;  %v15402_v4 = vadd.f32 %v15279_v19, %v8394_v9 }
 0x548   : > { %8709 = vst [vmem:[%s15346_s22 + $0x30] sm:$0xff] %v8677_v43  ;;  %11773 = vrcp.f32 %v8554_v58  ;;  %v9433_v53 = vmul.f32 -1.442695, %v15398_v24  ;;  %v15407_v30 = vadd.f32 %v15279_v19, %v8393_v46  ;;  %v16195_v43 = vld [vmem:[#allocation16_spill] sm:$0xff] }
 0x549   : > { %v11762_v49 = vpop.eup %11761  ;;  %11775 = vrcp.f32 %v8556_v0  ;;  %v9435_v34 = vmul.f32 -1.442695, %v15402_v4 }
 0x54a   : > { %v11764_v31 = vpop.eup %11763  ;;  %v8647_v52 = vmul.f32 %v11762_v49, %v15328_v60  ;;  %11777 = vpow2.f32 %v9433_v53  ;;  %v9434_v17 = vmul.f32 -1.442695, %v15407_v30  ;;  %v11321_v13 = vpop.f32.mrb[156].mxu1  ;;  %v16196_v53 = vld [vmem:[#allocation15_spill] sm:$0xff] }
 0x54b   : > { %v11766_v21 = vpop.eup %11765  ;;  %v8649_v29 = vmul.f32 %v11764_v31, %v15332_v40  ;;  %11779 = vpow2.f32 %v9435_v34  ;;  %v8396_v48 = vadd.f32 %v11321_v13, %v15245_v63  ;;  %v8304_v56 = vpop.f32.mrb[157].mxu1 }
 0x54c   : > { %v11768_v54 = vpop.eup %11767  ;;  %v8679_v3 = vadd.f32 %v8647_v52, %v16192_v32  ;;  %v8648_v62 = vmul.f32 %v11766_v21, %v15336_v35  ;;  %11781 = vpow2.f32 %v9434_v17  ;;  %v8395_v60 = vadd.f32 %v8304_v56, %v15248_v20  ;;  %v11322_v8 = vpop.f32.mrb[158].mxu1 }
 0x54d   : > { %v8681_v47 = vadd.f32 %v8649_v29, %v16193_v51  ;;  %v8558_v55 = vadd.f32 1.0, %v11768_v54  ;;  %v15419_v40 = vadd.f32 %v15279_v19, %v8396_v48  ;;  %v8397_v63 = vadd.f32 %v11322_v8, %v15250_v25  ;;  %v8307_v41 = vpop.f32.mrb[159].mxu1  ;;  %v16198_v8 = vld [vmem:[#allocation24_spill] sm:$0xff] }
 0x54e   : > { %v11770_v23 = vpop.eup %11769  ;;  %8711 = vst [vmem:[%s15346_s22 + $0x40] sm:$0xff] %v8679_v3  ;;  %v8680_v10 = vadd.f32 %v8648_v62, %v16194_v5  ;;  %v15425_v35 = vadd.f32 %v15279_v19, %v8395_v60 }
 0x54f   : > { %8713 = vst [vmem:[%s15346_s22 + $0x50] sm:$0xff] %v8681_v47  ;;  %11783 = vrcp.f32 %v8558_v55  ;;  %v8557_v20 = vadd.f32 1.0, %v11770_v23  ;;  %v9437_v2 = vmul.f32 -1.442695, %v15419_v40  ;;  %v15430_v28 = vadd.f32 %v15279_v19, %v8397_v63 }
 0x550   : > { %8712 = vst [vmem:[%s15346_s22 + $0x48] sm:$0xff] %v8680_v10  ;;  %v9436_v26 = vmul.f32 -1.442695, %v15425_v35 }
 0x551   : > { %v11772_v25 = vpop.eup %11771  ;;  %11785 = vrcp.f32 %v8557_v20  ;;  %v9438_v15 = vmul.f32 -1.442695, %v15430_v28  ;;  %v16199_v20 = vld [vmem:[#allocation20_spill] sm:$0xff] }
 0x552   : > { %v11774_v37 = vpop.eup %11773  ;;  %v8651_v7 = vmul.f32 %v11772_v25, %v15355_v59  ;;  %11787 = vpow2.f32 %v9437_v2  ;;  %v11325_v39 = vpop.f32.mrb[160].mxu1 }
 0x553   : > { %v11776_v1 = vpop.eup %11775  ;;  %v8650_v9 = vmul.f32 %v11774_v37, %v15361_v18  ;;  %11789 = vpow2.f32 %v9436_v26  ;;  %v8399_v57 = vadd.f32 %v11325_v39, %v15254_v38  ;;  %v8319_v61 = vpop.f32.mrb[161].mxu1  ;;  %v16197_v38 = vld [vmem:[#allocation17_spill] sm:$0xff] }
 0x554   : > { %v11778_v50 = vpop.eup %11777  ;;  %v8683_v58 = vadd.f32 %v8651_v7, %v16195_v43  ;;  %v8652_v46 = vmul.f32 %v11776_v1, %v15366_v16  ;;  %11791 = vpow2.f32 %v9438_v15  ;;  %v11326_v0 = vpop.f32.mrb[162].mxu1 }
 0x555   : > { %v11780_v59 = vpop.eup %11779  ;;  %v8682_v49 = vadd.f32 %v8650_v9, %v16196_v53  ;;  %v8559_v34 = vadd.f32 1.0, %v11778_v50  ;;  %v15442_v31 = vadd.f32 %v15279_v19, %v8399_v57  ;;  %v8321_v18 = vpop.f32.mrb[163].mxu1  ;;  %v16200_v0 = vld [vmem:[#allocation25_spill] sm:$0xff] }
 0x556   : > { %v11782_v52 = vpop.eup %11781  ;;  %8715 = vst [vmem:[%s15346_s22 + $0x60] sm:$0xff] %v8683_v58  ;;  %v8684_v17 = vadd.f32 %v8652_v46, %v16197_v38  ;;  %v8561_v13 = vadd.f32 1.0, %v11780_v59  ;;  %v8398_v21 = vadd.f32 %v8321_v18, %v15257_v45 }
 0x557   : > { %8714 = vst [vmem:[%s15346_s22 + $0x58] sm:$0xff] %v8682_v49  ;;  %11793 = vrcp.f32 %v8559_v34  ;;  %v8560_v16 = vadd.f32 1.0, %v11782_v52  ;;  %v9440_v29 = vmul.f32 -1.442695, %v15442_v31  ;;  %v16201_v34 = vld [vmem:[#allocation28_spill] sm:$0xff] }
 0x558   : > { %8716 = vst [vmem:[%s15346_s22 + $0x68] sm:$0xff] %v8684_v17  ;;  %11795 = vrcp.f32 %v8561_v13  ;;  %v15451_v48 = vadd.f32 %v15279_v19, %v8398_v21  ;;  %v16202_v13 = vld [vmem:[#allocation27_spill] sm:$0xff] }
 0x559   : > { %v11784_v56 = vpop.eup %11783  ;;  %11797 = vrcp.f32 %v8560_v16 }
 0x55a   : > { %v8654_v54 = vmul.f32 %v11784_v56, %v15380_v44  ;;  %11799 = vpow2.f32 %v9440_v29  ;;  %v9439_v32 = vmul.f32 -1.442695, %v15451_v48  ;;  %v11329_v3 = vpop.f32.mrb[164].mxu1 }
 0x55b   : > { %v11786_v45 = vpop.eup %11785  ;;  %v8333_v62 = vpop.f32.mrb[165].mxu1 }
 0x55c   : > { %v11788_v60 = vpop.eup %11787  ;;  %v8686_v51 = vadd.f32 %v8654_v54, %v16198_v8  ;;  %v8653_v47 = vmul.f32 %v11786_v45, %v15387_v42  ;;  %11801 = vpow2.f32 %v9439_v32  ;;  %v8400_v55 = vadd.f32 %v8333_v62, %v15262_v6  ;;  %v11330_v63 = vpop.f32.mrb[166].mxu1 }
 0x55d   : > { %v11790_v41 = vpop.eup %11789  ;;  %v8563_v23 = vadd.f32 1.0, %v11788_v60  ;;  %v8402_v44 = vadd.f32 %v11330_v63, %v15264_v12  ;;  %v8336_v5 = vpop.f32.mrb[167].mxu1 }
 0x55e   : > { %v11792_v10 = vpop.eup %11791  ;;  %8718 = vst [vmem:[%s15346_s22 + $0x78] sm:$0xff] %v8686_v51  ;;  %v8685_v2 = vadd.f32 %v8653_v47, %v16199_v20  ;;  %v8562_v26 = vadd.f32 1.0, %v11790_v41  ;;  %v15462_v25 = vadd.f32 %v15279_v19, %v8400_v55  ;;  %v8401_v42 = vadd.f32 %v8336_v5, %v15266_v22  ;;  %v16203_v55 = vld [vmem:[#allocation30_spill] sm:$0xff] }
 0x55f   : > { %11803 = vrcp.f32 %v8563_v23  ;;  %v8564_v15 = vadd.f32 1.0, %v11792_v10  ;;  %v15466_v6 = vadd.f32 %v15279_v19, %v8402_v44  ;;  %v16204_v44 = vld [vmem:[#allocation29_spill] sm:$0xff] }
 0x560   : > { %8717 = vst [vmem:[%s15346_s22 + $0x70] sm:$0xff] %v8685_v2  ;;  %11805 = vrcp.f32 %v8562_v26  ;;  %v9441_v12 = vmul.f32 -1.442695, %v15462_v25  ;;  %v15471_v37 = vadd.f32 %v15279_v19, %v8401_v42 }
 0x561   : > { %v11794_v7 = vpop.eup %11793  ;;  %11807 = vrcp.f32 %v8564_v15  ;;  %v9443_v39 = vmul.f32 -1.442695, %v15466_v6 }
 0x562   : > { %v11796_v1 = vpop.eup %11795  ;;  %v8655_v9 = vmul.f32 %v11794_v7, %v15398_v24  ;;  %11809 = vpow2.f32 %v9441_v12  ;;  %v9442_v22 = vmul.f32 -1.442695, %v15471_v37  ;;  %v11333_v57 = vpop.f32.mrb[168].mxu1 }
 0x563   : > { %v11798_v61 = vpop.eup %11797  ;;  %v8657_v50 = vmul.f32 %v11796_v1, %v15402_v4  ;;  %11811 = vpow2.f32 %v9443_v39  ;;  %v8404_v43 = vadd.f32 %v11333_v57, %v15269_v33  ;;  %v8348_v58 = vpop.f32.mrb[169].mxu1 }
 0x564   : > { %v11800_v46 = vpop.eup %11799  ;;  %v8687_v59 = vadd.f32 %v8655_v9, %v16200_v0  ;;  %v8656_v53 = vmul.f32 %v11798_v61, %v15407_v30  ;;  %11813 = vpow2.f32 %v9442_v22  ;;  %v8403_v24 = vadd.f32 %v8348_v58, %v15272_v11  ;;  %v11334_v49 = vpop.f32.mrb[170].mxu1  ;;  %v16207_v0 = vld [vmem:[#allocation32_spill] sm:$0xff] }
 0x565   : > { %v8689_v18 = vadd.f32 %v8657_v50, %v16201_v34  ;;  %v8566_v52 = vadd.f32 1.0, %v11800_v46  ;;  %v15483_v4 = vadd.f32 %v15279_v19, %v8404_v43  ;;  %v8405_v33 = vadd.f32 %v11334_v49, %v15274_v14  ;;  %v8351_v38 = vpop.f32.mrb[171].mxu1 }
 0x566   : > { %v11802_v17 = vpop.eup %11801  ;;  %8719 = vst [vmem:[%s15346_s22 + $0x80] sm:$0xff] %v8687_v59  ;;  %v8688_v21 = vadd.f32 %v8656_v53, %v16202_v13  ;;  %v15489_v30 = vadd.f32 %v15279_v19, %v8403_v24 }
 0x567   : > { %8721 = vst [vmem:[%s15346_s22 + $0x90] sm:$0xff] %v8689_v18  ;;  %11815 = vrcp.f32 %v8566_v52  ;;  %v8565_v11 = vadd.f32 1.0, %v11802_v17  ;;  %v9445_v16 = vmul.f32 -1.442695, %v15483_v4  ;;  %v15494_v29 = vadd.f32 %v15279_v19, %v8405_v33  ;;  %v16208_v52 = vld [vmem:[#allocation34_spill] sm:$0xff]  ;;  %v16209_v17 = vld [vmem:[#allocation36_spill] sm:$0xff] }
 0x568   : > { %8720 = vst [vmem:[%s15346_s22 + $0x88] sm:$0xff] %v8688_v21  ;;  %v9444_v56 = vmul.f32 -1.442695, %v15489_v30 }
 0x569   : > { %v11804_v14 = vpop.eup %11803  ;;  %11817 = vrcp.f32 %v8565_v11  ;;  %v9446_v54 = vmul.f32 -1.442695, %v15494_v29 }
 0x56a   : > { %v11806_v32 = vpop.eup %11805  ;;  %v8659_v3 = vmul.f32 %v11804_v14, %v15419_v40  ;;  %11819 = vpow2.f32 %v9445_v16  ;;  %v11337_v45 = vpop.f32.mrb[172].mxu1  ;;  %v16210_v16 = vld [vmem:[#allocation35_spill] sm:$0xff] }
 0x56b   : > { %v11808_v62 = vpop.eup %11807  ;;  %v8658_v60 = vmul.f32 %v11806_v32, %v15425_v35  ;;  %11821 = vpow2.f32 %v9444_v56  ;;  %v8407_v8 = vadd.f32 %v11337_v45, %v15283_v36  ;;  %v8363_v51 = vpop.f32.mrb[173].mxu1  ;;  %v16205_v36 = vld [vmem:[#allocation31_spill] sm:$0xff] }
 0x56c   : > { %v11810_v47 = vpop.eup %11809  ;;  %v8691_v63 = vadd.f32 %v8659_v3, %v16203_v55  ;;  %v8660_v41 = vmul.f32 %v11808_v62, %v15430_v28  ;;  %11823 = vpow2.f32 %v9446_v54  ;;  %v11338_v23 = vpop.f32.mrb[174].mxu1  ;;  %v16211_v3 = vld [vmem:[#allocation38_spill] sm:$0xff]  ;;  %v16213_v51 = vld [vmem:[#allocation40_spill] sm:$0xff] }
 0x56d   : > { %v11812_v40 = vpop.eup %11811  ;;  %v8690_v5 = vadd.f32 %v8658_v60, %v16204_v44  ;;  %v8567_v10 = vadd.f32 1.0, %v11810_v47  ;;  %v15506_v20 = vadd.f32 %v15279_v19, %v8407_v8  ;;  %v8365_v35 = vpop.f32.mrb[175].mxu1  ;;  %v16212_v60 = vld [vmem:[#allocation37_spill] sm:$0xff] }
 0x56e   : > { %v11814_v2 = vpop.eup %11813  ;;  %8723 = vst [vmem:[%s15346_s22 + $0xa0] sm:$0xff] %v8691_v63  ;;  %v8692_v26 = vadd.f32 %v8660_v41, %v16205_v36  ;;  %v8569_v42 = vadd.f32 1.0, %v11812_v40  ;;  %v8406_v15 = vadd.f32 %v8365_v35, %v15296_v27  ;;  %v16206_v27 = vld [vmem:[#allocation33_spill] sm:$0xff] }
 0x56f   : > { %8722 = vst [vmem:[%s15346_s22 + $0x98] sm:$0xff] %v8690_v5  ;;  %11825 = vrcp.f32 %v8567_v10  ;;  %v8568_v28 = vadd.f32 1.0, %v11814_v2  ;;  %v9448_v12 = vmul.f32 -1.442695, %v15506_v20 }
 0x570   : > { %8724 = vst [vmem:[%s15346_s22 + $0xa8] sm:$0xff] %v8692_v26  ;;  %11827 = vrcp.f32 %v8569_v42  ;;  %v8445_v7 = vadd.f32 %v15279_v19, %v8406_v15 }
 0x571   : > { %v11816_v39 = vpop.eup %11815  ;;  %11829 = vrcp.f32 %v8568_v28 }
 0x572   : > { %v8662_v1 = vmul.f32 %v11816_v39, %v15442_v31  ;;  %11831 = vpow2.f32 %v9448_v12  ;;  %v9447_v9 = vmul.f32 -1.442695, %v8445_v7 }
 0x573   : > { %v11818_v22 = vpop.eup %11817 }
 0x574   : > { %v11820_v57 = vpop.eup %11819  ;;  %v8694_v61 = vadd.f32 %v8662_v1, %v16206_v27  ;;  %v8661_v50 = vmul.f32 %v11818_v22, %v15451_v48  ;;  %11833 = vpow2.f32 %v9447_v9 }
 0x575   : > { %v11822_v43 = vpop.eup %11821  ;;  %v8571_v58 = vadd.f32 1.0, %v11820_v57 }
 0x576   : > { %v11824_v46 = vpop.eup %11823  ;;  %8726 = vst [vmem:[%s15346_s22 + $0xb8] sm:$0xff] %v8694_v61  ;;  %v8693_v19 = vadd.f32 %v8661_v50, %v16207_v0  ;;  %v8570_v59 = vadd.f32 1.0, %v11822_v43 }
 0x577   : > { %11835 = vrcp.f32 %v8571_v58  ;;  %v8572_v31 = vadd.f32 1.0, %v11824_v46 }
 0x578   : > { %8725 = vst [vmem:[%s15346_s22 + $0xb0] sm:$0xff] %v8693_v19  ;;  %11837 = vrcp.f32 %v8570_v59 }
 0x579   : > { %v11826_v53 = vpop.eup %11825  ;;  %11839 = vrcp.f32 %v8572_v31 }
 0x57a   : > { %v11828_v24 = vpop.eup %11827  ;;  %v8663_v48 = vmul.f32 %v11826_v53, %v15462_v25 }
 0x57b   : > { %v11830_v49 = vpop.eup %11829  ;;  %v8665_v34 = vmul.f32 %v11828_v24, %v15466_v6 }
 0x57c   : > { %v11832_v18 = vpop.eup %11831  ;;  %v8695_v33 = vadd.f32 %v8663_v48, %v16208_v52  ;;  %v8664_v38 = vmul.f32 %v11830_v49, %v15471_v37 }
 0x57d   : > { %v8697_v13 = vadd.f32 %v8665_v34, %v16209_v17  ;;  %v8574_v21 = vadd.f32 1.0, %v11832_v18 }
 0x57e   : > { %v11834_v11 = vpop.eup %11833  ;;  %8727 = vst [vmem:[%s15346_s22 + $0xc0] sm:$0xff] %v8695_v33  ;;  %v8696_v56 = vadd.f32 %v8664_v38, %v16210_v16 }
 0x57f   : > { %8729 = vst [vmem:[%s15346_s22 + $0xd0] sm:$0xff] %v8697_v13  ;;  %11841 = vrcp.f32 %v8574_v21  ;;  %v8573_v25 = vadd.f32 1.0, %v11834_v11 }
 0x580   : > { %8728 = vst [vmem:[%s15346_s22 + $0xc8] sm:$0xff] %v8696_v56 }
 0x581   : > { %v11836_v6 = vpop.eup %11835  ;;  %11843 = vrcp.f32 %v8573_v25 }
 0x582   : > { %v11838_v14 = vpop.eup %11837  ;;  %v8667_v37 = vmul.f32 %v11836_v6, %v15483_v4  ;;  %v16214_v4 = vld [vmem:[#allocation68_spill] sm:$0xff] }
 0x583   : > { %v11840_v54 = vpop.eup %11839  ;;  %v8666_v32 = vmul.f32 %v11838_v14, %v15489_v30  ;;  %v16215_v30 = vld [vmem:[#allocation66_spill] sm:$0xff] }
 0x584   : > { %v8699_v45 = vadd.f32 %v8667_v37, %v16211_v3  ;;  %v8668_v62 = vmul.f32 %v11840_v54, %v15494_v29 }
 0x585   : > { %v8698_v8 = vadd.f32 %v8666_v32, %v16212_v60 }
 0x586   : > { %8731 = vst [vmem:[%s15346_s22 + $0xe0] sm:$0xff] %v8699_v45  ;;  %v8700_v47 = vadd.f32 %v8668_v62, %v16213_v51 }
 0x587   : > { %8730 = vst [vmem:[%s15346_s22 + $0xd8] sm:$0xff] %v8698_v8 }
 0x588   : > { %8732 = vst [vmem:[%s15346_s22 + $0xe8] sm:$0xff] %v8700_v47 }
 0x589   : > { %v11842_v55 = vpop.eup %11841 }
 0x58a   : > { %v8670_v63 = vmul.f32 %v11842_v55, %v15506_v20 }
 0x58b   : > { %v11844_v41 = vpop.eup %11843 }
 0x58c   : > { %v8702_v23 = vadd.f32 %v8670_v63, %v16214_v4  ;;  %v8669_v40 = vmul.f32 %v11844_v41, %v8445_v7 }
 0x58e   : > { %8734 = vst [vmem:[%s15346_s22 + $0xf8] sm:$0xff] %v8702_v23  ;;  %v8701_v44 = vadd.f32 %v8669_v40, %v16215_v30 }
 0x590   : > { %8733 = vst [vmem:[%s15346_s22 + $0xf0] sm:$0xff] %v8701_v44 }
 0x591 PF: > { %s15_s18 = sadd.s32 1, %s11856_s18  }
 0x592   : > { %p12_p4 = scmp.ge.s32.totalorder %s15_s18, 4  }
 0x594   :  { %14 = sbr.rel (!%p12_p4) target bundleno = 1 (0x1), region = 92 }

</bundles_post_ra>
